<compile_context>
chip_gen: v5e
topology: v5e:2x2
jax: 0.10.0
libtpu: 0.0.40
codegen_flags: <defaults>
</compile_context>

<pallas_src>
import numpy as np
import jax
import jax.numpy as jnp
from jax import lax
from jax.experimental import pallas as pl
from jax.experimental.pallas import tpu as pltpu


def _round_up(v, m):
    return ((v + m - 1) // m) * m


# ----------------------------- module structure -------------------------------

def discriminator_layer_cfgs(input_nc, ndf, n_layers):
    """Replicates the layer list built by NLayerDiscriminator.__init__."""
    cfgs = [dict(cin=input_nc, cout=ndf, stride=2, bias=True, bn=False, act=True)]
    nf = 1
    for n in range(1, n_layers):
        nf_prev, nf = nf, min(2 ** n, 8)
        cfgs.append(dict(cin=ndf * nf_prev, cout=ndf * nf, stride=2,
                         bias=False, bn=True, act=True))
    nf_prev, nf = nf, min(2 ** n_layers, 8)
    cfgs.append(dict(cin=ndf * nf_prev, cout=ndf * nf, stride=1,
                     bias=False, bn=True, act=True))
    cfgs.append(dict(cin=ndf * nf, cout=1, stride=1, bias=True, bn=False, act=False))
    return cfgs


# ----------------------- host-side constant construction ----------------------

def _build_tap_masks(Hl, Wl, Hv, Wv, HWp):
    """(16, HWp) 0/1 masks over the LAYOUT lane grid (j = h*Wl + w): tap (kh,kw)
    at output root (h,w) is valid iff it reads a pixel inside the LOGICAL
    (Hv, Wv) image.  The pad=1 ring and cropped/pad lanes contribute zeros."""
    j = np.arange(HWp)
    h = j // Wl
    w = j % Wl
    rows = []
    for kh in range(4):
        for kw in range(4):
            dh, dw = kh - 1, kw - 1
            valid = ((h + dh >= 0) & (h + dh < Hv) &
                     (w + dw >= 0) & (w + dw < Wv))
            rows.append(valid.astype(np.float32))
    return np.stack(rows)


def _build_resample(Wl, Ho, Wo, stride, HWp_in, HWp_out):
    """0/1 selection matrix: full-resolution conv output -> strided compact output."""
    S = np.zeros((HWp_in, HWp_out), np.float32)
    for oh in range(Ho):
        for ow in range(Wo):
            S[(stride * oh) * Wl + (stride * ow), oh * Wo + ow] = 1.0
    return S


def pack_kernel_params(params, cfgs, H, W, eps=1e-5):
    """Returns (metas, tensors, final):
       metas   : static per-layer meta
       tensors : flat list, per layer [w_flat(bf16), shift(f32), mask(f32)] and
                 additionally S(bf16) for stride-2 layers
       final   : layout/logical geometry of the network output."""
    metas, tensors = [], []
    Hl, Wl = H, W          # lane-layout grid of the current activation
    Hv, Wv = H, W          # logical (valid) image embedded in that grid
    cin0_pad = _round_up(max(cfgs[0]['cin'], 8), 8)
    for li, (cfg, p) in enumerate(zip(cfgs, params)):
        cin, cout, stride = cfg['cin'], cfg['cout'], cfg['stride']
        cin_p = cin0_pad if li == 0 else cin
        assert cin_p % 8 == 0, "channel counts must be multiples of 8"
        HWp = max(_round_up(Hl * Wl, 128), 128)
        Ho = (Hv - 2) // stride + 1
        Wo = (Wv - 2) // stride + 1
        assert Ho >= 1 and Wo >= 1, "spatial size too small for this depth"

        # weights -> (cout, 16*cin_p); im2col row order t*cin_p + ci, t = kh*4+kw
        w = np.asarray(p['w'], np.float32)                       # (O, I, 4, 4)
        if cin_p != cin:
            w = np.concatenate(
                [w, np.zeros((cout, cin_p - cin, 4, 4), np.float32)], axis=1)
        w_flat = np.transpose(w, (0, 2, 3, 1)).reshape(cout, 16 * cin_p)

        if cfg['bn']:
            scale = (np.asarray(p['gamma'], np.float32)
                     / np.sqrt(np.asarray(p['var'], np.float32) + eps))
            shift = np.asarray(p['beta'], np.float32) - np.asarray(p['mean'], np.float32) * scale
            w_flat = w_flat * scale[:, None]      # fold BN scale into weights
        elif cfg['bias']:
            shift = np.asarray(p['b'], np.float32)
        else:
            shift = np.zeros((cout,), np.float32)

        mask = _build_tap_masks(Hl, Wl, Hv, Wv, HWp)

        layer_tensors = [jnp.asarray(w_flat, jnp.bfloat16),
                         jnp.asarray(shift.reshape(cout, 1), jnp.float32),
                         jnp.asarray(mask, jnp.float32)]

        if stride == 2:
            # compact strided subsample via 0/1 selection matmul (small-image path)
            HWop = max(_round_up(Ho * Wo, 128), 128)
            S = _build_resample(Wl, Ho, Wo, stride, HWp, HWop)
            layer_tensors.append(jnp.asarray(S, jnp.bfloat16))
            Hl_out, Wl_out, HWp_out, has_S = Ho, Wo, HWop, True
        else:
            # stride-1: the -1 row/col crop is pure relabeling — keep the layout
            # grid, shrink the logical region (consumed by the next layer's masks
            # and by the final host-side slice).
            Hl_out, Wl_out, HWp_out, has_S = Hl, Wl, HWp, False

        # bf16 scratch stores must start on 16-sublane boundaries: pair taps when
        # cin == 8 so every store writes 16*k rows at a 16-aligned offset.
        tap_group = 1 if cin_p % 16 == 0 else 2
        assert (tap_group * cin_p) % 16 == 0

        tensors += layer_tensors
        metas.append(dict(cin=cin_p, cout=cout, Wlay=Wl, HWp=HWp,
                          HWp_out=HWp_out, has_S=has_S, act=cfg['act'],
                          tap_group=tap_group))
        Hl, Wl, Hv, Wv = Hl_out, Wl_out, Ho, Wo

    final = dict(Hlay=Hl, Wlay=Wl, Ho=Hv, Wo=Wv, HWp=metas[-1]['HWp_out'])
    return metas, tensors, final


# --------------------------------- the kernel ---------------------------------

def _make_kernel(metas, use_sigmoid):

    def kernel(*refs):
        x_ref = refs[0]
        out_ref = refs[-1]
        const_refs = refs[1:-1]

        act = x_ref[0].astype(jnp.float32)                       # (cin0_p, HWp0)
        p = 0
        for m in metas:
            w_ref, shift_ref, mask_ref = const_refs[p], const_refs[p + 1], const_refs[p + 2]
            s_ref = const_refs[p + 3] if m['has_S'] else None
            p += 4 if m['has_S'] else 3

            cin, Wl, HWp, grp = m['cin'], m['Wlay'], m['HWp'], m['tap_group']

            def conv(scr, act=act, cin=cin, Wl=Wl, HWp=HWp, grp=grp,
                     w_ref=w_ref, mask_ref=mask_ref):
                # im2col: 16 lane-rolled, pre-masked copies of act, stored bf16.
                # Roll/mask math stays f32; cast happens only at the store.
                for t0 in range(0, 16, grp):
                    parts = []
                    for t in range(t0, t0 + grp):
                        kh, kw = divmod(t, 4)
                        off = (kh - 1) * Wl + (kw - 1)
                        if off == 0:
                            piece = act          # center tap: valid roots read valid data
                        else:
                            piece = (pltpu.roll(act, (-off) % HWp, axis=1)
                                     * mask_ref[t:t + 1, :])
                        parts.append(piece)
                    block = parts[0] if grp == 1 else jnp.concatenate(parts, axis=0)
                    scr[t0 * cin:(t0 + grp) * cin, :] = block.astype(jnp.bfloat16)
                # conv as ONE bf16 MXU matmul (BN scale already folded into weights)
                return jnp.dot(w_ref[...], scr[...],
                               preferred_element_type=jnp.float32)   # (cout, HWp)

            # Sequential run_scoped regions reuse the same VMEM offset, so peak
            # scratch = max over layers (not the sum of all layers).
            y = pl.run_scoped(conv, pltpu.VMEM((16 * cin, HWp), jnp.bfloat16))

            if m['has_S']:
                # stride-2 subsample as a 0/1 selection matmul (stays on the MXU)
                y = jnp.dot(y.astype(jnp.bfloat16), s_ref[...],
                            preferred_element_type=jnp.float32)      # (cout, HWp_out)
            y = y + shift_ref[...]                                   # bias / BN shift
            if m['act']:
                y = jnp.where(y > 0.0, y, 0.2 * y)                   # LeakyReLU(0.2)
            act = y

        if use_sigmoid:
            act = 1.0 / (1.0 + jnp.exp(-act))
        out_ref[0] = act.astype(out_ref.dtype)

    return kernel


def discriminator_forward(x_nchw, metas, tensors, final, use_sigmoid=False):
    """x_nchw: (N, input_nc, H, W) f32 -> (N, 1, Ho, Wo) f32."""
    N, cin, H, W = x_nchw.shape
    m0 = metas[0]
    cin_p, HWp0 = m0['cin'], m0['HWp']
    HW0 = H * W

    x_flat = x_nchw.astype(jnp.float32).reshape(N, cin, HW0)
    if cin_p > cin:
        x_flat = jnp.concatenate(
            [x_flat, jnp.zeros((N, cin_p - cin, HW0), jnp.float32)], axis=1)
    if HWp0 > HW0:
        x_flat = jnp.pad(x_flat, ((0, 0), (0, 0), (0, HWp0 - HW0)))

    kernel = _make_kernel(metas, use_sigmoid)
    out_lanes = final['HWp']

    # Constants have constant index_maps -> single-buffer them (no overlap benefit,
    # halves their VMEM residency).
    def const_spec(a):
        nd = a.ndim
        return pl.BlockSpec(a.shape, lambda n_, _nd=nd: (0,) * _nd,
                            pipeline_mode=pl.Buffered(1))

    in_specs = [pl.BlockSpec((1, cin_p, HWp0), lambda n_: (n_, 0, 0))]
    in_specs += [const_spec(t) for t in tensors]

    # Explicit VMEM budget from the known footprint: constants single-buffered,
    # input/output blocks double-buffered, im2col scratch = max over run_scoped
    # regions (bf16), plus generous headroom for compiler temporaries.
    const_bytes = sum(int(t.size) * t.dtype.itemsize for t in tensors)
    scratch_bytes = max(16 * m['cin'] * m['HWp'] * 2 for m in metas)
    io_bytes = 2 * (cin_p * HWp0 * 4) + 2 * (out_lanes * 4)
    footprint = const_bytes + scratch_bytes + io_bytes
    vmem_limit = int(min(100 * 2 ** 20, max(32 * 2 ** 20, 2 * footprint + (16 << 20))))

    flops = 0
    for m in metas:
        flops += 2 * m['cout'] * 16 * m['cin'] * m['HWp']            # conv matmul
        if m['has_S']:
            flops += 2 * m['cout'] * m['HWp'] * m['HWp_out']         # selection matmul
    flops *= N
    transcendentals = N * out_lanes if use_sigmoid else 0
    bytes_accessed = N * cin_p * HWp0 * 4 + const_bytes + N * out_lanes * 4

    out = pl.pallas_call(
        kernel,
        out_shape=jax.ShapeDtypeStruct((N, 1, out_lanes), jnp.float32),
        grid_spec=pltpu.PrefetchScalarGridSpec(
            num_scalar_prefetch=0,
            grid=(N,),
            in_specs=in_specs,
            out_specs=pl.BlockSpec((1, 1, out_lanes), lambda n_: (n_, 0, 0)),
        ),
        compiler_params=pltpu.CompilerParams(
            dimension_semantics=("parallel",),
            vmem_limit_bytes=vmem_limit),
        cost_estimate=pl.CostEstimate(flops=int(flops),
                                      transcendentals=int(transcendentals),
                                      bytes_accessed=int(bytes_accessed)),
    )(x_flat, *tensors)

    # The last layers are stride-1: the network output lives embedded in the
    # last stride-2 layout grid; extract the logical (Ho, Wo) corner.
    Hl, Wl, Ho, Wo = final['Hlay'], final['Wlay'], final['Ho'], final['Wo']
    out = out[:, :, :Hl * Wl].reshape(N, 1, Hl, Wl)
    return out[:, :, :Ho, :Wo]


# ----------------------- parameters (deterministic) + reference ---------------

def init_params(key, cfgs):
    params = []
    for cfg, k in zip(cfgs, jax.random.split(key, len(cfgs))):
        k1, k2, k3, k4, k5, k6 = jax.random.split(k, 6)
        fan_in = cfg['cin'] * 16
        p = {'w': jax.random.normal(k1, (cfg['cout'], cfg['cin'], 4, 4),
                                    jnp.float32) / np.sqrt(float(fan_in))}
        if cfg['bias']:
            p['b'] = 0.1 * jax.random.normal(k2, (cfg['cout'],), jnp.float32)
        if cfg['bn']:
            p['gamma'] = 1.0 + 0.1 * jax.random.normal(k3, (cfg['cout'],), jnp.float32)
            p['beta'] = 0.1 * jax.random.normal(k4, (cfg['cout'],), jnp.float32)
            p['mean'] = 0.1 * jax.random.normal(k5, (cfg['cout'],), jnp.float32)
            p['var'] = jax.random.uniform(k6, (cfg['cout'],), jnp.float32, 0.5, 1.5)
        params.append(p)
    return params


def ref_forward(x, params, cfgs, eps=1e-5, use_sigmoid=False):
    dn = ("NCHW", "OIHW", "NCHW")
    y = x
    for cfg, p in zip(cfgs, params):
        y = lax.conv_general_dilated(y, p['w'], (cfg['stride'], cfg['stride']),
                                     [(1, 1), (1, 1)], dimension_numbers=dn,
                                     precision=lax.Precision.HIGHEST)
        if cfg['bias']:
            y = y + p['b'][None, :, None, None]
        if cfg['bn']:
            scale = p['gamma'] / jnp.sqrt(p['var'] + eps)
            shift = p['beta'] - p['mean'] * scale
            y = y * scale[None, :, None, None] + shift[None, :, None, None]
        if cfg['act']:
            y = jnp.where(y > 0, y, 0.2 * y)
    if use_sigmoid:
        y = jax.nn.sigmoid(y)
    return y


if __name__ == "__main__":
    # NLayerDiscriminator(input_nc=4, ndf=8, n_layers=3) at a small spatial size
    # (32x32 is the smallest even size that keeps every layer's output >= 2x2).
    N, input_nc, H, W = 2, 4, 32, 32
    ndf, n_layers = 8, 3

    cfgs = discriminator_layer_cfgs(input_nc, ndf, n_layers)
    key = jax.random.PRNGKey(0)
    kp, kx = jax.random.split(key)
    params = init_params(kp, cfgs)
    x = jax.random.normal(kx, (N, input_nc, H, W), jnp.float32)

    metas, tensors, final = pack_kernel_params(params, cfgs, H, W)
    out = jax.block_until_ready(discriminator_forward(x, metas, tensors, final))

    ref = jax.block_until_ready(ref_forward(x, params, cfgs))
    assert out.shape == ref.shape, (out.shape, ref.shape)
    max_err = float(jnp.max(jnp.abs(out - ref)))
    assert bool(jnp.allclose(out, ref, rtol=5e-2, atol=5e-2)), (
        f"max abs err {max_err}")
    print("KERNEL_OK")
</pallas_src>

<mosaic_0001>
module attributes {stable_mosaic.version = 11 : i64} {
  func.func @kernel(%arg0: i32, %arg1: memref<1x8x1024xf32, #tpu.memory_space<vmem>>, %arg2: memref<8x128xbf16, #tpu.memory_space<vmem>>, %arg3: memref<8x1xf32, #tpu.memory_space<vmem>>, %arg4: memref<16x1024xf32, #tpu.memory_space<vmem>>, %arg5: memref<1024x256xbf16, #tpu.memory_space<vmem>>, %arg6: memref<16x128xbf16, #tpu.memory_space<vmem>>, %arg7: memref<16x1xf32, #tpu.memory_space<vmem>>, %arg8: memref<16x256xf32, #tpu.memory_space<vmem>>, %arg9: memref<256x128xbf16, #tpu.memory_space<vmem>>, %arg10: memref<32x256xbf16, #tpu.memory_space<vmem>>, %arg11: memref<32x1xf32, #tpu.memory_space<vmem>>, %arg12: memref<16x128xf32, #tpu.memory_space<vmem>>, %arg13: memref<128x128xbf16, #tpu.memory_space<vmem>>, %arg14: memref<64x512xbf16, #tpu.memory_space<vmem>>, %arg15: memref<64x1xf32, #tpu.memory_space<vmem>>, %arg16: memref<16x128xf32, #tpu.memory_space<vmem>>, %arg17: memref<1x1024xbf16, #tpu.memory_space<vmem>>, %arg18: memref<1x1xf32, #tpu.memory_space<vmem>>, %arg19: memref<16x128xf32, #tpu.memory_space<vmem>>, %arg20: memref<1x1x128xf32, #tpu.memory_space<vmem>>) attributes {dimension_semantics = [#tpu.dimension_semantics<parallel>], iteration_bounds = array<i64: 2>, scalar_prefetch = 0 : i64, scratch_operands = 0 : i64, tpu.core_type = #tpu.core_type<tc>, window_params = [{transform_indices = @transform_0, window_bounds = array<i64: 1, 8, 1024>}, {pipeline_mode = #tpu.pipeline_mode<synchronous>, transform_indices = @transform_1, window_bounds = array<i64: 8, 128>}, {pipeline_mode = #tpu.pipeline_mode<synchronous>, transform_indices = @transform_2, window_bounds = array<i64: 8, 1>}, {pipeline_mode = #tpu.pipeline_mode<synchronous>, transform_indices = @transform_3, window_bounds = array<i64: 16, 1024>}, {pipeline_mode = #tpu.pipeline_mode<synchronous>, transform_indices = @transform_4, window_bounds = array<i64: 1024, 256>}, {pipeline_mode = #tpu.pipeline_mode<synchronous>, transform_indices = @transform_5, window_bounds = array<i64: 16, 128>}, {pipeline_mode = #tpu.pipeline_mode<synchronous>, transform_indices = @transform_6, window_bounds = array<i64: 16, 1>}, {pipeline_mode = #tpu.pipeline_mode<synchronous>, transform_indices = @transform_7, window_bounds = array<i64: 16, 256>}, {pipeline_mode = #tpu.pipeline_mode<synchronous>, transform_indices = @transform_8, window_bounds = array<i64: 256, 128>}, {pipeline_mode = #tpu.pipeline_mode<synchronous>, transform_indices = @transform_9, window_bounds = array<i64: 32, 256>}, {pipeline_mode = #tpu.pipeline_mode<synchronous>, transform_indices = @transform_10, window_bounds = array<i64: 32, 1>}, {pipeline_mode = #tpu.pipeline_mode<synchronous>, transform_indices = @transform_11, window_bounds = array<i64: 16, 128>}, {pipeline_mode = #tpu.pipeline_mode<synchronous>, transform_indices = @transform_12, window_bounds = array<i64: 128, 128>}, {pipeline_mode = #tpu.pipeline_mode<synchronous>, transform_indices = @transform_13, window_bounds = array<i64: 64, 512>}, {pipeline_mode = #tpu.pipeline_mode<synchronous>, transform_indices = @transform_14, window_bounds = array<i64: 64, 1>}, {pipeline_mode = #tpu.pipeline_mode<synchronous>, transform_indices = @transform_15, window_bounds = array<i64: 16, 128>}, {pipeline_mode = #tpu.pipeline_mode<synchronous>, transform_indices = @transform_16, window_bounds = array<i64: 1, 1024>}, {pipeline_mode = #tpu.pipeline_mode<synchronous>, transform_indices = @transform_17, window_bounds = array<i64: 1, 1>}, {pipeline_mode = #tpu.pipeline_mode<synchronous>, transform_indices = @transform_18, window_bounds = array<i64: 16, 128>}, {transform_indices = @transform_19, window_bounds = array<i64: 1, 1, 128>}]} {
    %c0 = arith.constant 0 : index
    %c0_0 = arith.constant 0 : index
    %c0_1 = arith.constant 0 : index
    %0 = vector.load %arg1[%c0, %c0_0, %c0_1] : memref<1x8x1024xf32, #tpu.memory_space<vmem>>, vector<1x8x1024xf32>
    %1 = vector.shape_cast %0 : vector<1x8x1024xf32> to vector<8x1024xf32>
    %2 = "tpu.region"() ({
      %alloca = memref.alloca() : memref<128x1024xbf16, #tpu.memory_space<vmem>>
      %c33_i32 = arith.constant 33 : i32
      %54 = tpu.dynamic_rotate %1 by %c33_i32 dim 1 : vector<8x1024xf32>, i32 -> vector<8x1024xf32>
      %c0_31 = arith.constant 0 : index
      %c0_32 = arith.constant 0 : index
      %55 = vector.load %arg4[%c0_31, %c0_32] : memref<16x1024xf32, #tpu.memory_space<vmem>>, vector<1x1024xf32>
      %56 = vector.broadcast %55 : vector<1x1024xf32> to vector<8x1024xf32>
      %57 = arith.mulf %54, %56 : vector<8x1024xf32>
      %c32_i32 = arith.constant 32 : i32
      %58 = tpu.dynamic_rotate %1 by %c32_i32 dim 1 : vector<8x1024xf32>, i32 -> vector<8x1024xf32>
      %c1 = arith.constant 1 : index
      %c0_33 = arith.constant 0 : index
      %59 = vector.load %arg4[%c1, %c0_33] : memref<16x1024xf32, #tpu.memory_space<vmem>>, vector<1x1024xf32>
      %60 = vector.broadcast %59 : vector<1x1024xf32> to vector<8x1024xf32>
      %61 = arith.mulf %58, %60 : vector<8x1024xf32>
      %62 = tpu.concatenate %57, %61 in 0 : vector<8x1024xf32>, vector<8x1024xf32> -> vector<16x1024xf32>
      %63 = arith.truncf %62 : vector<16x1024xf32> to vector<16x1024xbf16>
      %c0_34 = arith.constant 0 : index
      %c0_35 = arith.constant 0 : index
      %64 = vector.load %alloca[%c0_34, %c0_35] : memref<128x1024xbf16, #tpu.memory_space<vmem>>, vector<16x1024xbf16>
      tpu.vector_store %alloca[%c0_34, %c0_35], %63 {strides = array<i32>} : memref<128x1024xbf16, #tpu.memory_space<vmem>>, vector<16x1024xbf16>,
      %c31_i32 = arith.constant 31 : i32
      %65 = tpu.dynamic_rotate %1 by %c31_i32 dim 1 : vector<8x1024xf32>, i32 -> vector<8x1024xf32>
      %c2 = arith.constant 2 : index
      %c0_36 = arith.constant 0 : index
      %66 = vector.load %arg4[%c2, %c0_36] : memref<16x1024xf32, #tpu.memory_space<vmem>>, vector<1x1024xf32>
      %67 = vector.broadcast %66 : vector<1x1024xf32> to vector<8x1024xf32>
      %68 = arith.mulf %65, %67 : vector<8x1024xf32>
      %c30_i32 = arith.constant 30 : i32
      %69 = tpu.dynamic_rotate %1 by %c30_i32 dim 1 : vector<8x1024xf32>, i32 -> vector<8x1024xf32>
      %c3 = arith.constant 3 : index
      %c0_37 = arith.constant 0 : index
      %70 = vector.load %arg4[%c3, %c0_37] : memref<16x1024xf32, #tpu.memory_space<vmem>>, vector<1x1024xf32>
      %71 = vector.broadcast %70 : vector<1x1024xf32> to vector<8x1024xf32>
      %72 = arith.mulf %69, %71 : vector<8x1024xf32>
      %73 = tpu.concatenate %68, %72 in 0 : vector<8x1024xf32>, vector<8x1024xf32> -> vector<16x1024xf32>
      %74 = arith.truncf %73 : vector<16x1024xf32> to vector<16x1024xbf16>
      %c16 = arith.constant 16 : index
      %c0_38 = arith.constant 0 : index
      %75 = vector.load %alloca[%c16, %c0_38] : memref<128x1024xbf16, #tpu.memory_space<vmem>>, vector<16x1024xbf16>
      tpu.vector_store %alloca[%c16, %c0_38], %74 {strides = array<i32>} : memref<128x1024xbf16, #tpu.memory_space<vmem>>, vector<16x1024xbf16>,
      %c1_i32 = arith.constant 1 : i32
      %76 = tpu.dynamic_rotate %1 by %c1_i32 dim 1 : vector<8x1024xf32>, i32 -> vector<8x1024xf32>
      %c4 = arith.constant 4 : index
      %c0_39 = arith.constant 0 : index
      %77 = vector.load %arg4[%c4, %c0_39] : memref<16x1024xf32, #tpu.memory_space<vmem>>, vector<1x1024xf32>
      %78 = vector.broadcast %77 : vector<1x1024xf32> to vector<8x1024xf32>
      %79 = arith.mulf %76, %78 : vector<8x1024xf32>
      %80 = tpu.concatenate %79, %1 in 0 : vector<8x1024xf32>, vector<8x1024xf32> -> vector<16x1024xf32>
      %81 = arith.truncf %80 : vector<16x1024xf32> to vector<16x1024xbf16>
      %c32 = arith.constant 32 : index
      %c0_40 = arith.constant 0 : index
      %82 = vector.load %alloca[%c32, %c0_40] : memref<128x1024xbf16, #tpu.memory_space<vmem>>, vector<16x1024xbf16>
      tpu.vector_store %alloca[%c32, %c0_40], %81 {strides = array<i32>} : memref<128x1024xbf16, #tpu.memory_space<vmem>>, vector<16x1024xbf16>,
      %c1023_i32 = arith.constant 1023 : i32
      %83 = tpu.dynamic_rotate %1 by %c1023_i32 dim 1 : vector<8x1024xf32>, i32 -> vector<8x1024xf32>
      %c6 = arith.constant 6 : index
      %c0_41 = arith.constant 0 : index
      %84 = vector.load %arg4[%c6, %c0_41] : memref<16x1024xf32, #tpu.memory_space<vmem>>, vector<1x1024xf32>
      %85 = vector.broadcast %84 : vector<1x1024xf32> to vector<8x1024xf32>
      %86 = arith.mulf %83, %85 : vector<8x1024xf32>
      %c1022_i32 = arith.constant 1022 : i32
      %87 = tpu.dynamic_rotate %1 by %c1022_i32 dim 1 : vector<8x1024xf32>, i32 -> vector<8x1024xf32>
      %c7 = arith.constant 7 : index
      %c0_42 = arith.constant 0 : index
      %88 = vector.load %arg4[%c7, %c0_42] : memref<16x1024xf32, #tpu.memory_space<vmem>>, vector<1x1024xf32>
      %89 = vector.broadcast %88 : vector<1x1024xf32> to vector<8x1024xf32>
      %90 = arith.mulf %87, %89 : vector<8x1024xf32>
      %91 = tpu.concatenate %86, %90 in 0 : vector<8x1024xf32>, vector<8x1024xf32> -> vector<16x1024xf32>
      %92 = arith.truncf %91 : vector<16x1024xf32> to vector<16x1024xbf16>
      %c48 = arith.constant 48 : index
      %c0_43 = arith.constant 0 : index
      %93 = vector.load %alloca[%c48, %c0_43] : memref<128x1024xbf16, #tpu.memory_space<vmem>>, vector<16x1024xbf16>
      tpu.vector_store %alloca[%c48, %c0_43], %92 {strides = array<i32>} : memref<128x1024xbf16, #tpu.memory_space<vmem>>, vector<16x1024xbf16>,
      %c993_i32 = arith.constant 993 : i32
      %94 = tpu.dynamic_rotate %1 by %c993_i32 dim 1 : vector<8x1024xf32>, i32 -> vector<8x1024xf32>
      %c8 = arith.constant 8 : index
      %c0_44 = arith.constant 0 : index
      %95 = vector.load %arg4[%c8, %c0_44] : memref<16x1024xf32, #tpu.memory_space<vmem>>, vector<1x1024xf32>
      %96 = vector.broadcast %95 : vector<1x1024xf32> to vector<8x1024xf32>
      %97 = arith.mulf %94, %96 : vector<8x1024xf32>
      %c992_i32 = arith.constant 992 : i32
      %98 = tpu.dynamic_rotate %1 by %c992_i32 dim 1 : vector<8x1024xf32>, i32 -> vector<8x1024xf32>
      %c9 = arith.constant 9 : index
      %c0_45 = arith.constant 0 : index
      %99 = vector.load %arg4[%c9, %c0_45] : memref<16x1024xf32, #tpu.memory_space<vmem>>, vector<1x1024xf32>
      %100 = vector.broadcast %99 : vector<1x1024xf32> to vector<8x1024xf32>
      %101 = arith.mulf %98, %100 : vector<8x1024xf32>
      %102 = tpu.concatenate %97, %101 in 0 : vector<8x1024xf32>, vector<8x1024xf32> -> vector<16x1024xf32>
      %103 = arith.truncf %102 : vector<16x1024xf32> to vector<16x1024xbf16>
      %c64 = arith.constant 64 : index
      %c0_46 = arith.constant 0 : index
      %104 = vector.load %alloca[%c64, %c0_46] : memref<128x1024xbf16, #tpu.memory_space<vmem>>, vector<16x1024xbf16>
      tpu.vector_store %alloca[%c64, %c0_46], %103 {strides = array<i32>} : memref<128x1024xbf16, #tpu.memory_space<vmem>>, vector<16x1024xbf16>,
      %c991_i32 = arith.constant 991 : i32
      %105 = tpu.dynamic_rotate %1 by %c991_i32 dim 1 : vector<8x1024xf32>, i32 -> vector<8x1024xf32>
      %c10 = arith.constant 10 : index
      %c0_47 = arith.constant 0 : index
      %106 = vector.load %arg4[%c10, %c0_47] : memref<16x1024xf32, #tpu.memory_space<vmem>>, vector<1x1024xf32>
      %107 = vector.broadcast %106 : vector<1x1024xf32> to vector<8x1024xf32>
      %108 = arith.mulf %105, %107 : vector<8x1024xf32>
      %c990_i32 = arith.constant 990 : i32
      %109 = tpu.dynamic_rotate %1 by %c990_i32 dim 1 : vector<8x1024xf32>, i32 -> vector<8x1024xf32>
      %c11 = arith.constant 11 : index
      %c0_48 = arith.constant 0 : index
      %110 = vector.load %arg4[%c11, %c0_48] : memref<16x1024xf32, #tpu.memory_space<vmem>>, vector<1x1024xf32>
      %111 = vector.broadcast %110 : vector<1x1024xf32> to vector<8x1024xf32>
      %112 = arith.mulf %109, %111 : vector<8x1024xf32>
      %113 = tpu.concatenate %108, %112 in 0 : vector<8x1024xf32>, vector<8x1024xf32> -> vector<16x1024xf32>
      %114 = arith.truncf %113 : vector<16x1024xf32> to vector<16x1024xbf16>
      %c80 = arith.constant 80 : index
      %c0_49 = arith.constant 0 : index
      %115 = vector.load %alloca[%c80, %c0_49] : memref<128x1024xbf16, #tpu.memory_space<vmem>>, vector<16x1024xbf16>
      tpu.vector_store %alloca[%c80, %c0_49], %114 {strides = array<i32>} : memref<128x1024xbf16, #tpu.memory_space<vmem>>, vector<16x1024xbf16>,
      %c961_i32 = arith.constant 961 : i32
      %116 = tpu.dynamic_rotate %1 by %c961_i32 dim 1 : vector<8x1024xf32>, i32 -> vector<8x1024xf32>
      %c12 = arith.constant 12 : index
      %c0_50 = arith.constant 0 : index
      %117 = vector.load %arg4[%c12, %c0_50] : memref<16x1024xf32, #tpu.memory_space<vmem>>, vector<1x1024xf32>
      %118 = vector.broadcast %117 : vector<1x1024xf32> to vector<8x1024xf32>
      %119 = arith.mulf %116, %118 : vector<8x1024xf32>
      %c960_i32 = arith.constant 960 : i32
      %120 = tpu.dynamic_rotate %1 by %c960_i32 dim 1 : vector<8x1024xf32>, i32 -> vector<8x1024xf32>
      %c13 = arith.constant 13 : index
      %c0_51 = arith.constant 0 : index
      %121 = vector.load %arg4[%c13, %c0_51] : memref<16x1024xf32, #tpu.memory_space<vmem>>, vector<1x1024xf32>
      %122 = vector.broadcast %121 : vector<1x1024xf32> to vector<8x1024xf32>
      %123 = arith.mulf %120, %122 : vector<8x1024xf32>
      %124 = tpu.concatenate %119, %123 in 0 : vector<8x1024xf32>, vector<8x1024xf32> -> vector<16x1024xf32>
      %125 = arith.truncf %124 : vector<16x1024xf32> to vector<16x1024xbf16>
      %c96 = arith.constant 96 : index
      %c0_52 = arith.constant 0 : index
      %126 = vector.load %alloca[%c96, %c0_52] : memref<128x1024xbf16, #tpu.memory_space<vmem>>, vector<16x1024xbf16>
      tpu.vector_store %alloca[%c96, %c0_52], %125 {strides = array<i32>} : memref<128x1024xbf16, #tpu.memory_space<vmem>>, vector<16x1024xbf16>,
      %c959_i32 = arith.constant 959 : i32
      %127 = tpu.dynamic_rotate %1 by %c959_i32 dim 1 : vector<8x1024xf32>, i32 -> vector<8x1024xf32>
      %c14 = arith.constant 14 : index
      %c0_53 = arith.constant 0 : index
      %128 = vector.load %arg4[%c14, %c0_53] : memref<16x1024xf32, #tpu.memory_space<vmem>>, vector<1x1024xf32>
      %129 = vector.broadcast %128 : vector<1x1024xf32> to vector<8x1024xf32>
      %130 = arith.mulf %127, %129 : vector<8x1024xf32>
      %c958_i32 = arith.constant 958 : i32
      %131 = tpu.dynamic_rotate %1 by %c958_i32 dim 1 : vector<8x1024xf32>, i32 -> vector<8x1024xf32>
      %c15 = arith.constant 15 : index
      %c0_54 = arith.constant 0 : index
      %132 = vector.load %arg4[%c15, %c0_54] : memref<16x1024xf32, #tpu.memory_space<vmem>>, vector<1x1024xf32>
      %133 = vector.broadcast %132 : vector<1x1024xf32> to vector<8x1024xf32>
      %134 = arith.mulf %131, %133 : vector<8x1024xf32>
      %135 = tpu.concatenate %130, %134 in 0 : vector<8x1024xf32>, vector<8x1024xf32> -> vector<16x1024xf32>
      %136 = arith.truncf %135 : vector<16x1024xf32> to vector<16x1024xbf16>
      %c112 = arith.constant 112 : index
      %c0_55 = arith.constant 0 : index
      %137 = vector.load %alloca[%c112, %c0_55] : memref<128x1024xbf16, #tpu.memory_space<vmem>>, vector<16x1024xbf16>
      tpu.vector_store %alloca[%c112, %c0_55], %136 {strides = array<i32>} : memref<128x1024xbf16, #tpu.memory_space<vmem>>, vector<16x1024xbf16>,
      %c0_56 = arith.constant 0 : index
      %c0_57 = arith.constant 0 : index
      %138 = vector.load %arg2[%c0_56, %c0_57] : memref<8x128xbf16, #tpu.memory_space<vmem>>, vector<8x128xbf16>
      %c0_58 = arith.constant 0 : index
      %c0_59 = arith.constant 0 : index
      %139 = vector.load %alloca[%c0_58, %c0_59] : memref<128x1024xbf16, #tpu.memory_space<vmem>>, vector<128x1024xbf16>
      %cst_60 = arith.constant dense<0.000000e+00> : vector<8x1024xf32>
      %140 = tpu.matmul %138, %139, %cst_60 {dimension_numbers = #tpu.dot_dimension_numbers<[1], [0], [0], [1], [0, 0, 1, 1], [], []>} : vector<8x128xbf16>, vector<128x1024xbf16>, vector<8x1024xf32> -> vector<8x1024xf32>
      tpu.yield %140 : vector<8x1024xf32>
    }) : () -> vector<8x1024xf32>
    %3 = arith.truncf %2 : vector<8x1024xf32> to vector<8x1024xbf16>
    %c0_2 = arith.constant 0 : index
    %c0_3 = arith.constant 0 : index
    %4 = vector.load %arg5[%c0_2, %c0_3] : memref<1024x256xbf16, #tpu.memory_space<vmem>>, vector<1024x256xbf16>
    %cst = arith.constant dense<0.000000e+00> : vector<8x256xf32>
    %5 = tpu.matmul %3, %4, %cst {dimension_numbers = #tpu.dot_dimension_numbers<[1], [0], [0], [1], [0, 0, 1, 1], [], []>} : vector<8x1024xbf16>, vector<1024x256xbf16>, vector<8x256xf32> -> vector<8x256xf32>
    %c0_4 = arith.constant 0 : index
    %c0_5 = arith.constant 0 : index
    %6 = vector.load %arg3[%c0_4, %c0_5] : memref<8x1xf32, #tpu.memory_space<vmem>>, vector<8x1xf32>
    %7 = vector.broadcast %6 : vector<8x1xf32> to vector<8x256xf32>
    %8 = arith.addf %5, %7 : vector<8x256xf32>
    %cst_6 = arith.constant 0.000000e+00 : f32
    %9 = vector.broadcast %cst_6 : f32 to vector<8x256xf32>
    %10 = arith.cmpf ogt, %8, %9 : vector<8x256xf32>
    %cst_7 = arith.constant 2.000000e-01 : f32
    %11 = vector.broadcast %cst_7 : f32 to vector<8x256xf32>
    %12 = arith.mulf %11, %8 : vector<8x256xf32>
    %13 = arith.select %10, %8, %12 : vector<8x256xi1>, vector<8x256xf32>
    %14 = "tpu.region"() ({
      %alloca = memref.alloca() : memref<128x256xbf16, #tpu.memory_space<vmem>>
      %c17_i32 = arith.constant 17 : i32
      %54 = tpu.dynamic_rotate %13 by %c17_i32 dim 1 : vector<8x256xf32>, i32 -> vector<8x256xf32>
      %c0_31 = arith.constant 0 : index
      %c0_32 = arith.constant 0 : index
      %55 = vector.load %arg8[%c0_31, %c0_32] : memref<16x256xf32, #tpu.memory_space<vmem>>, vector<1x256xf32>
      %56 = vector.broadcast %55 : vector<1x256xf32> to vector<8x256xf32>
      %57 = arith.mulf %54, %56 : vector<8x256xf32>
      %c16_i32 = arith.constant 16 : i32
      %58 = tpu.dynamic_rotate %13 by %c16_i32 dim 1 : vector<8x256xf32>, i32 -> vector<8x256xf32>
      %c1 = arith.constant 1 : index
      %c0_33 = arith.constant 0 : index
      %59 = vector.load %arg8[%c1, %c0_33] : memref<16x256xf32, #tpu.memory_space<vmem>>, vector<1x256xf32>
      %60 = vector.broadcast %59 : vector<1x256xf32> to vector<8x256xf32>
      %61 = arith.mulf %58, %60 : vector<8x256xf32>
      %62 = tpu.concatenate %57, %61 in 0 : vector<8x256xf32>, vector<8x256xf32> -> vector<16x256xf32>
      %63 = arith.truncf %62 : vector<16x256xf32> to vector<16x256xbf16>
      %c0_34 = arith.constant 0 : index
      %c0_35 = arith.constant 0 : index
      %64 = vector.load %alloca[%c0_34, %c0_35] : memref<128x256xbf16, #tpu.memory_space<vmem>>, vector<16x256xbf16>
      tpu.vector_store %alloca[%c0_34, %c0_35], %63 {strides = array<i32>} : memref<128x256xbf16, #tpu.memory_space<vmem>>, vector<16x256xbf16>,
      %c15_i32 = arith.constant 15 : i32
      %65 = tpu.dynamic_rotate %13 by %c15_i32 dim 1 : vector<8x256xf32>, i32 -> vector<8x256xf32>
      %c2 = arith.constant 2 : index
      %c0_36 = arith.constant 0 : index
      %66 = vector.load %arg8[%c2, %c0_36] : memref<16x256xf32, #tpu.memory_space<vmem>>, vector<1x256xf32>
      %67 = vector.broadcast %66 : vector<1x256xf32> to vector<8x256xf32>
      %68 = arith.mulf %65, %67 : vector<8x256xf32>
      %c14_i32 = arith.constant 14 : i32
      %69 = tpu.dynamic_rotate %13 by %c14_i32 dim 1 : vector<8x256xf32>, i32 -> vector<8x256xf32>
      %c3 = arith.constant 3 : index
      %c0_37 = arith.constant 0 : index
      %70 = vector.load %arg8[%c3, %c0_37] : memref<16x256xf32, #tpu.memory_space<vmem>>, vector<1x256xf32>
      %71 = vector.broadcast %70 : vector<1x256xf32> to vector<8x256xf32>
      %72 = arith.mulf %69, %71 : vector<8x256xf32>
      %73 = tpu.concatenate %68, %72 in 0 : vector<8x256xf32>, vector<8x256xf32> -> vector<16x256xf32>
      %74 = arith.truncf %73 : vector<16x256xf32> to vector<16x256xbf16>
      %c16 = arith.constant 16 : index
      %c0_38 = arith.constant 0 : index
      %75 = vector.load %alloca[%c16, %c0_38] : memref<128x256xbf16, #tpu.memory_space<vmem>>, vector<16x256xbf16>
      tpu.vector_store %alloca[%c16, %c0_38], %74 {strides = array<i32>} : memref<128x256xbf16, #tpu.memory_space<vmem>>, vector<16x256xbf16>,
      %c1_i32 = arith.constant 1 : i32
      %76 = tpu.dynamic_rotate %13 by %c1_i32 dim 1 : vector<8x256xf32>, i32 -> vector<8x256xf32>
      %c4 = arith.constant 4 : index
      %c0_39 = arith.constant 0 : index
      %77 = vector.load %arg8[%c4, %c0_39] : memref<16x256xf32, #tpu.memory_space<vmem>>, vector<1x256xf32>
      %78 = vector.broadcast %77 : vector<1x256xf32> to vector<8x256xf32>
      %79 = arith.mulf %76, %78 : vector<8x256xf32>
      %80 = tpu.concatenate %79, %13 in 0 : vector<8x256xf32>, vector<8x256xf32> -> vector<16x256xf32>
      %81 = arith.truncf %80 : vector<16x256xf32> to vector<16x256xbf16>
      %c32 = arith.constant 32 : index
      %c0_40 = arith.constant 0 : index
      %82 = vector.load %alloca[%c32, %c0_40] : memref<128x256xbf16, #tpu.memory_space<vmem>>, vector<16x256xbf16>
      tpu.vector_store %alloca[%c32, %c0_40], %81 {strides = array<i32>} : memref<128x256xbf16, #tpu.memory_space<vmem>>, vector<16x256xbf16>,
      %c255_i32 = arith.constant 255 : i32
      %83 = tpu.dynamic_rotate %13 by %c255_i32 dim 1 : vector<8x256xf32>, i32 -> vector<8x256xf32>
      %c6 = arith.constant 6 : index
      %c0_41 = arith.constant 0 : index
      %84 = vector.load %arg8[%c6, %c0_41] : memref<16x256xf32, #tpu.memory_space<vmem>>, vector<1x256xf32>
      %85 = vector.broadcast %84 : vector<1x256xf32> to vector<8x256xf32>
      %86 = arith.mulf %83, %85 : vector<8x256xf32>
      %c254_i32 = arith.constant 254 : i32
      %87 = tpu.dynamic_rotate %13 by %c254_i32 dim 1 : vector<8x256xf32>, i32 -> vector<8x256xf32>
      %c7 = arith.constant 7 : index
      %c0_42 = arith.constant 0 : index
      %88 = vector.load %arg8[%c7, %c0_42] : memref<16x256xf32, #tpu.memory_space<vmem>>, vector<1x256xf32>
      %89 = vector.broadcast %88 : vector<1x256xf32> to vector<8x256xf32>
      %90 = arith.mulf %87, %89 : vector<8x256xf32>
      %91 = tpu.concatenate %86, %90 in 0 : vector<8x256xf32>, vector<8x256xf32> -> vector<16x256xf32>
      %92 = arith.truncf %91 : vector<16x256xf32> to vector<16x256xbf16>
      %c48 = arith.constant 48 : index
      %c0_43 = arith.constant 0 : index
      %93 = vector.load %alloca[%c48, %c0_43] : memref<128x256xbf16, #tpu.memory_space<vmem>>, vector<16x256xbf16>
      tpu.vector_store %alloca[%c48, %c0_43], %92 {strides = array<i32>} : memref<128x256xbf16, #tpu.memory_space<vmem>>, vector<16x256xbf16>,
      %c241_i32 = arith.constant 241 : i32
      %94 = tpu.dynamic_rotate %13 by %c241_i32 dim 1 : vector<8x256xf32>, i32 -> vector<8x256xf32>
      %c8 = arith.constant 8 : index
      %c0_44 = arith.constant 0 : index
      %95 = vector.load %arg8[%c8, %c0_44] : memref<16x256xf32, #tpu.memory_space<vmem>>, vector<1x256xf32>
      %96 = vector.broadcast %95 : vector<1x256xf32> to vector<8x256xf32>
      %97 = arith.mulf %94, %96 : vector<8x256xf32>
      %c240_i32 = arith.constant 240 : i32
      %98 = tpu.dynamic_rotate %13 by %c240_i32 dim 1 : vector<8x256xf32>, i32 -> vector<8x256xf32>
      %c9 = arith.constant 9 : index
      %c0_45 = arith.constant 0 : index
      %99 = vector.load %arg8[%c9, %c0_45] : memref<16x256xf32, #tpu.memory_space<vmem>>, vector<1x256xf32>
      %100 = vector.broadcast %99 : vector<1x256xf32> to vector<8x256xf32>
      %101 = arith.mulf %98, %100 : vector<8x256xf32>
      %102 = tpu.concatenate %97, %101 in 0 : vector<8x256xf32>, vector<8x256xf32> -> vector<16x256xf32>
      %103 = arith.truncf %102 : vector<16x256xf32> to vector<16x256xbf16>
      %c64 = arith.constant 64 : index
      %c0_46 = arith.constant 0 : index
      %104 = vector.load %alloca[%c64, %c0_46] : memref<128x256xbf16, #tpu.memory_space<vmem>>, vector<16x256xbf16>
      tpu.vector_store %alloca[%c64, %c0_46], %103 {strides = array<i32>} : memref<128x256xbf16, #tpu.memory_space<vmem>>, vector<16x256xbf16>,
      %c239_i32 = arith.constant 239 : i32
      %105 = tpu.dynamic_rotate %13 by %c239_i32 dim 1 : vector<8x256xf32>, i32 -> vector<8x256xf32>
      %c10 = arith.constant 10 : index
      %c0_47 = arith.constant 0 : index
      %106 = vector.load %arg8[%c10, %c0_47] : memref<16x256xf32, #tpu.memory_space<vmem>>, vector<1x256xf32>
      %107 = vector.broadcast %106 : vector<1x256xf32> to vector<8x256xf32>
      %108 = arith.mulf %105, %107 : vector<8x256xf32>
      %c238_i32 = arith.constant 238 : i32
      %109 = tpu.dynamic_rotate %13 by %c238_i32 dim 1 : vector<8x256xf32>, i32 -> vector<8x256xf32>
      %c11 = arith.constant 11 : index
      %c0_48 = arith.constant 0 : index
      %110 = vector.load %arg8[%c11, %c0_48] : memref<16x256xf32, #tpu.memory_space<vmem>>, vector<1x256xf32>
      %111 = vector.broadcast %110 : vector<1x256xf32> to vector<8x256xf32>
      %112 = arith.mulf %109, %111 : vector<8x256xf32>
      %113 = tpu.concatenate %108, %112 in 0 : vector<8x256xf32>, vector<8x256xf32> -> vector<16x256xf32>
      %114 = arith.truncf %113 : vector<16x256xf32> to vector<16x256xbf16>
      %c80 = arith.constant 80 : index
      %c0_49 = arith.constant 0 : index
      %115 = vector.load %alloca[%c80, %c0_49] : memref<128x256xbf16, #tpu.memory_space<vmem>>, vector<16x256xbf16>
      tpu.vector_store %alloca[%c80, %c0_49], %114 {strides = array<i32>} : memref<128x256xbf16, #tpu.memory_space<vmem>>, vector<16x256xbf16>,
      %c225_i32 = arith.constant 225 : i32
      %116 = tpu.dynamic_rotate %13 by %c225_i32 dim 1 : vector<8x256xf32>, i32 -> vector<8x256xf32>
      %c12 = arith.constant 12 : index
      %c0_50 = arith.constant 0 : index
      %117 = vector.load %arg8[%c12, %c0_50] : memref<16x256xf32, #tpu.memory_space<vmem>>, vector<1x256xf32>
      %118 = vector.broadcast %117 : vector<1x256xf32> to vector<8x256xf32>
      %119 = arith.mulf %116, %118 : vector<8x256xf32>
      %c224_i32 = arith.constant 224 : i32
      %120 = tpu.dynamic_rotate %13 by %c224_i32 dim 1 : vector<8x256xf32>, i32 -> vector<8x256xf32>
      %c13 = arith.constant 13 : index
      %c0_51 = arith.constant 0 : index
      %121 = vector.load %arg8[%c13, %c0_51] : memref<16x256xf32, #tpu.memory_space<vmem>>, vector<1x256xf32>
      %122 = vector.broadcast %121 : vector<1x256xf32> to vector<8x256xf32>
      %123 = arith.mulf %120, %122 : vector<8x256xf32>
      %124 = tpu.concatenate %119, %123 in 0 : vector<8x256xf32>, vector<8x256xf32> -> vector<16x256xf32>
      %125 = arith.truncf %124 : vector<16x256xf32> to vector<16x256xbf16>
      %c96 = arith.constant 96 : index
      %c0_52 = arith.constant 0 : index
      %126 = vector.load %alloca[%c96, %c0_52] : memref<128x256xbf16, #tpu.memory_space<vmem>>, vector<16x256xbf16>
      tpu.vector_store %alloca[%c96, %c0_52], %125 {strides = array<i32>} : memref<128x256xbf16, #tpu.memory_space<vmem>>, vector<16x256xbf16>,
      %c223_i32 = arith.constant 223 : i32
      %127 = tpu.dynamic_rotate %13 by %c223_i32 dim 1 : vector<8x256xf32>, i32 -> vector<8x256xf32>
      %c14 = arith.constant 14 : index
      %c0_53 = arith.constant 0 : index
      %128 = vector.load %arg8[%c14, %c0_53] : memref<16x256xf32, #tpu.memory_space<vmem>>, vector<1x256xf32>
      %129 = vector.broadcast %128 : vector<1x256xf32> to vector<8x256xf32>
      %130 = arith.mulf %127, %129 : vector<8x256xf32>
      %c222_i32 = arith.constant 222 : i32
      %131 = tpu.dynamic_rotate %13 by %c222_i32 dim 1 : vector<8x256xf32>, i32 -> vector<8x256xf32>
      %c15 = arith.constant 15 : index
      %c0_54 = arith.constant 0 : index
      %132 = vector.load %arg8[%c15, %c0_54] : memref<16x256xf32, #tpu.memory_space<vmem>>, vector<1x256xf32>
      %133 = vector.broadcast %132 : vector<1x256xf32> to vector<8x256xf32>
      %134 = arith.mulf %131, %133 : vector<8x256xf32>
      %135 = tpu.concatenate %130, %134 in 0 : vector<8x256xf32>, vector<8x256xf32> -> vector<16x256xf32>
      %136 = arith.truncf %135 : vector<16x256xf32> to vector<16x256xbf16>
      %c112 = arith.constant 112 : index
      %c0_55 = arith.constant 0 : index
      %137 = vector.load %alloca[%c112, %c0_55] : memref<128x256xbf16, #tpu.memory_space<vmem>>, vector<16x256xbf16>
      tpu.vector_store %alloca[%c112, %c0_55], %136 {strides = array<i32>} : memref<128x256xbf16, #tpu.memory_space<vmem>>, vector<16x256xbf16>,
      %c0_56 = arith.constant 0 : index
      %c0_57 = arith.constant 0 : index
      %138 = vector.load %arg6[%c0_56, %c0_57] : memref<16x128xbf16, #tpu.memory_space<vmem>>, vector<16x128xbf16>
      %c0_58 = arith.constant 0 : index
      %c0_59 = arith.constant 0 : index
      %139 = vector.load %alloca[%c0_58, %c0_59] : memref<128x256xbf16, #tpu.memory_space<vmem>>, vector<128x256xbf16>
      %cst_60 = arith.constant dense<0.000000e+00> : vector<16x256xf32>
      %140 = tpu.matmul %138, %139, %cst_60 {dimension_numbers = #tpu.dot_dimension_numbers<[1], [0], [0], [1], [0, 0, 1, 1], [], []>} : vector<16x128xbf16>, vector<128x256xbf16>, vector<16x256xf32> -> vector<16x256xf32>
      tpu.yield %140 : vector<16x256xf32>
    }) : () -> vector<16x256xf32>
    %15 = arith.truncf %14 : vector<16x256xf32> to vector<16x256xbf16>
    %c0_8 = arith.constant 0 : index
    %c0_9 = arith.constant 0 : index
    %16 = vector.load %arg9[%c0_8, %c0_9] : memref<256x128xbf16, #tpu.memory_space<vmem>>, vector<256x128xbf16>
    %cst_10 = arith.constant dense<0.000000e+00> : vector<16x128xf32>
    %17 = tpu.matmul %15, %16, %cst_10 {dimension_numbers = #tpu.dot_dimension_numbers<[1], [0], [0], [1], [0, 0, 1, 1], [], []>} : vector<16x256xbf16>, vector<256x128xbf16>, vector<16x128xf32> -> vector<16x128xf32>
    %c0_11 = arith.constant 0 : index
    %c0_12 = arith.constant 0 : index
    %18 = vector.load %arg7[%c0_11, %c0_12] : memref<16x1xf32, #tpu.memory_space<vmem>>, vector<16x1xf32>
    %19 = vector.broadcast %18 : vector<16x1xf32> to vector<16x128xf32>
    %20 = arith.addf %17, %19 : vector<16x128xf32>
    %cst_13 = arith.constant 0.000000e+00 : f32
    %21 = vector.broadcast %cst_13 : f32 to vector<16x128xf32>
    %22 = arith.cmpf ogt, %20, %21 : vector<16x128xf32>
    %cst_14 = arith.constant 2.000000e-01 : f32
    %23 = vector.broadcast %cst_14 : f32 to vector<16x128xf32>
    %24 = arith.mulf %23, %20 : vector<16x128xf32>
    %25 = arith.select %22, %20, %24 : vector<16x128xi1>, vector<16x128xf32>
    %26 = "tpu.region"() ({
      %alloca = memref.alloca() : memref<256x128xbf16, #tpu.memory_space<vmem>>
      %c9_i32 = arith.constant 9 : i32
      %54 = tpu.dynamic_rotate %25 by %c9_i32 dim 1 : vector<16x128xf32>, i32 -> vector<16x128xf32>
      %c0_31 = arith.constant 0 : index
      %c0_32 = arith.constant 0 : index
      %55 = vector.load %arg12[%c0_31, %c0_32] : memref<16x128xf32, #tpu.memory_space<vmem>>, vector<1x128xf32>
      %56 = vector.broadcast %55 : vector<1x128xf32> to vector<16x128xf32>
      %57 = arith.mulf %54, %56 : vector<16x128xf32>
      %58 = arith.truncf %57 : vector<16x128xf32> to vector<16x128xbf16>
      %c0_33 = arith.constant 0 : index
      %c0_34 = arith.constant 0 : index
      %59 = vector.load %alloca[%c0_33, %c0_34] : memref<256x128xbf16, #tpu.memory_space<vmem>>, vector<16x128xbf16>
      tpu.vector_store %alloca[%c0_33, %c0_34], %58 {strides = array<i32>} : memref<256x128xbf16, #tpu.memory_space<vmem>>, vector<16x128xbf16>,
      %c8_i32 = arith.constant 8 : i32
      %60 = tpu.dynamic_rotate %25 by %c8_i32 dim 1 : vector<16x128xf32>, i32 -> vector<16x128xf32>
      %c1 = arith.constant 1 : index
      %c0_35 = arith.constant 0 : index
      %61 = vector.load %arg12[%c1, %c0_35] : memref<16x128xf32, #tpu.memory_space<vmem>>, vector<1x128xf32>
      %62 = vector.broadcast %61 : vector<1x128xf32> to vector<16x128xf32>
      %63 = arith.mulf %60, %62 : vector<16x128xf32>
      %64 = arith.truncf %63 : vector<16x128xf32> to vector<16x128xbf16>
      %c16 = arith.constant 16 : index
      %c0_36 = arith.constant 0 : index
      %65 = vector.load %alloca[%c16, %c0_36] : memref<256x128xbf16, #tpu.memory_space<vmem>>, vector<16x128xbf16>
      tpu.vector_store %alloca[%c16, %c0_36], %64 {strides = array<i32>} : memref<256x128xbf16, #tpu.memory_space<vmem>>, vector<16x128xbf16>,
      %c7_i32 = arith.constant 7 : i32
      %66 = tpu.dynamic_rotate %25 by %c7_i32 dim 1 : vector<16x128xf32>, i32 -> vector<16x128xf32>
      %c2 = arith.constant 2 : index
      %c0_37 = arith.constant 0 : index
      %67 = vector.load %arg12[%c2, %c0_37] : memref<16x128xf32, #tpu.memory_space<vmem>>, vector<1x128xf32>
      %68 = vector.broadcast %67 : vector<1x128xf32> to vector<16x128xf32>
      %69 = arith.mulf %66, %68 : vector<16x128xf32>
      %70 = arith.truncf %69 : vector<16x128xf32> to vector<16x128xbf16>
      %c32 = arith.constant 32 : index
      %c0_38 = arith.constant 0 : index
      %71 = vector.load %alloca[%c32, %c0_38] : memref<256x128xbf16, #tpu.memory_space<vmem>>, vector<16x128xbf16>
      tpu.vector_store %alloca[%c32, %c0_38], %70 {strides = array<i32>} : memref<256x128xbf16, #tpu.memory_space<vmem>>, vector<16x128xbf16>,
      %c6_i32 = arith.constant 6 : i32
      %72 = tpu.dynamic_rotate %25 by %c6_i32 dim 1 : vector<16x128xf32>, i32 -> vector<16x128xf32>
      %c3 = arith.constant 3 : index
      %c0_39 = arith.constant 0 : index
      %73 = vector.load %arg12[%c3, %c0_39] : memref<16x128xf32, #tpu.memory_space<vmem>>, vector<1x128xf32>
      %74 = vector.broadcast %73 : vector<1x128xf32> to vector<16x128xf32>
      %75 = arith.mulf %72, %74 : vector<16x128xf32>
      %76 = arith.truncf %75 : vector<16x128xf32> to vector<16x128xbf16>
      %c48 = arith.constant 48 : index
      %c0_40 = arith.constant 0 : index
      %77 = vector.load %alloca[%c48, %c0_40] : memref<256x128xbf16, #tpu.memory_space<vmem>>, vector<16x128xbf16>
      tpu.vector_store %alloca[%c48, %c0_40], %76 {strides = array<i32>} : memref<256x128xbf16, #tpu.memory_space<vmem>>, vector<16x128xbf16>,
      %c1_i32 = arith.constant 1 : i32
      %78 = tpu.dynamic_rotate %25 by %c1_i32 dim 1 : vector<16x128xf32>, i32 -> vector<16x128xf32>
      %c4 = arith.constant 4 : index
      %c0_41 = arith.constant 0 : index
      %79 = vector.load %arg12[%c4, %c0_41] : memref<16x128xf32, #tpu.memory_space<vmem>>, vector<1x128xf32>
      %80 = vector.broadcast %79 : vector<1x128xf32> to vector<16x128xf32>
      %81 = arith.mulf %78, %80 : vector<16x128xf32>
      %82 = arith.truncf %81 : vector<16x128xf32> to vector<16x128xbf16>
      %c64 = arith.constant 64 : index
      %c0_42 = arith.constant 0 : index
      %83 = vector.load %alloca[%c64, %c0_42] : memref<256x128xbf16, #tpu.memory_space<vmem>>, vector<16x128xbf16>
      tpu.vector_store %alloca[%c64, %c0_42], %82 {strides = array<i32>} : memref<256x128xbf16, #tpu.memory_space<vmem>>, vector<16x128xbf16>,
      %84 = arith.truncf %25 : vector<16x128xf32> to vector<16x128xbf16>
      %c80 = arith.constant 80 : index
      %c0_43 = arith.constant 0 : index
      %85 = vector.load %alloca[%c80, %c0_43] : memref<256x128xbf16, #tpu.memory_space<vmem>>, vector<16x128xbf16>
      tpu.vector_store %alloca[%c80, %c0_43], %84 {strides = array<i32>} : memref<256x128xbf16, #tpu.memory_space<vmem>>, vector<16x128xbf16>,
      %c127_i32 = arith.constant 127 : i32
      %86 = tpu.dynamic_rotate %25 by %c127_i32 dim 1 : vector<16x128xf32>, i32 -> vector<16x128xf32>
      %c6 = arith.constant 6 : index
      %c0_44 = arith.constant 0 : index
      %87 = vector.load %arg12[%c6, %c0_44] : memref<16x128xf32, #tpu.memory_space<vmem>>, vector<1x128xf32>
      %88 = vector.broadcast %87 : vector<1x128xf32> to vector<16x128xf32>
      %89 = arith.mulf %86, %88 : vector<16x128xf32>
      %90 = arith.truncf %89 : vector<16x128xf32> to vector<16x128xbf16>
      %c96 = arith.constant 96 : index
      %c0_45 = arith.constant 0 : index
      %91 = vector.load %alloca[%c96, %c0_45] : memref<256x128xbf16, #tpu.memory_space<vmem>>, vector<16x128xbf16>
      tpu.vector_store %alloca[%c96, %c0_45], %90 {strides = array<i32>} : memref<256x128xbf16, #tpu.memory_space<vmem>>, vector<16x128xbf16>,
      %c126_i32 = arith.constant 126 : i32
      %92 = tpu.dynamic_rotate %25 by %c126_i32 dim 1 : vector<16x128xf32>, i32 -> vector<16x128xf32>
      %c7 = arith.constant 7 : index
      %c0_46 = arith.constant 0 : index
      %93 = vector.load %arg12[%c7, %c0_46] : memref<16x128xf32, #tpu.memory_space<vmem>>, vector<1x128xf32>
      %94 = vector.broadcast %93 : vector<1x128xf32> to vector<16x128xf32>
      %95 = arith.mulf %92, %94 : vector<16x128xf32>
      %96 = arith.truncf %95 : vector<16x128xf32> to vector<16x128xbf16>
      %c112 = arith.constant 112 : index
      %c0_47 = arith.constant 0 : index
      %97 = vector.load %alloca[%c112, %c0_47] : memref<256x128xbf16, #tpu.memory_space<vmem>>, vector<16x128xbf16>
      tpu.vector_store %alloca[%c112, %c0_47], %96 {strides = array<i32>} : memref<256x128xbf16, #tpu.memory_space<vmem>>, vector<16x128xbf16>,
      %c121_i32 = arith.constant 121 : i32
      %98 = tpu.dynamic_rotate %25 by %c121_i32 dim 1 : vector<16x128xf32>, i32 -> vector<16x128xf32>
      %c8 = arith.constant 8 : index
      %c0_48 = arith.constant 0 : index
      %99 = vector.load %arg12[%c8, %c0_48] : memref<16x128xf32, #tpu.memory_space<vmem>>, vector<1x128xf32>
      %100 = vector.broadcast %99 : vector<1x128xf32> to vector<16x128xf32>
      %101 = arith.mulf %98, %100 : vector<16x128xf32>
      %102 = arith.truncf %101 : vector<16x128xf32> to vector<16x128xbf16>
      %c128 = arith.constant 128 : index
      %c0_49 = arith.constant 0 : index
      %103 = vector.load %alloca[%c128, %c0_49] : memref<256x128xbf16, #tpu.memory_space<vmem>>, vector<16x128xbf16>
      tpu.vector_store %alloca[%c128, %c0_49], %102 {strides = array<i32>} : memref<256x128xbf16, #tpu.memory_space<vmem>>, vector<16x128xbf16>,
      %c120_i32 = arith.constant 120 : i32
      %104 = tpu.dynamic_rotate %25 by %c120_i32 dim 1 : vector<16x128xf32>, i32 -> vector<16x128xf32>
      %c9 = arith.constant 9 : index
      %c0_50 = arith.constant 0 : index
      %105 = vector.load %arg12[%c9, %c0_50] : memref<16x128xf32, #tpu.memory_space<vmem>>, vector<1x128xf32>
      %106 = vector.broadcast %105 : vector<1x128xf32> to vector<16x128xf32>
      %107 = arith.mulf %104, %106 : vector<16x128xf32>
      %108 = arith.truncf %107 : vector<16x128xf32> to vector<16x128xbf16>
      %c144 = arith.constant 144 : index
      %c0_51 = arith.constant 0 : index
      %109 = vector.load %alloca[%c144, %c0_51] : memref<256x128xbf16, #tpu.memory_space<vmem>>, vector<16x128xbf16>
      tpu.vector_store %alloca[%c144, %c0_51], %108 {strides = array<i32>} : memref<256x128xbf16, #tpu.memory_space<vmem>>, vector<16x128xbf16>,
      %c119_i32 = arith.constant 119 : i32
      %110 = tpu.dynamic_rotate %25 by %c119_i32 dim 1 : vector<16x128xf32>, i32 -> vector<16x128xf32>
      %c10 = arith.constant 10 : index
      %c0_52 = arith.constant 0 : index
      %111 = vector.load %arg12[%c10, %c0_52] : memref<16x128xf32, #tpu.memory_space<vmem>>, vector<1x128xf32>
      %112 = vector.broadcast %111 : vector<1x128xf32> to vector<16x128xf32>
      %113 = arith.mulf %110, %112 : vector<16x128xf32>
      %114 = arith.truncf %113 : vector<16x128xf32> to vector<16x128xbf16>
      %c160 = arith.constant 160 : index
      %c0_53 = arith.constant 0 : index
      %115 = vector.load %alloca[%c160, %c0_53] : memref<256x128xbf16, #tpu.memory_space<vmem>>, vector<16x128xbf16>
      tpu.vector_store %alloca[%c160, %c0_53], %114 {strides = array<i32>} : memref<256x128xbf16, #tpu.memory_space<vmem>>, vector<16x128xbf16>,
      %c118_i32 = arith.constant 118 : i32
      %116 = tpu.dynamic_rotate %25 by %c118_i32 dim 1 : vector<16x128xf32>, i32 -> vector<16x128xf32>
      %c11 = arith.constant 11 : index
      %c0_54 = arith.constant 0 : index
      %117 = vector.load %arg12[%c11, %c0_54] : memref<16x128xf32, #tpu.memory_space<vmem>>, vector<1x128xf32>
      %118 = vector.broadcast %117 : vector<1x128xf32> to vector<16x128xf32>
      %119 = arith.mulf %116, %118 : vector<16x128xf32>
      %120 = arith.truncf %119 : vector<16x128xf32> to vector<16x128xbf16>
      %c176 = arith.constant 176 : index
      %c0_55 = arith.constant 0 : index
      %121 = vector.load %alloca[%c176, %c0_55] : memref<256x128xbf16, #tpu.memory_space<vmem>>, vector<16x128xbf16>
      tpu.vector_store %alloca[%c176, %c0_55], %120 {strides = array<i32>} : memref<256x128xbf16, #tpu.memory_space<vmem>>, vector<16x128xbf16>,
      %c113_i32 = arith.constant 113 : i32
      %122 = tpu.dynamic_rotate %25 by %c113_i32 dim 1 : vector<16x128xf32>, i32 -> vector<16x128xf32>
      %c12 = arith.constant 12 : index
      %c0_56 = arith.constant 0 : index
      %123 = vector.load %arg12[%c12, %c0_56] : memref<16x128xf32, #tpu.memory_space<vmem>>, vector<1x128xf32>
      %124 = vector.broadcast %123 : vector<1x128xf32> to vector<16x128xf32>
      %125 = arith.mulf %122, %124 : vector<16x128xf32>
      %126 = arith.truncf %125 : vector<16x128xf32> to vector<16x128xbf16>
      %c192 = arith.constant 192 : index
      %c0_57 = arith.constant 0 : index
      %127 = vector.load %alloca[%c192, %c0_57] : memref<256x128xbf16, #tpu.memory_space<vmem>>, vector<16x128xbf16>
      tpu.vector_store %alloca[%c192, %c0_57], %126 {strides = array<i32>} : memref<256x128xbf16, #tpu.memory_space<vmem>>, vector<16x128xbf16>,
      %c112_i32 = arith.constant 112 : i32
      %128 = tpu.dynamic_rotate %25 by %c112_i32 dim 1 : vector<16x128xf32>, i32 -> vector<16x128xf32>
      %c13 = arith.constant 13 : index
      %c0_58 = arith.constant 0 : index
      %129 = vector.load %arg12[%c13, %c0_58] : memref<16x128xf32, #tpu.memory_space<vmem>>, vector<1x128xf32>
      %130 = vector.broadcast %129 : vector<1x128xf32> to vector<16x128xf32>
      %131 = arith.mulf %128, %130 : vector<16x128xf32>
      %132 = arith.truncf %131 : vector<16x128xf32> to vector<16x128xbf16>
      %c208 = arith.constant 208 : index
      %c0_59 = arith.constant 0 : index
      %133 = vector.load %alloca[%c208, %c0_59] : memref<256x128xbf16, #tpu.memory_space<vmem>>, vector<16x128xbf16>
      tpu.vector_store %alloca[%c208, %c0_59], %132 {strides = array<i32>} : memref<256x128xbf16, #tpu.memory_space<vmem>>, vector<16x128xbf16>,
      %c111_i32 = arith.constant 111 : i32
      %134 = tpu.dynamic_rotate %25 by %c111_i32 dim 1 : vector<16x128xf32>, i32 -> vector<16x128xf32>
      %c14 = arith.constant 14 : index
      %c0_60 = arith.constant 0 : index
      %135 = vector.load %arg12[%c14, %c0_60] : memref<16x128xf32, #tpu.memory_space<vmem>>, vector<1x128xf32>
      %136 = vector.broadcast %135 : vector<1x128xf32> to vector<16x128xf32>
      %137 = arith.mulf %134, %136 : vector<16x128xf32>
      %138 = arith.truncf %137 : vector<16x128xf32> to vector<16x128xbf16>
      %c224 = arith.constant 224 : index
      %c0_61 = arith.constant 0 : index
      %139 = vector.load %alloca[%c224, %c0_61] : memref<256x128xbf16, #tpu.memory_space<vmem>>, vector<16x128xbf16>
      tpu.vector_store %alloca[%c224, %c0_61], %138 {strides = array<i32>} : memref<256x128xbf16, #tpu.memory_space<vmem>>, vector<16x128xbf16>,
      %c110_i32 = arith.constant 110 : i32
      %140 = tpu.dynamic_rotate %25 by %c110_i32 dim 1 : vector<16x128xf32>, i32 -> vector<16x128xf32>
      %c15 = arith.constant 15 : index
      %c0_62 = arith.constant 0 : index
      %141 = vector.load %arg12[%c15, %c0_62] : memref<16x128xf32, #tpu.memory_space<vmem>>, vector<1x128xf32>
      %142 = vector.broadcast %141 : vector<1x128xf32> to vector<16x128xf32>
      %143 = arith.mulf %140, %142 : vector<16x128xf32>
      %144 = arith.truncf %143 : vector<16x128xf32> to vector<16x128xbf16>
      %c240 = arith.constant 240 : index
      %c0_63 = arith.constant 0 : index
      %145 = vector.load %alloca[%c240, %c0_63] : memref<256x128xbf16, #tpu.memory_space<vmem>>, vector<16x128xbf16>
      tpu.vector_store %alloca[%c240, %c0_63], %144 {strides = array<i32>} : memref<256x128xbf16, #tpu.memory_space<vmem>>, vector<16x128xbf16>,
      %c0_64 = arith.constant 0 : index
      %c0_65 = arith.constant 0 : index
      %146 = vector.load %arg10[%c0_64, %c0_65] : memref<32x256xbf16, #tpu.memory_space<vmem>>, vector<32x256xbf16>
      %c0_66 = arith.constant 0 : index
      %c0_67 = arith.constant 0 : index
      %147 = vector.load %alloca[%c0_66, %c0_67] : memref<256x128xbf16, #tpu.memory_space<vmem>>, vector<256x128xbf16>
      %cst_68 = arith.constant dense<0.000000e+00> : vector<32x128xf32>
      %148 = tpu.matmul %146, %147, %cst_68 {dimension_numbers = #tpu.dot_dimension_numbers<[1], [0], [0], [1], [0, 0, 1, 1], [], []>} : vector<32x256xbf16>, vector<256x128xbf16>, vector<32x128xf32> -> vector<32x128xf32>
      tpu.yield %148 : vector<32x128xf32>
    }) : () -> vector<32x128xf32>
    %27 = arith.truncf %26 : vector<32x128xf32> to vector<32x128xbf16>
    %c0_15 = arith.constant 0 : index
    %c0_16 = arith.constant 0 : index
    %28 = vector.load %arg13[%c0_15, %c0_16] : memref<128x128xbf16, #tpu.memory_space<vmem>>, vector<128x128xbf16>
    %cst_17 = arith.constant dense<0.000000e+00> : vector<32x128xf32>
    %29 = tpu.matmul %27, %28, %cst_17 {dimension_numbers = #tpu.dot_dimension_numbers<[1], [0], [0], [1], [0, 0, 1, 1], [], []>} : vector<32x128xbf16>, vector<128x128xbf16>, vector<32x128xf32> -> vector<32x128xf32>
    %c0_18 = arith.constant 0 : index
    %c0_19 = arith.constant 0 : index
    %30 = vector.load %arg11[%c0_18, %c0_19] : memref<32x1xf32, #tpu.memory_space<vmem>>, vector<32x1xf32>
    %31 = vector.broadcast %30 : vector<32x1xf32> to vector<32x128xf32>
    %32 = arith.addf %29, %31 : vector<32x128xf32>
    %cst_20 = arith.constant 0.000000e+00 : f32
    %33 = vector.broadcast %cst_20 : f32 to vector<32x128xf32>
    %34 = arith.cmpf ogt, %32, %33 : vector<32x128xf32>
    %cst_21 = arith.constant 2.000000e-01 : f32
    %35 = vector.broadcast %cst_21 : f32 to vector<32x128xf32>
    %36 = arith.mulf %35, %32 : vector<32x128xf32>
    %37 = arith.select %34, %32, %36 : vector<32x128xi1>, vector<32x128xf32>
    %38 = "tpu.region"() ({
      %alloca = memref.alloca() : memref<512x128xbf16, #tpu.memory_space<vmem>>
      %c5_i32 = arith.constant 5 : i32
      %54 = tpu.dynamic_rotate %37 by %c5_i32 dim 1 : vector<32x128xf32>, i32 -> vector<32x128xf32>
      %c0_31 = arith.constant 0 : index
      %c0_32 = arith.constant 0 : index
      %55 = vector.load %arg16[%c0_31, %c0_32] : memref<16x128xf32, #tpu.memory_space<vmem>>, vector<1x128xf32>
      %56 = vector.broadcast %55 : vector<1x128xf32> to vector<32x128xf32>
      %57 = arith.mulf %54, %56 : vector<32x128xf32>
      %58 = arith.truncf %57 : vector<32x128xf32> to vector<32x128xbf16>
      %c0_33 = arith.constant 0 : index
      %c0_34 = arith.constant 0 : index
      %59 = vector.load %alloca[%c0_33, %c0_34] : memref<512x128xbf16, #tpu.memory_space<vmem>>, vector<32x128xbf16>
      tpu.vector_store %alloca[%c0_33, %c0_34], %58 {strides = array<i32>} : memref<512x128xbf16, #tpu.memory_space<vmem>>, vector<32x128xbf16>,
      %c4_i32 = arith.constant 4 : i32
      %60 = tpu.dynamic_rotate %37 by %c4_i32 dim 1 : vector<32x128xf32>, i32 -> vector<32x128xf32>
      %c1 = arith.constant 1 : index
      %c0_35 = arith.constant 0 : index
      %61 = vector.load %arg16[%c1, %c0_35] : memref<16x128xf32, #tpu.memory_space<vmem>>, vector<1x128xf32>
      %62 = vector.broadcast %61 : vector<1x128xf32> to vector<32x128xf32>
      %63 = arith.mulf %60, %62 : vector<32x128xf32>
      %64 = arith.truncf %63 : vector<32x128xf32> to vector<32x128xbf16>
      %c32 = arith.constant 32 : index
      %c0_36 = arith.constant 0 : index
      %65 = vector.load %alloca[%c32, %c0_36] : memref<512x128xbf16, #tpu.memory_space<vmem>>, vector<32x128xbf16>
      tpu.vector_store %alloca[%c32, %c0_36], %64 {strides = array<i32>} : memref<512x128xbf16, #tpu.memory_space<vmem>>, vector<32x128xbf16>,
      %c3_i32 = arith.constant 3 : i32
      %66 = tpu.dynamic_rotate %37 by %c3_i32 dim 1 : vector<32x128xf32>, i32 -> vector<32x128xf32>
      %c2 = arith.constant 2 : index
      %c0_37 = arith.constant 0 : index
      %67 = vector.load %arg16[%c2, %c0_37] : memref<16x128xf32, #tpu.memory_space<vmem>>, vector<1x128xf32>
      %68 = vector.broadcast %67 : vector<1x128xf32> to vector<32x128xf32>
      %69 = arith.mulf %66, %68 : vector<32x128xf32>
      %70 = arith.truncf %69 : vector<32x128xf32> to vector<32x128xbf16>
      %c64 = arith.constant 64 : index
      %c0_38 = arith.constant 0 : index
      %71 = vector.load %alloca[%c64, %c0_38] : memref<512x128xbf16, #tpu.memory_space<vmem>>, vector<32x128xbf16>
      tpu.vector_store %alloca[%c64, %c0_38], %70 {strides = array<i32>} : memref<512x128xbf16, #tpu.memory_space<vmem>>, vector<32x128xbf16>,
      %c2_i32 = arith.constant 2 : i32
      %72 = tpu.dynamic_rotate %37 by %c2_i32 dim 1 : vector<32x128xf32>, i32 -> vector<32x128xf32>
      %c3 = arith.constant 3 : index
      %c0_39 = arith.constant 0 : index
      %73 = vector.load %arg16[%c3, %c0_39] : memref<16x128xf32, #tpu.memory_space<vmem>>, vector<1x128xf32>
      %74 = vector.broadcast %73 : vector<1x128xf32> to vector<32x128xf32>
      %75 = arith.mulf %72, %74 : vector<32x128xf32>
      %76 = arith.truncf %75 : vector<32x128xf32> to vector<32x128xbf16>
      %c96 = arith.constant 96 : index
      %c0_40 = arith.constant 0 : index
      %77 = vector.load %alloca[%c96, %c0_40] : memref<512x128xbf16, #tpu.memory_space<vmem>>, vector<32x128xbf16>
      tpu.vector_store %alloca[%c96, %c0_40], %76 {strides = array<i32>} : memref<512x128xbf16, #tpu.memory_space<vmem>>, vector<32x128xbf16>,
      %c1_i32 = arith.constant 1 : i32
      %78 = tpu.dynamic_rotate %37 by %c1_i32 dim 1 : vector<32x128xf32>, i32 -> vector<32x128xf32>
      %c4 = arith.constant 4 : index
      %c0_41 = arith.constant 0 : index
      %79 = vector.load %arg16[%c4, %c0_41] : memref<16x128xf32, #tpu.memory_space<vmem>>, vector<1x128xf32>
      %80 = vector.broadcast %79 : vector<1x128xf32> to vector<32x128xf32>
      %81 = arith.mulf %78, %80 : vector<32x128xf32>
      %82 = arith.truncf %81 : vector<32x128xf32> to vector<32x128xbf16>
      %c128 = arith.constant 128 : index
      %c0_42 = arith.constant 0 : index
      %83 = vector.load %alloca[%c128, %c0_42] : memref<512x128xbf16, #tpu.memory_space<vmem>>, vector<32x128xbf16>
      tpu.vector_store %alloca[%c128, %c0_42], %82 {strides = array<i32>} : memref<512x128xbf16, #tpu.memory_space<vmem>>, vector<32x128xbf16>,
      %84 = arith.truncf %37 : vector<32x128xf32> to vector<32x128xbf16>
      %c160 = arith.constant 160 : index
      %c0_43 = arith.constant 0 : index
      %85 = vector.load %alloca[%c160, %c0_43] : memref<512x128xbf16, #tpu.memory_space<vmem>>, vector<32x128xbf16>
      tpu.vector_store %alloca[%c160, %c0_43], %84 {strides = array<i32>} : memref<512x128xbf16, #tpu.memory_space<vmem>>, vector<32x128xbf16>,
      %c127_i32 = arith.constant 127 : i32
      %86 = tpu.dynamic_rotate %37 by %c127_i32 dim 1 : vector<32x128xf32>, i32 -> vector<32x128xf32>
      %c6 = arith.constant 6 : index
      %c0_44 = arith.constant 0 : index
      %87 = vector.load %arg16[%c6, %c0_44] : memref<16x128xf32, #tpu.memory_space<vmem>>, vector<1x128xf32>
      %88 = vector.broadcast %87 : vector<1x128xf32> to vector<32x128xf32>
      %89 = arith.mulf %86, %88 : vector<32x128xf32>
      %90 = arith.truncf %89 : vector<32x128xf32> to vector<32x128xbf16>
      %c192 = arith.constant 192 : index
      %c0_45 = arith.constant 0 : index
      %91 = vector.load %alloca[%c192, %c0_45] : memref<512x128xbf16, #tpu.memory_space<vmem>>, vector<32x128xbf16>
      tpu.vector_store %alloca[%c192, %c0_45], %90 {strides = array<i32>} : memref<512x128xbf16, #tpu.memory_space<vmem>>, vector<32x128xbf16>,
      %c126_i32 = arith.constant 126 : i32
      %92 = tpu.dynamic_rotate %37 by %c126_i32 dim 1 : vector<32x128xf32>, i32 -> vector<32x128xf32>
      %c7 = arith.constant 7 : index
      %c0_46 = arith.constant 0 : index
      %93 = vector.load %arg16[%c7, %c0_46] : memref<16x128xf32, #tpu.memory_space<vmem>>, vector<1x128xf32>
      %94 = vector.broadcast %93 : vector<1x128xf32> to vector<32x128xf32>
      %95 = arith.mulf %92, %94 : vector<32x128xf32>
      %96 = arith.truncf %95 : vector<32x128xf32> to vector<32x128xbf16>
      %c224 = arith.constant 224 : index
      %c0_47 = arith.constant 0 : index
      %97 = vector.load %alloca[%c224, %c0_47] : memref<512x128xbf16, #tpu.memory_space<vmem>>, vector<32x128xbf16>
      tpu.vector_store %alloca[%c224, %c0_47], %96 {strides = array<i32>} : memref<512x128xbf16, #tpu.memory_space<vmem>>, vector<32x128xbf16>,
      %c125_i32 = arith.constant 125 : i32
      %98 = tpu.dynamic_rotate %37 by %c125_i32 dim 1 : vector<32x128xf32>, i32 -> vector<32x128xf32>
      %c8 = arith.constant 8 : index
      %c0_48 = arith.constant 0 : index
      %99 = vector.load %arg16[%c8, %c0_48] : memref<16x128xf32, #tpu.memory_space<vmem>>, vector<1x128xf32>
      %100 = vector.broadcast %99 : vector<1x128xf32> to vector<32x128xf32>
      %101 = arith.mulf %98, %100 : vector<32x128xf32>
      %102 = arith.truncf %101 : vector<32x128xf32> to vector<32x128xbf16>
      %c256 = arith.constant 256 : index
      %c0_49 = arith.constant 0 : index
      %103 = vector.load %alloca[%c256, %c0_49] : memref<512x128xbf16, #tpu.memory_space<vmem>>, vector<32x128xbf16>
      tpu.vector_store %alloca[%c256, %c0_49], %102 {strides = array<i32>} : memref<512x128xbf16, #tpu.memory_space<vmem>>, vector<32x128xbf16>,
      %c124_i32 = arith.constant 124 : i32
      %104 = tpu.dynamic_rotate %37 by %c124_i32 dim 1 : vector<32x128xf32>, i32 -> vector<32x128xf32>
      %c9 = arith.constant 9 : index
      %c0_50 = arith.constant 0 : index
      %105 = vector.load %arg16[%c9, %c0_50] : memref<16x128xf32, #tpu.memory_space<vmem>>, vector<1x128xf32>
      %106 = vector.broadcast %105 : vector<1x128xf32> to vector<32x128xf32>
      %107 = arith.mulf %104, %106 : vector<32x128xf32>
      %108 = arith.truncf %107 : vector<32x128xf32> to vector<32x128xbf16>
      %c288 = arith.constant 288 : index
      %c0_51 = arith.constant 0 : index
      %109 = vector.load %alloca[%c288, %c0_51] : memref<512x128xbf16, #tpu.memory_space<vmem>>, vector<32x128xbf16>
      tpu.vector_store %alloca[%c288, %c0_51], %108 {strides = array<i32>} : memref<512x128xbf16, #tpu.memory_space<vmem>>, vector<32x128xbf16>,
      %c123_i32 = arith.constant 123 : i32
      %110 = tpu.dynamic_rotate %37 by %c123_i32 dim 1 : vector<32x128xf32>, i32 -> vector<32x128xf32>
      %c10 = arith.constant 10 : index
      %c0_52 = arith.constant 0 : index
      %111 = vector.load %arg16[%c10, %c0_52] : memref<16x128xf32, #tpu.memory_space<vmem>>, vector<1x128xf32>
      %112 = vector.broadcast %111 : vector<1x128xf32> to vector<32x128xf32>
      %113 = arith.mulf %110, %112 : vector<32x128xf32>
      %114 = arith.truncf %113 : vector<32x128xf32> to vector<32x128xbf16>
      %c320 = arith.constant 320 : index
      %c0_53 = arith.constant 0 : index
      %115 = vector.load %alloca[%c320, %c0_53] : memref<512x128xbf16, #tpu.memory_space<vmem>>, vector<32x128xbf16>
      tpu.vector_store %alloca[%c320, %c0_53], %114 {strides = array<i32>} : memref<512x128xbf16, #tpu.memory_space<vmem>>, vector<32x128xbf16>,
      %c122_i32 = arith.constant 122 : i32
      %116 = tpu.dynamic_rotate %37 by %c122_i32 dim 1 : vector<32x128xf32>, i32 -> vector<32x128xf32>
      %c11 = arith.constant 11 : index
      %c0_54 = arith.constant 0 : index
      %117 = vector.load %arg16[%c11, %c0_54] : memref<16x128xf32, #tpu.memory_space<vmem>>, vector<1x128xf32>
      %118 = vector.broadcast %117 : vector<1x128xf32> to vector<32x128xf32>
      %119 = arith.mulf %116, %118 : vector<32x128xf32>
      %120 = arith.truncf %119 : vector<32x128xf32> to vector<32x128xbf16>
      %c352 = arith.constant 352 : index
      %c0_55 = arith.constant 0 : index
      %121 = vector.load %alloca[%c352, %c0_55] : memref<512x128xbf16, #tpu.memory_space<vmem>>, vector<32x128xbf16>
      tpu.vector_store %alloca[%c352, %c0_55], %120 {strides = array<i32>} : memref<512x128xbf16, #tpu.memory_space<vmem>>, vector<32x128xbf16>,
      %c121_i32 = arith.constant 121 : i32
      %122 = tpu.dynamic_rotate %37 by %c121_i32 dim 1 : vector<32x128xf32>, i32 -> vector<32x128xf32>
      %c12 = arith.constant 12 : index
      %c0_56 = arith.constant 0 : index
      %123 = vector.load %arg16[%c12, %c0_56] : memref<16x128xf32, #tpu.memory_space<vmem>>, vector<1x128xf32>
      %124 = vector.broadcast %123 : vector<1x128xf32> to vector<32x128xf32>
      %125 = arith.mulf %122, %124 : vector<32x128xf32>
      %126 = arith.truncf %125 : vector<32x128xf32> to vector<32x128xbf16>
      %c384 = arith.constant 384 : index
      %c0_57 = arith.constant 0 : index
      %127 = vector.load %alloca[%c384, %c0_57] : memref<512x128xbf16, #tpu.memory_space<vmem>>, vector<32x128xbf16>
      tpu.vector_store %alloca[%c384, %c0_57], %126 {strides = array<i32>} : memref<512x128xbf16, #tpu.memory_space<vmem>>, vector<32x128xbf16>,
      %c120_i32 = arith.constant 120 : i32
      %128 = tpu.dynamic_rotate %37 by %c120_i32 dim 1 : vector<32x128xf32>, i32 -> vector<32x128xf32>
      %c13 = arith.constant 13 : index
      %c0_58 = arith.constant 0 : index
      %129 = vector.load %arg16[%c13, %c0_58] : memref<16x128xf32, #tpu.memory_space<vmem>>, vector<1x128xf32>
      %130 = vector.broadcast %129 : vector<1x128xf32> to vector<32x128xf32>
      %131 = arith.mulf %128, %130 : vector<32x128xf32>
      %132 = arith.truncf %131 : vector<32x128xf32> to vector<32x128xbf16>
      %c416 = arith.constant 416 : index
      %c0_59 = arith.constant 0 : index
      %133 = vector.load %alloca[%c416, %c0_59] : memref<512x128xbf16, #tpu.memory_space<vmem>>, vector<32x128xbf16>
      tpu.vector_store %alloca[%c416, %c0_59], %132 {strides = array<i32>} : memref<512x128xbf16, #tpu.memory_space<vmem>>, vector<32x128xbf16>,
      %c119_i32 = arith.constant 119 : i32
      %134 = tpu.dynamic_rotate %37 by %c119_i32 dim 1 : vector<32x128xf32>, i32 -> vector<32x128xf32>
      %c14 = arith.constant 14 : index
      %c0_60 = arith.constant 0 : index
      %135 = vector.load %arg16[%c14, %c0_60] : memref<16x128xf32, #tpu.memory_space<vmem>>, vector<1x128xf32>
      %136 = vector.broadcast %135 : vector<1x128xf32> to vector<32x128xf32>
      %137 = arith.mulf %134, %136 : vector<32x128xf32>
      %138 = arith.truncf %137 : vector<32x128xf32> to vector<32x128xbf16>
      %c448 = arith.constant 448 : index
      %c0_61 = arith.constant 0 : index
      %139 = vector.load %alloca[%c448, %c0_61] : memref<512x128xbf16, #tpu.memory_space<vmem>>, vector<32x128xbf16>
      tpu.vector_store %alloca[%c448, %c0_61], %138 {strides = array<i32>} : memref<512x128xbf16, #tpu.memory_space<vmem>>, vector<32x128xbf16>,
      %c118_i32 = arith.constant 118 : i32
      %140 = tpu.dynamic_rotate %37 by %c118_i32 dim 1 : vector<32x128xf32>, i32 -> vector<32x128xf32>
      %c15 = arith.constant 15 : index
      %c0_62 = arith.constant 0 : index
      %141 = vector.load %arg16[%c15, %c0_62] : memref<16x128xf32, #tpu.memory_space<vmem>>, vector<1x128xf32>
      %142 = vector.broadcast %141 : vector<1x128xf32> to vector<32x128xf32>
      %143 = arith.mulf %140, %142 : vector<32x128xf32>
      %144 = arith.truncf %143 : vector<32x128xf32> to vector<32x128xbf16>
      %c480 = arith.constant 480 : index
      %c0_63 = arith.constant 0 : index
      %145 = vector.load %alloca[%c480, %c0_63] : memref<512x128xbf16, #tpu.memory_space<vmem>>, vector<32x128xbf16>
      tpu.vector_store %alloca[%c480, %c0_63], %144 {strides = array<i32>} : memref<512x128xbf16, #tpu.memory_space<vmem>>, vector<32x128xbf16>,
      %c0_64 = arith.constant 0 : index
      %c0_65 = arith.constant 0 : index
      %146 = vector.load %arg14[%c0_64, %c0_65] : memref<64x512xbf16, #tpu.memory_space<vmem>>, vector<64x512xbf16>
      %c0_66 = arith.constant 0 : index
      %c0_67 = arith.constant 0 : index
      %147 = vector.load %alloca[%c0_66, %c0_67] : memref<512x128xbf16, #tpu.memory_space<vmem>>, vector<512x128xbf16>
      %cst_68 = arith.constant dense<0.000000e+00> : vector<64x128xf32>
      %148 = tpu.matmul %146, %147, %cst_68 {dimension_numbers = #tpu.dot_dimension_numbers<[1], [0], [0], [1], [0, 0, 1, 1], [], []>} : vector<64x512xbf16>, vector<512x128xbf16>, vector<64x128xf32> -> vector<64x128xf32>
      tpu.yield %148 : vector<64x128xf32>
    }) : () -> vector<64x128xf32>
    %c0_22 = arith.constant 0 : index
    %c0_23 = arith.constant 0 : index
    %39 = vector.load %arg15[%c0_22, %c0_23] : memref<64x1xf32, #tpu.memory_space<vmem>>, vector<64x1xf32>
    %40 = vector.broadcast %39 : vector<64x1xf32> to vector<64x128xf32>
    %41 = arith.addf %38, %40 : vector<64x128xf32>
    %cst_24 = arith.constant 0.000000e+00 : f32
    %42 = vector.broadcast %cst_24 : f32 to vector<64x128xf32>
    %43 = arith.cmpf ogt, %41, %42 : vector<64x128xf32>
    %cst_25 = arith.constant 2.000000e-01 : f32
    %44 = vector.broadcast %cst_25 : f32 to vector<64x128xf32>
    %45 = arith.mulf %44, %41 : vector<64x128xf32>
    %46 = arith.select %43, %41, %45 : vector<64x128xi1>, vector<64x128xf32>
    %47 = "tpu.region"() ({
      %alloca = memref.alloca() : memref<1024x128xbf16, #tpu.memory_space<vmem>>
      %c5_i32 = arith.constant 5 : i32
      %54 = tpu.dynamic_rotate %46 by %c5_i32 dim 1 : vector<64x128xf32>, i32 -> vector<64x128xf32>
      %c0_31 = arith.constant 0 : index
      %c0_32 = arith.constant 0 : index
      %55 = vector.load %arg19[%c0_31, %c0_32] : memref<16x128xf32, #tpu.memory_space<vmem>>, vector<1x128xf32>
      %56 = vector.broadcast %55 : vector<1x128xf32> to vector<64x128xf32>
      %57 = arith.mulf %54, %56 : vector<64x128xf32>
      %58 = arith.truncf %57 : vector<64x128xf32> to vector<64x128xbf16>
      %c0_33 = arith.constant 0 : index
      %c0_34 = arith.constant 0 : index
      %59 = vector.load %alloca[%c0_33, %c0_34] : memref<1024x128xbf16, #tpu.memory_space<vmem>>, vector<64x128xbf16>
      tpu.vector_store %alloca[%c0_33, %c0_34], %58 {strides = array<i32>} : memref<1024x128xbf16, #tpu.memory_space<vmem>>, vector<64x128xbf16>,
      %c4_i32 = arith.constant 4 : i32
      %60 = tpu.dynamic_rotate %46 by %c4_i32 dim 1 : vector<64x128xf32>, i32 -> vector<64x128xf32>
      %c1 = arith.constant 1 : index
      %c0_35 = arith.constant 0 : index
      %61 = vector.load %arg19[%c1, %c0_35] : memref<16x128xf32, #tpu.memory_space<vmem>>, vector<1x128xf32>
      %62 = vector.broadcast %61 : vector<1x128xf32> to vector<64x128xf32>
      %63 = arith.mulf %60, %62 : vector<64x128xf32>
      %64 = arith.truncf %63 : vector<64x128xf32> to vector<64x128xbf16>
      %c64 = arith.constant 64 : index
      %c0_36 = arith.constant 0 : index
      %65 = vector.load %alloca[%c64, %c0_36] : memref<1024x128xbf16, #tpu.memory_space<vmem>>, vector<64x128xbf16>
      tpu.vector_store %alloca[%c64, %c0_36], %64 {strides = array<i32>} : memref<1024x128xbf16, #tpu.memory_space<vmem>>, vector<64x128xbf16>,
      %c3_i32 = arith.constant 3 : i32
      %66 = tpu.dynamic_rotate %46 by %c3_i32 dim 1 : vector<64x128xf32>, i32 -> vector<64x128xf32>
      %c2 = arith.constant 2 : index
      %c0_37 = arith.constant 0 : index
      %67 = vector.load %arg19[%c2, %c0_37] : memref<16x128xf32, #tpu.memory_space<vmem>>, vector<1x128xf32>
      %68 = vector.broadcast %67 : vector<1x128xf32> to vector<64x128xf32>
      %69 = arith.mulf %66, %68 : vector<64x128xf32>
      %70 = arith.truncf %69 : vector<64x128xf32> to vector<64x128xbf16>
      %c128 = arith.constant 128 : index
      %c0_38 = arith.constant 0 : index
      %71 = vector.load %alloca[%c128, %c0_38] : memref<1024x128xbf16, #tpu.memory_space<vmem>>, vector<64x128xbf16>
      tpu.vector_store %alloca[%c128, %c0_38], %70 {strides = array<i32>} : memref<1024x128xbf16, #tpu.memory_space<vmem>>, vector<64x128xbf16>,
      %c2_i32 = arith.constant 2 : i32
      %72 = tpu.dynamic_rotate %46 by %c2_i32 dim 1 : vector<64x128xf32>, i32 -> vector<64x128xf32>
      %c3 = arith.constant 3 : index
      %c0_39 = arith.constant 0 : index
      %73 = vector.load %arg19[%c3, %c0_39] : memref<16x128xf32, #tpu.memory_space<vmem>>, vector<1x128xf32>
      %74 = vector.broadcast %73 : vector<1x128xf32> to vector<64x128xf32>
      %75 = arith.mulf %72, %74 : vector<64x128xf32>
      %76 = arith.truncf %75 : vector<64x128xf32> to vector<64x128xbf16>
      %c192 = arith.constant 192 : index
      %c0_40 = arith.constant 0 : index
      %77 = vector.load %alloca[%c192, %c0_40] : memref<1024x128xbf16, #tpu.memory_space<vmem>>, vector<64x128xbf16>
      tpu.vector_store %alloca[%c192, %c0_40], %76 {strides = array<i32>} : memref<1024x128xbf16, #tpu.memory_space<vmem>>, vector<64x128xbf16>,
      %c1_i32 = arith.constant 1 : i32
      %78 = tpu.dynamic_rotate %46 by %c1_i32 dim 1 : vector<64x128xf32>, i32 -> vector<64x128xf32>
      %c4 = arith.constant 4 : index
      %c0_41 = arith.constant 0 : index
      %79 = vector.load %arg19[%c4, %c0_41] : memref<16x128xf32, #tpu.memory_space<vmem>>, vector<1x128xf32>
      %80 = vector.broadcast %79 : vector<1x128xf32> to vector<64x128xf32>
      %81 = arith.mulf %78, %80 : vector<64x128xf32>
      %82 = arith.truncf %81 : vector<64x128xf32> to vector<64x128xbf16>
      %c256 = arith.constant 256 : index
      %c0_42 = arith.constant 0 : index
      %83 = vector.load %alloca[%c256, %c0_42] : memref<1024x128xbf16, #tpu.memory_space<vmem>>, vector<64x128xbf16>
      tpu.vector_store %alloca[%c256, %c0_42], %82 {strides = array<i32>} : memref<1024x128xbf16, #tpu.memory_space<vmem>>, vector<64x128xbf16>,
      %84 = arith.truncf %46 : vector<64x128xf32> to vector<64x128xbf16>
      %c320 = arith.constant 320 : index
      %c0_43 = arith.constant 0 : index
      %85 = vector.load %alloca[%c320, %c0_43] : memref<1024x128xbf16, #tpu.memory_space<vmem>>, vector<64x128xbf16>
      tpu.vector_store %alloca[%c320, %c0_43], %84 {strides = array<i32>} : memref<1024x128xbf16, #tpu.memory_space<vmem>>, vector<64x128xbf16>,
      %c127_i32 = arith.constant 127 : i32
      %86 = tpu.dynamic_rotate %46 by %c127_i32 dim 1 : vector<64x128xf32>, i32 -> vector<64x128xf32>
      %c6 = arith.constant 6 : index
      %c0_44 = arith.constant 0 : index
      %87 = vector.load %arg19[%c6, %c0_44] : memref<16x128xf32, #tpu.memory_space<vmem>>, vector<1x128xf32>
      %88 = vector.broadcast %87 : vector<1x128xf32> to vector<64x128xf32>
      %89 = arith.mulf %86, %88 : vector<64x128xf32>
      %90 = arith.truncf %89 : vector<64x128xf32> to vector<64x128xbf16>
      %c384 = arith.constant 384 : index
      %c0_45 = arith.constant 0 : index
      %91 = vector.load %alloca[%c384, %c0_45] : memref<1024x128xbf16, #tpu.memory_space<vmem>>, vector<64x128xbf16>
      tpu.vector_store %alloca[%c384, %c0_45], %90 {strides = array<i32>} : memref<1024x128xbf16, #tpu.memory_space<vmem>>, vector<64x128xbf16>,
      %c126_i32 = arith.constant 126 : i32
      %92 = tpu.dynamic_rotate %46 by %c126_i32 dim 1 : vector<64x128xf32>, i32 -> vector<64x128xf32>
      %c7 = arith.constant 7 : index
      %c0_46 = arith.constant 0 : index
      %93 = vector.load %arg19[%c7, %c0_46] : memref<16x128xf32, #tpu.memory_space<vmem>>, vector<1x128xf32>
      %94 = vector.broadcast %93 : vector<1x128xf32> to vector<64x128xf32>
      %95 = arith.mulf %92, %94 : vector<64x128xf32>
      %96 = arith.truncf %95 : vector<64x128xf32> to vector<64x128xbf16>
      %c448 = arith.constant 448 : index
      %c0_47 = arith.constant 0 : index
      %97 = vector.load %alloca[%c448, %c0_47] : memref<1024x128xbf16, #tpu.memory_space<vmem>>, vector<64x128xbf16>
      tpu.vector_store %alloca[%c448, %c0_47], %96 {strides = array<i32>} : memref<1024x128xbf16, #tpu.memory_space<vmem>>, vector<64x128xbf16>,
      %c125_i32 = arith.constant 125 : i32
      %98 = tpu.dynamic_rotate %46 by %c125_i32 dim 1 : vector<64x128xf32>, i32 -> vector<64x128xf32>
      %c8 = arith.constant 8 : index
      %c0_48 = arith.constant 0 : index
      %99 = vector.load %arg19[%c8, %c0_48] : memref<16x128xf32, #tpu.memory_space<vmem>>, vector<1x128xf32>
      %100 = vector.broadcast %99 : vector<1x128xf32> to vector<64x128xf32>
      %101 = arith.mulf %98, %100 : vector<64x128xf32>
      %102 = arith.truncf %101 : vector<64x128xf32> to vector<64x128xbf16>
      %c512 = arith.constant 512 : index
      %c0_49 = arith.constant 0 : index
      %103 = vector.load %alloca[%c512, %c0_49] : memref<1024x128xbf16, #tpu.memory_space<vmem>>, vector<64x128xbf16>
      tpu.vector_store %alloca[%c512, %c0_49], %102 {strides = array<i32>} : memref<1024x128xbf16, #tpu.memory_space<vmem>>, vector<64x128xbf16>,
      %c124_i32 = arith.constant 124 : i32
      %104 = tpu.dynamic_rotate %46 by %c124_i32 dim 1 : vector<64x128xf32>, i32 -> vector<64x128xf32>
      %c9 = arith.constant 9 : index
      %c0_50 = arith.constant 0 : index
      %105 = vector.load %arg19[%c9, %c0_50] : memref<16x128xf32, #tpu.memory_space<vmem>>, vector<1x128xf32>
      %106 = vector.broadcast %105 : vector<1x128xf32> to vector<64x128xf32>
      %107 = arith.mulf %104, %106 : vector<64x128xf32>
      %108 = arith.truncf %107 : vector<64x128xf32> to vector<64x128xbf16>
      %c576 = arith.constant 576 : index
      %c0_51 = arith.constant 0 : index
      %109 = vector.load %alloca[%c576, %c0_51] : memref<1024x128xbf16, #tpu.memory_space<vmem>>, vector<64x128xbf16>
      tpu.vector_store %alloca[%c576, %c0_51], %108 {strides = array<i32>} : memref<1024x128xbf16, #tpu.memory_space<vmem>>, vector<64x128xbf16>,
      %c123_i32 = arith.constant 123 : i32
      %110 = tpu.dynamic_rotate %46 by %c123_i32 dim 1 : vector<64x128xf32>, i32 -> vector<64x128xf32>
      %c10 = arith.constant 10 : index
      %c0_52 = arith.constant 0 : index
      %111 = vector.load %arg19[%c10, %c0_52] : memref<16x128xf32, #tpu.memory_space<vmem>>, vector<1x128xf32>
      %112 = vector.broadcast %111 : vector<1x128xf32> to vector<64x128xf32>
      %113 = arith.mulf %110, %112 : vector<64x128xf32>
      %114 = arith.truncf %113 : vector<64x128xf32> to vector<64x128xbf16>
      %c640 = arith.constant 640 : index
      %c0_53 = arith.constant 0 : index
      %115 = vector.load %alloca[%c640, %c0_53] : memref<1024x128xbf16, #tpu.memory_space<vmem>>, vector<64x128xbf16>
      tpu.vector_store %alloca[%c640, %c0_53], %114 {strides = array<i32>} : memref<1024x128xbf16, #tpu.memory_space<vmem>>, vector<64x128xbf16>,
      %c122_i32 = arith.constant 122 : i32
      %116 = tpu.dynamic_rotate %46 by %c122_i32 dim 1 : vector<64x128xf32>, i32 -> vector<64x128xf32>
      %c11 = arith.constant 11 : index
      %c0_54 = arith.constant 0 : index
      %117 = vector.load %arg19[%c11, %c0_54] : memref<16x128xf32, #tpu.memory_space<vmem>>, vector<1x128xf32>
      %118 = vector.broadcast %117 : vector<1x128xf32> to vector<64x128xf32>
      %119 = arith.mulf %116, %118 : vector<64x128xf32>
      %120 = arith.truncf %119 : vector<64x128xf32> to vector<64x128xbf16>
      %c704 = arith.constant 704 : index
      %c0_55 = arith.constant 0 : index
      %121 = vector.load %alloca[%c704, %c0_55] : memref<1024x128xbf16, #tpu.memory_space<vmem>>, vector<64x128xbf16>
      tpu.vector_store %alloca[%c704, %c0_55], %120 {strides = array<i32>} : memref<1024x128xbf16, #tpu.memory_space<vmem>>, vector<64x128xbf16>,
      %c121_i32 = arith.constant 121 : i32
      %122 = tpu.dynamic_rotate %46 by %c121_i32 dim 1 : vector<64x128xf32>, i32 -> vector<64x128xf32>
      %c12 = arith.constant 12 : index
      %c0_56 = arith.constant 0 : index
      %123 = vector.load %arg19[%c12, %c0_56] : memref<16x128xf32, #tpu.memory_space<vmem>>, vector<1x128xf32>
      %124 = vector.broadcast %123 : vector<1x128xf32> to vector<64x128xf32>
      %125 = arith.mulf %122, %124 : vector<64x128xf32>
      %126 = arith.truncf %125 : vector<64x128xf32> to vector<64x128xbf16>
      %c768 = arith.constant 768 : index
      %c0_57 = arith.constant 0 : index
      %127 = vector.load %alloca[%c768, %c0_57] : memref<1024x128xbf16, #tpu.memory_space<vmem>>, vector<64x128xbf16>
      tpu.vector_store %alloca[%c768, %c0_57], %126 {strides = array<i32>} : memref<1024x128xbf16, #tpu.memory_space<vmem>>, vector<64x128xbf16>,
      %c120_i32 = arith.constant 120 : i32
      %128 = tpu.dynamic_rotate %46 by %c120_i32 dim 1 : vector<64x128xf32>, i32 -> vector<64x128xf32>
      %c13 = arith.constant 13 : index
      %c0_58 = arith.constant 0 : index
      %129 = vector.load %arg19[%c13, %c0_58] : memref<16x128xf32, #tpu.memory_space<vmem>>, vector<1x128xf32>
      %130 = vector.broadcast %129 : vector<1x128xf32> to vector<64x128xf32>
      %131 = arith.mulf %128, %130 : vector<64x128xf32>
      %132 = arith.truncf %131 : vector<64x128xf32> to vector<64x128xbf16>
      %c832 = arith.constant 832 : index
      %c0_59 = arith.constant 0 : index
      %133 = vector.load %alloca[%c832, %c0_59] : memref<1024x128xbf16, #tpu.memory_space<vmem>>, vector<64x128xbf16>
      tpu.vector_store %alloca[%c832, %c0_59], %132 {strides = array<i32>} : memref<1024x128xbf16, #tpu.memory_space<vmem>>, vector<64x128xbf16>,
      %c119_i32 = arith.constant 119 : i32
      %134 = tpu.dynamic_rotate %46 by %c119_i32 dim 1 : vector<64x128xf32>, i32 -> vector<64x128xf32>
      %c14 = arith.constant 14 : index
      %c0_60 = arith.constant 0 : index
      %135 = vector.load %arg19[%c14, %c0_60] : memref<16x128xf32, #tpu.memory_space<vmem>>, vector<1x128xf32>
      %136 = vector.broadcast %135 : vector<1x128xf32> to vector<64x128xf32>
      %137 = arith.mulf %134, %136 : vector<64x128xf32>
      %138 = arith.truncf %137 : vector<64x128xf32> to vector<64x128xbf16>
      %c896 = arith.constant 896 : index
      %c0_61 = arith.constant 0 : index
      %139 = vector.load %alloca[%c896, %c0_61] : memref<1024x128xbf16, #tpu.memory_space<vmem>>, vector<64x128xbf16>
      tpu.vector_store %alloca[%c896, %c0_61], %138 {strides = array<i32>} : memref<1024x128xbf16, #tpu.memory_space<vmem>>, vector<64x128xbf16>,
      %c118_i32 = arith.constant 118 : i32
      %140 = tpu.dynamic_rotate %46 by %c118_i32 dim 1 : vector<64x128xf32>, i32 -> vector<64x128xf32>
      %c15 = arith.constant 15 : index
      %c0_62 = arith.constant 0 : index
      %141 = vector.load %arg19[%c15, %c0_62] : memref<16x128xf32, #tpu.memory_space<vmem>>, vector<1x128xf32>
      %142 = vector.broadcast %141 : vector<1x128xf32> to vector<64x128xf32>
      %143 = arith.mulf %140, %142 : vector<64x128xf32>
      %144 = arith.truncf %143 : vector<64x128xf32> to vector<64x128xbf16>
      %c960 = arith.constant 960 : index
      %c0_63 = arith.constant 0 : index
      %145 = vector.load %alloca[%c960, %c0_63] : memref<1024x128xbf16, #tpu.memory_space<vmem>>, vector<64x128xbf16>
      tpu.vector_store %alloca[%c960, %c0_63], %144 {strides = array<i32>} : memref<1024x128xbf16, #tpu.memory_space<vmem>>, vector<64x128xbf16>,
      %c0_64 = arith.constant 0 : index
      %c0_65 = arith.constant 0 : index
      %146 = vector.load %arg17[%c0_64, %c0_65] : memref<1x1024xbf16, #tpu.memory_space<vmem>>, vector<1x1024xbf16>
      %c0_66 = arith.constant 0 : index
      %c0_67 = arith.constant 0 : index
      %147 = vector.load %alloca[%c0_66, %c0_67] : memref<1024x128xbf16, #tpu.memory_space<vmem>>, vector<1024x128xbf16>
      %cst_68 = arith.constant dense<0.000000e+00> : vector<1x128xf32>
      %148 = tpu.matmul %146, %147, %cst_68 {dimension_numbers = #tpu.dot_dimension_numbers<[1], [0], [0], [1], [0, 0, 1, 1], [], []>} : vector<1x1024xbf16>, vector<1024x128xbf16>, vector<1x128xf32> -> vector<1x128xf32>
      tpu.yield %148 : vector<1x128xf32>
    }) : () -> vector<1x128xf32>
    %c0_26 = arith.constant 0 : index
    %c0_27 = arith.constant 0 : index
    %48 = vector.load %arg18[%c0_26, %c0_27] : memref<1x1xf32, #tpu.memory_space<vmem>>, vector<1x1xf32>
    %49 = vector.broadcast %48 : vector<1x1xf32> to vector<1x128xf32>
    %50 = arith.addf %47, %49 : vector<1x128xf32>
    %c0_28 = arith.constant 0 : index
    %c0_29 = arith.constant 0 : index
    %c0_30 = arith.constant 0 : index
    %51 = vector.load %arg20[%c0_28, %c0_29, %c0_30] : memref<1x1x128xf32, #tpu.memory_space<vmem>>, vector<1x1x128xf32>
    %52 = vector.shape_cast %51 : vector<1x1x128xf32> to vector<1x128xf32>
    %53 = vector.shape_cast %50 : vector<1x128xf32> to vector<1x1x128xf32>
    tpu.vector_store %arg20[%c0_28, %c0_29, %c0_30], %53 {strides = array<i32>} : memref<1x1x128xf32, #tpu.memory_space<vmem>>, vector<1x1x128xf32>,
    return
  }
  func.func @transform_0(%arg0: i32) -> (i32, i32, i32) {
    %c0_i32 = arith.constant 0 : i32
    %c0_i32_0 = arith.constant 0 : i32
    %c0_i32_1 = arith.constant 0 : i32
    return %arg0, %c0_i32, %c0_i32_0 : i32, i32, i32
  }
  func.func @transform_1(%arg0: i32) -> (i32, i32) {
    %c0_i32 = arith.constant 0 : i32
    %c0_i32_0 = arith.constant 0 : i32
    %c0_i32_1 = arith.constant 0 : i32
    return %c0_i32, %c0_i32_0 : i32, i32
  }
  func.func @transform_2(%arg0: i32) -> (i32, i32) {
    %c0_i32 = arith.constant 0 : i32
    %c0_i32_0 = arith.constant 0 : i32
    %c0_i32_1 = arith.constant 0 : i32
    return %c0_i32, %c0_i32_0 : i32, i32
  }
  func.func @transform_3(%arg0: i32) -> (i32, i32) {
    %c0_i32 = arith.constant 0 : i32
    %c0_i32_0 = arith.constant 0 : i32
    %c0_i32_1 = arith.constant 0 : i32
    return %c0_i32, %c0_i32_0 : i32, i32
  }
  func.func @transform_4(%arg0: i32) -> (i32, i32) {
    %c0_i32 = arith.constant 0 : i32
    %c0_i32_0 = arith.constant 0 : i32
    %c0_i32_1 = arith.constant 0 : i32
    return %c0_i32, %c0_i32_0 : i32, i32
  }
  func.func @transform_5(%arg0: i32) -> (i32, i32) {
    %c0_i32 = arith.constant 0 : i32
    %c0_i32_0 = arith.constant 0 : i32
    %c0_i32_1 = arith.constant 0 : i32
    return %c0_i32, %c0_i32_0 : i32, i32
  }
  func.func @transform_6(%arg0: i32) -> (i32, i32) {
    %c0_i32 = arith.constant 0 : i32
    %c0_i32_0 = arith.constant 0 : i32
    %c0_i32_1 = arith.constant 0 : i32
    return %c0_i32, %c0_i32_0 : i32, i32
  }
  func.func @transform_7(%arg0: i32) -> (i32, i32) {
    %c0_i32 = arith.constant 0 : i32
    %c0_i32_0 = arith.constant 0 : i32
    %c0_i32_1 = arith.constant 0 : i32
    return %c0_i32, %c0_i32_0 : i32, i32
  }
  func.func @transform_8(%arg0: i32) -> (i32, i32) {
    %c0_i32 = arith.constant 0 : i32
    %c0_i32_0 = arith.constant 0 : i32
    %c0_i32_1 = arith.constant 0 : i32
    return %c0_i32, %c0_i32_0 : i32, i32
  }
  func.func @transform_9(%arg0: i32) -> (i32, i32) {
    %c0_i32 = arith.constant 0 : i32
    %c0_i32_0 = arith.constant 0 : i32
    %c0_i32_1 = arith.constant 0 : i32
    return %c0_i32, %c0_i32_0 : i32, i32
  }
  func.func @transform_10(%arg0: i32) -> (i32, i32) {
    %c0_i32 = arith.constant 0 : i32
    %c0_i32_0 = arith.constant 0 : i32
    %c0_i32_1 = arith.constant 0 : i32
    return %c0_i32, %c0_i32_0 : i32, i32
  }
  func.func @transform_11(%arg0: i32) -> (i32, i32) {
    %c0_i32 = arith.constant 0 : i32
    %c0_i32_0 = arith.constant 0 : i32
    %c0_i32_1 = arith.constant 0 : i32
    return %c0_i32, %c0_i32_0 : i32, i32
  }
  func.func @transform_12(%arg0: i32) -> (i32, i32) {
    %c0_i32 = arith.constant 0 : i32
    %c0_i32_0 = arith.constant 0 : i32
    %c0_i32_1 = arith.constant 0 : i32
    return %c0_i32, %c0_i32_0 : i32, i32
  }
  func.func @transform_13(%arg0: i32) -> (i32, i32) {
    %c0_i32 = arith.constant 0 : i32
    %c0_i32_0 = arith.constant 0 : i32
    %c0_i32_1 = arith.constant 0 : i32
    return %c0_i32, %c0_i32_0 : i32, i32
  }
  func.func @transform_14(%arg0: i32) -> (i32, i32) {
    %c0_i32 = arith.constant 0 : i32
    %c0_i32_0 = arith.constant 0 : i32
    %c0_i32_1 = arith.constant 0 : i32
    return %c0_i32, %c0_i32_0 : i32, i32
  }
  func.func @transform_15(%arg0: i32) -> (i32, i32) {
    %c0_i32 = arith.constant 0 : i32
    %c0_i32_0 = arith.constant 0 : i32
    %c0_i32_1 = arith.constant 0 : i32
    return %c0_i32, %c0_i32_0 : i32, i32
  }
  func.func @transform_16(%arg0: i32) -> (i32, i32) {
    %c0_i32 = arith.constant 0 : i32
    %c0_i32_0 = arith.constant 0 : i32
    %c0_i32_1 = arith.constant 0 : i32
    return %c0_i32, %c0_i32_0 : i32, i32
  }
  func.func @transform_17(%arg0: i32) -> (i32, i32) {
    %c0_i32 = arith.constant 0 : i32
    %c0_i32_0 = arith.constant 0 : i32
    %c0_i32_1 = arith.constant 0 : i32
    return %c0_i32, %c0_i32_0 : i32, i32
  }
  func.func @transform_18(%arg0: i32) -> (i32, i32) {
    %c0_i32 = arith.constant 0 : i32
    %c0_i32_0 = arith.constant 0 : i32
    %c0_i32_1 = arith.constant 0 : i32
    return %c0_i32, %c0_i32_0 : i32, i32
  }
  func.func @transform_19(%arg0: i32) -> (i32, i32, i32) {
    %c0_i32 = arith.constant 0 : i32
    %c0_i32_0 = arith.constant 0 : i32
    %c0_i32_1 = arith.constant 0 : i32
    return %arg0, %c0_i32, %c0_i32_0 : i32, i32, i32
  }
}

</mosaic_0001>

<bundles_post_ra>
// kernel: tpu_custom_call.1
= control target key start
LH: loop header
LB: loop body
LE: loop exit
PB: predicated region body
PF: predicated region fallthrough
CT: control target
= control target key end

     0   :  { %s11999_s0 = inlined_call_operand.hbm [shape: f32[2,8,1024], index: 0, kind: input, shape index: {}]   ;;  %s12000_s1 = inlined_call_operand.hbm [shape: bf16[8,128], index: 1, kind: input, shape index: {}]   ;;  %s12001_s2 = inlined_call_operand.vmem [shape: f32[8,1], index: 2, kind: input, shape index: {}]   ;;  %s12002_s3 = inlined_call_operand.vmem [shape: f32[16,1024], index: 3, kind: input, shape index: {}]   ;;  %s12003_s4 = inlined_call_operand.hbm [shape: bf16[1024,256], index: 4, kind: input, shape index: {}]   ;;  %s12004_s5 = inlined_call_operand.hbm [shape: bf16[16,128], index: 5, kind: input, shape index: {}]   ;;  %s12005_s6 = inlined_call_operand.vmem [shape: f32[16,1], index: 6, kind: input, shape index: {}]   ;;  %s12006_s7 = inlined_call_operand.hbm [shape: f32[16,256], index: 7, kind: input, shape index: {}]   ;;  %s12007_s8 = inlined_call_operand.hbm [shape: bf16[256,128], index: 8, kind: input, shape index: {}]   ;;  %s12008_s9 = inlined_call_operand.hbm [shape: bf16[32,256], index: 9, kind: input, shape index: {}]   ;;  %s12009_s10 = inlined_call_operand.vmem [shape: f32[32,1], index: 10, kind: input, shape index: {}]   ;;  %s12010_s11 = inlined_call_operand.hbm [shape: f32[16,128], index: 11, kind: input, shape index: {}]   ;;  %s12011_s12 = inlined_call_operand.hbm [shape: bf16[128,128], index: 12, kind: input, shape index: {}]   ;;  %s12012_s13 = inlined_call_operand.hbm [shape: bf16[64,512], index: 13, kind: input, shape index: {}]   ;;  %s12013_s14 = inlined_call_operand.vmem [shape: f32[64,1], index: 14, kind: input, shape index: {}]   ;;  %s12014_s15 = inlined_call_operand.hbm [shape: f32[16,128], index: 15, kind: input, shape index: {}]   ;;  %s12015_s16 = inlined_call_operand.vmem [shape: bf16[1,1024], index: 16, kind: input, shape index: {}]   ;;  %s12016_s17 = inlined_call_operand.<no memory space> [shape: f32[1,1], index: 17, kind: input, shape index: {}]   ;;  %s12017_s18 = inlined_call_operand.hbm [shape: f32[16,128], index: 18, kind: input, shape index: {}]   ;;  %s12018_s19 = inlined_call_operand.hbm [shape: f32[2,1,128], index: 19, kind: output, shape index: {}]  }
   0x1   :  { %12028 = sst [smem:[#allocation37_spill]] %s11999_s0  ;;  %v24_v0 = vstv %s12016_s17 }
   0x2   :  { %12029 = sst [smem:[#allocation38_spill]] %s12000_s1  ;;  %25 = vst [vmem:[#allocation2] sm:$0x1] %v24_v0 }
   0x3   :  { %12030 = sst [smem:[#allocation39_spill]] %s12001_s2 }
   0x4   :  { %12031 = sst [smem:[#allocation40_spill]] %s12002_s3 }
   0x5   :  { %12032 = sst [smem:[#allocation41_spill]] %s12003_s4 }
   0x6   :  { %12033 = sst [smem:[#allocation42_spill]] %s12004_s5 }
   0x7   :  { %12034 = sst [smem:[#allocation43_spill]] %s12006_s7 }
   0x8   :  { %12035 = sst [smem:[#allocation44_spill]] %s12007_s8 }
   0x9   :  { %12036 = sst [smem:[#allocation45_spill]] %s12008_s9 }
   0xa   :  { %12037 = sst [smem:[#allocation46_spill]] %s12010_s11 }
   0xb   :  { %12038 = sst [smem:[#allocation47_spill]] %s12012_s13 }
   0xc   :  { %12039 = sst [smem:[#allocation48_spill]] %s12015_s16 }
   0xd   :  { %12040 = sst [smem:[#allocation49_spill]] %s12018_s19 }
   0xe   :  { %26 = vsyncpa [#allocation4], 0 }
   0xf   :  { %28 = vsyncpa [#allocation4 + $0x1], 0 }
  0x10   :  { %29 = vsyncpa [#allocation7], 0 }
  0x11   :  { %30 = vsyncpa [#allocation10], 0 }
  0x12   :  { %31 = vsyncpa [#allocation13], 0 }
  0x13   :  { %32 = vsyncpa [#allocation16], 0 }
  0x14   :  { %33 = vsyncpa [#allocation19], 0 }
  0x15   :  { %34 = vsyncpa [#allocation22], 0 }
  0x16   :  { %35 = vsyncpa [#allocation5], 0 }
  0x17   :  { %37 = vsyncpa [#allocation5 + $0x1], 0  ;;  %s10165_s20 = smov 0   ;;  %s10167_s21 = smov 0  }
  0x18   :  { %s10169_s1 = smov 0   ;;  %s10171_s22 = smov 0  }
  0x19 LB: > { %s12041_s23 = sld [smem:[#allocation38_spill]]  ;;  %s10189_s25 = sadd.s32 4294967295, %s9967_s22   ;;  %s9967_s22 = sphi %s10171_s22, %s12070_s22   ;;  %s9963_s1 = sphi %s10169_s1, %s12069_s1   ;;  %s9959_s21 = sphi %s10167_s21, %s12068_s21   ;;  %s9955_s20 = sphi %s10165_s20, %s12067_s20  }
  0x1a   : > { %p6671_p0 = scmp.ge.s32.totalorder %s9967_s22, 1  ;;  %p64_p1 = scmp.eq.s32.totalorder %s10189_s25, 0 }
  0x1b   : > { %p478_p2 = scmp.lt.s32.totalorder %s9967_s22, 3  ;;  %s9969_s26 = smov [#allocation6]  }
  0x1c   : > { %s492_s27 = sshll.u32 %s9969_s26, 4  ;;  %s12043_s5 = sld [smem:[#allocation42_spill]]  ;;  %s493_s27 = int_to_ptr.vmem [resolvable:$true] %s492_s27 }
  0x1d   : > { %p10194_p3 = pnand %p6671_p0, %p478_p2  ;;  %s9970_s17 = smov [#allocation9]  }
  0x1e   : > { %s523_s2 = sshll.u32 %s9970_s17, 4  ;;  %s12023_s26 = smov 4   ;;  %s524_s2 = int_to_ptr.vmem [resolvable:$true] %s523_s2 }
  0x1f   : > { %s490_s24 = sshll.u32 %s12041_s23, 4  ;;  %p9273_p5 = pneg %p10194_p3  ;;  %s491_s24 = int_to_ptr.hbm [resolvable:$true] %s490_s24 }
  0x20   : > { %s12022_s23 = smov 64   ;;  %s12045_s8 = sld [smem:[#allocation44_spill]] }
  0x21   : > { %p10206_p6 = pnand %p9273_p5, %p64_p1  ;;  %s9973_s19 = smov [#allocation12]  }
  0x22   : > { %s521_s0 = sshll.u32 %s12043_s5, 4  ;;  %s554_s16 = sshll.u32 %s9973_s19, 4  ;;  %s522_s0 = int_to_ptr.hbm [resolvable:$true] %s521_s0  ;;  %s555_s16 = int_to_ptr.vmem [resolvable:$true] %s554_s16 }
  0x23   : > { %9276 = dma.hbm_to_vmem [thread:$0]  (!%p10206_p6), %s491_s24, 64, %s493_s27, [#allocation7]  }
  0x24   : > { %9282 = dma.hbm_to_vmem [thread:$0]  (!%p10206_p6), %s522_s0, 128, %s524_s2, [#allocation10], %s12022_s23, %s12022_s23, %s12023_s26  }
  0x25   : > { %s12046_s11 = sld [smem:[#allocation46_spill]]  ;;  %s9974_s0 = smov [#allocation15]  }
  0x26   : > { %s552_s5 = sshll.u32 %s12045_s8, 4  ;;  %s585_s2 = sshll.u32 %s9974_s0, 4  ;;  %s553_s5 = int_to_ptr.hbm [resolvable:$true] %s552_s5  ;;  %s586_s2 = int_to_ptr.vmem [resolvable:$true] %s585_s2 }
  0x27   : > { %9288 = dma.hbm_to_vmem [thread:$0]  (!%p10206_p6), %s553_s5, 2048, %s555_s16, [#allocation13], %s12022_s23, %s12022_s23, %s12023_s26  }
  0x28   : > { %s12024_s28 = smov 128   ;;  %s9976_s29 = smov 8  }
  0x29   : > { %s12047_s13 = sld [smem:[#allocation47_spill]]  ;;  %s9977_s16 = smov [#allocation18]  }
  0x2a   : > { %s613_s24 = sshll.u32 %s9977_s16, 4  ;;  %s12048_s4 = sld [smem:[#allocation41_spill]]  ;;  %s614_s24 = int_to_ptr.vmem [resolvable:$true] %s613_s24 }
  0x2b   : > { %s583_s17 = sshll.u32 %s12046_s11, 4  ;;  %s9978_s26 = smov 256   ;;  %s584_s17 = int_to_ptr.hbm [resolvable:$true] %s583_s17 }
  0x2c   : > { %9294 = dma.hbm_to_vmem [thread:$0]  (!%p10206_p6), %s584_s17, 256, %s586_s2, [#allocation16], %s12024_s28, %s12024_s28, %s9976_s29  }
  0x2d   : > { %s9979_s11 = smov 16   ;;  %s9980_s17 = smov [#allocation8]  }
  0x2e   : > { %s509_s2 = sshll.u32 %s9980_s17, 4  ;;  %s12049_s7 = sld [smem:[#allocation43_spill]]  ;;  %s510_s2 = int_to_ptr.vmem [resolvable:$true] %s509_s2 }
  0x2f   : > { %s611_s5 = sshll.u32 %s12047_s13, 4  ;;  %s12050_s16 = smov 128   ;;  %s612_s5 = int_to_ptr.hbm [resolvable:$true] %s611_s5 }
  0x30   : > { %s507_s0 = sshll.u32 %s12048_s4, 4  ;;  %s12051_s9 = sld [smem:[#allocation45_spill]]  ;;  %s508_s0 = int_to_ptr.hbm [resolvable:$true] %s507_s0 }
  0x31   : > { %9300 = dma.hbm_to_vmem [thread:$0]  (!%p10206_p6), %s612_s5, 2048, %s614_s24, [#allocation19], %s9978_s26, %s9978_s26, %s9979_s11  }
  0x32   : > { %9279 = dma.hbm_to_vmem [thread:$0]  (!%p10206_p6), %s508_s0, 16384, %s510_s2, [#allocation7], %s12050_s16, %s12050_s16, %s9976_s29  }
  0x33   : > { %s9981_s5 = smov [#allocation11]   ;;  %s9982_s28 = smov [#allocation14]  }
  0x34   : > { %s538_s19 = sshll.u32 %s12049_s7, 4  ;;  %s540_s24 = sshll.u32 %s9981_s5, 4  ;;  %s539_s19 = int_to_ptr.hbm [resolvable:$true] %s538_s19  ;;  %s541_s24 = int_to_ptr.vmem [resolvable:$true] %s540_s24 }
  0x35   : > { %9285 = dma.hbm_to_vmem [thread:$0]  (!%p10206_p6), %s539_s19, 512, %s541_s24, [#allocation10], %s9978_s26, %s9978_s26, %s9979_s11  }
  0x36   : > { %s566_s4 = sshll.u32 %s12051_s9, 4  ;;  %s568_s17 = sshll.u32 %s9982_s28, 4  ;;  %s567_s4 = int_to_ptr.hbm [resolvable:$true] %s566_s4  ;;  %s569_s17 = int_to_ptr.vmem [resolvable:$true] %s568_s17 }
  0x37   : > { %s597_s13 = sshll.u32 %s12011_s12, 4  ;;  %s628_s23 = sshll.u32 %s12014_s15, 4  ;;  %s598_s13 = int_to_ptr.hbm [resolvable:$true] %s597_s13  ;;  %s629_s23 = int_to_ptr.hbm [resolvable:$true] %s628_s23 }
  0x38   : > { %9291 = dma.hbm_to_vmem [thread:$0]  (!%p10206_p6), %s567_s4, 512, %s569_s17, [#allocation13], %s12050_s16, %s12050_s16, %s9976_s29  }
  0x39   : > { %s9983_s11 = smov [#allocation17]   ;;  %s12052_s7 = smov 4  }
  0x3a   : > { %s599_s26 = sshll.u32 %s9983_s11, 4  ;;  %s12053_s19 = smov 64   ;;  %s600_s26 = int_to_ptr.vmem [resolvable:$true] %s599_s26 }
  0x3b   : > { %9297 = dma.hbm_to_vmem [thread:$0]  (!%p10206_p6), %s598_s13, 1024, %s600_s26, [#allocation16], %s12053_s19, %s12053_s19, %s12052_s7  }
  0x3c   : > { %s9984_s4 = smov [#allocation20]   ;;  %s648_s28 = sshll.u32 %s12017_s18, 4  ;;  %s649_s28 = int_to_ptr.hbm [resolvable:$true] %s648_s28 }
  0x3d   : > { %s630_s27 = sshll.u32 %s9984_s4, 4  ;;  %s9985_s13 = smov [#allocation21]   ;;  %s631_s27 = int_to_ptr.vmem [resolvable:$true] %s630_s27 }
  0x3e   : > { %9303 = dma.hbm_to_vmem [thread:$0]  (!%p10206_p6), %s629_s23, 256, %s631_s27, [#allocation19], %s12050_s16, %s12050_s16, %s9976_s29  }
  0x3f   : > { %s650_s17 = sshll.u32 %s9985_s13, 4  ;;  %s6670_s8 = sadd.s32 4294967294, %s9967_s22   ;;  %s651_s17 = int_to_ptr.vmem [resolvable:$true] %s650_s17 }
  0x40   : > { %9306 = dma.hbm_to_vmem [thread:$0]  (!%p10206_p6), %s649_s28, 256, %s651_s17, [#allocation22], %s12050_s16, %s12050_s16, %s9976_s29  }
  0x41   : > { %s10285_s0 = sadd.s32 1, %s9967_s22   ;;  %s50_s2 = sadd.s32 1, %s9963_s1 }
  0x42   : > { %s47_s11 = ssub.s32 %s9967_s22, %s10285_s0  ;;  %p57_p7 = scmp.ne.s32.totalorder %s9963_s1, %s9959_s21 }
  0x43   : > { %p48_p8 = scmp.eq.s32.totalorder %s47_s11, 0  ;;  %p58_p9 = scmp.eq.s32.totalorder %s9967_s22, 0 }
  0x44   : > { %p63_p10 = scmp.ne.s32.totalorder %s9959_s21, %s9955_s20  ;;  %p465_p11 = scmp.eq.s32.totalorder %s10189_s25, 1 }
  0x45   : > { %s10297_s23 = scalar_select %p48_p8, %s9963_s1, %s50_s2  }
  0x46   : > { %p10301_p12 = por %p64_p1, %p63_p10  ;;  %p10305_p13 = por %p465_p11, %p57_p7 }
  0x47   : > { %p471_p0 = scmp.eq.s32.totalorder %s6670_s8, 1  ;;  %p59_p2 = por %p58_p9, %p57_p7 }
  0x48   : > { %s664_s16 = sand.u32 1, %s9963_s1   ;;  %p9326_p6 = scmp.lt.s32.totalorder %s9967_s22, 2 }
  0x49   : > { %p10310_p5 = por %p471_p0, %p63_p10  ;;  %s6684_s7 = sshll.u32 %s664_s16, 6 }
  0x4a   : > { %s8190_s19 = sshll.u32 %s9967_s22, 6  ;;  %s12057_s5 = sld [smem:[#allocation37_spill]] }
  0x4b   : > { %s668_s13 = scalar_lea.vmem [#allocation3], %s6684_s7  ;;  %p10319_p8 = pnand %p9326_p6, %p59_p2 }
  0x4c   : > { %s677_s17 = sshll.u32 %s668_s13, 4  ;;  %s665_s2 = scalar_lea.sflag [#allocation4], %s664_s16  ;;  %s678_s17 = int_to_ptr.vmem [resolvable:$true] %s677_s17 }
  0x4d   : > { %p9851_p9 = pneg %p10319_p8 }
  0x50   : > { %s673_s24 = scalar_lea.hbm %s12057_s5, %s8190_s19  ;;  %s9854_s7 = scalar_lea.hbm %s12057_s5, 128 }
  0x51   : > { %s675_s28 = sshll.u32 %s673_s24, 4  ;;  %s676_s28 = int_to_ptr.hbm [resolvable:$true] %s675_s28 }
  0x52   : > { %s9847_s11 = sshra.s32 %s676_s28, 4  ;;  %s9848_s11 = int_to_ptr.hbm [resolvable:$true] %s9847_s11 }
  0x53   : > { %s9849_s9 = scalar_lea.hbm %s9848_s11, 64  ;;  %p9855_p0 = scmp.lt.s32.totalorder %s9848_s11, %s12057_s5 }
  0x54   : > { %p9850_p7 = scmp.ne.s32.totalorder %s9848_s11, %s9849_s9  ;;  %p9856_p2 = scmp.lt.s32.totalorder %s9854_s7, %s9849_s9 }
  0x56   : > { %p9852_p10 = pnand %p9851_p9, %p9850_p7  ;;  %p9857_p6 = por %p9856_p2, %p9855_p0 }
  0x58   : > { %p9853_p11 = pneg %p9852_p10 }
  0x5a   : > { %p9858_p4 = pnand %p9857_p6, %p9853_p11 }
  0x5c   : > { %9861 = shalt.err (!%p9858_p4)
}
  0x5d   : > { %9310 = dma.hbm_to_vmem [thread:$0]  (!%p10319_p8), %s676_s28, 1024, %s678_s17, %s665_s2  }
  0x5e   : > { %686 = sbr.rel (%p10194_p3) target bundleno = 3071 (0xbff), region = 96  ;;  %s10336_s16 = sand.u32 (!%p10194_p3), 1, %s9959_s21  }
  0x5f   : > { %s6688_s13 = sshll.u32 (!%p10194_p3), %s10336_s16, 6  ;;  %s689_s19 = scalar_lea.sflag (!%p10194_p3), [#allocation4], %s10336_s16 }
  0x60   : > { %s692_s4 = scalar_lea.vmem (!%p10194_p3), [#allocation3], %s6688_s13 }
  0x63   : > { %9922 = dma.done.wait (%p10301_p12), %s689_s19, 1024  }
  0x64   : > { %9924 = vsyncadd (%p10301_p12), %s689_s19, 4294966272 }
  0x65   : > { %9926 = dma.done.wait (%p64_p1), [#allocation7], 16448  }
  0x66   : > { %9928 = vsyncadd (%p64_p1), [#allocation7], 4294950848 }
  0x67   : > { %9930 = dma.done.wait (%p64_p1), [#allocation10], 640  }
  0x68   : > { %9932 = vsyncadd (%p64_p1), [#allocation10], 4294966656 }
  0x69   : > { %9934 = dma.done.wait (%p64_p1), [#allocation13], 2560  }
  0x6a   : > { %9936 = vsyncadd (%p64_p1), [#allocation13], 4294964736 }
  0x6b   : > { %9938 = dma.done.wait (%p64_p1), [#allocation16], 1280  }
  0x6c   : > { %9940 = vsyncadd (%p64_p1), [#allocation16], 4294966016 }
  0x6d   : > { %9942 = dma.done.wait (%p64_p1), [#allocation19], 2304  }
  0x6e   : > { %9944 = vsyncadd (%p64_p1), [#allocation19], 4294964992 }
  0x6f   : > { %9946 = dma.done.wait (%p64_p1), [#allocation22], 256  }
  0x70   : > { %9948 = vsyncadd (%p64_p1), [#allocation22], 4294967040  ;;  %v10368_v1 = vld [vmem:[%s692_s4] sm:$0xff]  ;;  %v10370_v2 = vld [vmem:[%s692_s4 + $0x8] sm:$0xff] }
  0x71   : > { %v10372_v3 = vld [vmem:[%s692_s4 + $0x10] sm:$0xff]  ;;  %v10374_v4 = vld [vmem:[%s692_s4 + $0x18] sm:$0xff]  ;;  %v10376_v5 = vld [vmem:[%s692_s4 + $0x20] sm:$0xff] }
  0x72   : > { %v10378_v6 = vld [vmem:[%s692_s4 + $0x28] sm:$0xff]  ;;  %v10380_v7 = vld [vmem:[%s692_s4 + $0x30] sm:$0xff]  ;;  %v10382_v8 = vld [vmem:[%s692_s4 + $0x38] sm:$0xff] }
  0x73   : > { %s9986_s3 = smov 33   ;;  %s9987_s30 = smov 32   ;;  %v826_v12 = vlaneseq }
  0x74   : > { %818 = vrot.lane.b32.xlu2 %v10376_v5, %s9986_s3  ;;  %814 = vrot.lane.b32.xlu1 %v10372_v3, %s9986_s3  ;;  %s9988_s28 = smov 31   ;;  %s9989_s17 = smov 30  }
  0x75   : > { %810 = vrot.lane.b32.xlu0 %v10368_v1, %s9986_s3  ;;  %s9990_s8 = smov 1   ;;  %s9991_s2 = smov 63   ;;  %v10443_v15 = vand.u32 127, %v826_v12 }
  0x76   : > { %s9992_s11 = smov 62   ;;  %s12059_s24 = sld [smem:[#allocation40_spill]] }
  0x77   : > { %vm828_vm0 = vcmp.lt.s32.totalorder %v10443_v15, 33  ;;  %s9993_s4 = smov 65   ;;  %vm881_vm1 = vcmp.lt.s32.totalorder %v10443_v15, 32  ;;  %s9995_s7 = smov 95   ;;  %vm951_vm2 = vcmp.lt.s32.totalorder %v10443_v15, 31  ;;  %vm1005_vm3 = vcmp.lt.s32.totalorder %v10443_v15, 30 }
  0x78   : > { %vm1075_vm4 = vcmp.lt.s32.totalorder %v10443_v15, 1  ;;  %s10000_s27 = smov 126   ;;  %vm1641_vm5 = vcmp.lt.s32.totalorder %v10443_v15, 63  ;;  %vm1695_vm6 = vcmp.lt.s32.totalorder %v10443_v15, 62  ;;  %vm1517_vm7 = vcmp.lt.s32.totalorder %v10443_v15, 65 }
  0x79   : > { %vm1571_vm8 = vcmp.lt.s32.totalorder %v10443_v15, 64  ;;  %vm1393_vm9 = vcmp.lt.s32.totalorder %v10443_v15, 95  ;;  %vm1447_vm10 = vcmp.lt.s32.totalorder %v10443_v15, 94  ;;  %vm1269_vm11 = vcmp.lt.s32.totalorder %v10443_v15, 97 }
  0x7a   : > { %vm1323_vm12 = vcmp.lt.s32.totalorder %v10443_v15, 96  ;;  %vm1145_vm13 = vcmp.lt.s32.totalorder %v10443_v15, 127  ;;  %vm1199_vm14 = vcmp.lt.s32.totalorder %v10443_v15, 126 }
  0x7c   : > { %820 = vrot.lane.b32.xlu2 %v10378_v6, %s9986_s3  ;;  %816 = vrot.lane.b32.xlu1 %v10374_v4, %s9986_s3  ;;  %v837_v13 = vld [vmem:[%s12059_s24] ss:$8 sm:$0xf]  ;;  %v6700_v37 = vld [vmem:[%s12059_s24 + $0x1] ss:$8 sm:$0xf] }
  0x7d   : > { %812 = vrot.lane.b32.xlu0 %v10370_v2, %s9986_s3  ;;  %v838_v14 = vld [vmem:[%s12059_s24] ss:$8 sm:$0xf0]  ;;  %v6701_v40 = vld [vmem:[%s12059_s24 + $0x1] ss:$8 sm:$0xf0] }
  0x7e   : > { %v839_v19 = vor.u32 %v838_v14, %v837_v13  ;;  %v10482_v48 = vor.u32 %v6701_v40, %v6700_v37  ;;  %v6702_v12 = vld [vmem:[%s12059_s24 + $0x2] ss:$8 sm:$0xf] }
  0x80   : > { %v846_v20 = vperm.slane %v839_v19, 5  ;;  %v844_v21 = vperm.slane %v839_v19, 3  ;;  %v845_v22 = vperm.slane %v839_v19, 4  ;;  %v843_v24 = vperm.slane %v839_v19, 2 }
  0x81   : > { %v842_v38 = vperm.slane %v839_v19, 1  ;;  %v841_v39 = vperm.slane %v839_v19, 0  ;;  %v847_v42 = vperm.slane %v839_v19, 6  ;;  %v848_v43 = vperm.slane %v839_v19, 7 }
  0x82   : > { %v898_v57 = vperm.slane %v10482_v48, 3  ;;  %v897_v58 = vperm.slane %v10482_v48, 2  ;;  %v899_v13 = vperm.slane %v10482_v48, 4  ;;  %v900_v14 = vperm.slane %v10482_v48, 5 }
  0x84   : > { %865 = vrot.lane.b32.xlu2 %v10368_v1, %s9987_s30  ;;  %824 = vrot.lane.b32.xlu1 %v10382_v8, %s9986_s3 }
  0x85   : > { %822 = vrot.lane.b32.xlu0 %v10380_v7, %s9986_s3  ;;  %s9998_s3 = smov 96  }
  0x8c   : > { %871 = vrot.lane.b32.xlu2 %v10374_v4, %s9987_s30  ;;  %869 = vrot.lane.b32.xlu1 %v10372_v3, %s9987_s30 }
  0x8d   : > { %867 = vrot.lane.b32.xlu0 %v10370_v2, %s9987_s30 }
  0x94   : > { %877 = vrot.lane.b32.xlu2 %v10380_v7, %s9987_s30  ;;  %875 = vrot.lane.b32.xlu1 %v10378_v6, %s9987_s30 }
  0x95   : > { %873 = vrot.lane.b32.xlu0 %v10376_v5, %s9987_s30 }
  0x9c   : > { %937 = vrot.lane.b32.xlu2 %v10370_v2, %s9988_s28  ;;  %935 = vrot.lane.b32.xlu1 %v10368_v1, %s9988_s28 }
  0x9d   : > { %879 = vrot.lane.b32.xlu0 %v10382_v8, %s9987_s30  ;;  %s12026_s30 = smov 94  }
  0xa4   : > { %943 = vrot.lane.b32.xlu2 %v10376_v5, %s9988_s28  ;;  %941 = vrot.lane.b32.xlu1 %v10374_v4, %s9988_s28 }
  0xa5   : > { %939 = vrot.lane.b32.xlu0 %v10372_v3, %s9988_s28 }
  0xac   : > { %949 = vrot.lane.b32.xlu2 %v10382_v8, %s9988_s28  ;;  %947 = vrot.lane.b32.xlu1 %v10380_v7, %s9988_s28 }
  0xad   : > { %945 = vrot.lane.b32.xlu0 %v10378_v6, %s9988_s28  ;;  %s9994_s28 = smov 64  }
  0xb4   : > { %993 = vrot.lane.b32.xlu2 %v10372_v3, %s9989_s17  ;;  %991 = vrot.lane.b32.xlu1 %v10370_v2, %s9989_s17 }
  0xb5   : > { %989 = vrot.lane.b32.xlu0 %v10368_v1, %s9989_s17 }
  0xbc   : > { %999 = vrot.lane.b32.xlu2 %v10378_v6, %s9989_s17  ;;  %997 = vrot.lane.b32.xlu1 %v10376_v5, %s9989_s17 }
  0xbd   : > { %995 = vrot.lane.b32.xlu0 %v10374_v4, %s9989_s17 }
  0xc4   : > { %1059 = vrot.lane.b32.xlu2 %v10368_v1, %s9990_s8  ;;  %1003 = vrot.lane.b32.xlu1 %v10382_v8, %s9989_s17 }
  0xc5   : > { %1001 = vrot.lane.b32.xlu0 %v10380_v7, %s9989_s17  ;;  %s9997_s17 = smov 97  }
  0xcc   : > { %1065 = vrot.lane.b32.xlu2 %v10374_v4, %s9990_s8  ;;  %1063 = vrot.lane.b32.xlu1 %v10372_v3, %s9990_s8 }
  0xcd   : > { %1061 = vrot.lane.b32.xlu0 %v10370_v2, %s9990_s8 }
  0xce   : > { %v819_v9 = vpop.permute.xlu2 %818 }
  0xd4   : > { %1071 = vrot.lane.b32.xlu2 %v10380_v7, %s9990_s8  ;;  %1069 = vrot.lane.b32.xlu1 %v10378_v6, %s9990_s8 }
  0xd5   : > { %1067 = vrot.lane.b32.xlu0 %v10376_v5, %s9990_s8 }
  0xd6   : > { %v821_v10 = vpop.permute.xlu2 %820 }
  0xd7   : > { %v831_v23 = vsel %vm828_vm0, %v819_v9, %v821_v10 }
  0xd8   : > { %v862_v30 = vmul.f32 %v846_v20, %v831_v23 }
  0xdc   : > { %1631 = vrot.lane.b32.xlu2 %v10374_v4, %s9991_s2  ;;  %1629 = vrot.lane.b32.xlu1 %v10372_v3, %s9991_s2 }
  0xdd   : > { %1073 = vrot.lane.b32.xlu0 %v10382_v8, %s9990_s8  ;;  %s9999_s8 = smov 127  }
  0xde   : > { %v10429_v11 = vpop.permute.xlu2 %865 }
  0xe4   : > { %1685 = vrot.lane.b32.xlu2 %v10374_v4, %s9992_s11  ;;  %1683 = vrot.lane.b32.xlu1 %v10372_v3, %s9992_s11 }
  0xe5   : > { %1633 = vrot.lane.b32.xlu0 %v10376_v5, %s9991_s2 }
  0xe6   : > { %v10445_v16 = vpop.permute.xlu2 %871  ;;  %v815_v17 = vpop.permute.xlu1 %814 }
  0xe7   : > { %v811_v18 = vpop.permute.xlu0 %810 }
  0xec   : > { %1507 = vrot.lane.b32.xlu2 %v10374_v4, %s9993_s4  ;;  %1505 = vrot.lane.b32.xlu1 %v10372_v3, %s9993_s4 }
  0xed   : > { %1687 = vrot.lane.b32.xlu0 %v10376_v5, %s9992_s11 }
  0xee   : > { %v10456_v25 = vpop.permute.xlu2 %877  ;;  %v817_v26 = vpop.permute.xlu1 %816 }
  0xef   : > { %v832_v27 = vsel %vm828_vm0, %v817_v26, %v819_v9  ;;  %v833_v28 = vsel %vm828_vm0, %v815_v17, %v817_v26  ;;  %v813_v29 = vpop.permute.xlu0 %812 }
  0xf0   : > { %v860_v31 = vmul.f32 %v844_v21, %v833_v28  ;;  %v861_v32 = vmul.f32 %v845_v22, %v832_v27  ;;  %v834_v33 = vsel %vm828_vm0, %v813_v29, %v815_v17  ;;  %v835_v41 = vsel %vm828_vm0, %v811_v18, %v813_v29  ;;  %v6703_v17 = vld [vmem:[%s12059_s24 + $0x2] ss:$8 sm:$0xf0] }
  0xf1   : > { %v859_v34 = vmul.f32 %v843_v24, %v834_v33  ;;  %v858_v49 = vmul.f32 %v842_v38, %v835_v41  ;;  %v10525_v23 = vor.u32 %v6703_v17, %v6702_v12 }
  0xf2   : > { %v921_v35 = vpack.c.bf16 %v862_v30, %v861_v32  ;;  %v901_v30 = vperm.slane %v10482_v48, 6  ;;  %v902_v32 = vperm.slane %v10482_v48, 7 }
  0xf3   : > { %v920_v36 = vpack.c.bf16 %v860_v31, %v859_v34  ;;  %v965_v28 = vperm.slane %v10525_v23, 0  ;;  %v966_v29 = vperm.slane %v10525_v23, 1  ;;  %v895_v31 = vperm.slane %v10482_v48, 0 }
  0xf4   : > { %929 = vst [vmem:[#allocation24 + $0x10] sm:$0xff] %v921_v35  ;;  %1561 = vrot.lane.b32.xlu2 %v10374_v4, %s9994_s28  ;;  %1559 = vrot.lane.b32.xlu1 %v10372_v3, %s9994_s28 }
  0xf5   : > { %928 = vst [vmem:[#allocation24 + $0x8] sm:$0xff] %v920_v36  ;;  %1509 = vrot.lane.b32.xlu0 %v10376_v5, %s9993_s4 }
  0xf6   : > { %v10478_v44 = vpop.permute.xlu2 %937  ;;  %v825_v45 = vpop.permute.xlu1 %824 }
  0xf7   : > { %v836_v46 = vsel %vm828_vm0, %v825_v45, %v811_v18  ;;  %v823_v47 = vpop.permute.xlu0 %822 }
  0xf8   : > { %v857_v50 = vmul.f32 %v841_v39, %v836_v46  ;;  %v829_v51 = vsel %vm828_vm0, %v823_v47, %v825_v45  ;;  %v830_v52 = vsel %vm828_vm0, %v821_v10, %v823_v47 }
  0xf9   : > { %v863_v53 = vmul.f32 %v847_v42, %v830_v52  ;;  %v864_v54 = vmul.f32 %v848_v43, %v829_v51 }
  0xfa   : > { %v919_v55 = vpack.c.bf16 %v858_v49, %v857_v50 }
  0xfb   : > { %v922_v56 = vpack.c.bf16 %v864_v54, %v863_v53 }
  0xfc   : > { %927 = vst [vmem:[#allocation24] sm:$0xff] %v919_v55  ;;  %1627 = vrot.lane.b32.xlu2 %v10370_v2, %s9991_s2  ;;  %1625 = vrot.lane.b32.xlu1 %v10368_v1, %s9991_s2 }
  0xfd   : > { %930 = vst [vmem:[#allocation24 + $0x18] sm:$0xff] %v922_v56  ;;  %1563 = vrot.lane.b32.xlu0 %v10376_v5, %s9994_s28 }
  0xfe   : > { %v10497_v59 = vpop.permute.xlu2 %943  ;;  %v870_v60 = vpop.permute.xlu1 %869 }
  0xff   : > { %v886_v61 = vsel %vm881_vm1, %v870_v60, %v10445_v16  ;;  %v868_v62 = vpop.permute.xlu0 %867 }
 0x100   : > { %v914_v63 = vmul.f32 %v898_v57, %v886_v61  ;;  %v887_v0 = vsel %vm881_vm1, %v868_v62, %v870_v60  ;;  %v888_v33 = vsel %vm881_vm1, %v10429_v11, %v868_v62  ;;  %v972_v61 = vperm.slane %v10525_v23, 7 }
 0x101   : > { %v913_v9 = vmul.f32 %v897_v58, %v887_v0  ;;  %v969_v62 = vperm.slane %v10525_v23, 4 }
 0x103   : > { %v924_v10 = vpack.c.bf16 %v914_v63, %v913_v9  ;;  %v970_v63 = vperm.slane %v10525_v23, 5 }
 0x104   : > { %1381 = vrot.lane.b32.xlu2 %v10372_v3, %s9995_s7  ;;  %1681 = vrot.lane.b32.xlu1 %v10370_v2, %s9992_s11 }
 0x105   : > { %932 = vst [vmem:[#allocation24 + $0x28] sm:$0xff] %v924_v10  ;;  %1679 = vrot.lane.b32.xlu0 %v10368_v1, %s9992_s11 }
 0x106   : > { %v10518_v18 = vpop.permute.xlu2 %949  ;;  %v876_v19 = vpop.permute.xlu1 %875 }
 0x107   : > { %v874_v20 = vpop.permute.xlu0 %873  ;;  %v883_v34 = vsel %vm881_vm1, %v876_v19, %v10456_v25 }
 0x108   : > { %v884_v21 = vsel %vm881_vm1, %v874_v20, %v876_v19  ;;  %v885_v22 = vsel %vm881_vm1, %v10445_v16, %v874_v20  ;;  %v896_v16 = vperm.slane %v10482_v48, 1  ;;  %v917_v46 = vmul.f32 %v901_v30, %v883_v34 }
 0x109   : > { %v915_v24 = vmul.f32 %v899_v13, %v885_v22  ;;  %v916_v26 = vmul.f32 %v900_v14, %v884_v21  ;;  %v1119_v34 = vpack.c.bf16 %v10378_v6, %v10376_v5 }
 0x10a   : > { %v912_v45 = vmul.f32 %v896_v16, %v888_v33 }
 0x10b   : > { %v925_v27 = vpack.c.bf16 %v916_v26, %v915_v24  ;;  %v6704_v26 = vld [vmem:[%s12059_s24 + $0x3] ss:$8 sm:$0xf]  ;;  %1127 = vst [vmem:[#allocation24 + $0xb0] sm:$0xff] %v1119_v34 }
 0x10c   : > { %1435 = vrot.lane.b32.xlu2 %v10372_v3, %s12026_s30  ;;  %1385 = vrot.lane.b32.xlu1 %v10376_v5, %s9995_s7 }
 0x10d   : > { %933 = vst [vmem:[#allocation24 + $0x30] sm:$0xff] %v925_v27  ;;  %1383 = vrot.lane.b32.xlu0 %v10374_v4, %s9995_s7 }
 0x10e   : > { %v10546_v35 = vpop.permute.xlu2 %993  ;;  %v936_v36 = vpop.permute.xlu1 %935 }
 0x10f   : > { %v958_v37 = vsel %vm951_vm2, %v936_v36, %v10478_v44  ;;  %v959_v38 = vsel %vm951_vm2, %v10518_v18, %v936_v36  ;;  %v880_v39 = vpop.permute.xlu0 %879 }
 0x110   : > { %v981_v40 = vmul.f32 %v965_v28, %v959_v38  ;;  %v982_v41 = vmul.f32 %v966_v29, %v958_v37  ;;  %v882_v42 = vsel %vm881_vm1, %v10456_v25, %v880_v39  ;;  %v889_v43 = vsel %vm881_vm1, %v880_v39, %v10429_v11  ;;  %v6705_v28 = vld [vmem:[%s12059_s24 + $0x3] ss:$8 sm:$0xf0] }
 0x111   : > { %v911_v47 = vmul.f32 %v895_v31, %v889_v43  ;;  %v918_v48 = vmul.f32 %v902_v32, %v882_v42  ;;  %v967_v11 = vperm.slane %v10525_v23, 2  ;;  %v968_v25 = vperm.slane %v10525_v23, 3 }
 0x112   : > { %v1043_v49 = vpack.c.bf16 %v982_v41, %v981_v40  ;;  %v1017_v16 = vor.u32 %v6705_v28, %v6704_v26 }
 0x113   : > { %v923_v50 = vpack.c.bf16 %v912_v45, %v911_v47  ;;  %v926_v51 = vpack.c.bf16 %v918_v48, %v917_v46 }
 0x114   : > { %1051 = vst [vmem:[#allocation24 + $0x40] sm:$0xff] %v1043_v49  ;;  %1501 = vrot.lane.b32.xlu2 %v10368_v1, %s9993_s4  ;;  %1439 = vrot.lane.b32.xlu1 %v10376_v5, %s12026_s30  ;;  %v1024_v30 = vperm.slane %v1017_v16, 5  ;;  %v1021_v31 = vperm.slane %v1017_v16, 2  ;;  %v1022_v32 = vperm.slane %v1017_v16, 3  ;;  %v1023_v33 = vperm.slane %v1017_v16, 4 }
 0x115   : > { %931 = vst [vmem:[#allocation24 + $0x20] sm:$0xff] %v923_v50  ;;  %1437 = vrot.lane.b32.xlu0 %v10374_v4, %s12026_s30  ;;  %v1020_v48 = vperm.slane %v1017_v16, 1 }
 0x116   : > { %934 = vst [vmem:[#allocation24 + $0x38] sm:$0xff] %v926_v51  ;;  %v10568_v52 = vpop.permute.xlu2 %999  ;;  %v942_v53 = vpop.permute.xlu1 %941  ;;  %v1019_v51 = vperm.slane %v1017_v16, 0 }
 0x117   : > { %v940_v54 = vpop.permute.xlu0 %939  ;;  %v955_v0 = vsel %vm951_vm2, %v942_v53, %v10497_v59 }
 0x118   : > { %v956_v55 = vsel %vm951_vm2, %v940_v54, %v942_v53  ;;  %v957_v56 = vsel %vm951_vm2, %v10478_v44, %v940_v54  ;;  %v971_v44 = vperm.slane %v10525_v23, 6  ;;  %v985_v20 = vmul.f32 %v969_v62, %v955_v0 }
 0x119   : > { %v983_v57 = vmul.f32 %v967_v11, %v957_v56  ;;  %v984_v58 = vmul.f32 %v968_v25, %v956_v55  ;;  %v6706_v11 = vld [vmem:[%s12059_s24 + $0x4] ss:$8 sm:$0xf]  ;;  %v1117_v25 = vpack.c.bf16 %v10370_v2, %v10368_v1  ;;  %v1120_v53 = vpack.c.bf16 %v10382_v8, %v10380_v7 }
 0x11a   : > { %v1025_v55 = vperm.slane %v1017_v16, 6  ;;  %v1026_v56 = vperm.slane %v1017_v16, 7 }
 0x11b   : > { %v1044_v60 = vpack.c.bf16 %v984_v58, %v983_v57  ;;  %1125 = vst [vmem:[#allocation24 + $0xa0] sm:$0xff] %v1117_v25 }
 0x11c   : > { %1557 = vrot.lane.b32.xlu2 %v10370_v2, %s9994_s28  ;;  %1555 = vrot.lane.b32.xlu1 %v10368_v1, %s9994_s28  ;;  %1128 = vst [vmem:[#allocation24 + $0xb8] sm:$0xff] %v1120_v53 }
 0x11d   : > { %1052 = vst [vmem:[#allocation24 + $0x48] sm:$0xff] %v1044_v60  ;;  %1503 = vrot.lane.b32.xlu0 %v10370_v2, %s9993_s4 }
 0x11e   : > { %v10588_v9 = vpop.permute.xlu2 %1059  ;;  %v948_v10 = vpop.permute.xlu1 %947 }
 0x11f   : > { %v952_v12 = vsel %vm951_vm2, %v948_v10, %v10518_v18  ;;  %v946_v13 = vpop.permute.xlu0 %945  ;;  %v1118_v18 = vpack.c.bf16 %v10374_v4, %v10372_v3 }
 0x120   : > { %v988_v14 = vmul.f32 %v972_v61, %v952_v12  ;;  %v953_v17 = vsel %vm951_vm2, %v946_v13, %v948_v10  ;;  %v954_v19 = vsel %vm951_vm2, %v10497_v59, %v946_v13 }
 0x121   : > { %v986_v21 = vmul.f32 %v970_v63, %v954_v19  ;;  %v987_v22 = vmul.f32 %v971_v44, %v953_v17  ;;  %1126 = vst [vmem:[#allocation24 + $0xa8] sm:$0xff] %v1118_v18 }
 0x123   : > { %v1045_v23 = vpack.c.bf16 %v986_v21, %v985_v20  ;;  %v1046_v24 = vpack.c.bf16 %v988_v14, %v987_v22 }
 0x124   : > { %1261 = vrot.lane.b32.xlu2 %v10376_v5, %s9997_s17  ;;  %1259 = vrot.lane.b32.xlu1 %v10374_v4, %s9997_s17 }
 0x125   : > { %1053 = vst [vmem:[#allocation24 + $0x50] sm:$0xff] %v1045_v23  ;;  %1257 = vrot.lane.b32.xlu0 %v10372_v3, %s9997_s17 }
 0x126   : > { %1054 = vst [vmem:[#allocation24 + $0x58] sm:$0xff] %v1046_v24  ;;  %v10606_v59 = vpop.permute.xlu2 %1065  ;;  %v992_v27 = vpop.permute.xlu1 %991 }
 0x127   : > { %v990_v29 = vpop.permute.xlu0 %989  ;;  %v1011_v36 = vsel %vm1005_vm3, %v992_v27, %v10546_v35 }
 0x128   : > { %v1037_v45 = vmul.f32 %v1021_v31, %v1011_v36  ;;  %v1012_v54 = vsel %vm1005_vm3, %v990_v29, %v992_v27 }
 0x129   : > { %v1036_v63 = vmul.f32 %v1020_v48, %v1012_v54 }
 0x12c   : > { %1315 = vrot.lane.b32.xlu2 %v10376_v5, %s9998_s3  ;;  %1313 = vrot.lane.b32.xlu1 %v10374_v4, %s9998_s3 }
 0x12d   : > { %1311 = vrot.lane.b32.xlu0 %v10372_v3, %s9998_s3 }
 0x12e   : > { %v10626_v37 = vpop.permute.xlu2 %1071  ;;  %v998_v38 = vpop.permute.xlu1 %997 }
 0x12f   : > { %v1008_v39 = vsel %vm1005_vm3, %v998_v38, %v10568_v52  ;;  %v996_v40 = vpop.permute.xlu0 %995 }
 0x130   : > { %v1040_v41 = vmul.f32 %v1024_v30, %v1008_v39  ;;  %v1009_v42 = vsel %vm1005_vm3, %v996_v40, %v998_v38  ;;  %v1010_v43 = vsel %vm1005_vm3, %v10546_v35, %v996_v40  ;;  %v6707_v35 = vld [vmem:[%s12059_s24 + $0x4] ss:$8 sm:$0xf0]  ;;  %v6724_v39 = vld [vmem:[%s12059_s24 + $0x46] ss:$8 sm:$0xf] }
 0x131   : > { %v1038_v46 = vmul.f32 %v1022_v32, %v1010_v43  ;;  %v1039_v47 = vmul.f32 %v1023_v33, %v1009_v42  ;;  %v10658_v62 = vor.u32 %v6707_v35, %v6706_v11 }
 0x133   : > { %v1048_v49 = vpack.c.bf16 %v1038_v46, %v1037_v45  ;;  %v1049_v50 = vpack.c.bf16 %v1040_v41, %v1039_v47  ;;  %v1092_v19 = vperm.slane %v10658_v62, 3  ;;  %v1093_v28 = vperm.slane %v10658_v62, 4 }
 0x134   : > { %1431 = vrot.lane.b32.xlu2 %v10368_v1, %s12026_s30  ;;  %1379 = vrot.lane.b32.xlu1 %v10370_v2, %s9995_s7  ;;  %v1090_v36 = vperm.slane %v10658_v62, 1  ;;  %v1095_v38 = vperm.slane %v10658_v62, 6  ;;  %v1089_v40 = vperm.slane %v10658_v62, 0  ;;  %v1096_v41 = vperm.slane %v10658_v62, 7 }
 0x135   : > { %1056 = vst [vmem:[#allocation24 + $0x68] sm:$0xff] %v1048_v49  ;;  %1377 = vrot.lane.b32.xlu0 %v10368_v1, %s9995_s7 }
 0x136   : > { %1057 = vst [vmem:[#allocation24 + $0x70] sm:$0xff] %v1049_v50  ;;  %v10654_v57 = vpop.permute.xlu2 %1631  ;;  %v1004_v58 = vpop.permute.xlu1 %1003 }
 0x137   : > { %v1013_v60 = vsel %vm1005_vm3, %v1004_v58, %v990_v29  ;;  %v1002_v61 = vpop.permute.xlu0 %1001  ;;  %v1094_v29 = vperm.slane %v10658_v62, 5 }
 0x138   : > { %v1035_v44 = vmul.f32 %v1019_v51, %v1013_v60  ;;  %v1006_v0 = vsel %vm1005_vm3, %v1002_v61, %v1004_v58  ;;  %v1007_v10 = vsel %vm1005_vm3, %v10568_v52, %v1002_v61  ;;  %v1091_v52 = vperm.slane %v10658_v62, 2  ;;  %v6727_v58 = vld [vmem:[%s12059_s24 + $0x47] ss:$8 sm:$0xf0] }
 0x139   : > { %v1041_v12 = vmul.f32 %v1025_v55, %v1007_v10  ;;  %v1042_v13 = vmul.f32 %v1026_v56, %v1006_v0 }
 0x13a   : > { %v1047_v14 = vpack.c.bf16 %v1036_v63, %v1035_v44 }
 0x13b   : > { %v1050_v17 = vpack.c.bf16 %v1042_v13, %v1041_v12 }
 0x13c   : > { %1055 = vst [vmem:[#allocation24 + $0x60] sm:$0xff] %v1047_v14  ;;  %1135 = vrot.lane.b32.xlu2 %v10374_v4, %s9999_s8  ;;  %1133 = vrot.lane.b32.xlu1 %v10372_v3, %s9999_s8 }
 0x13d   : > { %1058 = vst [vmem:[#allocation24 + $0x78] sm:$0xff] %v1050_v17  ;;  %1433 = vrot.lane.b32.xlu0 %v10370_v2, %s12026_s30  ;;  %v6720_v17 = vld [vmem:[%s12059_s24 + $0x44] ss:$8 sm:$0xf]  ;;  %s12061_s30 = sld [smem:[#allocation39_spill]] }
 0x13e   : > { %v10674_v20 = vpop.permute.xlu2 %1685  ;;  %v1064_v21 = vpop.permute.xlu1 %1063 }
 0x13f   : > { %v1080_v22 = vsel %vm1075_vm4, %v1064_v21, %v10606_v59  ;;  %v1062_v23 = vpop.permute.xlu0 %1061 }
 0x140   : > { %v1108_v24 = vmul.f32 %v1092_v19, %v1080_v22  ;;  %v1081_v18 = vsel %vm1075_vm4, %v1062_v23, %v1064_v21  ;;  %v1082_v42 = vsel %vm1075_vm4, %v10588_v9, %v1062_v23  ;;  %v6721_v19 = vld [vmem:[%s12059_s24 + $0x44] ss:$8 sm:$0xf0] }
 0x141   : > { %v1107_v26 = vmul.f32 %v1091_v52, %v1081_v18  ;;  %v1106_v50 = vmul.f32 %v1090_v36, %v1082_v42 }
 0x143   : > { %v1114_v27 = vpack.c.bf16 %v1108_v24, %v1107_v26  ;;  %v10790_v24 = vor.u32 %v6721_v19, %v6720_v17 }
 0x144   : > { %1189 = vrot.lane.b32.xlu2 %v10374_v4, %s10000_s27  ;;  %1187 = vrot.lane.b32.xlu1 %v10372_v3, %s10000_s27 }
 0x145   : > { %1122 = vst [vmem:[#allocation24 + $0x88] sm:$0xff] %v1114_v27  ;;  %1137 = vrot.lane.b32.xlu0 %v10376_v5, %s9999_s8  ;;  %v6722_v27 = vld [vmem:[%s12059_s24 + $0x45] ss:$8 sm:$0xf] }
 0x146   : > { %v10689_v16 = vpop.permute.xlu2 %1507  ;;  %v1070_v30 = vpop.permute.xlu1 %1069 }
 0x147   : > { %v1068_v31 = vpop.permute.xlu0 %1067  ;;  %v1077_v43 = vsel %vm1075_vm4, %v1070_v30, %v10626_v37 }
 0x148   : > { %v1078_v32 = vsel %vm1075_vm4, %v1068_v31, %v1070_v30  ;;  %v1079_v4 = vsel %vm1075_vm4, %v10606_v59, %v1068_v31  ;;  %v6725_v59 = vld [vmem:[%s12059_s24 + $0x46] ss:$8 sm:$0xf0]  ;;  %v1111_v51 = vmul.f32 %v1095_v38, %v1077_v43 }
 0x149   : > { %v1109_v3 = vmul.f32 %v1093_v28, %v1079_v4  ;;  %v1110_v33 = vmul.f32 %v1094_v29, %v1078_v32  ;;  %v10722_v47 = vor.u32 %v6725_v59, %v6724_v39  ;;  %v1533_v28 = vperm.slane %v10790_v24, 2 }
 0x14a   : > { %v1534_v29 = vperm.slane %v10790_v24, 3 }
 0x14b   : > { %v1115_v34 = vpack.c.bf16 %v1110_v33, %v1109_v3  ;;  %v1658_v54 = vperm.slane %v10722_v47, 3  ;;  %v1656_v38 = vperm.slane %v10722_v47, 1 }
 0x14c   : > { %1639 = vrot.lane.b32.xlu2 %v10382_v8, %s9991_s2  ;;  %1637 = vrot.lane.b32.xlu1 %v10380_v7, %s9991_s2 }
 0x14d   : > { %1123 = vst [vmem:[#allocation24 + $0x90] sm:$0xff] %v1115_v34  ;;  %1191 = vrot.lane.b32.xlu0 %v10376_v5, %s10000_s27 }
 0x14e   : > { %v10718_v45 = vpop.permute.xlu2 %1561  ;;  %v10720_v46 = vpop.permute.xlu1 %1629 }
 0x14f   : > { %v1074_v5 = vpop.permute.xlu0 %1073  ;;  %v1646_v55 = vsel %vm1641_vm5, %v10720_v46, %v10654_v57 }
 0x150   : > { %v1076_v48 = vsel %vm1075_vm4, %v10626_v37, %v1074_v5  ;;  %v1083_v49 = vsel %vm1075_vm4, %v1074_v5, %v10588_v9  ;;  %v1657_v37 = vperm.slane %v10722_v47, 2  ;;  %v6726_v9 = vld [vmem:[%s12059_s24 + $0x47] ss:$8 sm:$0xf] }
 0x151   : > { %v1105_v11 = vmul.f32 %v1089_v40, %v1083_v49  ;;  %v1112_v35 = vmul.f32 %v1096_v41, %v1076_v48  ;;  %v10759_v44 = vor.u32 %v6727_v58, %v6726_v9  ;;  %v1655_v40 = vperm.slane %v10722_v47, 0 }
 0x152   : > { %v1673_v63 = vmul.f32 %v1657_v37, %v1646_v55 }
 0x153   : > { %v1113_v25 = vpack.c.bf16 %v1106_v50, %v1105_v11  ;;  %v1116_v53 = vpack.c.bf16 %v1112_v35, %v1111_v51  ;;  %v1711_v12 = vperm.slane %v10759_v44, 2 }
 0x154   : > { %1253 = vrot.lane.b32.xlu2 %v10368_v1, %s9997_s17  ;;  %1693 = vrot.lane.b32.xlu1 %v10382_v8, %s9992_s11 }
 0x155   : > { %1121 = vst [vmem:[#allocation24 + $0x80] sm:$0xff] %v1113_v25  ;;  %1691 = vrot.lane.b32.xlu0 %v10380_v7, %s9992_s11 }
 0x156   : > { %1124 = vst [vmem:[#allocation24 + $0x98] sm:$0xff] %v1116_v53  ;;  %v10746_v56 = vpop.permute.xlu2 %1627  ;;  %v10751_v60 = vpop.permute.xlu1 %1683 }
 0x157   : > { %v10753_v61 = vpop.permute.xlu0 %1633  ;;  %v1700_v13 = vsel %vm1695_vm6, %v10751_v60, %v10674_v20  ;;  %v1647_v5 = vsel %vm1641_vm5, %v10746_v56, %v10720_v46 }
 0x158   : > { %v1645_v62 = vsel %vm1641_vm5, %v10654_v57, %v10753_v61  ;;  %v1712_v57 = vperm.slane %v10759_v44, 3  ;;  %v1727_v23 = vmul.f32 %v1711_v12, %v1700_v13  ;;  %v1672_v53 = vmul.f32 %v1656_v38, %v1647_v5  ;;  %v6717_v12 = vld [vmem:[%s12059_s24 + $0x42] ss:$8 sm:$0xf0] }
 0x159   : > { %v1674_v0 = vmul.f32 %v1658_v54, %v1645_v62 }
 0x15b   : > { %v1734_v10 = vpack.c.bf16 %v1674_v0, %v1673_v63  ;;  %v1709_v63 = vperm.slane %v10759_v44, 0 }
 0x15c   : > { %1309 = vrot.lane.b32.xlu2 %v10370_v2, %s9998_s3  ;;  %1307 = vrot.lane.b32.xlu1 %v10368_v1, %s9998_s3 }
 0x15d   : > { %1742 = vst [vmem:[#allocation24 + $0x1c8] sm:$0xff] %v1734_v10  ;;  %1255 = vrot.lane.b32.xlu0 %v10370_v2, %s9997_s17  ;;  %v6716_v10 = vld [vmem:[%s12059_s24 + $0x42] ss:$8 sm:$0xf] }
 0x15e   : > { %v10774_v14 = vpop.permute.xlu2 %1381  ;;  %v10782_v52 = vpop.permute.xlu1 %1505  ;;  %v10880_v19 = vor.u32 %v6717_v12, %v6716_v10  ;;  %v6712_v12 = vld [vmem:[%s12059_s24 + $0x40] ss:$8 sm:$0xf] }
 0x15f   : > { %v10784_v21 = vpop.permute.xlu0 %1687  ;;  %v1522_v30 = vsel %vm1517_vm7, %v10782_v52, %v10689_v16 }
 0x160   : > { %v1699_v22 = vsel %vm1695_vm6, %v10674_v20, %v10784_v21  ;;  %v6723_v20 = vld [vmem:[%s12059_s24 + $0x45] ss:$8 sm:$0xf0]  ;;  %v1549_v34 = vmul.f32 %v1533_v28, %v1522_v30  ;;  %v1409_v28 = vperm.slane %v10880_v19, 2 }
 0x161   : > { %v1728_v18 = vmul.f32 %v1712_v57, %v1699_v22  ;;  %v10815_v4 = vor.u32 %v6723_v20, %v6722_v27 }
 0x163   : > { %v1738_v26 = vpack.c.bf16 %v1728_v18, %v1727_v23  ;;  %v1587_v39 = vperm.slane %v10815_v4, 2  ;;  %v1588_v50 = vperm.slane %v10815_v4, 3  ;;  %v1585_v10 = vperm.slane %v10815_v4, 0 }
 0x164   : > { %1567 = vrot.lane.b32.xlu2 %v10380_v7, %s9994_s28  ;;  %1515 = vrot.lane.b32.xlu1 %v10382_v8, %s9993_s4  ;;  %v6962_v41 = vld [vmem:[#allocation24 + $0x1c8] sm:$0xf] }
 0x165   : > { %1746 = vst [vmem:[#allocation24 + $0x1e8] sm:$0xff] %v1738_v26  ;;  %1513 = vrot.lane.b32.xlu0 %v10380_v7, %s9993_s4 }
 0x166   : > { %v10811_v31 = vpop.permute.xlu2 %1435  ;;  %v10813_v32 = vpop.permute.xlu1 %1559 }
 0x167   : > { %v10817_v3 = vpop.permute.xlu0 %1509  ;;  %v1576_v51 = vsel %vm1571_vm8, %v10813_v32, %v10718_v45 }
 0x168   : > { %v1521_v33 = vsel %vm1517_vm7, %v10689_v16, %v10817_v3  ;;  %v8248_v16 = vld [vmem:[#allocation24 + $0x1cc] sm:$0xf]  ;;  %v1603_v54 = vmul.f32 %v1587_v39, %v1576_v51 }
 0x169   : > { %v1550_v36 = vmul.f32 %v1534_v29, %v1521_v33  ;;  %v1410_v29 = vperm.slane %v10880_v19, 3 }
 0x16b   : > { %v1610_v59 = vpack.c.bf16 %v1550_v36, %v1549_v34  ;;  %v6718_v34 = vld [vmem:[%s12059_s24 + $0x43] ss:$8 sm:$0xf] }
 0x16c   : > { %1131 = vrot.lane.b32.xlu2 %v10370_v2, %s9999_s8  ;;  %1129 = vrot.lane.b32.xlu1 %v10368_v1, %s9999_s8  ;;  %v8252_v42 = vld [vmem:[#allocation24 + $0x1e4] sm:$0xf0]  ;;  %v6964_v43 = vld [vmem:[#allocation24 + $0x1e8] sm:$0xf0] }
 0x16d   : > { %1618 = vst [vmem:[#allocation24 + $0x188] sm:$0xff] %v1610_v59  ;;  %1569 = vrot.lane.b32.xlu0 %v10382_v8, %s9994_s28  ;;  %v6963_v48 = vor.u32 %v8252_v42, %v6962_v41  ;;  %v6967_v49 = vor.u32 %v8248_v16, %v6964_v43  ;;  %v6719_v36 = vld [vmem:[%s12059_s24 + $0x43] ss:$8 sm:$0xf0] }
 0x16e   : > { %v10842_v11 = vpop.permute.xlu2 %1501  ;;  %v10844_v35 = vpop.permute.xlu1 %1625  ;;  %v10907_v42 = vor.u32 %v6719_v36, %v6718_v34 }
 0x16f   : > { %v1648_v46 = vsel %vm1641_vm5, %v10844_v35, %v10746_v56  ;;  %2160 = vmatpush.bf16.msra.mxu2 %v6963_v48  ;;  %2173 = vmatpush.bf16.msra.mxu3 %v6967_v49  ;;  %v10850_v25 = vpop.permute.xlu0 %1563  ;;  %v1710_v56 = vperm.slane %v10759_v44, 1 }
 0x170   : > { %v1671_v37 = vmul.f32 %v1655_v40, %v1648_v46  ;;  %v1575_v9 = vsel %vm1571_vm8, %v10718_v45, %v10850_v25  ;;  %v1463_v46 = vperm.slane %v10907_v42, 2 }
 0x171   : > { %v1604_v55 = vmul.f32 %v1588_v50, %v1575_v9 }
 0x172   : > { %v1733_v58 = vpack.c.bf16 %v1672_v53, %v1671_v37  ;;  %v1464_v53 = vperm.slane %v10907_v42, 3 }
 0x173   : > { %v1614_v62 = vpack.c.bf16 %v1604_v55, %v1603_v54 }
 0x174   : > { %1741 = vst [vmem:[#allocation24 + $0x1c0] sm:$0xff] %v1733_v58  ;;  %1635 = vrot.lane.b32.xlu2 %v10378_v6, %s9991_s2  ;;  %1185 = vrot.lane.b32.xlu1 %v10370_v2, %s10000_s27  ;;  %v6930_v23 = vld [vmem:[#allocation24 + $0x188] sm:$0xf]  ;;  %v8240_v18 = vld [vmem:[#allocation24 + $0x18c] sm:$0xf] }
 0x175   : > { %1622 = vst [vmem:[#allocation24 + $0x1a8] sm:$0xff] %v1614_v62  ;;  %1183 = vrot.lane.b32.xlu0 %v10368_v1, %s10000_s27 }
 0x176   : > { %v10864_v45 = vpop.permute.xlu2 %1557  ;;  %v1682_v0 = vpop.permute.xlu1 %1681 }
 0x177   : > { %v1701_v2 = vsel %vm1695_vm6, %v1682_v0, %v10751_v60  ;;  %v10875_v57 = vpop.permute.xlu0 %1679 }
 0x178   : > { %v1726_v1 = vmul.f32 %v1710_v56, %v1701_v2  ;;  %v1702_v13 = vsel %vm1695_vm6, %v10875_v57, %v1682_v0  ;;  %v6713_v2 = vld [vmem:[%s12059_s24 + $0x40] ss:$8 sm:$0xf0] }
 0x179   : > { %v1725_v17 = vmul.f32 %v1709_v63, %v1702_v13  ;;  %v1586_v63 = vperm.slane %v10815_v4, 1  ;;  %v1531_v13 = vperm.slane %v10790_v24, 0 }
 0x17b   : > { %v1737_v22 = vpack.c.bf16 %v1726_v1, %v1725_v17  ;;  %v6954_v43 = vld [vmem:[#allocation24 + $0x1c0] sm:$0xf]  ;;  %v8247_v48 = vld [vmem:[#allocation24 + $0x1c4] sm:$0xf]  ;;  %v1577_v1 = vsel %vm1571_vm8, %v10864_v45, %v10813_v32  ;;  %v1532_v17 = vperm.slane %v10790_v24, 1 }
 0x17c   : > { %1391 = vrot.lane.b32.xlu2 %v10382_v8, %s9995_s7  ;;  %1389 = vrot.lane.b32.xlu1 %v10380_v7, %s9995_s7  ;;  %v8244_v60 = vld [vmem:[#allocation24 + $0x1a4] sm:$0xf0]  ;;  %v6932_v26 = vld [vmem:[#allocation24 + $0x1a8] sm:$0xf0]  ;;  %v1602_v32 = vmul.f32 %v1586_v63, %v1577_v1 }
 0x17d   : > { %1745 = vst [vmem:[#allocation24 + $0x1e0] sm:$0xff] %v1737_v22  ;;  %1689 = vrot.lane.b32.xlu0 %v10378_v6, %s9992_s11  ;;  %v6931_v27 = vor.u32 %v8244_v60, %v6930_v23  ;;  %v6935_v20 = vor.u32 %v8240_v18, %v6932_v26  ;;  %s12060_s11 = smov 94   ;;  %v10956_v26 = vor.u32 %v6713_v2, %v6712_v12 }
 0x17e   : > { %v10891_v30 = vpop.permute.xlu2 %1261  ;;  %v10893_v33 = vpop.permute.xlu1 %1385 }
 0x17f   : > { %2161 = vmatpush.bf16.msra.mxu2 %v6931_v27  ;;  %2174 = vmatpush.bf16.msra.mxu3 %v6935_v20  ;;  %v1384_v38 = vpop.permute.xlu0 %1383 }
 0x180   : > { %v1397_v39 = vsel %vm1393_vm9, %v1384_v38, %v10893_v33  ;;  %v1398_v59 = vsel %vm1393_vm9, %v10774_v14, %v1384_v38 }
 0x181   : > { %v1425_v40 = vmul.f32 %v1409_v28, %v1398_v59  ;;  %v1426_v41 = vmul.f32 %v1410_v29, %v1397_v39  ;;  %v6714_v59 = vld [vmem:[%s12059_s24 + $0x41] ss:$8 sm:$0xf] }
 0x183   : > { %v1486_v16 = vpack.c.bf16 %v1426_v41, %v1425_v40 }
 0x184   : > { %1511 = vrot.lane.b32.xlu2 %v10378_v6, %s9993_s4  ;;  %1445 = vrot.lane.b32.xlu1 %v10382_v8, %s12060_s11  ;;  %v8251_v5 = vld [vmem:[#allocation24 + $0x1dc] sm:$0xf0]  ;;  %v6956_v49 = vld [vmem:[#allocation24 + $0x1e0] sm:$0xf0] }
 0x185   : > { %1494 = vst [vmem:[#allocation24 + $0x148] sm:$0xff] %v1486_v16  ;;  %1443 = vrot.lane.b32.xlu0 %v10380_v7, %s12060_s11  ;;  %v6955_v50 = vor.u32 %v8251_v5, %v6954_v43  ;;  %v6959_v51 = vor.u32 %v8247_v48, %v6956_v49  ;;  %v1285_v5 = vperm.slane %v10956_v26, 2  ;;  %v6715_v48 = vld [vmem:[%s12059_s24 + $0x41] ss:$8 sm:$0xf0] }
 0x186   : > { %v10918_v37 = vpop.permute.xlu2 %1315  ;;  %v10920_v9 = vpop.permute.xlu1 %1439 }
 0x187   : > { %2134 = vmatpush.bf16.msra.mxu0 %v6955_v50  ;;  %2147 = vmatpush.bf16.msra.mxu1 %v6959_v51  ;;  %v1438_v54 = vpop.permute.xlu0 %1437 }
 0x188   : > { %v1451_v55 = vsel %vm1447_vm10, %v1438_v54, %v10920_v9  ;;  %v1452_v58 = vsel %vm1447_vm10, %v10811_v31, %v1438_v54 }
 0x189   : > { %v1479_v62 = vmul.f32 %v1463_v46, %v1452_v58  ;;  %v1480_v56 = vmul.f32 %v1464_v53, %v1451_v55  ;;  %v10989_v55 = vor.u32 %v6715_v48, %v6714_v59 }
 0x18b   : > { %v1490_v0 = vpack.c.bf16 %v1480_v56, %v1479_v62 }
 0x18c   : > { %1267 = vrot.lane.b32.xlu2 %v10382_v8, %s9997_s17  ;;  %1265 = vrot.lane.b32.xlu1 %v10380_v7, %s9997_s17  ;;  %v8232_v39 = vld [vmem:[#allocation24 + $0x14c] sm:$0xf] }
 0x18d   : > { %1498 = vst [vmem:[#allocation24 + $0x168] sm:$0xff] %v1490_v0  ;;  %1565 = vrot.lane.b32.xlu0 %v10378_v6, %s9994_s28  ;;  %v1340_v0 = vperm.slane %v10989_v55, 3 }
 0x18e   : > { %v10948_v22 = vpop.permute.xlu2 %1431  ;;  %v10950_v23 = vpop.permute.xlu1 %1555 }
 0x18f   : > { %v1578_v60 = vsel %vm1571_vm8, %v10950_v23, %v10864_v45  ;;  %v1504_v18 = vpop.permute.xlu0 %1503  ;;  %v6898_v45 = vld [vmem:[#allocation24 + $0x148] sm:$0xf] }
 0x190   : > { %v1601_v27 = vmul.f32 %v1585_v10, %v1578_v60  ;;  %v1523_v20 = vsel %vm1517_vm7, %v1504_v18, %v10782_v52  ;;  %v1524_v28 = vsel %vm1517_vm7, %v10842_v11, %v1504_v18  ;;  %v1286_v52 = vperm.slane %v10956_v26, 3 }
 0x191   : > { %v1547_v29 = vmul.f32 %v1531_v13, %v1524_v28  ;;  %v1548_v34 = vmul.f32 %v1532_v17, %v1523_v20  ;;  %v1339_v13 = vperm.slane %v10989_v55, 2 }
 0x192   : > { %v1613_v36 = vpack.c.bf16 %v1602_v32, %v1601_v27 }
 0x193   : > { %v1609_v38 = vpack.c.bf16 %v1548_v34, %v1547_v29  ;;  %v1408_v34 = vperm.slane %v10880_v19, 1 }
 0x194   : > { %1621 = vst [vmem:[#allocation24 + $0x1a0] sm:$0xff] %v1613_v36  ;;  %1387 = vrot.lane.b32.xlu2 %v10378_v6, %s9995_s7  ;;  %1321 = vrot.lane.b32.xlu1 %v10382_v8, %s9998_s3  ;;  %v8236_v40 = vld [vmem:[#allocation24 + $0x164] sm:$0xf0]  ;;  %v6900_v41 = vld [vmem:[#allocation24 + $0x168] sm:$0xf0]  ;;  %v1407_v36 = vperm.slane %v10880_v19, 0 }
 0x195   : > { %1617 = vst [vmem:[#allocation24 + $0x180] sm:$0xff] %v1609_v38  ;;  %1319 = vrot.lane.b32.xlu0 %v10380_v7, %s9998_s3  ;;  %v6899_v16 = vor.u32 %v8236_v40, %v6898_v45  ;;  %v6903_v43 = vor.u32 %v8232_v39, %v6900_v41 }
 0x196   : > { %v10979_v49 = vpop.permute.xlu2 %1135  ;;  %v1260_v50 = vpop.permute.xlu1 %1259 }
 0x197   : > { %v1273_v51 = vsel %vm1269_vm11, %v1260_v50, %v10891_v30  ;;  %2162 = vmatpush.bf16.msra.mxu2 %v6899_v16  ;;  %2175 = vmatpush.bf16.msra.mxu3 %v6903_v43  ;;  %v10984_v46 = vpop.permute.xlu0 %1257 }
 0x198   : > { %v1302_v53 = vmul.f32 %v1286_v52, %v1273_v51  ;;  %v1274_v54 = vsel %vm1269_vm11, %v10984_v46, %v1260_v50  ;;  %v1461_v50 = vperm.slane %v10907_v42, 0  ;;  %v1462_v51 = vperm.slane %v10907_v42, 1 }
 0x199   : > { %v1301_v58 = vmul.f32 %v1285_v5, %v1274_v54  ;;  %v6708_v54 = vld [vmem:[%s12059_s24 + $0x6] ss:$8 sm:$0xf] }
 0x19b   : > { %v1362_v62 = vpack.c.bf16 %v1302_v53, %v1301_v58  ;;  %v8243_v56 = vld [vmem:[#allocation24 + $0x19c] sm:$0xf0]  ;;  %v6924_v63 = vld [vmem:[#allocation24 + $0x1a0] sm:$0xf0] }
 0x19c   : > { %1143 = vrot.lane.b32.xlu2 %v10382_v8, %s9999_s8  ;;  %1141 = vrot.lane.b32.xlu1 %v10380_v7, %s9999_s8  ;;  %v6922_v10 = vld [vmem:[#allocation24 + $0x180] sm:$0xf]  ;;  %v8239_v12 = vld [vmem:[#allocation24 + $0x184] sm:$0xf] }
 0x19d   : > { %1370 = vst [vmem:[#allocation24 + $0x108] sm:$0xff] %v1362_v62  ;;  %1441 = vrot.lane.b32.xlu0 %v10378_v6, %s12060_s11  ;;  %v6923_v2 = vor.u32 %v8243_v56, %v6922_v10  ;;  %v6927_v1 = vor.u32 %v8239_v12, %v6924_v63  ;;  %v6709_v58 = vld [vmem:[%s12059_s24 + $0x6] ss:$8 sm:$0xf0] }
 0x19e   : > { %v11000_v17 = vpop.permute.xlu2 %1189  ;;  %v1314_v60 = vpop.permute.xlu1 %1313 }
 0x19f   : > { %v1327_v18 = vsel %vm1323_vm12, %v1314_v60, %v10918_v37  ;;  %2135 = vmatpush.bf16.msra.mxu0 %v6923_v2  ;;  %2148 = vmatpush.bf16.msra.mxu1 %v6927_v1  ;;  %v11005_v32 = vpop.permute.xlu0 %1311  ;;  %v6710_v1 = vld [vmem:[%s12059_s24 + $0x7] ss:$8 sm:$0xf] }
 0x1a0   : > { %v1356_v27 = vmul.f32 %v1340_v0, %v1327_v18  ;;  %v1328_v20 = vsel %vm1323_vm12, %v11005_v32, %v1314_v60  ;;  %v11052_v0 = vor.u32 %v6709_v58, %v6708_v54 }
 0x1a1   : > { %v1355_v28 = vmul.f32 %v1339_v13, %v1328_v20  ;;  %v6711_v13 = vld [vmem:[%s12059_s24 + $0x7] ss:$8 sm:$0xf0] }
 0x1a2   : > { %v1162_v60 = vperm.slane %v11052_v0, 3 }
 0x1a3   : > { %v1366_v29 = vpack.c.bf16 %v1356_v27, %v1355_v28  ;;  %v11071_v28 = vor.u32 %v6711_v13, %v6710_v1  ;;  %v1716_v13 = vperm.slane %v10759_v44, 7 }
 0x1a4   : > { %1263 = vrot.lane.b32.xlu2 %v10378_v6, %s9997_s17  ;;  %1197 = vrot.lane.b32.xlu1 %v10382_v8, %s10000_s27  ;;  %v6866_v16 = vld [vmem:[#allocation24 + $0x108] sm:$0xf]  ;;  %v8224_v43 = vld [vmem:[#allocation24 + $0x10c] sm:$0xf] }
 0x1a5   : > { %1374 = vst [vmem:[#allocation24 + $0x128] sm:$0xff] %v1366_v29  ;;  %1195 = vrot.lane.b32.xlu0 %v10380_v7, %s10000_s27 }
 0x1a6   : > { %v11018_v38 = vpop.permute.xlu2 %1639  ;;  %v1380_v45 = vpop.permute.xlu1 %1379 }
 0x1a7   : > { %v1399_v39 = vsel %vm1393_vm9, %v1380_v45, %v10774_v14  ;;  %v11023_v59 = vpop.permute.xlu0 %1377 }
 0x1a8   : > { %v1424_v52 = vmul.f32 %v1408_v34, %v1399_v39  ;;  %v1400_v8 = vsel %vm1393_vm9, %v11023_v59, %v1380_v45  ;;  %v1662_v39 = vperm.slane %v10722_v47, 7 }
 0x1a9   : > { %v1423_v40 = vmul.f32 %v1407_v36, %v1400_v8 }
 0x1ab   : > { %v1485_v41 = vpack.c.bf16 %v1424_v52, %v1423_v40  ;;  %v1215_v52 = vperm.slane %v11071_v28, 2  ;;  %v1661_v40 = vperm.slane %v10722_v47, 6 }
 0x1ac   : > { %1193 = vrot.lane.b32.xlu2 %v10378_v6, %s10000_s27  ;;  %1139 = vrot.lane.b32.xlu1 %v10378_v6, %s9999_s8  ;;  %v8228_v7 = vld [vmem:[#allocation24 + $0x124] sm:$0xf0]  ;;  %v6868_v5 = vld [vmem:[#allocation24 + $0x128] sm:$0xf0] }
 0x1ad   : > { %1493 = vst [vmem:[#allocation24 + $0x140] sm:$0xff] %v1485_v41  ;;  %1317 = vrot.lane.b32.xlu0 %v10378_v6, %s9998_s3  ;;  %v6867_v14 = vor.u32 %v8228_v7, %v6866_v16  ;;  %v6871_v48 = vor.u32 %v8224_v43, %v6868_v5 }
 0x1ae   : > { %v11036_v53 = vpop.permute.xlu2 %1253  ;;  %v11044_v62 = vpop.permute.xlu1 %1133 }
 0x1af   : > { %2163 = vmatpush.bf16.msra.mxu2 %v6867_v14  ;;  %2176 = vmatpush.bf16.msra.mxu3 %v6871_v48  ;;  %v1434_v6 = vpop.permute.xlu0 %1433  ;;  %v1150_v18 = vsel %vm1145_vm13, %v11044_v62, %v10979_v49  ;;  %v1216_v48 = vperm.slane %v11071_v28, 3 }
 0x1b0   : > { %v1453_v56 = vsel %vm1447_vm10, %v1434_v6, %v10811_v31  ;;  %v1454_v63 = vsel %vm1447_vm10, %v10948_v22, %v1434_v6  ;;  %v1161_v31 = vperm.slane %v11052_v0, 2 }
 0x1b1   : > { %v1477_v10 = vmul.f32 %v1461_v50, %v1454_v63  ;;  %v1478_v12 = vmul.f32 %v1462_v51, %v1453_v56 }
 0x1b2   : > { %v1177_v36 = vmul.f32 %v1161_v31, %v1150_v18 }
 0x1b3   : > { %v1489_v2 = vpack.c.bf16 %v1478_v12, %v1477_v10 }
 0x1b4   : > { %v6890_v41 = vld [vmem:[#allocation24 + $0x140] sm:$0xf]  ;;  %v8231_v7 = vld [vmem:[#allocation24 + $0x144] sm:$0xf] }
 0x1b5   : > { %1497 = vst [vmem:[#allocation24 + $0x160] sm:$0xff] %v1489_v2 }
 0x1b6   : > { %v11067_v27 = vpop.permute.xlu2 %1309  ;;  %v11069_v20 = vpop.permute.xlu1 %1187 }
 0x1b7   : > { %v11073_v29 = vpop.permute.xlu0 %1137  ;;  %v1204_v50 = vsel %vm1199_vm14, %v11069_v20, %v11000_v17 }
 0x1b8   : > { %v1149_v34 = vsel %vm1145_vm13, %v10979_v49, %v11073_v29  ;;  %v1649_v49 = vsel %vm1641_vm5, %v11018_v38, %v10844_v35  ;;  %v1231_v10 = vmul.f32 %v1215_v52, %v1204_v50  ;;  %v1659_v52 = vperm.slane %v10722_v47, 4  ;;  %v8212_v50 = vld [vmem:[#allocation24 + $0xa4] sm:$0xf0] }
 0x1b9   : > { %v1178_v45 = vmul.f32 %v1162_v60, %v1149_v34  ;;  %v1678_v6 = vmul.f32 %v1662_v39, %v1649_v49  ;;  %v1338_v39 = vperm.slane %v10989_v55, 1 }
 0x1bb   : > { %v1238_v8 = vpack.c.bf16 %v1178_v45, %v1177_v36 }
 0x1bc   : > { %v8235_v16 = vld [vmem:[#allocation24 + $0x15c] sm:$0xf0]  ;;  %v6892_v43 = vld [vmem:[#allocation24 + $0x160] sm:$0xf0] }
 0x1bd   : > { %1246 = vst [vmem:[#allocation24 + $0xc8] sm:$0xff] %v1238_v8  ;;  %v6891_v5 = vor.u32 %v8235_v16, %v6890_v41  ;;  %v6895_v14 = vor.u32 %v8231_v7, %v6892_v43  ;;  %v1329_v8 = vsel %vm1323_vm12, %v11067_v27, %v11005_v32  ;;  %v1337_v41 = vperm.slane %v10989_v55, 0 }
 0x1be   : > { %v11092_v51 = vpop.permute.xlu2 %1567  ;;  %v1638_v54 = vpop.permute.xlu1 %1637  ;;  %v1283_v32 = vperm.slane %v10956_v26, 0 }
 0x1bf   : > { %v1642_v58 = vsel %vm1641_vm5, %v1638_v54, %v11018_v38  ;;  %2136 = vmatpush.bf16.msra.mxu0 %v6891_v5  ;;  %2149 = vmatpush.bf16.msra.mxu1 %v6895_v14  ;;  %v11097_v35 = vpop.permute.xlu0 %1191  ;;  %v1715_v38 = vperm.slane %v10759_v44, 6 }
 0x1c0   : > { %v1677_v56 = vmul.f32 %v1661_v40, %v1642_v58  ;;  %v1203_v63 = vsel %vm1199_vm14, %v11000_v17, %v11097_v35  ;;  %v6804_v58 = vld [vmem:[#allocation24 + $0xa8] sm:$0xf0] }
 0x1c1   : > { %v1232_v12 = vmul.f32 %v1216_v48, %v1203_v63  ;;  %v1284_v48 = vperm.slane %v10956_v26, 1 }
 0x1c2   : > { %v1736_v2 = vpack.c.bf16 %v1678_v6, %v1677_v56  ;;  %v1354_v6 = vmul.f32 %v1338_v39, %v1329_v8 }
 0x1c3   : > { %v1242_v1 = vpack.c.bf16 %v1232_v12, %v1231_v10  ;;  %v8208_v10 = vld [vmem:[#allocation24 + $0x8c] sm:$0xf] }
 0x1c4   : > { %1744 = vst [vmem:[#allocation24 + $0x1d8] sm:$0xff] %v1736_v2  ;;  %v6834_v16 = vld [vmem:[#allocation24 + $0xc8] sm:$0xf]  ;;  %v8216_v43 = vld [vmem:[#allocation24 + $0xcc] sm:$0xf] }
 0x1c5   : > { %1250 = vst [vmem:[#allocation24 + $0xe8] sm:$0xff] %v1242_v1 }
 0x1c6   : > { %v11105_v31 = vpop.permute.xlu2 %1131  ;;  %v1694_v60 = vpop.permute.xlu1 %1693 }
 0x1c7   : > { %v1703_v18 = vsel %vm1695_vm6, %v1694_v60, %v10875_v57  ;;  %v11110_v34 = vpop.permute.xlu0 %1691  ;;  %v1660_v57 = vperm.slane %v10722_v47, 5  ;;  %v6802_v47 = vld [vmem:[#allocation24 + $0x88] sm:$0xf] }
 0x1c8   : > { %v1732_v17 = vmul.f32 %v1716_v13, %v1703_v18  ;;  %v1696_v36 = vsel %vm1695_vm6, %v11110_v34, %v1694_v60 }
 0x1c9   : > { %v1731_v45 = vmul.f32 %v1715_v38, %v1696_v36  ;;  %v6803_v36 = vor.u32 %v8212_v50, %v6802_v47  ;;  %v6740_v50 = vld [vmem:[#allocation24 + $0x28] sm:$0xf0] }
 0x1cb   : > { %v1740_v40 = vpack.c.bf16 %v1732_v17, %v1731_v45  ;;  %v6807_v45 = vor.u32 %v8208_v10, %v6804_v58 }
 0x1cc   : > { %v8220_v7 = vld [vmem:[#allocation24 + $0xe4] sm:$0xf0]  ;;  %v6836_v49 = vld [vmem:[#allocation24 + $0xe8] sm:$0xf0] }
 0x1cd   : > { %1748 = vst [vmem:[#allocation24 + $0x1f8] sm:$0xff] %v1740_v40  ;;  %v6835_v5 = vor.u32 %v8220_v7, %v6834_v16  ;;  %v6839_v14 = vor.u32 %v8216_v43, %v6836_v49  ;;  %v8204_v40 = vld [vmem:[#allocation24 + $0x64] sm:$0xf0]  ;;  %v6772_v16 = vld [vmem:[#allocation24 + $0x68] sm:$0xf0]  ;;  %v1537_v49 = vperm.slane %v10790_v24, 6 }
 0x1ce   : > { %v1636_v56 = vpop.permute.xlu2 %1635  ;;  %v11124_v63 = vpop.permute.xlu1 %1307 }
 0x1cf   : > { %v1643_v12 = vsel %vm1641_vm5, %v1636_v56, %v1638_v54  ;;  %v1644_v2 = vsel %vm1641_vm5, %v10753_v61, %v1636_v56  ;;  %v1330_v1 = vsel %vm1323_vm12, %v11124_v63, %v11067_v27  ;;  %2164 = vmatpush.bf16.msra.mxu2 %v6835_v5  ;;  %2177 = vmatpush.bf16.msra.mxu3 %v6839_v14  ;;  %v1256_v13 = vpop.permute.xlu0 %1255 }
 0x1d0   : > { %v1675_v38 = vmul.f32 %v1659_v52, %v1644_v2  ;;  %v1676_v60 = vmul.f32 %v1660_v57, %v1643_v12  ;;  %v1353_v18 = vmul.f32 %v1337_v41, %v1330_v1  ;;  %v1275_v17 = vsel %vm1269_vm11, %v1256_v13, %v10984_v46  ;;  %v6770_v41 = vld [vmem:[#allocation24 + $0x48] sm:$0xf]  ;;  %v8200_v46 = vld [vmem:[#allocation24 + $0x4c] sm:$0xf] }
 0x1d1   : > { %v1276_v54 = vsel %vm1269_vm11, %v11036_v53, %v1256_v13  ;;  %v1300_v61 = vmul.f32 %v1284_v48, %v1275_v17  ;;  %v1538_v57 = vperm.slane %v10790_v24, 7  ;;  %v6771_v7 = vor.u32 %v8204_v40, %v6770_v41  ;;  %v8196_v48 = vld [vmem:[#allocation24 + $0x24] sm:$0xf0]  ;;  %v8192_v2 = vld [vmem:[#allocation24 + $0xc] sm:$0xf] }
 0x1d2   : > { %v1735_v39 = vpack.c.bf16 %v1676_v60, %v1675_v38  ;;  %v1365_v8 = vpack.c.bf16 %v1354_v6, %v1353_v18  ;;  %v1299_v27 = vmul.f32 %v1283_v32, %v1276_v54  ;;  %v6775_v43 = vor.u32 %v8200_v46, %v6772_v16  ;;  %v6738_v12 = vld [vmem:[#allocation24 + $0x8] sm:$0xf]  ;;  %v6978_v60 = vld [vmem:[#allocation24 + $0x1d8] sm:$0xf]  ;;  %v8250_v18 = vld [vmem:[#allocation24 + $0x1dc] sm:$0xf] }
 0x1d3   : > { %2165 = vmatpush.bf16.msra.mxu2 %v6803_v36  ;;  %2178 = vmatpush.bf16.msra.mxu3 %v6807_v45  ;;  %v6739_v13 = vor.u32 %v8196_v48, %v6738_v12  ;;  %v6743_v38 = vor.u32 %v8192_v2, %v6740_v50  ;;  %v1535_v36 = vperm.slane %v10790_v24, 4  ;;  %v1151_v45 = vsel %vm1145_vm13, %v11105_v31, %v11044_v62 }
 0x1d4   : > { %1743 = vst [vmem:[#allocation24 + $0x1d0] sm:$0xff] %v1735_v39  ;;  %v1361_v52 = vpack.c.bf16 %v1300_v61, %v1299_v27  ;;  %v8254_v56 = vld [vmem:[#allocation24 + $0x1f4] sm:$0xf0]  ;;  %v6980_v32 = vld [vmem:[#allocation24 + $0x1f8] sm:$0xf0]  ;;  %v1536_v39 = vperm.slane %v10790_v24, 5 }
 0x1d5   : > { %1373 = vst [vmem:[#allocation24 + $0x120] sm:$0xff] %v1365_v8  ;;  %v6979_v17 = vor.u32 %v8254_v56, %v6978_v60  ;;  %v6983_v54 = vor.u32 %v8250_v18, %v6980_v32  ;;  %v1159_v8 = vperm.slane %v11052_v0, 0  ;;  %v1592_v62 = vperm.slane %v10815_v4, 7 }
 0x1d6   : > { %1369 = vst [vmem:[#allocation24 + $0x100] sm:$0xff] %v1361_v52  ;;  %v11144_v5 = vpop.permute.xlu2 %1391  ;;  %v1516_v14 = vpop.permute.xlu1 %1515 }
 0x1d7   : > { %v1525_v58 = vsel %vm1517_vm7, %v1516_v14, %v10842_v11  ;;  %2166 = vmatpush.bf16.msra.mxu2 %v6771_v7  ;;  %2179 = vmatpush.bf16.msra.mxu3 %v6775_v43  ;;  %v1514_v6 = vpop.permute.xlu0 %1513  ;;  %v1160_v11 = vperm.slane %v11052_v0, 1  ;;  %v1591_v43 = vperm.slane %v10815_v4, 6 }
 0x1d8   : > { %v1554_v47 = vmul.f32 %v1538_v57, %v1525_v58  ;;  %v1518_v10 = vsel %vm1517_vm7, %v1514_v6, %v1516_v14 }
 0x1d9   : > { %v1553_v1 = vmul.f32 %v1537_v49, %v1518_v10  ;;  %v1176_v49 = vmul.f32 %v1160_v11, %v1151_v45  ;;  %v1411_v45 = vperm.slane %v10880_v19, 4 }
 0x1db   : > { %v1612_v61 = vpack.c.bf16 %v1554_v47, %v1553_v1  ;;  %2167 = vmatpush.bf16.msra.mxu2 %v6739_v13  ;;  %2180 = vmatpush.bf16.msra.mxu3 %v6743_v38  ;;  %v1214_v1 = vperm.slane %v11071_v28, 1  ;;  %v1213_v13 = vperm.slane %v11071_v28, 0 }
 0x1dc   : > { %v8227_v27 = vld [vmem:[#allocation24 + $0x11c] sm:$0xf0]  ;;  %v6860_v40 = vld [vmem:[#allocation24 + $0x120] sm:$0xf0] }
 0x1dd   : > { %1620 = vst [vmem:[#allocation24 + $0x198] sm:$0xff] %v1612_v61  ;;  %v6858_v16 = vld [vmem:[#allocation24 + $0x100] sm:$0xf]  ;;  %v8223_v52 = vld [vmem:[#allocation24 + $0x104] sm:$0xf]  ;;  %v1414_v61 = vperm.slane %v10880_v19, 7 }
 0x1de   : > { %v1512_v57 = vpop.permute.xlu2 %1511  ;;  %v11159_v41 = vpop.permute.xlu1 %1129  ;;  %v6859_v46 = vor.u32 %v8227_v27, %v6858_v16  ;;  %v6863_v7 = vor.u32 %v8223_v52, %v6860_v40 }
 0x1df   : > { %2212 = vmatpush.bf16.msrb.mxu2 %v6979_v17  ;;  %2225 = vmatpush.bf16.msrb.mxu3 %v6983_v54  ;;  %v1519_v24 = vsel %vm1517_vm7, %v1512_v57, %v1514_v6  ;;  %v1520_v14 = vsel %vm1517_vm7, %v10817_v3, %v1512_v57  ;;  %v1152_v48 = vsel %vm1145_vm13, %v11159_v41, %v11105_v31  ;;  %v1570_v50 = vpop.permute.xlu0 %1569 }
 0x1e0   : > { %v1551_v58 = vmul.f32 %v1535_v36, %v1520_v14  ;;  %v1552_v56 = vmul.f32 %v1536_v39, %v1519_v24  ;;  %v1175_v32 = vmul.f32 %v1159_v8, %v1152_v48  ;;  %2137 = vmatpush.bf16.msra.mxu0 %v6859_v46  ;;  %2150 = vmatpush.bf16.msra.mxu1 %v6863_v7  ;;  %v1413_v8 = vperm.slane %v10880_v19, 6 }
 0x1e1   : > { %v1572_v47 = vsel %vm1571_vm8, %v11092_v51, %v1570_v50  ;;  %v1579_v6 = vsel %vm1571_vm8, %v1570_v50, %v10950_v23  ;;  %v1401_v39 = vsel %vm1393_vm9, %v11144_v5, %v11023_v59 }
 0x1e2   : > { %v1611_v3 = vpack.c.bf16 %v1552_v56, %v1551_v58  ;;  %v1237_v10 = vpack.c.bf16 %v1176_v49, %v1175_v32  ;;  %v1607_v12 = vmul.f32 %v1591_v43, %v1572_v47  ;;  %v1608_v2 = vmul.f32 %v1592_v62, %v1579_v6 }
 0x1e3   : > { %v1713_v62 = vperm.slane %v10759_v44, 4  ;;  %v1714_v49 = vperm.slane %v10759_v44, 5  ;;  %v1430_v24 = vmul.f32 %v1414_v61, %v1401_v39  ;;  %v8207_v61 = vld [vmem:[#allocation24 + $0x84] sm:$0xf] }
 0x1e4   : > { %1619 = vst [vmem:[#allocation24 + $0x190] sm:$0xff] %v1611_v3  ;;  %v1616_v31 = vpack.c.bf16 %v1608_v2, %v1607_v12  ;;  %v6946_v27 = vld [vmem:[#allocation24 + $0x198] sm:$0xf]  ;;  %v8242_v40 = vld [vmem:[#allocation24 + $0x19c] sm:$0xf]  ;;  %v1468_v2 = vperm.slane %v10907_v42, 7 }
 0x1e5   : > { %1245 = vst [vmem:[#allocation24 + $0xc0] sm:$0xff] %v1237_v10 }
 0x1e6   : > { %1624 = vst [vmem:[#allocation24 + $0x1b8] sm:$0xff] %v1616_v31  ;;  %v11180_v38 = vpop.permute.xlu2 %1267  ;;  %v1186_v60 = vpop.permute.xlu1 %1185 }
 0x1e7   : > { %v1205_v18 = vsel %vm1199_vm14, %v1186_v60, %v11069_v20  ;;  %v11185_v23 = vpop.permute.xlu0 %1183  ;;  %v1412_v20 = vperm.slane %v10880_v19, 5 }
 0x1e8   : > { %v1230_v17 = vmul.f32 %v1214_v1, %v1205_v18  ;;  %v1206_v54 = vsel %vm1199_vm14, %v11185_v23, %v1186_v60  ;;  %v8211_v18 = vld [vmem:[#allocation24 + $0x9c] sm:$0xf0] }
 0x1e9   : > { %v1229_v11 = vmul.f32 %v1213_v13, %v1206_v54 }
 0x1eb   : > { %v1241_v36 = vpack.c.bf16 %v1230_v17, %v1229_v11  ;;  %v6796_v17 = vld [vmem:[#allocation24 + $0xa0] sm:$0xf0]  ;;  %v6794_v11 = vld [vmem:[#allocation24 + $0x80] sm:$0xf] }
 0x1ec   : > { %v6826_v3 = vld [vmem:[#allocation24 + $0xc0] sm:$0xf]  ;;  %v8215_v10 = vld [vmem:[#allocation24 + $0xc4] sm:$0xf] }
 0x1ed   : > { %1249 = vst [vmem:[#allocation24 + $0xe0] sm:$0xff] %v1241_v36  ;;  %v8246_v16 = vld [vmem:[#allocation24 + $0x1b4] sm:$0xf0]  ;;  %v6948_v52 = vld [vmem:[#allocation24 + $0x1b8] sm:$0xf0] }
 0x1ee   : > { %v1388_v57 = vpop.permute.xlu2 %1387  ;;  %v1390_v46 = vpop.permute.xlu1 %1389  ;;  %v6947_v7 = vor.u32 %v8246_v16, %v6946_v27  ;;  %v6951_v43 = vor.u32 %v8242_v40, %v6948_v52  ;;  %v6795_v27 = vor.u32 %v8211_v18, %v6794_v11  ;;  %v6799_v40 = vor.u32 %v8207_v61, %v6796_v17  ;;  %v8203_v52 = vld [vmem:[#allocation24 + $0x5c] sm:$0xf0]  ;;  %v8249_v18 = vld [vmem:[#allocation24 + $0x1d4] sm:$0xf] }
 0x1ef   : > { %v1396_v59 = vsel %vm1393_vm9, %v10893_v33, %v1388_v57  ;;  %v1394_v19 = vsel %vm1393_vm9, %v1390_v46, %v11144_v5  ;;  %v1395_v14 = vsel %vm1393_vm9, %v1388_v57, %v1390_v46  ;;  %v1690_v48 = vpop.permute.xlu0 %1689  ;;  %v1290_v16 = vperm.slane %v10956_v26, 7  ;;  %v6764_v57 = vld [vmem:[#allocation24 + $0x60] sm:$0xf0] }
 0x1f0   : > { %v1427_v50 = vmul.f32 %v1411_v45, %v1396_v59  ;;  %v1428_v58 = vmul.f32 %v1412_v20, %v1395_v14  ;;  %v1429_v56 = vmul.f32 %v1413_v8, %v1394_v19  ;;  %2213 = vmatpush.bf16.msrb.mxu2 %v6947_v7  ;;  %2226 = vmatpush.bf16.msrb.mxu3 %v6951_v43  ;;  %v6762_v7 = vld [vmem:[#allocation24 + $0x40] sm:$0xf]  ;;  %v8199_v59 = vld [vmem:[#allocation24 + $0x44] sm:$0xf] }
 0x1f1   : > { %v1697_v44 = vsel %vm1695_vm6, %v1690_v48, %v11110_v34  ;;  %v1698_v33 = vsel %vm1695_vm6, %v10784_v21, %v1690_v48  ;;  %v1467_v34 = vperm.slane %v10907_v42, 6  ;;  %v8195_v43 = vld [vmem:[#allocation24 + $0x1c] sm:$0xf0]  ;;  %v6763_v19 = vor.u32 %v8203_v52, %v6762_v7 }
 0x1f2   : > { %v1487_v32 = vpack.c.bf16 %v1428_v58, %v1427_v50  ;;  %v1488_v47 = vpack.c.bf16 %v1430_v24, %v1429_v56  ;;  %v1729_v5 = vmul.f32 %v1713_v62, %v1698_v33  ;;  %v1730_v6 = vmul.f32 %v1714_v49, %v1697_v44  ;;  %v6730_v50 = vld [vmem:[#allocation24] sm:$0xf] }
 0x1f3   : > { %v1287_v62 = vperm.slane %v10956_v26, 4  ;;  %v1288_v49 = vperm.slane %v10956_v26, 5  ;;  %v1289_v24 = vperm.slane %v10956_v26, 6  ;;  %v6767_v14 = vor.u32 %v8199_v59, %v6764_v57  ;;  %v11252_v52 = vld [vmem:[#allocation6] sm:$0xf] }
 0x1f4   : > { %1495 = vst [vmem:[#allocation24 + $0x150] sm:$0xff] %v1487_v32  ;;  %v1739_v12 = vpack.c.bf16 %v1730_v6, %v1729_v5  ;;  %v8219_v31 = vld [vmem:[#allocation24 + $0xdc] sm:$0xf0]  ;;  %v6828_v1 = vld [vmem:[#allocation24 + $0xe0] sm:$0xf0]  ;;  %v1590_v48 = vperm.slane %v10815_v4, 5  ;;  %v6731_v33 = vor.u32 %v8195_v43, %v6730_v50  ;;  %2168 = vmatmul.bf16.vlgmr.msra.gmra.mxu2 %v11252_v52  ;;  %2181 = vmatmul.bf16.vlgmr.msra.gmra.mxu3 %v11252_v52 }
 0x1f5   : > { %1496 = vst [vmem:[#allocation24 + $0x158] sm:$0xff] %v1488_v47  ;;  %v6827_v13 = vor.u32 %v8219_v31, %v6826_v3  ;;  %v6831_v60 = vor.u32 %v8215_v10, %v6828_v1  ;;  %v1589_v44 = vperm.slane %v10815_v4, 4  ;;  %v6732_v32 = vld [vmem:[#allocation24 + $0x20] sm:$0xf0]  ;;  %v1165_v59 = vperm.slane %v11052_v0, 6 }
 0x1f6   : > { %1747 = vst [vmem:[#allocation24 + $0x1f0] sm:$0xff] %v1739_v12  ;;  %v11216_v21 = vpop.permute.xlu2 %1143  ;;  %v1446_v54 = vpop.permute.xlu1 %1445  ;;  %v8191_v1 = vld [vmem:[#allocation24 + $0x4] sm:$0xf] }
 0x1f7   : > { %v1455_v36 = vsel %vm1447_vm10, %v1446_v54, %v10948_v22  ;;  %2138 = vmatpush.bf16.msra.mxu0 %v6827_v13  ;;  %2151 = vmatpush.bf16.msra.mxu1 %v6831_v60  ;;  %v11221_v45 = vpop.permute.xlu0 %1443  ;;  %v1277_v22 = vsel %vm1269_vm11, %v11180_v38, %v11036_v53  ;;  %v6735_v60 = vor.u32 %v8191_v1, %v6732_v32  ;;  %v1220_v1 = vperm.slane %v11071_v28, 7 }
 0x1f8   : > { %v1484_v39 = vmul.f32 %v1468_v2, %v1455_v36  ;;  %v1448_v20 = vsel %vm1447_vm10, %v11221_v45, %v1446_v54  ;;  %v1306_v58 = vmul.f32 %v1290_v16, %v1277_v22  ;;  %v1343_v16 = vperm.slane %v10989_v55, 6 }
 0x1f9   : > { %v1483_v8 = vmul.f32 %v1467_v34, %v1448_v20  ;;  %v1344_v20 = vperm.slane %v10989_v55, 7 }
 0x1fb   : > { %v1492_v46 = vpack.c.bf16 %v1484_v39, %v1483_v8  ;;  %2139 = vmatpush.bf16.msra.mxu0 %v6795_v27  ;;  %2152 = vmatpush.bf16.msra.mxu1 %v6799_v40 }
 0x1fc   : > { %v6914_v36 = vld [vmem:[#allocation24 + $0x158] sm:$0xf]  ;;  %v8234_v39 = vld [vmem:[#allocation24 + $0x15c] sm:$0xf] }
 0x1fd   : > { %1500 = vst [vmem:[#allocation24 + $0x178] sm:$0xff] %v1492_v46  ;;  %v8253_v47 = vld [vmem:[#allocation24 + $0x1ec] sm:$0xf0]  ;;  %v6972_v10 = vld [vmem:[#allocation24 + $0x1f0] sm:$0xf0] }
 0x1fe   : > { %v1264_v53 = vpop.permute.xlu2 %1263  ;;  %v1266_v56 = vpop.permute.xlu1 %1265  ;;  %v6975_v61 = vor.u32 %v8249_v18, %v6972_v10 }
 0x1ff   : > { %v1272_v5 = vsel %vm1269_vm11, %v10891_v30, %v1264_v53  ;;  %v1270_v26 = vsel %vm1269_vm11, %v1266_v56, %v11180_v38  ;;  %v1271_v6 = vsel %vm1269_vm11, %v1264_v53, %v1266_v56  ;;  %2140 = vmatpush.bf16.msra.mxu0 %v6763_v19  ;;  %2153 = vmatpush.bf16.msra.mxu1 %v6767_v14  ;;  %v1566_v3 = vpop.permute.xlu0 %1565  ;;  %v6970_v30 = vld [vmem:[#allocation24 + $0x1d0] sm:$0xf]  ;;  %v8241_v14 = vld [vmem:[#allocation24 + $0x194] sm:$0xf]  ;;  %v1466_v53 = vperm.slane %v10907_v42, 5 }
 0x200   : > { %v1303_v12 = vmul.f32 %v1287_v62, %v1272_v5  ;;  %v1304_v4 = vmul.f32 %v1288_v49, %v1271_v6  ;;  %v1305_v2 = vmul.f32 %v1289_v24, %v1270_v26  ;;  %v1573_v31 = vsel %vm1571_vm8, %v1566_v3, %v11092_v51  ;;  %v6938_v19 = vld [vmem:[#allocation24 + $0x190] sm:$0xf] }
 0x201   : > { %v1574_v38 = vsel %vm1571_vm8, %v10850_v25, %v1566_v3  ;;  %v1606_v13 = vmul.f32 %v1590_v48, %v1573_v31  ;;  %v6971_v34 = vor.u32 %v8253_v47, %v6970_v30  ;;  %v1166_v49 = vperm.slane %v11052_v0, 7 }
 0x202   : > { %v1363_v17 = vpack.c.bf16 %v1304_v4, %v1303_v12  ;;  %v1364_v54 = vpack.c.bf16 %v1306_v58, %v1305_v2  ;;  %v1605_v11 = vmul.f32 %v1589_v44, %v1574_v38  ;;  %v1465_v48 = vperm.slane %v10907_v42, 4 }
 0x203   : > { %2141 = vmatpush.bf16.msra.mxu0 %v6731_v33  ;;  %2154 = vmatpush.bf16.msra.mxu1 %v6735_v60  ;;  %v1217_v12 = vperm.slane %v11071_v28, 4  ;;  %v1218_v60 = vperm.slane %v11071_v28, 5 }
 0x204   : > { %1371 = vst [vmem:[#allocation24 + $0x110] sm:$0xff] %v1363_v17  ;;  %v1615_v51 = vpack.c.bf16 %v1606_v13, %v1605_v11  ;;  %v8238_v8 = vld [vmem:[#allocation24 + $0x174] sm:$0xf0]  ;;  %v6916_v25 = vld [vmem:[#allocation24 + $0x178] sm:$0xf0] }
 0x205   : > { %1372 = vst [vmem:[#allocation24 + $0x118] sm:$0xff] %v1364_v54  ;;  %v6915_v27 = vor.u32 %v8238_v8, %v6914_v36  ;;  %v6919_v40 = vor.u32 %v8234_v39, %v6916_v25  ;;  %v6906_v8 = vld [vmem:[#allocation24 + $0x150] sm:$0xf]  ;;  %v8233_v25 = vld [vmem:[#allocation24 + $0x154] sm:$0xf] }
 0x206   : > { %1623 = vst [vmem:[#allocation24 + $0x1b0] sm:$0xff] %v1615_v51  ;;  %v1322_v57 = vpop.permute.xlu1 %1321  ;;  %2142 = vmatmul.bf16.vlgmr.msra.gmra.mxu0 %v11252_v52  ;;  %2155 = vmatmul.bf16.vlgmr.msra.gmra.mxu1 %v11252_v52  ;;  %v1194_v4 = vpop.permute.xlu2 %1193 }
 0x207   : > { %2186 = vmatpush.bf16.msrb.mxu0 %v6971_v34  ;;  %2199 = vmatpush.bf16.msrb.mxu1 %v6975_v61  ;;  %v1331_v22 = vsel %vm1323_vm12, %v1322_v57, %v11124_v63  ;;  %v11259_v46 = vpop.permute.xlu0 %1319  ;;  %v1153_v63 = vsel %vm1145_vm13, %v11216_v21, %v11159_v41  ;;  %v1202_v34 = vsel %vm1199_vm14, %v11097_v35, %v1194_v4 }
 0x208   : > { %2214 = vmatpush.bf16.msrb.mxu2 %v6915_v27  ;;  %2227 = vmatpush.bf16.msrb.mxu3 %v6919_v40  ;;  %v1360_v7 = vmul.f32 %v1344_v20, %v1331_v22  ;;  %v1324_v43 = vsel %vm1323_vm12, %v11259_v46, %v1322_v57  ;;  %v1182_v32 = vmul.f32 %v1166_v49, %v1153_v63  ;;  %v1163_v27 = vperm.slane %v11052_v0, 4 }
 0x209   : > { %v1359_v62 = vmul.f32 %v1343_v16, %v1324_v43  ;;  %v1342_v43 = vperm.slane %v10989_v55, 5 }
 0x20b   : > { %v1368_v24 = vpack.c.bf16 %v1360_v7, %v1359_v62  ;;  %v1341_v7 = vperm.slane %v10989_v55, 4 }
 0x20c   : > { %v8226_v31 = vld [vmem:[#allocation24 + $0x11c] sm:$0xf] }
 0x20d   : > { %1376 = vst [vmem:[#allocation24 + $0x138] sm:$0xff] %v1368_v24  ;;  %v8245_v50 = vld [vmem:[#allocation24 + $0x1ac] sm:$0xf0]  ;;  %v6940_v58 = vld [vmem:[#allocation24 + $0x1b0] sm:$0xf0] }
 0x20e   : > { %v1142_v56 = vpop.permute.xlu1 %1141  ;;  %v6939_v44 = vor.u32 %v8245_v50, %v6938_v19  ;;  %v6943_v33 = vor.u32 %v8241_v14, %v6940_v58 }
 0x20f   : > { %v1146_v47 = vsel %vm1145_vm13, %v1142_v56, %v11216_v21  ;;  %v1442_v41 = vpop.permute.xlu0 %1441  ;;  %v6882_v21 = vld [vmem:[#allocation24 + $0x118] sm:$0xf] }
 0x210   : > { %v1181_v5 = vmul.f32 %v1165_v59, %v1146_v47  ;;  %2187 = vmatpush.bf16.msrb.mxu0 %v6939_v44  ;;  %2200 = vmatpush.bf16.msrb.mxu1 %v6943_v33  ;;  %v1449_v26 = vsel %vm1447_vm10, %v1442_v41, %v11221_v45  ;;  %v1450_v42 = vsel %vm1447_vm10, %v10920_v9, %v1442_v41  ;;  %v1219_v9 = vperm.slane %v11071_v28, 6  ;;  %v8214_v47 = vld [vmem:[#allocation24 + $0xb4] sm:$0xf0] }
 0x211   : > { %v1481_v6 = vmul.f32 %v1465_v48, %v1450_v42  ;;  %v1482_v3 = vmul.f32 %v1466_v53, %v1449_v26  ;;  %v1233_v28 = vmul.f32 %v1217_v12, %v1202_v34  ;;  %v6818_v41 = vld [vmem:[#allocation24 + $0x98] sm:$0xf]  ;;  %v6874_v42 = vld [vmem:[#allocation24 + $0x110] sm:$0xf]  ;;  %v8225_v12 = vld [vmem:[#allocation24 + $0x114] sm:$0xf] }
 0x212   : > { %v1240_v10 = vpack.c.bf16 %v1182_v32, %v1181_v5  ;;  %v8210_v5 = vld [vmem:[#allocation24 + $0x9c] sm:$0xf]  ;;  %v6819_v26 = vor.u32 %v8214_v47, %v6818_v41  ;;  %v7042_v41 = vld [vmem:[#allocation8 + $0x70] sm:$0xf] }
 0x213   : > { %v1491_v2 = vpack.c.bf16 %v1482_v3, %v1481_v6  ;;  %v8206_v6 = vld [vmem:[#allocation24 + $0x74] sm:$0xf0]  ;;  %v6788_v3 = vld [vmem:[#allocation24 + $0x78] sm:$0xf0] }
 0x214   : > { %1248 = vst [vmem:[#allocation24 + $0xd8] sm:$0xff] %v1240_v10  ;;  %v8230_v30 = vld [vmem:[#allocation24 + $0x134] sm:$0xf0]  ;;  %v6884_v38 = vld [vmem:[#allocation24 + $0x138] sm:$0xf0] }
 0x215   : > { %1499 = vst [vmem:[#allocation24 + $0x170] sm:$0xff] %v1491_v2  ;;  %v6883_v45 = vor.u32 %v8230_v30, %v6882_v21  ;;  %v6887_v13 = vor.u32 %v8226_v31, %v6884_v38  ;;  %v6786_v31 = vld [vmem:[#allocation24 + $0x58] sm:$0xf] }
 0x216   : > { %v1198_v18 = vpop.permute.xlu1 %1197  ;;  %v6787_v30 = vor.u32 %v8206_v6, %v6786_v31  ;;  %v8302_v6 = vld [vmem:[#allocation8 + $0x174] sm:$0xf0]  ;;  %v8268_v31 = vld [vmem:[#allocation8 + $0x64] sm:$0xf0] }
 0x217   : > { %v1207_v17 = vsel %vm1199_vm14, %v1198_v18, %v11185_v23  ;;  %2215 = vmatpush.bf16.msrb.mxu2 %v6883_v45  ;;  %2228 = vmatpush.bf16.msrb.mxu3 %v6887_v13  ;;  %v1196_v54 = vpop.permute.xlu0 %1195  ;;  %v1164_v23 = vperm.slane %v11052_v0, 5 }
 0x218   : > { %v1236_v11 = vmul.f32 %v1220_v1, %v1207_v17  ;;  %v1200_v61 = vsel %vm1199_vm14, %v1196_v54, %v1198_v18  ;;  %v1201_v36 = vsel %vm1199_vm14, %v1194_v4, %v1196_v54  ;;  %v8202_v1 = vld [vmem:[#allocation24 + $0x5c] sm:$0xf] }
 0x219   : > { %v1234_v39 = vmul.f32 %v1218_v60, %v1201_v36  ;;  %v1235_v51 = vmul.f32 %v1219_v9, %v1200_v61  ;;  %v6791_v38 = vor.u32 %v8202_v1, %v6788_v3  ;;  %v8198_v60 = vld [vmem:[#allocation24 + $0x34] sm:$0xf0]  ;;  %v6756_v9 = vld [vmem:[#allocation24 + $0x38] sm:$0xf0]  ;;  %v7098_v1 = vld [vmem:[#allocation8 + $0xe0] sm:$0xf] }
 0x21a   : > { %v8194_v61 = vld [vmem:[#allocation24 + $0x1c] sm:$0xf] }
 0x21b   : > { %v1243_v20 = vpack.c.bf16 %v1234_v39, %v1233_v28  ;;  %v1244_v35 = vpack.c.bf16 %v1236_v11, %v1235_v51  ;;  %v6850_v53 = vld [vmem:[#allocation24 + $0xd8] sm:$0xf]  ;;  %v6759_v28 = vor.u32 %v8194_v61, %v6756_v9  ;;  %v8213_v39 = vld [vmem:[#allocation24 + $0xac] sm:$0xf0]  ;;  %v7226_v9 = vld [vmem:[#allocation8 + $0x1e0] sm:$0xf] }
 0x21c   : > { %v8237_v40 = vld [vmem:[#allocation24 + $0x16c] sm:$0xf0]  ;;  %v6908_v16 = vld [vmem:[#allocation24 + $0x170] sm:$0xf0]  ;;  %v6754_v11 = vld [vmem:[#allocation24 + $0x18] sm:$0xf] }
 0x21d   : > { %1251 = vst [vmem:[#allocation24 + $0xf0] sm:$0xff] %v1243_v20  ;;  %v6907_v57 = vor.u32 %v8237_v40, %v6906_v8  ;;  %v6911_v22 = vor.u32 %v8233_v25, %v6908_v16  ;;  %v6755_v36 = vor.u32 %v8198_v60, %v6754_v11  ;;  %v6810_v51 = vld [vmem:[#allocation24 + $0x90] sm:$0xf]  ;;  %v8209_v20 = vld [vmem:[#allocation24 + $0x94] sm:$0xf] }
 0x21e   : > { %1252 = vst [vmem:[#allocation24 + $0xf8] sm:$0xff] %v1244_v35  ;;  %v1140_v62 = vpop.permute.xlu1 %1139  ;;  %v6812_v35 = vld [vmem:[#allocation24 + $0xb0] sm:$0xf0]  ;;  %v6811_v8 = vor.u32 %v8213_v39, %v6810_v51  ;;  %v6778_v40 = vld [vmem:[#allocation24 + $0x50] sm:$0xf] }
 0x21f   : > { %v1147_v49 = vsel %vm1145_vm13, %v1140_v62, %v1142_v56  ;;  %v1148_v24 = vsel %vm1145_vm13, %v11073_v29, %v1140_v62  ;;  %2188 = vmatpush.bf16.msrb.mxu0 %v6907_v57  ;;  %2201 = vmatpush.bf16.msrb.mxu1 %v6911_v22  ;;  %v1318_v0 = vpop.permute.xlu0 %1317  ;;  %v8218_v29 = vld [vmem:[#allocation24 + $0xdc] sm:$0xf]  ;;  %v6815_v25 = vor.u32 %v8209_v20, %v6812_v35  ;;  %v8201_v16 = vld [vmem:[#allocation24 + $0x54] sm:$0xf]  ;;  %v6746_v62 = vld [vmem:[#allocation24 + $0x10] sm:$0xf] }
 0x220   : > { %v1179_v63 = vmul.f32 %v1163_v27, %v1148_v24  ;;  %v1180_v59 = vmul.f32 %v1164_v23, %v1147_v49  ;;  %v1325_v19 = vsel %vm1323_vm12, %v1318_v0, %v11259_v46  ;;  %v1326_v55 = vsel %vm1323_vm12, %v10918_v37, %v1318_v0  ;;  %v6820_v46 = vld [vmem:[#allocation24 + $0xb8] sm:$0xf0]  ;;  %v8205_v27 = vld [vmem:[#allocation24 + $0x6c] sm:$0xf0]  ;;  %v6780_v23 = vld [vmem:[#allocation24 + $0x70] sm:$0xf0] }
 0x221   : > { %v1357_v14 = vmul.f32 %v1341_v7, %v1326_v55  ;;  %v1358_v48 = vmul.f32 %v1342_v43, %v1325_v19  ;;  %v6823_v37 = vor.u32 %v8210_v5, %v6820_v46  ;;  %v6779_v57 = vor.u32 %v8205_v27, %v6778_v40  ;;  %v8197_v7 = vld [vmem:[#allocation24 + $0x2c] sm:$0xf0]  ;;  %v6748_v43 = vld [vmem:[#allocation24 + $0x30] sm:$0xf0]  ;;  %v8270_v5 = vld [vmem:[#allocation8 + $0x74] sm:$0xf0] }
 0x222   : > { %v1239_v50 = vpack.c.bf16 %v1180_v59, %v1179_v63  ;;  %v6783_v22 = vor.u32 %v8201_v16, %v6780_v23  ;;  %v8193_v49 = vld [vmem:[#allocation24 + $0x14] sm:$0xf]  ;;  %v6747_v24 = vor.u32 %v8197_v7, %v6746_v62  ;;  %v8300_v60 = vld [vmem:[#allocation8 + $0x164] sm:$0xf0]  ;;  %v8298_v51 = vld [vmem:[#allocation8 + $0x154] sm:$0xf0] }
 0x223   : > { %v1367_v58 = vpack.c.bf16 %v1358_v48, %v1357_v14  ;;  %v6751_v0 = vor.u32 %v8193_v49, %v6748_v43  ;;  %v7106_v46 = vld [vmem:[#allocation8 + $0xf0] sm:$0xf]  ;;  %v8314_v35 = vld [vmem:[#allocation8 + $0x1d4] sm:$0xf0]  ;;  %v7018_v27 = vld [vmem:[#allocation8 + $0x40] sm:$0xf] }
 0x224   : > { %1247 = vst [vmem:[#allocation24 + $0xd0] sm:$0xff] %v1239_v50  ;;  %v8221_v34 = vld [vmem:[#allocation24 + $0xec] sm:$0xf0]  ;;  %v6844_v18 = vld [vmem:[#allocation24 + $0xf0] sm:$0xf0] }
 0x225   : > { %1375 = vst [vmem:[#allocation24 + $0x130] sm:$0xff] %v1367_v58  ;;  %v8222_v56 = vld [vmem:[#allocation24 + $0xf4] sm:$0xf0]  ;;  %v6852_v44 = vld [vmem:[#allocation24 + $0xf8] sm:$0xf0] }
 0x226   : > { %v6851_v33 = vor.u32 %v8222_v56, %v6850_v53  ;;  %v6855_v32 = vor.u32 %v8218_v29, %v6852_v44  ;;  %v7090_v61 = vld [vmem:[#allocation8 + $0xd0] sm:$0xf]  ;;  %v8264_v23 = vld [vmem:[#allocation8 + $0x44] sm:$0xf0]  ;;  %v7082_v40 = vld [vmem:[#allocation8 + $0xc0] sm:$0xf] }
 0x227   : > { %v7218_v20 = vld [vmem:[#allocation8 + $0x1d0] sm:$0xf]  ;;  %v8296_v7 = vld [vmem:[#allocation8 + $0x144] sm:$0xf0]  ;;  %v7210_v43 = vld [vmem:[#allocation8 + $0x1c0] sm:$0xf]  ;;  %v7019_v49 = vor.u32 %v8264_v23, %v7018_v27 }
 0x228   : > { %2216 = vmatpush.bf16.msrb.mxu2 %v6851_v33  ;;  %2229 = vmatpush.bf16.msrb.mxu3 %v6855_v32  ;;  %v7219_v16 = vor.u32 %v8314_v35, %v7218_v20  ;;  %v8312_v62 = vld [vmem:[#allocation8 + $0x1c4] sm:$0xf0]  ;;  %v7114_v35 = vld [vmem:[#allocation8 + $0x100] sm:$0xf] }
 0x229   : > { %v8272_v20 = vld [vmem:[#allocation8 + $0x84] sm:$0xf0]  ;;  %v7178_v27 = vld [vmem:[#allocation8 + $0x180] sm:$0xf] }
 0x22a   : > { %v8304_v23 = vld [vmem:[#allocation8 + $0x184] sm:$0xf0] }
 0x22b   : > { %v6842_v45 = vld [vmem:[#allocation24 + $0xd0] sm:$0xf]  ;;  %v8217_v13 = vld [vmem:[#allocation24 + $0xd4] sm:$0xf] }
 0x22c   : > { %2217 = vmatpush.bf16.msrb.mxu2 %v6819_v26  ;;  %2230 = vmatpush.bf16.msrb.mxu3 %v6823_v37  ;;  %v8229_v10 = vld [vmem:[#allocation24 + $0x12c] sm:$0xf0]  ;;  %v6876_v4 = vld [vmem:[#allocation24 + $0x130] sm:$0xf0]  ;;  %v6843_v17 = vor.u32 %v8221_v34, %v6842_v45  ;;  %v6847_v54 = vor.u32 %v8217_v13, %v6844_v18  ;;  %v7043_v26 = vor.u32 %v8270_v5, %v7042_v41  ;;  %v8286_v37 = vld [vmem:[#allocation8 + $0xf4] sm:$0xf0] }
 0x22d   : > { %v6875_v2 = vor.u32 %v8229_v10, %v6874_v42  ;;  %v6879_v21 = vor.u32 %v8225_v12, %v6876_v4  ;;  %v7170_v42 = vld [vmem:[#allocation8 + $0x170] sm:$0xf]  ;;  %v7107_v3 = vor.u32 %v8286_v37, %v7106_v46  ;;  %v8318_v4 = vld [vmem:[#allocation8 + $0x1f4] sm:$0xf0]  ;;  %v7162_v13 = vld [vmem:[#allocation8 + $0x160] sm:$0xf] }
 0x22e   : > { %v7171_v10 = vor.u32 %v8302_v6, %v7170_v42  ;;  %v7234_v12 = vld [vmem:[#allocation8 + $0x1f0] sm:$0xf]  ;;  %v7163_v34 = vor.u32 %v8300_v60, %v7162_v13  ;;  %v8316_v18 = vld [vmem:[#allocation8 + $0x1e4] sm:$0xf0]  ;;  %v8310_v41 = vld [vmem:[#allocation8 + $0x1b4] sm:$0xf0] }
 0x22f   : > { %2189 = vmatpush.bf16.msrb.mxu0 %v6875_v2  ;;  %2202 = vmatpush.bf16.msrb.mxu1 %v6879_v21  ;;  %v7034_v2 = vld [vmem:[#allocation8 + $0x60] sm:$0xf]  ;;  %v7235_v21 = vor.u32 %v8318_v4, %v7234_v12  ;;  %v7227_v11 = vor.u32 %v8316_v18, %v7226_v9  ;;  %v8260_v42 = vld [vmem:[#allocation8 + $0x24] sm:$0xf0]  ;;  %v7058_v13 = vld [vmem:[#allocation8 + $0x90] sm:$0xf] }
 0x230   : > { %2218 = vmatpush.bf16.msrb.mxu2 %v6787_v30  ;;  %2231 = vmatpush.bf16.msrb.mxu3 %v6791_v38  ;;  %v8284_v30 = vld [vmem:[#allocation8 + $0xe4] sm:$0xf0]  ;;  %v7035_v38 = vor.u32 %v8268_v31, %v7034_v2  ;;  %v7002_v37 = vld [vmem:[#allocation8 + $0x20] sm:$0xf]  ;;  %v8274_v9 = vld [vmem:[#allocation8 + $0x94] sm:$0xf0] }
 0x231   : > { %v7099_v45 = vor.u32 %v8284_v30, %v7098_v1  ;;  %v7066_v6 = vld [vmem:[#allocation8 + $0xa0] sm:$0xf]  ;;  %v8292_v4 = vld [vmem:[#allocation8 + $0x124] sm:$0xf0]  ;;  %v7003_v31 = vor.u32 %v8260_v42, %v7002_v37  ;;  %v8290_v18 = vld [vmem:[#allocation8 + $0x114] sm:$0xf0] }
 0x232   : > { %v7130_v12 = vld [vmem:[#allocation8 + $0x120] sm:$0xf] }
 0x233   : > { %2190 = vmatpush.bf16.msrb.mxu0 %v6843_v17  ;;  %2203 = vmatpush.bf16.msrb.mxu1 %v6847_v54  ;;  %v7026_v17 = vld [vmem:[#allocation8 + $0x50] sm:$0xf]  ;;  %v8266_v54 = vld [vmem:[#allocation8 + $0x54] sm:$0xf0]  ;;  %v7194_v2 = vld [vmem:[#allocation8 + $0x1a0] sm:$0xf]  ;;  %v7131_v30 = vor.u32 %v8292_v4, %v7130_v12 }
 0x234   : > { %2219 = vmatpush.bf16.msrb.mxu2 %v6755_v36  ;;  %2232 = vmatpush.bf16.msrb.mxu3 %v6759_v28  ;;  %v8282_v36 = vld [vmem:[#allocation8 + $0xd4] sm:$0xf0]  ;;  %v7154_v28 = vld [vmem:[#allocation8 + $0x150] sm:$0xf]  ;;  %v7027_v39 = vor.u32 %v8266_v54, %v7026_v17  ;;  %v7482_v42 = vld [vmem:[#allocation8 + $0x3e0] sm:$0xf] }
 0x235   : > { %v7186_v17 = vld [vmem:[#allocation8 + $0x190] sm:$0xf]  ;;  %v8306_v54 = vld [vmem:[#allocation8 + $0x194] sm:$0xf0] }
 0x237   : > { %2220 = vmatmul.bf16.vlgmr.msrb.gmra.mxu2 %v11252_v52  ;;  %2233 = vmatmul.bf16.vlgmr.msrb.gmra.mxu3 %v11252_v52 }
 0x238   : > { %2191 = vmatpush.bf16.msrb.mxu0 %v6811_v8  ;;  %2204 = vmatpush.bf16.msrb.mxu1 %v6815_v25  ;;  %v7091_v8 = vor.u32 %v8282_v36, %v7090_v61  ;;  %v7155_v25 = vor.u32 %v8298_v51, %v7154_v28  ;;  %v6986_v61 = vld [vmem:[#allocation8] sm:$0xf]  ;;  %v8256_v36 = vld [vmem:[#allocation8 + $0x4] sm:$0xf0]  ;;  %v7059_v28 = vor.u32 %v8274_v9, %v7058_v13  ;;  %v8378_v13 = vld [vmem:[#allocation8 + $0x3d4] sm:$0xf0] }
 0x239   : > { %3046 = vmatpush.bf16.msra.mxu2 %v7171_v10  ;;  %3059 = vmatpush.bf16.msra.mxu3 %v7235_v21  ;;  %v8276_v10 = vld [vmem:[#allocation8 + $0xa4] sm:$0xf0]  ;;  %v7050_v51 = vld [vmem:[#allocation8 + $0x80] sm:$0xf] }
 0x23a   : > { %v8308_v21 = vld [vmem:[#allocation8 + $0x1a4] sm:$0xf0]  ;;  %v7067_v1 = vor.u32 %v8276_v10, %v7066_v6 }
 0x23b   : > { %v7195_v60 = vor.u32 %v8308_v21, %v7194_v2  ;;  %v8380_v6 = vld [vmem:[#allocation8 + $0x3e4] sm:$0xf0]  ;;  %v7282_v21 = vld [vmem:[#allocation8 + $0x250] sm:$0xf] }
 0x23c   : > { %2192 = vmatpush.bf16.msrb.mxu0 %v6779_v57  ;;  %2205 = vmatpush.bf16.msrb.mxu1 %v6783_v22  ;;  %v8280_v57 = vld [vmem:[#allocation8 + $0xc4] sm:$0xf0]  ;;  %v7146_v22 = vld [vmem:[#allocation8 + $0x140] sm:$0xf] }
 0x23d   : > { %3047 = vmatpush.bf16.msra.mxu2 %v7163_v34  ;;  %3060 = vmatpush.bf16.msra.mxu3 %v7227_v11  ;;  %v7122_v34 = vld [vmem:[#allocation8 + $0x110] sm:$0xf] }
 0x240   : > { %2193 = vmatpush.bf16.msrb.mxu0 %v6747_v24  ;;  %2206 = vmatpush.bf16.msrb.mxu1 %v6751_v0  ;;  %v7083_v24 = vor.u32 %v8280_v57, %v7082_v40  ;;  %v7147_v0 = vor.u32 %v8296_v7, %v7146_v22  ;;  %v7298_v40 = vld [vmem:[#allocation8 + $0x270] sm:$0xf]  ;;  %v6987_v22 = vor.u32 %v8256_v36, %v6986_v61  ;;  %v8350_v7 = vld [vmem:[#allocation8 + $0x2f4] sm:$0xf0]  ;;  %v7402_v61 = vld [vmem:[#allocation8 + $0x340] sm:$0xf] }
 0x241   : > { %3048 = vmatpush.bf16.msra.mxu2 %v7155_v25  ;;  %3061 = vmatpush.bf16.msra.mxu3 %v7219_v16  ;;  %v8288_v25 = vld [vmem:[#allocation8 + $0x104] sm:$0xf0]  ;;  %v8334_v16 = vld [vmem:[#allocation8 + $0x274] sm:$0xf0]  ;;  %v7362_v57 = vld [vmem:[#allocation8 + $0x2f0] sm:$0xf] }
 0x242   : > { %v8360_v36 = vld [vmem:[#allocation8 + $0x344] sm:$0xf0] }
 0x243   : > { %2194 = vmatmul.bf16.vlgmr.msrb.gmra.mxu0 %v11252_v52  ;;  %2207 = vmatmul.bf16.vlgmr.msrb.gmra.mxu1 %v11252_v52 }
 0x244   : > { %3020 = vmatpush.bf16.msra.mxu0 %v7043_v26  ;;  %3033 = vmatpush.bf16.msra.mxu1 %v7107_v3 }
 0x245   : > { %3049 = vmatpush.bf16.msra.mxu2 %v7147_v0  ;;  %v7490_v0 = vld [vmem:[#allocation8 + $0x3f0] sm:$0xf] }
 0x248   : > { %3021 = vmatpush.bf16.msra.mxu0 %v7035_v38  ;;  %3034 = vmatpush.bf16.msra.mxu1 %v7099_v45  ;;  %v6994_v38 = vld [vmem:[#allocation8 + $0x10] sm:$0xf]  ;;  %v8258_v45 = vld [vmem:[#allocation8 + $0x14] sm:$0xf0] }
 0x249   : > { %v6995_v11 = vor.u32 %v8258_v45, %v6994_v38  ;;  %v7410_v38 = vld [vmem:[#allocation8 + $0x350] sm:$0xf] }
 0x24a   : > { %v7474_v45 = vld [vmem:[#allocation8 + $0x3d0] sm:$0xf] }
 0x24c   : > { %3022 = vmatpush.bf16.msra.mxu0 %v7027_v39  ;;  %3035 = vmatpush.bf16.msra.mxu1 %v7091_v8  ;;  %v7123_v39 = vor.u32 %v8290_v18, %v7122_v34  ;;  %v7187_v8 = vor.u32 %v8306_v54, %v7186_v17  ;;  %v7274_v34 = vld [vmem:[#allocation8 + $0x240] sm:$0xf]  ;;  %v8328_v18 = vld [vmem:[#allocation8 + $0x244] sm:$0xf0]  ;;  %v7475_v54 = vor.u32 %v8378_v13, %v7474_v45 }
 0x24d   : > { %v7338_v17 = vld [vmem:[#allocation8 + $0x2c0] sm:$0xf] }
 0x250   : > { %3023 = vmatpush.bf16.msra.mxu0 %v7019_v49  ;;  %3036 = vmatpush.bf16.msra.mxu1 %v7083_v24  ;;  %v7051_v49 = vor.u32 %v8272_v20, %v7050_v51  ;;  %v7115_v24 = vor.u32 %v8288_v25, %v7114_v35  ;;  %v7275_v51 = vor.u32 %v8328_v18, %v7274_v34  ;;  %v8326_v25 = vld [vmem:[#allocation8 + $0x234] sm:$0xf0]  ;;  %v8352_v18 = vld [vmem:[#allocation8 + $0x304] sm:$0xf0] }
 0x251   : > { %v7403_v35 = vor.u32 %v8360_v36, %v7402_v61  ;;  %v7044_v61 = vld [vmem:[#allocation8 + $0x78] sm:$0xf0]  ;;  %v8285_v36 = vld [vmem:[#allocation8 + $0xf4] sm:$0xf] }
 0x277   : > { %v11320_v19 = vpop.f32.mrf.mxu2  ;;  %v11322_v55 = vpop.f32.mrf.mxu3 }
 0x278   : > { %v11334_v37 = vpack.c.bf16 %v11320_v19, %v11320_v19  ;;  %v11342_v10 = vpack.c.bf16 %v11322_v55, %v11322_v55  ;;  %v8362_v55 = vld [vmem:[#allocation8 + $0x354] sm:$0xf0] }
 0x279   : > { %v7411_v9 = vor.u32 %v8362_v55, %v7410_v38  ;;  %v7242_v38 = vld [vmem:[#allocation8 + $0x200] sm:$0xf]  ;;  %v8320_v55 = vld [vmem:[#allocation8 + $0x204] sm:$0xf0] }
 0x27f   : > { %v2171_v50 = vpop.f32.mrf.mxu2  ;;  %v2184_v58 = vpop.f32.mrf.mxu3 }
 0x280   : > { %v7074_v50 = vld [vmem:[#allocation8 + $0xb0] sm:$0xf]  ;;  %v7211_v58 = vor.u32 %v8312_v62, %v7210_v43  ;;  %v8366_v62 = vld [vmem:[#allocation8 + $0x374] sm:$0xf0] }
 0x281   : > { %v7426_v43 = vld [vmem:[#allocation8 + $0x370] sm:$0xf] }
 0x282   : > { %3062 = vmatpush.bf16.msra.mxu3 %v7211_v58  ;;  %v7363_v58 = vor.u32 %v8350_v7, %v7362_v57  ;;  %v8358_v57 = vld [vmem:[#allocation8 + $0x334] sm:$0xf0] }
 0x283   : > { %v11316_v63 = vpop.f32.mrf.mxu0  ;;  %v11318_v59 = vpop.f32.mrf.mxu1  ;;  %v8374_v7 = vld [vmem:[#allocation8 + $0x3b4] sm:$0xf0] }
 0x284   : > { %v11346_v4 = vpack.c.bf16 %v11318_v59, %v11318_v59 }
 0x28b   : > { %v2145_v14 = vpop.f32.mrf.mxu0  ;;  %v2158_v48 = vpop.f32.mrf.mxu1 }
 0x28c   : > { %v7010_v14 = vld [vmem:[#allocation8 + $0x30] sm:$0xf]  ;;  %v8262_v48 = vld [vmem:[#allocation8 + $0x34] sm:$0xf0] }
 0x28d   : > { %v7011_v5 = vor.u32 %v8262_v48, %v7010_v14  ;;  %v8382_v14 = vld [vmem:[#allocation8 + $0x3f4] sm:$0xf0]  ;;  %v7179_v48 = vor.u32 %v8304_v23, %v7178_v27  ;;  %v7330_v27 = vld [vmem:[#allocation8 + $0x2b0] sm:$0xf] }
 0x28f   : > { %3024 = vmatpush.bf16.msra.mxu0 %v7011_v5  ;;  %v8348_v5 = vld [vmem:[#allocation8 + $0x2e4] sm:$0xf0] }
 0x293   : > { %3025 = vmatpush.bf16.msra.mxu0 %v7003_v31  ;;  %v8330_v31 = vld [vmem:[#allocation8 + $0x254] sm:$0xf0] }
 0x294   : > { %v7283_v59 = vor.u32 %v8330_v31, %v7282_v21  ;;  %v7378_v21 = vld [vmem:[#allocation8 + $0x310] sm:$0xf]  ;;  %v8354_v31 = vld [vmem:[#allocation8 + $0x314] sm:$0xf0] }
 0x295   : > { %v7379_v13 = vor.u32 %v8354_v31, %v7378_v21  ;;  %v8263_v31 = vld [vmem:[#allocation8 + $0x44] sm:$0xf] }
 0x297   : > { %3026 = vmatpush.bf16.msra.mxu0 %v6995_v11  ;;  %v8344_v11 = vld [vmem:[#allocation8 + $0x2c4] sm:$0xf0] }
 0x298   : > { %v7339_v20 = vor.u32 %v8344_v11, %v7338_v17  ;;  %v7434_v17 = vld [vmem:[#allocation8 + $0x380] sm:$0xf]  ;;  %v8269_v11 = vld [vmem:[#allocation8 + $0x74] sm:$0xf] }
 0x29b   : > { %3027 = vmatpush.bf16.msra.mxu0 %v6987_v22  ;;  %v7458_v22 = vld [vmem:[#allocation8 + $0x3b0] sm:$0xf] }
 0x2ba   : > { %v11324_v53 = vpop.f32.mrf.mxu2  ;;  %v11326_v29 = vpop.f32.mrf.mxu3 }
 0x2c0   : > { %v11328_v56 = vpop.f32.mrf.mxu0  ;;  %v11330_v44 = vpop.f32.mrf.mxu1 }
 0x2c2   : > { %v2223_v52 = vpop.f32.mrf.mxu2  ;;  %v2236_v33 = vpop.f32.mrf.mxu3 }
 0x2c3   : > { %v8278_v52 = vld [vmem:[#allocation8 + $0xb4] sm:$0xf0]  ;;  %v7138_v33 = vld [vmem:[#allocation8 + $0x130] sm:$0xf] }
 0x2c4   : > { %v7075_v46 = vor.u32 %v8278_v52, %v7074_v50  ;;  %v7299_v50 = vor.u32 %v8334_v16, %v7298_v40  ;;  %v7427_v52 = vor.u32 %v8366_v62, %v7426_v43  ;;  %v8342_v40 = vld [vmem:[#allocation8 + $0x2b4] sm:$0xf0]  ;;  %v7394_v16 = vld [vmem:[#allocation8 + $0x330] sm:$0xf] }
 0x2c5   : > { %v7331_v62 = vor.u32 %v8342_v40, %v7330_v27  ;;  %v7236_v27 = vld [vmem:[#allocation8 + $0x1f8] sm:$0xf0]  ;;  %v7047_v40 = vor.u32 %v8269_v11, %v7044_v61 }
 0x2c6   : > { %3037 = vmatpush.bf16.msra.mxu1 %v7075_v46  ;;  %v7418_v46 = vld [vmem:[#allocation8 + $0x360] sm:$0xf]  ;;  %3072 = vmatpush.bf16.msrb.mxu0 %v7299_v50  ;;  %v8340_v50 = vld [vmem:[#allocation8 + $0x2a4] sm:$0xf0]  ;;  %v7076_v61 = vld [vmem:[#allocation8 + $0xb8] sm:$0xf0] }
 0x2c8   : > { %v2197_v32 = vpop.f32.mrf.mxu0  ;;  %v2210_v47 = vpop.f32.mrf.mxu1 }
 0x2c9   : > { %v8294_v32 = vld [vmem:[#allocation8 + $0x134] sm:$0xf0]  ;;  %v7202_v47 = vld [vmem:[#allocation8 + $0x1b0] sm:$0xf] }
 0x2ca   : > { %v7139_v26 = vor.u32 %v8294_v32, %v7138_v33  ;;  %v7203_v3 = vor.u32 %v8310_v41, %v7202_v47  ;;  %3038 = vmatpush.bf16.msra.mxu1 %v7067_v1  ;;  %v7290_v33 = vld [vmem:[#allocation8 + $0x260] sm:$0xf]  ;;  %v8332_v32 = vld [vmem:[#allocation8 + $0x264] sm:$0xf0]  ;;  %v7491_v41 = vor.u32 %v8382_v14, %v7490_v0  ;;  %v7346_v1 = vld [vmem:[#allocation8 + $0x2d0] sm:$0xf] }
 0x2cb   : > { %v7354_v47 = vld [vmem:[#allocation8 + $0x2e0] sm:$0xf]  ;;  %v7291_v12 = vor.u32 %v8332_v32, %v7290_v33  ;;  %v8324_v0 = vld [vmem:[#allocation8 + $0x224] sm:$0xf0] }
 0x2cc   : > { %3050 = vmatpush.bf16.msra.mxu2 %v7139_v26  ;;  %3063 = vmatpush.bf16.msra.mxu3 %v7203_v3  ;;  %v8364_v26 = vld [vmem:[#allocation8 + $0x364] sm:$0xf0]  ;;  %v11338_v3 = vpack.c.bf16 %v11316_v63, %v11316_v63  ;;  %v7355_v19 = vor.u32 %v8348_v5, %v7354_v47  ;;  %v7483_v63 = vor.u32 %v8380_v6, %v7482_v42  ;;  %v7322_v14 = vld [vmem:[#allocation8 + $0x2a0] sm:$0xf]  ;;  %v2374_v47 = vld [vmem:[%s12061_s30] sm:$0xff]  ;;  %v10001_v5 = vmov 0  }
 0x2cd   : > { %v7419_v2 = vor.u32 %v8364_v26, %v7418_v46  ;;  %3073 = vmatpush.bf16.msrb.mxu0 %v7291_v12  ;;  %v7450_v33 = vld [vmem:[#allocation8 + $0x3a0] sm:$0xf]  ;;  %v8372_v32 = vld [vmem:[#allocation8 + $0x3a4] sm:$0xf0]  ;;  %9464 = vset.pattern.permute.xlu0 %v10001_v5  ;;  %v7323_v46 = vor.u32 %v8340_v50, %v7322_v14  ;;  %v7250_v42 = vld [vmem:[#allocation8 + $0x210] sm:$0xf] }
 0x2ce   : > { %3039 = vmatpush.bf16.msra.mxu1 %v7059_v28  ;;  %3028 = vmatmul.bf16.vlgmr.msra.gmra.mxu0 %v11338_v3  ;;  %v7466_v28 = vld [vmem:[#allocation8 + $0x3c0] sm:$0xf]  ;;  %v8322_v6 = vld [vmem:[#allocation8 + $0x214] sm:$0xf0]  ;;  %v7314_v12 = vld [vmem:[#allocation8 + $0x290] sm:$0xf] }
 0x2cf   : > { %2377 = vperm.xlu0 %9464, %v2374_v47   ;;  %v7164_v14 = vld [vmem:[#allocation8 + $0x168] sm:$0xf0] }
 0x2d0   : > { %3051 = vmatpush.bf16.msra.mxu2 %v7131_v30  ;;  %3064 = vmatpush.bf16.msra.mxu3 %v7195_v60  ;;  %v8346_v30 = vld [vmem:[#allocation8 + $0x2d4] sm:$0xf0]  ;;  %v7228_v50 = vld [vmem:[#allocation8 + $0x1e8] sm:$0xf0] }
 0x2d1   : > { %v7347_v60 = vor.u32 %v8346_v30, %v7346_v1  ;;  %3074 = vmatpush.bf16.msrb.mxu0 %v7283_v59  ;;  %v7442_v1 = vld [vmem:[#allocation8 + $0x390] sm:$0xf]  ;;  %v7251_v30 = vor.u32 %v8322_v6, %v7250_v42  ;;  %v7306_v59 = vld [vmem:[#allocation8 + $0x280] sm:$0xf]  ;;  %v8297_v42 = vld [vmem:[#allocation8 + $0x154] sm:$0xf] }
 0x2d2   : > { %3040 = vmatpush.bf16.msra.mxu1 %v7051_v49  ;;  %v7395_v49 = vor.u32 %v8358_v57, %v7394_v16  ;;  %v7156_v6 = vld [vmem:[#allocation8 + $0x158] sm:$0xf0] }
 0x2d3   : > { %v7159_v21 = vor.u32 %v8297_v42, %v7156_v6  ;;  %v6988_v42 = vld [vmem:[#allocation8 + $0x8] sm:$0xf0] }
 0x2d4   : > { %3052 = vmatpush.bf16.msra.mxu2 %v7123_v39  ;;  %3065 = vmatpush.bf16.msra.mxu3 %v7187_v8  ;;  %v8376_v39 = vld [vmem:[#allocation8 + $0x3c4] sm:$0xf0]  ;;  %v7266_v8 = vld [vmem:[#allocation8 + $0x230] sm:$0xf] }
 0x2d5   : > { %3041 = vmatmul.bf16.vlgmr.msra.gmra.mxu1 %v11346_v4  ;;  %v7467_v23 = vor.u32 %v8376_v39, %v7466_v28  ;;  %3075 = vmatpush.bf16.msrb.mxu0 %v7275_v51  ;;  %v7267_v43 = vor.u32 %v8326_v25, %v7266_v8  ;;  %v7243_v28 = vor.u32 %v8320_v55, %v7242_v38  ;;  %v7108_v39 = vld [vmem:[#allocation8 + $0xf8] sm:$0xf0]  ;;  %v8301_v51 = vld [vmem:[#allocation8 + $0x174] sm:$0xf]  ;;  %v7084_v38 = vld [vmem:[#allocation8 + $0xc8] sm:$0xf0] }
 0x2d6   : > { %3085 = vmatpush.bf16.msrb.mxu1 %v7363_v58  ;;  %v7386_v58 = vld [vmem:[#allocation8 + $0x320] sm:$0xf]  ;;  %v8317_v25 = vld [vmem:[#allocation8 + $0x1f4] sm:$0xf]  ;;  %v7111_v16 = vor.u32 %v8285_v36, %v7108_v39  ;;  %v8295_v55 = vld [vmem:[#allocation8 + $0x144] sm:$0xf] }
 0x2d7   : > { %v8293_v36 = vld [vmem:[#allocation8 + $0x134] sm:$0xf] }
 0x2d8   : > { %3053 = vmatpush.bf16.msra.mxu2 %v7115_v24  ;;  %3066 = vmatpush.bf16.msra.mxu3 %v7179_v48  ;;  %v7258_v24 = vld [vmem:[#allocation8 + $0x220] sm:$0xf]  ;;  %v7459_v48 = vor.u32 %v8374_v7, %v7458_v22  ;;  %v8267_v22 = vld [vmem:[#allocation8 + $0x64] sm:$0xf]  ;;  %v7036_v7 = vld [vmem:[#allocation8 + $0x68] sm:$0xf0] }
 0x2d9   : > { %3076 = vmatpush.bf16.msrb.mxu0 %v7267_v43  ;;  %v8283_v43 = vld [vmem:[#allocation8 + $0xe4] sm:$0xf]  ;;  %v8309_v39 = vld [vmem:[#allocation8 + $0x1b4] sm:$0xf] }
 0x2da   : > { %3086 = vmatpush.bf16.msrb.mxu1 %v7355_v19  ;;  %v7451_v19 = vor.u32 %v8372_v32, %v7450_v33  ;;  %v7039_v33 = vor.u32 %v8267_v22, %v7036_v7  ;;  %v7132_v22 = vld [vmem:[#allocation8 + $0x128] sm:$0xf0]  ;;  %v8307_v7 = vld [vmem:[#allocation8 + $0x1a4] sm:$0xf] }
 0x2db   : > { %3054 = vmatmul.bf16.vlgmr.msra.gmra.mxu2 %v11334_v37  ;;  %3067 = vmatmul.bf16.vlgmr.msra.gmra.mxu3 %v11342_v10 }
 0x2dc   : > { %3098 = vmatpush.bf16.msrb.mxu2 %v7427_v52  ;;  %3111 = vmatpush.bf16.msrb.mxu3 %v7491_v41  ;;  %v8356_v52 = vld [vmem:[#allocation8 + $0x324] sm:$0xf0]  ;;  %v7259_v41 = vor.u32 %v8324_v0, %v7258_v24  ;;  %v7100_v24 = vld [vmem:[#allocation8 + $0xe8] sm:$0xf0]  ;;  %v8299_v0 = vld [vmem:[#allocation8 + $0x164] sm:$0xf] }
 0x2dd   : > { %v7387_v26 = vor.u32 %v8356_v52, %v7386_v58  ;;  %v11362_v58 = vpack.c.bf16 %v11328_v56, %v11328_v56  ;;  %v11366_v52 = vpack.c.bf16 %v11326_v29, %v11326_v29  ;;  %v7103_v32 = vor.u32 %v8283_v43, %v7100_v24  ;;  %v7092_v29 = vld [vmem:[#allocation8 + $0xd8] sm:$0xf0]  ;;  %v7196_v43 = vld [vmem:[#allocation8 + $0x1a8] sm:$0xf0] }
 0x2de   : > { %3087 = vmatpush.bf16.msrb.mxu1 %v7347_v60  ;;  %3077 = vmatpush.bf16.msrb.mxu0 %v7259_v41  ;;  %v8336_v60 = vld [vmem:[#allocation8 + $0x284] sm:$0xf0]  ;;  %v7167_v47 = vor.u32 %v8299_v0, %v7164_v14  ;;  %v8265_v41 = vld [vmem:[#allocation8 + $0x54] sm:$0xf] }
 0x2df   : > { %v8257_v14 = vld [vmem:[#allocation8 + $0x14] sm:$0xf] }
 0x2e0   : > { %3099 = vmatpush.bf16.msrb.mxu2 %v7419_v2  ;;  %3112 = vmatpush.bf16.msrb.mxu3 %v7483_v63  ;;  %v8338_v2 = vld [vmem:[#allocation8 + $0x294] sm:$0xf0] }
 0x2e1   : > { %v8370_v63 = vld [vmem:[#allocation8 + $0x394] sm:$0xf0]  ;;  %v7315_v45 = vor.u32 %v8338_v2, %v7314_v12  ;;  %v7220_v12 = vld [vmem:[#allocation8 + $0x1d8] sm:$0xf0] }
 0x2e2   : > { %3088 = vmatpush.bf16.msrb.mxu1 %v7339_v20  ;;  %v7443_v34 = vor.u32 %v8370_v63, %v7442_v1  ;;  %3078 = vmatpush.bf16.msrb.mxu0 %v7251_v30  ;;  %v7172_v20 = vld [vmem:[#allocation8 + $0x178] sm:$0xf0]  ;;  %v7020_v1 = vld [vmem:[#allocation8 + $0x48] sm:$0xf0]  ;;  %v8279_v63 = vld [vmem:[#allocation8 + $0xc4] sm:$0xf] }
 0x2e3   : > { %v7175_v57 = vor.u32 %v8301_v51, %v7172_v20  ;;  %v7204_v51 = vld [vmem:[#allocation8 + $0x1b8] sm:$0xf0] }
 0x2e4   : > { %3100 = vmatpush.bf16.msrb.mxu2 %v7411_v9  ;;  %3113 = vmatpush.bf16.msrb.mxu3 %v7475_v54  ;;  %v7370_v9 = vld [vmem:[#allocation8 + $0x300] sm:$0xf]  ;;  %v8368_v54 = vld [vmem:[#allocation8 + $0x384] sm:$0xf0] }
 0x2e5   : > { %v7371_v8 = vor.u32 %v8352_v18, %v7370_v9  ;;  %v7087_v9 = vor.u32 %v8279_v63, %v7084_v38  ;;  %v8261_v18 = vld [vmem:[#allocation8 + $0x34] sm:$0xf]  ;;  %v7180_v63 = vld [vmem:[#allocation8 + $0x188] sm:$0xf0]  ;;  %v7300_v38 = vld [vmem:[#allocation8 + $0x278] sm:$0xf0] }
 0x2e6   : > { %3089 = vmatpush.bf16.msrb.mxu1 %v7331_v62  ;;  %3079 = vmatpush.bf16.msrb.mxu0 %v7243_v28  ;;  %v7239_v62 = vor.u32 %v8317_v25, %v7236_v27  ;;  %v7140_v28 = vld [vmem:[#allocation8 + $0x138] sm:$0xf0]  ;;  %v8259_v25 = vld [vmem:[#allocation8 + $0x24] sm:$0xf]  ;;  %v7004_v27 = vld [vmem:[#allocation8 + $0x28] sm:$0xf0] }
 0x2e8   : > { %3101 = vmatpush.bf16.msrb.mxu2 %v7403_v35  ;;  %3114 = vmatpush.bf16.msrb.mxu3 %v7467_v23  ;;  %v7307_v35 = vor.u32 %v8336_v60, %v7306_v59  ;;  %v7435_v23 = vor.u32 %v8368_v54, %v7434_v17  ;;  %v7212_v59 = vld [vmem:[#allocation8 + $0x1c8] sm:$0xf0]  ;;  %v7023_v60 = vor.u32 %v8263_v31, %v7020_v1  ;;  %v7012_v17 = vld [vmem:[#allocation8 + $0x38] sm:$0xf0]  ;;  %v8277_v54 = vld [vmem:[#allocation8 + $0xb4] sm:$0xf] }
 0x2e9   : > { %3080 = vmatmul.bf16.vlgmr.msrb.gmra.mxu0 %v11362_v58  ;;  %v7015_v20 = vor.u32 %v8261_v18, %v7012_v17  ;;  %v7116_v31 = vld [vmem:[#allocation8 + $0x108] sm:$0xf0]  ;;  %v8303_v1 = vld [vmem:[#allocation8 + $0x184] sm:$0xf]  ;;  %v8381_v18 = vld [vmem:[#allocation8 + $0x3f4] sm:$0xf] }
 0x2ea   : > { %3090 = vmatpush.bf16.msrb.mxu1 %v7323_v46  ;;  %3124 = vmatpush.bf16.msra.mxu0 %v7047_v40  ;;  %v7028_v46 = vld [vmem:[#allocation8 + $0x58] sm:$0xf0]  ;;  %v7207_v40 = vor.u32 %v8309_v39, %v7204_v51  ;;  %v7292_v39 = vld [vmem:[#allocation8 + $0x268] sm:$0xf0]  ;;  %v8347_v51 = vld [vmem:[#allocation8 + $0x2e4] sm:$0xf] }
 0x2eb   : > { %v7492_v17 = vld [vmem:[#allocation8 + $0x3f8] sm:$0xf0] }
 0x2ec   : > { %3102 = vmatpush.bf16.msrb.mxu2 %v7395_v49  ;;  %3115 = vmatpush.bf16.msrb.mxu3 %v7459_v48  ;;  %v11358_v49 = vpack.c.bf16 %v11324_v53, %v11324_v53  ;;  %v8315_v48 = vld [vmem:[#allocation8 + $0x1e4] sm:$0xf]  ;;  %v11370_v53 = vpack.c.bf16 %v11330_v44, %v11330_v44  ;;  %v8313_v44 = vld [vmem:[#allocation8 + $0x1d4] sm:$0xf] }
 0x2ed   : > { %v7231_v56 = vor.u32 %v8315_v48, %v7228_v50  ;;  %v7223_v30 = vor.u32 %v8313_v44, %v7220_v12  ;;  %v6996_v48 = vld [vmem:[#allocation8 + $0x18] sm:$0xf0]  ;;  %v8273_v50 = vld [vmem:[#allocation8 + $0x94] sm:$0xf]  ;;  %v8271_v12 = vld [vmem:[#allocation8 + $0x84] sm:$0xf] }
 0x2ee   : > { %3091 = vmatpush.bf16.msrb.mxu1 %v7315_v45  ;;  %3125 = vmatpush.bf16.msra.mxu0 %v7039_v33  ;;  %v7148_v45 = vld [vmem:[#allocation8 + $0x148] sm:$0xf0]  ;;  %v7199_v33 = vor.u32 %v8307_v7, %v7196_v43  ;;  %v7284_v7 = vld [vmem:[#allocation8 + $0x258] sm:$0xf0]  ;;  %v8345_v43 = vld [vmem:[#allocation8 + $0x2d4] sm:$0xf] }
 0x2f0   : > { %3103 = vmatpush.bf16.msrb.mxu2 %v7387_v26  ;;  %3116 = vmatpush.bf16.msrb.mxu3 %v7451_v19  ;;  %v8281_v26 = vld [vmem:[#allocation8 + $0xd4] sm:$0xf]  ;;  %v7031_v19 = vor.u32 %v8265_v41, %v7028_v46  ;;  %v7124_v41 = vld [vmem:[#allocation8 + $0x118] sm:$0xf0] }
 0x2f1   : > { %v7095_v2 = vor.u32 %v8281_v26, %v7092_v29  ;;  %v8305_v46 = vld [vmem:[#allocation8 + $0x194] sm:$0xf]  ;;  %v7188_v26 = vld [vmem:[#allocation8 + $0x198] sm:$0xf0]  ;;  %v8255_v29 = vld [vmem:[#allocation8 + $0x4] sm:$0xf] }
 0x2f2   : > { %3092 = vmatpush.bf16.msrb.mxu1 %v7307_v35  ;;  %3126 = vmatpush.bf16.msra.mxu0 %v7031_v19  ;;  %v7079_v35 = vor.u32 %v8277_v54, %v7076_v61  ;;  %v7052_v19 = vld [vmem:[#allocation8 + $0x88] sm:$0xf0]  ;;  %v7183_v54 = vor.u32 %v8303_v1, %v7180_v63  ;;  %v8357_v1 = vld [vmem:[#allocation8 + $0x334] sm:$0xf]  ;;  %v7396_v63 = vld [vmem:[#allocation8 + $0x338] sm:$0xf0] }
 0x2f4   : > { %3104 = vmatpush.bf16.msrb.mxu2 %v7379_v13  ;;  %3117 = vmatpush.bf16.msrb.mxu3 %v7443_v34  ;;  %v8311_v13 = vld [vmem:[#allocation8 + $0x1c4] sm:$0xf]  ;;  %v7151_v34 = vor.u32 %v8295_v55, %v7148_v45  ;;  %v8349_v55 = vld [vmem:[#allocation8 + $0x2f4] sm:$0xf]  ;;  %v6991_v45 = vor.u32 %v8255_v29, %v6988_v42 }
 0x2f5   : > { %3093 = vmatmul.bf16.vlgmr.msrb.gmra.mxu1 %v11370_v53  ;;  %v7215_v11 = vor.u32 %v8311_v13, %v7212_v59  ;;  %v7364_v13 = vld [vmem:[#allocation8 + $0x2f8] sm:$0xf0]  ;;  %v8365_v59 = vld [vmem:[#allocation8 + $0x374] sm:$0xf]  ;;  %v8359_v29 = vld [vmem:[#allocation8 + $0x344] sm:$0xf] }
 0x2f6   : > { %3137 = vmatpush.bf16.msra.mxu1 %v7111_v16  ;;  %3127 = vmatpush.bf16.msra.mxu0 %v7023_v60  ;;  %v7068_v16 = vld [vmem:[#allocation8 + $0xa8] sm:$0xf0]  ;;  %v7428_v60 = vld [vmem:[#allocation8 + $0x378] sm:$0xf0]  ;;  %v7367_v61 = vor.u32 %v8349_v55, %v7364_v13  ;;  %v8375_v42 = vld [vmem:[#allocation8 + $0x3c4] sm:$0xf]  ;;  %v7399_v13 = vor.u32 %v8357_v1, %v7396_v63 }
 0x2f8   : > { %3105 = vmatpush.bf16.msrb.mxu2 %v7371_v8  ;;  %3118 = vmatpush.bf16.msrb.mxu3 %v7435_v23  ;;  %v7143_v8 = vor.u32 %v8293_v36, %v7140_v28  ;;  %v8275_v23 = vld [vmem:[#allocation8 + $0xa4] sm:$0xf]  ;;  %v7431_v36 = vor.u32 %v8365_v59, %v7428_v60  ;;  %v7260_v60 = vld [vmem:[#allocation8 + $0x228] sm:$0xf0] }
 0x2f9   : > { %v7071_v24 = vor.u32 %v8275_v23, %v7068_v16  ;;  %v8331_v28 = vld [vmem:[#allocation8 + $0x264] sm:$0xf]  ;;  %v7484_v23 = vld [vmem:[#allocation8 + $0x3e8] sm:$0xf0] }
 0x2fa   : > { %3138 = vmatpush.bf16.msra.mxu1 %v7103_v32  ;;  %3128 = vmatpush.bf16.msra.mxu0 %v7015_v20  ;;  %v7060_v32 = vld [vmem:[#allocation8 + $0x98] sm:$0xf0]  ;;  %v7495_v20 = vor.u32 %v8381_v18, %v7492_v17  ;;  %v8323_v59 = vld [vmem:[#allocation8 + $0x224] sm:$0xf]  ;;  %v7324_v18 = vld [vmem:[#allocation8 + $0x2a8] sm:$0xf0] }
 0x2fb   : > { %3106 = vmatmul.bf16.vlgmr.msrb.gmra.mxu2 %v11358_v49  ;;  %3119 = vmatmul.bf16.vlgmr.msrb.gmra.mxu3 %v11366_v52  ;;  %v7063_v6 = vor.u32 %v8273_v50, %v7060_v32  ;;  %v7476_v50 = vld [vmem:[#allocation8 + $0x3d8] sm:$0xf0]  ;;  %v8355_v17 = vld [vmem:[#allocation8 + $0x324] sm:$0xf] }
 0x2fc   : > { %3150 = vmatpush.bf16.msra.mxu2 %v7175_v57  ;;  %3163 = vmatpush.bf16.msra.mxu3 %v7239_v62  ;;  %v8291_v57 = vld [vmem:[#allocation8 + $0x124] sm:$0xf]  ;;  %v7007_v62 = vor.u32 %v8259_v25, %v7004_v27  ;;  %v7420_v25 = vld [vmem:[#allocation8 + $0x368] sm:$0xf0] }
 0x2fd   : > { %v7135_v0 = vor.u32 %v8291_v57, %v7132_v22  ;;  %v8379_v27 = vld [vmem:[#allocation8 + $0x3e4] sm:$0xf]  ;;  %v8329_v22 = vld [vmem:[#allocation8 + $0x254] sm:$0xf] }
 0x2fe   : > { %3139 = vmatpush.bf16.msra.mxu1 %v7095_v2  ;;  %3129 = vmatpush.bf16.msra.mxu0 %v7007_v62  ;;  %v8287_v2 = vld [vmem:[#allocation8 + $0x104] sm:$0xf]  ;;  %v7487_v62 = vor.u32 %v8379_v27, %v7484_v23  ;;  %v8353_v27 = vld [vmem:[#allocation8 + $0x314] sm:$0xf]  ;;  %v7380_v23 = vld [vmem:[#allocation8 + $0x318] sm:$0xf0] }
 0x300   : > { %3151 = vmatpush.bf16.msra.mxu2 %v7167_v47  ;;  %3164 = vmatpush.bf16.msra.mxu3 %v7231_v56  ;;  %v8289_v47 = vld [vmem:[#allocation8 + $0x114] sm:$0xf]  ;;  %v6999_v56 = vor.u32 %v8257_v14, %v6996_v48  ;;  %v7412_v14 = vld [vmem:[#allocation8 + $0x358] sm:$0xf0] }
 0x301   : > { %v7127_v44 = vor.u32 %v8289_v47, %v7124_v41  ;;  %v8377_v48 = vld [vmem:[#allocation8 + $0x3d4] sm:$0xf]  ;;  %v8327_v41 = vld [vmem:[#allocation8 + $0x244] sm:$0xf] }
 0x302   : > { %3140 = vmatpush.bf16.msra.mxu1 %v7087_v9  ;;  %3130 = vmatpush.bf16.msra.mxu0 %v6999_v56  ;;  %v7055_v9 = vor.u32 %v8271_v12, %v7052_v19  ;;  %v7340_v56 = vld [vmem:[#allocation8 + $0x2c8] sm:$0xf0]  ;;  %v8325_v12 = vld [vmem:[#allocation8 + $0x234] sm:$0xf]  ;;  %v7268_v19 = vld [vmem:[#allocation8 + $0x238] sm:$0xf0] }
 0x303   : > { %v7271_v55 = vor.u32 %v8325_v12, %v7268_v19 }
 0x304   : > { %3152 = vmatpush.bf16.msra.mxu2 %v7159_v21  ;;  %3165 = vmatpush.bf16.msra.mxu3 %v7223_v30  ;;  %v7191_v21 = vor.u32 %v8305_v46, %v7188_v26  ;;  %v8333_v30 = vld [vmem:[#allocation8 + $0x274] sm:$0xf]  ;;  %v7276_v46 = vld [vmem:[#allocation8 + $0x248] sm:$0xf0]  ;;  %v7479_v26 = vor.u32 %v8377_v48, %v7476_v50  ;;  %v8351_v48 = vld [vmem:[#allocation8 + $0x304] sm:$0xf] }
 0x305   : > { %v7372_v50 = vld [vmem:[#allocation8 + $0x308] sm:$0xf0] }
 0x306   : > { %3141 = vmatpush.bf16.msra.mxu1 %v7079_v35  ;;  %3131 = vmatpush.bf16.msra.mxu0 %v6991_v45  ;;  %v7356_v35 = vld [vmem:[#allocation8 + $0x2e8] sm:$0xf0] }
 0x307   : > { %v7359_v16 = vor.u32 %v8347_v51, %v7356_v35  ;;  %v8321_v51 = vld [vmem:[#allocation8 + $0x214] sm:$0xf] }
 0x308   : > { %3153 = vmatpush.bf16.msra.mxu2 %v7151_v34  ;;  %3166 = vmatpush.bf16.msra.mxu3 %v7215_v11  ;;  %v7119_v34 = vor.u32 %v8287_v2, %v7116_v31  ;;  %v7303_v11 = vor.u32 %v8333_v30, %v7300_v38  ;;  %v8341_v2 = vld [vmem:[#allocation8 + $0x2b4] sm:$0xf]  ;;  %v7332_v31 = vld [vmem:[#allocation8 + $0x2b8] sm:$0xf0] }
 0x309   : > { %3132 = vmatmul.bf16.vlgmr.msra.gmra.mxu0 %v11338_v3  ;;  %v7279_v3 = vor.u32 %v8327_v41, %v7276_v46  ;;  %v8373_v30 = vld [vmem:[#allocation8 + $0x3b4] sm:$0xf]  ;;  %v7460_v38 = vld [vmem:[#allocation8 + $0x3b8] sm:$0xf0]  ;;  %v7335_v45 = vor.u32 %v8341_v2, %v7332_v31  ;;  %v7375_v46 = vor.u32 %v8351_v48, %v7372_v50 }
 0x30a   : > { %3142 = vmatpush.bf16.msra.mxu1 %v7071_v24  ;;  %3176 = vmatpush.bf16.msrb.mxu0 %v7303_v11  ;;  %v7348_v24 = vld [vmem:[#allocation8 + $0x2d8] sm:$0xf0]  ;;  %v8371_v11 = vld [vmem:[#allocation8 + $0x3a4] sm:$0xf]  ;;  %v8337_v35 = vld [vmem:[#allocation8 + $0x294] sm:$0xf] }
 0x30b   : > { %v7351_v32 = vor.u32 %v8345_v43, %v7348_v24  ;;  %v8319_v43 = vld [vmem:[#allocation8 + $0x204] sm:$0xf] }
 0x30c   : > { %3154 = vmatpush.bf16.msra.mxu2 %v7143_v8  ;;  %3167 = vmatpush.bf16.msra.mxu3 %v7207_v40  ;;  %v8363_v8 = vld [vmem:[#allocation8 + $0x364] sm:$0xf]  ;;  %v7295_v40 = vor.u32 %v8331_v28, %v7292_v39 }
 0x30d   : > { %v7423_v57 = vor.u32 %v8363_v8, %v7420_v25  ;;  %v7316_v25 = vld [vmem:[#allocation8 + $0x298] sm:$0xf0]  ;;  %v8335_v24 = vld [vmem:[#allocation8 + $0x284] sm:$0xf] }
 0x30e   : > { %3143 = vmatpush.bf16.msra.mxu1 %v7063_v6  ;;  %3177 = vmatpush.bf16.msrb.mxu0 %v7295_v40  ;;  %v7468_v6 = vld [vmem:[#allocation8 + $0x3c8] sm:$0xf0]  ;;  %v8369_v40 = vld [vmem:[#allocation8 + $0x394] sm:$0xf] }
 0x310   : > { %3155 = vmatpush.bf16.msra.mxu2 %v7135_v0  ;;  %3168 = vmatpush.bf16.msra.mxu3 %v7199_v33  ;;  %v8361_v0 = vld [vmem:[#allocation8 + $0x354] sm:$0xf]  ;;  %v7287_v33 = vor.u32 %v8329_v22, %v7284_v7  ;;  %v7319_v22 = vor.u32 %v8337_v35, %v7316_v25  ;;  %v7383_v7 = vor.u32 %v8353_v27, %v7380_v23 }
 0x311   : > { %v7415_v47 = vor.u32 %v8361_v0, %v7412_v14  ;;  %v7308_v14 = vld [vmem:[#allocation8 + $0x288] sm:$0xf0] }
 0x312   : > { %3144 = vmatpush.bf16.msra.mxu1 %v7055_v9  ;;  %3178 = vmatpush.bf16.msrb.mxu0 %v7287_v33  ;;  %v8339_v9 = vld [vmem:[#allocation8 + $0x2a4] sm:$0xf]  ;;  %v7311_v41 = vor.u32 %v8335_v24, %v7308_v14 }
 0x313   : > { %v7327_v28 = vor.u32 %v8339_v9, %v7324_v18  ;;  %v8367_v33 = vld [vmem:[#allocation8 + $0x384] sm:$0xf] }
 0x314   : > { %3156 = vmatpush.bf16.msra.mxu2 %v7127_v44  ;;  %3169 = vmatpush.bf16.msra.mxu3 %v7191_v21  ;;  %v7471_v21 = vor.u32 %v8375_v42, %v7468_v6 }
 0x315   : > { %3145 = vmatmul.bf16.vlgmr.msra.gmra.mxu1 %v11346_v4 }
 0x316   : > { %3189 = vmatpush.bf16.msrb.mxu1 %v7367_v61  ;;  %3179 = vmatpush.bf16.msrb.mxu0 %v7279_v3  ;;  %v7452_v61 = vld [vmem:[#allocation8 + $0x3a8] sm:$0xf0] }
 0x317   : > { %v7455_v8 = vor.u32 %v8371_v11, %v7452_v61 }
 0x318   : > { %3157 = vmatpush.bf16.msra.mxu2 %v7119_v34  ;;  %3170 = vmatpush.bf16.msra.mxu3 %v7183_v54  ;;  %v7463_v34 = vor.u32 %v8373_v30, %v7460_v38  ;;  %v7388_v54 = vld [vmem:[#allocation8 + $0x328] sm:$0xf0] }
 0x319   : > { %v7391_v39 = vor.u32 %v8355_v17, %v7388_v54 }
 0x31a   : > { %3190 = vmatpush.bf16.msrb.mxu1 %v7359_v16  ;;  %3180 = vmatpush.bf16.msrb.mxu0 %v7271_v55  ;;  %v7444_v16 = vld [vmem:[#allocation8 + $0x398] sm:$0xf0] }
 0x31b   : > { %3158 = vmatmul.bf16.vlgmr.msra.gmra.mxu2 %v11334_v37  ;;  %3171 = vmatmul.bf16.vlgmr.msra.gmra.mxu3 %v11342_v10  ;;  %v8343_v37 = vld [vmem:[#allocation8 + $0x2c4] sm:$0xf]  ;;  %v7404_v10 = vld [vmem:[#allocation8 + $0x348] sm:$0xf0]  ;;  %v7447_v0 = vor.u32 %v8369_v40, %v7444_v16 }
 0x31c   : > { %3202 = vmatpush.bf16.msrb.mxu2 %v7431_v36  ;;  %3215 = vmatpush.bf16.msrb.mxu3 %v7495_v20  ;;  %v7343_v44 = vor.u32 %v8343_v37, %v7340_v56  ;;  %v7407_v4 = vor.u32 %v8359_v29, %v7404_v10  ;;  %v7263_v36 = vor.u32 %v8323_v59, %v7260_v60  ;;  %v7252_v20 = vld [vmem:[#allocation8 + $0x218] sm:$0xf0] }
 0x31e   : > { %3191 = vmatpush.bf16.msrb.mxu1 %v7351_v32  ;;  %3181 = vmatpush.bf16.msrb.mxu0 %v7263_v36  ;;  %v7436_v32 = vld [vmem:[#allocation8 + $0x388] sm:$0xf0] }
 0x31f   : > { %v7439_v37 = vor.u32 %v8367_v33, %v7436_v32 }
 0x320   : > { %3203 = vmatpush.bf16.msrb.mxu2 %v7423_v57  ;;  %3216 = vmatpush.bf16.msrb.mxu3 %v7487_v62  ;;  %v7255_v57 = vor.u32 %v8321_v51, %v7252_v20  ;;  %v7244_v62 = vld [vmem:[#allocation8 + $0x208] sm:$0xf0] }
 0x322   : > { %3192 = vmatpush.bf16.msrb.mxu1 %v7343_v44  ;;  %3182 = vmatpush.bf16.msrb.mxu0 %v7255_v57 }
 0x324   : > { %3204 = vmatpush.bf16.msrb.mxu2 %v7415_v47  ;;  %3217 = vmatpush.bf16.msrb.mxu3 %v7479_v26  ;;  %v7247_v47 = vor.u32 %v8319_v43, %v7244_v62 }
 0x326   : > { %3193 = vmatpush.bf16.msrb.mxu1 %v7335_v45  ;;  %3183 = vmatpush.bf16.msrb.mxu0 %v7247_v47 }
 0x328   : > { %3205 = vmatpush.bf16.msrb.mxu2 %v7407_v4  ;;  %3218 = vmatpush.bf16.msrb.mxu3 %v7471_v21 }
 0x329   : > { %3184 = vmatmul.bf16.vlgmr.msrb.gmra.mxu0 %v11362_v58 }
 0x32a   : > { %3194 = vmatpush.bf16.msrb.mxu1 %v7327_v28 }
 0x32c   : > { %3206 = vmatpush.bf16.msrb.mxu2 %v7399_v13  ;;  %3219 = vmatpush.bf16.msrb.mxu3 %v7463_v34 }
 0x32e   : > { %3195 = vmatpush.bf16.msrb.mxu1 %v7319_v22 }
 0x330   : > { %3207 = vmatpush.bf16.msrb.mxu2 %v7391_v39  ;;  %3220 = vmatpush.bf16.msrb.mxu3 %v7455_v8 }
 0x332   : > { %3196 = vmatpush.bf16.msrb.mxu1 %v7311_v41 }
 0x334   : > { %3208 = vmatpush.bf16.msrb.mxu2 %v7383_v7  ;;  %3221 = vmatpush.bf16.msrb.mxu3 %v7447_v0 }
 0x335   : > { %3197 = vmatmul.bf16.vlgmr.msrb.gmra.mxu1 %v11370_v53 }
 0x338   : > { %3209 = vmatpush.bf16.msrb.mxu2 %v7375_v46  ;;  %3222 = vmatpush.bf16.msrb.mxu3 %v7439_v37 }
 0x33b   : > { %3210 = vmatmul.bf16.vlgmr.msrb.gmra.mxu2 %v11358_v49  ;;  %3223 = vmatmul.bf16.vlgmr.msrb.gmra.mxu3 %v11366_v52 }
 0x341   : > { %v2378_v29 = vpop.permute.xlu0 %2377 }
 0x34b   : > { %v3029_v26 = vpop.f32.mrf.mxu0 }
 0x34c   : > { %v3030_v42 = vadd.f32 %v3029_v26, %v2378_v29 }
 0x352   : > { %v3042_v56 = vpop.f32.mrf.mxu1 }
 0x353   : > { %v3043_v3 = vadd.f32 %v3042_v56, %v3030_v42  ;;  %v3031_v44 = vpop.f32.mrf.mxu0 }
 0x35a   : > { %v3044_v4 = vpop.f32.mrf.mxu1 }
 0x35e   : > { %v3055_v10 = vpop.f32.mrf.mxu2  ;;  %v3068_v6 = vpop.f32.mrf.mxu3 }
 0x35f   : > { %v3056_v12 = vadd.f32 %v3055_v10, %v3043_v3 }
 0x361   : > { %v3069_v19 = vadd.f32 %v3068_v6, %v3056_v12 }
 0x366   : > { %v3057_v2 = vpop.f32.mrf.mxu2  ;;  %v3070_v21 = vpop.f32.mrf.mxu3 }
 0x367   : > { %v3081_v58 = vpop.f32.mrf.mxu0 }
 0x368   : > { %v3082_v31 = vadd.f32 %v3081_v58, %v3069_v19 }
 0x36f   : > { %v3083_v38 = vpop.f32.mrf.mxu0 }
 0x372   : > { %v3094_v53 = vpop.f32.mrf.mxu1 }
 0x373   : > { %v3095_v1 = vadd.f32 %v3094_v53, %v3082_v31 }
 0x37a   : > { %v3096_v55 = vpop.f32.mrf.mxu1 }
 0x37e   : > { %v3107_v49 = vpop.f32.mrf.mxu2  ;;  %v3120_v52 = vpop.f32.mrf.mxu3 }
 0x37f   : > { %v3108_v63 = vadd.f32 %v3107_v49, %v3095_v1 }
 0x381   : > { %v3121_v30 = vadd.f32 %v3120_v52, %v3108_v63 }
 0x383   : > { %vm3228_vm15 = vcmp.gt.f32.partialorder %v3121_v30, 0.0  ;;  %v3230_v45 = vmul.f32 0.2, %v3121_v30 }
 0x385   : > { %v11384_v13 = vsel %vm3228_vm15, %v3121_v30, %v3230_v45 }
 0x386   : > { %v3109_v59 = vpop.f32.mrf.mxu2  ;;  %v3122_v60 = vpop.f32.mrf.mxu3 }
 0x387   : > { %v3133_v9 = vpop.f32.mrf.mxu0 }
 0x388   : > { %v3134_v28 = vadd.f32 %v3133_v9, %v2378_v29 }
 0x38f   : > { %v3135_v54 = vpop.f32.mrf.mxu0 }
 0x392   : > { %v3146_v34 = vpop.f32.mrf.mxu1 }
 0x393   : > { %v3147_v39 = vadd.f32 %v3146_v34, %v3134_v28 }
 0x39a   : > { %v3148_v11 = vpop.f32.mrf.mxu1 }
 0x39e   : > { %v3159_v18 = vpop.f32.mrf.mxu2  ;;  %v3172_v17 = vpop.f32.mrf.mxu3 }
 0x39f   : > { %v3160_v51 = vadd.f32 %v3159_v18, %v3147_v39 }
 0x3a1   : > { %v3173_v20 = vadd.f32 %v3172_v17, %v3160_v51 }
 0x3a6   : > { %v3161_v61 = vpop.f32.mrf.mxu2  ;;  %v3174_v36 = vpop.f32.mrf.mxu3 }
 0x3a7   : > { %v3185_v35 = vpop.f32.mrf.mxu0 }
 0x3a8   : > { %v3186_v25 = vadd.f32 %v3185_v35, %v3173_v20 }
 0x3af   : > { %v3187_v57 = vpop.f32.mrf.mxu0 }
 0x3b2   : > { %v3198_v8 = vpop.f32.mrf.mxu1 }
 0x3b3   : > { %v3199_v27 = vadd.f32 %v3198_v8, %v3186_v25 }
 0x3ba   : > { %v3200_v22 = vpop.f32.mrf.mxu1 }
 0x3be   : > { %v3211_v23 = vpop.f32.mrf.mxu2  ;;  %v3224_v16 = vpop.f32.mrf.mxu3 }
 0x3bf   : > { %v3212_v40 = vadd.f32 %v3211_v23, %v3199_v27 }
 0x3c1   : > { %v3225_v7 = vadd.f32 %v3224_v16, %v3212_v40 }
 0x3c3   : > { %vm3229_vm0 = vcmp.gt.f32.partialorder %v3225_v7, 0.0  ;;  %v3231_v43 = vmul.f32 0.2, %v3225_v7 }
 0x3c5   : > { %v11386_v62 = vsel %vm3229_vm0, %v3225_v7, %v3231_v43 }
 0x3c6   : > { %v3213_v24 = vpop.f32.mrf.mxu2  ;;  %v3226_v0 = vpop.f32.mrf.mxu3 }
 0x3c7   : > { %s10002_s13 = smov 94   ;;  %s10003_s4 = smov 95   ;;  %v3443_v48 = vld [vmem:[#allocation11 + $0x14] ss:$8 sm:$0x3]  ;;  %vm3403_vm1 = vcmp.lt.s32.totalorder %v10443_v15, 111  ;;  %9465 = vset.pattern.permute.xlu0 %v10001_v5 }
 0x3c8   : > { %3487 = vrot.lane.b32.xlu1 %v11384_v13, %s10002_s13  ;;  %3471 = vrot.lane.b32.xlu0 %v11384_v13, %s10003_s4  ;;  %s10004_s7 = smov 97   ;;  %s10005_s17 = smov 96   ;;  %v3445_v50 = vperm.slane %v3443_v48, 0  ;;  %v3446_v33 = vperm.slane %v3443_v48, 1  ;;  %vm3419_vm2 = vcmp.lt.s32.totalorder %v10443_v15, 110  ;;  %vm3367_vm3 = vcmp.lt.s32.totalorder %v10443_v15, 113 }
 0x3c9   : > { %3435 = vrot.lane.b32.xlu2 %v11384_v13, %s10004_s7  ;;  %s10006_s8 = smov 111   ;;  %s10007_s27 = smov 110   ;;  %v3495_v42 = vld [vmem:[#allocation11 + $0x17] ss:$8 sm:$0x3]  ;;  %vm3383_vm5 = vcmp.lt.s32.totalorder %v10443_v15, 112 }
 0x3ca   : > { %s10008_s3 = smov 113   ;;  %s10009_s11 = smov 112   ;;  %v3479_v6 = vld [vmem:[#allocation11 + $0x16] ss:$8 sm:$0x3]  ;;  %v3497_v3 = vperm.slane %v3495_v42, 0 }
 0x3cb   : > { %s10010_s2 = smov 127   ;;  %s10011_s19 = smov 126   ;;  %v3498_v44 = vperm.slane %v3495_v42, 1  ;;  %v3481_v4 = vperm.slane %v3479_v6, 0  ;;  %v3482_v12 = vperm.slane %v3479_v6, 1  ;;  %v3324_v42 = vpack.c.bf16 %v11386_v62, %v11384_v13 }
 0x3cc   : > { %s10012_s9 = smov 1   ;;  %s10013_s28 = smov 15   ;;  %v3459_v38 = vld [vmem:[#allocation11 + $0x15] ss:$8 sm:$0x3]  ;;  %vm3275_vm6 = vcmp.lt.s32.totalorder %v10443_v15, 15 }
 0x3cd   : > { %s10014_s30 = smov 14   ;;  %v3461_v59 = vperm.slane %v3459_v38, 0  ;;  %v3462_v60 = vperm.slane %v3459_v38, 1  ;;  %v3407_v54 = vld [vmem:[#allocation11 + $0x12] ss:$8 sm:$0x3] }
 0x3ce   : > { %v3423_v36 = vld [vmem:[#allocation11 + $0x13] ss:$8 sm:$0x3]  ;;  %v3409_v51 = vperm.slane %v3407_v54, 0  ;;  %v3410_v8 = vperm.slane %v3407_v54, 1  ;;  %3326 = vst [vmem:[#allocation25 + $0x28] sm:$0xff] %v3324_v42 }
 0x3cf   : > { %v3425_v23 = vperm.slane %v3423_v36, 0  ;;  %v3426_v57 = vperm.slane %v3423_v36, 1  ;;  %vm3291_vm7 = vcmp.lt.s32.totalorder %v10443_v15, 14  ;;  %vm3255_vm8 = vcmp.lt.s32.totalorder %v10443_v15, 16 }
 0x3d0   : > { %3489 = vrot.lane.b32.xlu1 %v11386_v62, %s10002_s13  ;;  %3473 = vrot.lane.b32.xlu0 %v11386_v62, %s10003_s4  ;;  %s10015_s13 = smov 17   ;;  %s10016_s4 = smov 16  }
 0x3d1   : > { %3437 = vrot.lane.b32.xlu2 %v11386_v62, %s10004_s7 }
 0x3d8   : > { %3453 = vrot.lane.b32.xlu1 %v11386_v62, %s10005_s17  ;;  %3451 = vrot.lane.b32.xlu0 %v11384_v13, %s10005_s17 }
 0x3d9   : > { %3399 = vrot.lane.b32.xlu2 %v11384_v13, %s10006_s8 }
 0x3e0   : > { %3415 = vrot.lane.b32.xlu1 %v11384_v13, %s10007_s27  ;;  %3401 = vrot.lane.b32.xlu0 %v11386_v62, %s10006_s8 }
 0x3e1   : > { %3417 = vrot.lane.b32.xlu2 %v11386_v62, %s10007_s27 }
 0x3e8   : > { %3365 = vrot.lane.b32.xlu1 %v11386_v62, %s10008_s3  ;;  %3363 = vrot.lane.b32.xlu0 %v11384_v13, %s10008_s3 }
 0x3e9   : > { %3379 = vrot.lane.b32.xlu2 %v11384_v13, %s10009_s11 }
 0x3f0   : > { %3381 = vrot.lane.b32.xlu0 %v11386_v62, %s10009_s11  ;;  %3327 = vrot.lane.b32.xlu1 %v11384_v13, %s10010_s2 }
 0x3f1   : > { %3329 = vrot.lane.b32.xlu2 %v11386_v62, %s10010_s2 }
 0x3f8   : > { %3343 = vrot.lane.b32.xlu0 %v11384_v13, %s10011_s19  ;;  %3345 = vrot.lane.b32.xlu1 %v11386_v62, %s10011_s19 }
 0x3f9   : > { %3307 = vrot.lane.b32.xlu2 %v11384_v13, %s10012_s9 }
 0x400   : > { %3309 = vrot.lane.b32.xlu0 %v11386_v62, %s10012_s9  ;;  %3271 = vrot.lane.b32.xlu1 %v11384_v13, %s10013_s28 }
 0x401   : > { %3273 = vrot.lane.b32.xlu2 %v11386_v62, %s10013_s28 }
 0x408   : > { %3287 = vrot.lane.b32.xlu0 %v11384_v13, %s10014_s30  ;;  %3289 = vrot.lane.b32.xlu1 %v11386_v62, %s10014_s30 }
 0x409   : > { %3234 = vrot.lane.b32.xlu2 %v11384_v13, %s10015_s13 }
 0x410   : > { %3251 = vrot.lane.b32.xlu1 %v11384_v13, %s10016_s4  ;;  %3236 = vrot.lane.b32.xlu0 %v11386_v62, %s10015_s13 }
 0x411   : > { %3253 = vrot.lane.b32.xlu2 %v11386_v62, %s10016_s4 }
 0x423   : > { %v3436_v14 = vpop.permute.xlu2 %3435 }
 0x42b   : > { %v3438_v32 = vpop.permute.xlu2 %3437 }
 0x42c   : > { %v3440_v47 = vsel %vm1269_vm11, %v3436_v14, %v3438_v32  ;;  %v3441_v41 = vsel %vm1269_vm11, %v3438_v32, %v3436_v14 }
 0x42d   : > { %v3449_v46 = vmul.f32 %v3445_v50, %v3440_v47  ;;  %v3450_v37 = vmul.f32 %v3446_v33, %v3441_v41  ;;  %v3371_v47 = vld [vmem:[#allocation11 + $0x10] ss:$8 sm:$0x3] }
 0x42f   : > { %v3467_v26 = vpack.c.bf16 %v3450_v37, %v3449_v46 }
 0x431   : > { %3469 = vst [vmem:[#allocation25 + $0x60] sm:$0xff] %v3467_v26 }
 0x433   : > { %v3400_v56 = vpop.permute.xlu2 %3399 }
 0x438   : > { %v7550_v46 = vld [vmem:[#allocation25 + $0x60] sm:$0xf]  ;;  %v8396_v37 = vld [vmem:[#allocation25 + $0x64] sm:$0xf] }
 0x43a   : > { %v3488_v29 = vpop.permute.xlu1 %3487  ;;  %v3472_v10 = vpop.permute.xlu0 %3471 }
 0x43b   : > { %v3418_v1 = vpop.permute.xlu2 %3417 }
 0x442   : > { %v3490_v19 = vpop.permute.xlu1 %3489  ;;  %v3474_v2 = vpop.permute.xlu0 %3473 }
 0x443   : > { %v3492_v21 = vsel %vm1447_vm10, %v3488_v29, %v3490_v19  ;;  %v3493_v58 = vsel %vm1447_vm10, %v3490_v19, %v3488_v29  ;;  %v3476_v31 = vsel %vm1393_vm9, %v3472_v10, %v3474_v2  ;;  %v3477_v53 = vsel %vm1393_vm9, %v3474_v2, %v3472_v10  ;;  %v11434_v28 = vpop.permute.xlu2 %3379 }
 0x444   : > { %v3501_v49 = vmul.f32 %v3497_v3, %v3492_v21  ;;  %v3502_v63 = vmul.f32 %v3498_v44, %v3493_v58  ;;  %v3485_v52 = vmul.f32 %v3481_v4, %v3476_v31  ;;  %v3486_v30 = vmul.f32 %v3482_v12, %v3477_v53  ;;  %v3387_v53 = vld [vmem:[#allocation11 + $0x11] ss:$8 sm:$0x3] }
 0x445   : > { %v3373_v44 = vperm.slane %v3371_v47, 0  ;;  %v3374_v4 = vperm.slane %v3371_v47, 1 }
 0x446   : > { %v3504_v55 = vpack.c.bf16 %v3502_v63, %v3501_v49  ;;  %v3503_v45 = vpack.c.bf16 %v3486_v30, %v3485_v52  ;;  %v3389_v63 = vperm.slane %v3387_v53, 0  ;;  %v3390_v52 = vperm.slane %v3387_v53, 1 }
 0x448   : > { %3506 = vst [vmem:[#allocation25 + $0x78] sm:$0xff] %v3504_v55 }
 0x449   : > { %3505 = vst [vmem:[#allocation25 + $0x70] sm:$0xff] %v3503_v45 }
 0x44a   : > { %v3454_v9 = vpop.permute.xlu1 %3453  ;;  %v3452_v34 = vpop.permute.xlu0 %3451 }
 0x44b   : > { %v3456_v18 = vsel %vm1323_vm12, %v3452_v34, %v3454_v9  ;;  %v3457_v17 = vsel %vm1323_vm12, %v3454_v9, %v3452_v34 }
 0x44c   : > { %v3465_v11 = vmul.f32 %v3461_v59, %v3456_v18  ;;  %v3466_v61 = vmul.f32 %v3462_v60, %v3457_v17 }
 0x44e   : > { %v3468_v39 = vpack.c.bf16 %v3466_v61, %v3465_v11 }
 0x44f   : > { %v8399_v20 = vld [vmem:[#allocation25 + $0x74] sm:$0xf0]  ;;  %v7560_v35 = vld [vmem:[#allocation25 + $0x78] sm:$0xf0] }
 0x450   : > { %3470 = vst [vmem:[#allocation25 + $0x68] sm:$0xff] %v3468_v39  ;;  %v7558_v25 = vld [vmem:[#allocation25 + $0x70] sm:$0xf]  ;;  %v8398_v27 = vld [vmem:[#allocation25 + $0x74] sm:$0xf] }
 0x451   : > { %v7559_v40 = vor.u32 %v8399_v20, %v7558_v25  ;;  %v7563_v16 = vor.u32 %v8398_v27, %v7560_v35  ;;  %v3351_v35 = vld [vmem:[#allocation11 + $0x7] ss:$8 sm:$0x3] }
 0x452   : > { %v3416_v22 = vpop.permute.xlu1 %3415  ;;  %v3402_v7 = vpop.permute.xlu0 %3401  ;;  %v3353_v27 = vperm.slane %v3351_v35, 0 }
 0x453   : > { %3611 = vmatpush.bf16.msra.mxu0 %v7559_v40  ;;  %3625 = vmatpush.bf16.msra.mxu1 %v7563_v16  ;;  %v3404_v43 = vsel %vm3403_vm1, %v3400_v56, %v3402_v7  ;;  %v3405_v24 = vsel %vm3403_vm1, %v3402_v7, %v3400_v56  ;;  %v3420_v0 = vsel %vm3419_vm2, %v3416_v22, %v3418_v1  ;;  %v3330_v56 = vpop.permute.xlu2 %3329 }
 0x454   : > { %v3413_v14 = vmul.f32 %v3409_v51, %v3404_v43  ;;  %v3414_v48 = vmul.f32 %v3410_v8, %v3405_v24  ;;  %v3421_v50 = vsel %vm3419_vm2, %v3418_v1, %v3416_v22  ;;  %v3429_v33 = vmul.f32 %v3425_v23, %v3420_v0  ;;  %v3335_v1 = vld [vmem:[#allocation11 + $0x6] ss:$8 sm:$0x3]  ;;  %v3315_v22 = vld [vmem:[#allocation11 + $0x4] ss:$8 sm:$0x3] }
 0x455   : > { %v3430_v32 = vmul.f32 %v3426_v57, %v3421_v50  ;;  %v3337_v55 = vperm.slane %v3335_v1, 0  ;;  %v3338_v60 = vperm.slane %v3335_v1, 1  ;;  %v3354_v23 = vperm.slane %v3351_v35, 1  ;;  %v3279_v0 = vld [vmem:[#allocation11 + $0x2] ss:$8 sm:$0x3] }
 0x456   : > { %v3431_v41 = vpack.c.bf16 %v3414_v48, %v3413_v14  ;;  %v3317_v50 = vperm.slane %v3315_v22, 0 }
 0x457   : > { %v3432_v26 = vpack.c.bf16 %v3430_v32, %v3429_v33  ;;  %v8397_v29 = vld [vmem:[#allocation25 + $0x64] sm:$0xf0]  ;;  %v7552_v10 = vld [vmem:[#allocation25 + $0x68] sm:$0xf0]  ;;  %v3318_v33 = vperm.slane %v3315_v22, 1 }
 0x458   : > { %3433 = vst [vmem:[#allocation25 + $0x50] sm:$0xff] %v3431_v41  ;;  %v7551_v6 = vor.u32 %v8397_v29, %v7550_v46  ;;  %v7555_v3 = vor.u32 %v8396_v37, %v7552_v10  ;;  %v3282_v29 = vperm.slane %v3279_v0, 1 }
 0x459   : > { %3434 = vst [vmem:[#allocation25 + $0x58] sm:$0xff] %v3432_v26  ;;  %v3281_v26 = vperm.slane %v3279_v0, 0 }
 0x45a   : > { %3612 = vmatpush.bf16.msra.mxu0 %v7551_v6  ;;  %3626 = vmatpush.bf16.msra.mxu1 %v7555_v3  ;;  %v3366_v12 = vpop.permute.xlu1 %3365  ;;  %v3364_v19 = vpop.permute.xlu0 %3363 }
 0x45b   : > { %v3368_v2 = vsel %vm3367_vm3, %v3364_v19, %v3366_v12  ;;  %v3369_v21 = vsel %vm3367_vm3, %v3366_v12, %v3364_v19  ;;  %v3308_v9 = vpop.permute.xlu2 %3307 }
 0x45c   : > { %v3377_v58 = vmul.f32 %v3373_v44, %v3368_v2  ;;  %v3378_v31 = vmul.f32 %v3374_v4, %v3369_v21  ;;  %v3295_v21 = vld [vmem:[#allocation11 + $0x3] ss:$8 sm:$0x3] }
 0x45e   : > { %v3395_v49 = vpack.c.bf16 %v3378_v31, %v3377_v58 }
 0x45f   : > { %v7542_v13 = vld [vmem:[#allocation25 + $0x50] sm:$0xf]  ;;  %v8394_v62 = vld [vmem:[#allocation25 + $0x54] sm:$0xf] }
 0x460   : > { %3397 = vst [vmem:[#allocation25 + $0x40] sm:$0xff] %v3395_v49  ;;  %v8395_v30 = vld [vmem:[#allocation25 + $0x54] sm:$0xf0]  ;;  %v7544_v38 = vld [vmem:[#allocation25 + $0x58] sm:$0xf0] }
 0x461   : > { %v7543_v45 = vor.u32 %v8395_v30, %v7542_v13  ;;  %v7547_v59 = vor.u32 %v8394_v62, %v7544_v38  ;;  %v3297_v30 = vperm.slane %v3295_v21, 0  ;;  %v3298_v38 = vperm.slane %v3295_v21, 1  ;;  %v8406_v21 = vld [vmem:[#allocation12 + $0x30] sm:$0xff] }
 0x462   : > { %v3382_v34 = vpop.permute.xlu0 %3381  ;;  %v3328_v18 = vpop.permute.xlu1 %3327 }
 0x463   : > { %3613 = vmatpush.bf16.msra.mxu0 %v7543_v45  ;;  %3627 = vmatpush.bf16.msra.mxu1 %v7547_v59  ;;  %v3384_v17 = vsel %vm3383_vm5, %v11434_v28, %v3382_v34  ;;  %v3385_v54 = vsel %vm3383_vm5, %v3382_v34, %v11434_v28  ;;  %v3332_v11 = vsel %vm1145_vm13, %v3328_v18, %v3330_v56  ;;  %v3274_v24 = vpop.permute.xlu2 %3273 }
 0x464   : > { %v3393_v61 = vmul.f32 %v3389_v63, %v3384_v17  ;;  %v3394_v36 = vmul.f32 %v3390_v52, %v3385_v54  ;;  %v3333_v39 = vsel %vm1145_vm13, %v3330_v56, %v3328_v18  ;;  %v3341_v51 = vmul.f32 %v3337_v55, %v3332_v11  ;;  %v8389_v17 = vld [vmem:[#allocation25 + $0x24] sm:$0xf0]  ;;  %v7520_v54 = vld [vmem:[#allocation25 + $0x28] sm:$0xf0] }
 0x465   : > { %v3342_v20 = vmul.f32 %v3338_v60, %v3333_v39  ;;  %v3259_v11 = vld [vmem:[#allocation11 + $0x1] ss:$8 sm:$0x3] }
 0x466   : > { %v3396_v8 = vpack.c.bf16 %v3394_v36, %v3393_v61 }
 0x467   : > { %v3359_v25 = vpack.c.bf16 %v3342_v20, %v3341_v51  ;;  %v7534_v48 = vld [vmem:[#allocation25 + $0x40] sm:$0xf]  ;;  %v8392_v47 = vld [vmem:[#allocation25 + $0x44] sm:$0xf] }
 0x468   : > { %3398 = vst [vmem:[#allocation25 + $0x48] sm:$0xff] %v3396_v8 }
 0x469   : > { %3361 = vst [vmem:[#allocation25 + $0x30] sm:$0xff] %v3359_v25  ;;  %v3261_v25 = vperm.slane %v3259_v11, 0 }
 0x46a   : > { %v3344_v40 = vpop.permute.xlu0 %3343  ;;  %v3346_v16 = vpop.permute.xlu1 %3345 }
 0x46b   : > { %v3348_v28 = vsel %vm1199_vm14, %v3344_v40, %v3346_v16  ;;  %v3349_v57 = vsel %vm1199_vm14, %v3346_v16, %v3344_v40  ;;  %v3235_v1 = vpop.permute.xlu2 %3234 }
 0x46c   : > { %v3357_v7 = vmul.f32 %v3353_v27, %v3348_v28  ;;  %v3358_v43 = vmul.f32 %v3354_v23, %v3349_v57  ;;  %v3262_v27 = vperm.slane %v3259_v11, 1 }
 0x46e   : > { %v3360_v14 = vpack.c.bf16 %v3358_v43, %v3357_v7 }
 0x46f   : > { %v8393_v32 = vld [vmem:[#allocation25 + $0x44] sm:$0xf0]  ;;  %v7536_v41 = vld [vmem:[#allocation25 + $0x48] sm:$0xf0] }
 0x470   : > { %3362 = vst [vmem:[#allocation25 + $0x38] sm:$0xff] %v3360_v14  ;;  %v7535_v46 = vor.u32 %v8393_v32, %v7534_v48  ;;  %v7539_v37 = vor.u32 %v8392_v47, %v7536_v41  ;;  %v7526_v53 = vld [vmem:[#allocation25 + $0x30] sm:$0xf]  ;;  %v8390_v13 = vld [vmem:[#allocation25 + $0x34] sm:$0xf] }
 0x472   : > { %3614 = vmatpush.bf16.msra.mxu0 %v7535_v46  ;;  %3628 = vmatpush.bf16.msra.mxu1 %v7539_v37  ;;  %v3310_v10 = vpop.permute.xlu0 %3309  ;;  %v3272_v56 = vpop.permute.xlu1 %3271 }
 0x473   : > { %v3312_v42 = vsel %vm1075_vm4, %v3308_v9, %v3310_v10  ;;  %v3313_v6 = vsel %vm1075_vm4, %v3310_v10, %v3308_v9  ;;  %v3276_v3 = vsel %vm3275_vm6, %v3272_v56, %v3274_v24  ;;  %v3277_v44 = vsel %vm3275_vm6, %v3274_v24, %v3272_v56  ;;  %v3243_v9 = vld [vmem:[#allocation11] ss:$8 sm:$0x3]  ;;  %v3254_v23 = vpop.permute.xlu2 %3253 }
 0x474   : > { %v3321_v4 = vmul.f32 %v3317_v50, %v3313_v6  ;;  %v3322_v12 = vmul.f32 %v3318_v33, %v3312_v42  ;;  %v3285_v19 = vmul.f32 %v3281_v26, %v3277_v44  ;;  %v3286_v2 = vmul.f32 %v3282_v29, %v3276_v3  ;;  %v8383_v6 = vld [vmem:[#allocation9] sm:$0xff] }
 0x475   : > { %vm3240_vm4 = vcmp.lt.s32.totalorder %v10443_v15, 17  ;;  %v3245_v36 = vperm.slane %v3243_v9, 0  ;;  %v3246_v20 = vperm.slane %v3243_v9, 1 }
 0x476   : > { %v3323_v58 = vpack.c.bf16 %v3322_v12, %v3321_v4  ;;  %v3303_v31 = vpack.c.bf16 %v3286_v2, %v3285_v19  ;;  %v8407_v19 = vld [vmem:[#allocation12 + $0x38] sm:$0xff] }
 0x477   : > { %v8391_v49 = vld [vmem:[#allocation25 + $0x34] sm:$0xf0]  ;;  %v7528_v62 = vld [vmem:[#allocation25 + $0x38] sm:$0xf0]  ;;  %v8415_v2 = vld [vmem:[#allocation12 + $0x78] sm:$0xff]  ;;  %3781 = vmatpush.bf16.msra.mxu2 %v8407_v19 }
 0x478   : > { %3325 = vst [vmem:[#allocation25 + $0x20] sm:$0xff] %v3323_v58  ;;  %v7527_v63 = vor.u32 %v8391_v49, %v7526_v53  ;;  %v7531_v52 = vor.u32 %v8390_v13, %v7528_v62  ;;  %3795 = vmatpush.bf16.msra.mxu3 %v8415_v2  ;;  %v8414_v58 = vld [vmem:[#allocation12 + $0x70] sm:$0xff]  ;;  %v8405_v53 = vld [vmem:[#allocation12 + $0x28] sm:$0xff]  ;;  %v8404_v49 = vld [vmem:[#allocation12 + $0x20] sm:$0xff] }
 0x479   : > { %3305 = vst [vmem:[#allocation25 + $0x10] sm:$0xff] %v3303_v31  ;;  %v3673_v31 = vld [vmem:[%s12005_s6] sm:$0xff]  ;;  %v8412_v13 = vld [vmem:[#allocation12 + $0x60] sm:$0xff]  ;;  %v3674_v62 = vld [vmem:[%s12005_s6 + $0x8] sm:$0xff] }
 0x47a   : > { %3615 = vmatpush.bf16.msra.mxu0 %v7527_v63  ;;  %3629 = vmatpush.bf16.msra.mxu1 %v7531_v52  ;;  %v3288_v55 = vpop.permute.xlu0 %3287  ;;  %v3290_v45 = vpop.permute.xlu1 %3289  ;;  %v8403_v63 = vld [vmem:[#allocation12 + $0x18] sm:$0xff] }
 0x47b   : > { %v3292_v59 = vsel %vm3291_vm7, %v3288_v55, %v3290_v45  ;;  %v3293_v60 = vsel %vm3291_vm7, %v3290_v45, %v3288_v55  ;;  %3782 = vmatpush.bf16.msra.mxu2 %v8406_v21  ;;  %3677 = vperm.xlu0 %9465, %v3673_v31   ;;  %v8411_v52 = vld [vmem:[#allocation12 + $0x58] sm:$0xff]  ;;  %v8401_v55 = vld [vmem:[#allocation12 + $0x8] sm:$0xff] }
 0x47c   : > { %v3301_v34 = vmul.f32 %v3297_v30, %v3293_v60  ;;  %v3302_v18 = vmul.f32 %v3298_v38, %v3292_v59  ;;  %3796 = vmatpush.bf16.msra.mxu3 %v8414_v58  ;;  %v8402_v30 = vld [vmem:[#allocation12 + $0x10] sm:$0xff]  ;;  %v8409_v45 = vld [vmem:[#allocation12 + $0x48] sm:$0xff]  ;;  %v8400_v59 = vld [vmem:[#allocation12] sm:$0xff] }
 0x47d   : > { %v8410_v38 = vld [vmem:[#allocation12 + $0x50] sm:$0xff]  ;;  %v8408_v60 = vld [vmem:[#allocation12 + $0x40] sm:$0xff] }
 0x47e   : > { %v3304_v61 = vpack.c.bf16 %v3302_v18, %v3301_v34 }
 0x47f   : > { %v7518_v39 = vld [vmem:[#allocation25 + $0x20] sm:$0xf]  ;;  %v8388_v51 = vld [vmem:[#allocation25 + $0x24] sm:$0xf]  ;;  %3783 = vmatpush.bf16.msra.mxu2 %v8405_v53 }
 0x480   : > { %3306 = vst [vmem:[#allocation25 + $0x18] sm:$0xff] %v3304_v61  ;;  %v7519_v35 = vor.u32 %v8389_v17, %v7518_v39  ;;  %v7523_v8 = vor.u32 %v8388_v51, %v7520_v54  ;;  %v7510_v33 = vld [vmem:[#allocation25 + $0x10] sm:$0xf]  ;;  %v8386_v47 = vld [vmem:[#allocation25 + $0x14] sm:$0xf] }
 0x482   : > { %3616 = vmatpush.bf16.msra.mxu0 %v7519_v35  ;;  %3630 = vmatpush.bf16.msra.mxu1 %v7523_v8  ;;  %v3252_v40 = vpop.permute.xlu1 %3251  ;;  %v3237_v16 = vpop.permute.xlu0 %3236 }
 0x483   : > { %v3241_v28 = vsel %vm3240_vm4, %v3235_v1, %v3237_v16  ;;  %v3242_v57 = vsel %vm3240_vm4, %v3237_v16, %v3235_v1  ;;  %v3256_v22 = vsel %vm3255_vm8, %v3252_v40, %v3254_v23  ;;  %v3257_v7 = vsel %vm3255_vm8, %v3254_v23, %v3252_v40  ;;  %v8413_v1 = vld [vmem:[#allocation12 + $0x68] sm:$0xff]  ;;  %3784 = vmatpush.bf16.msra.mxu2 %v8404_v49 }
 0x484   : > { %v3249_v43 = vmul.f32 %v3245_v36, %v3242_v57  ;;  %v3250_v24 = vmul.f32 %v3246_v20, %v3241_v28  ;;  %v3265_v0 = vmul.f32 %v3261_v25, %v3257_v7  ;;  %v3266_v14 = vmul.f32 %v3262_v27, %v3256_v22  ;;  %3797 = vmatpush.bf16.msra.mxu3 %v8413_v1 }
 0x485   : > { %3682 = vperm.xlu0 %9465, %v3674_v62  }
 0x486   : > { %v3267_v48 = vpack.c.bf16 %v3250_v24, %v3249_v43  ;;  %v3268_v50 = vpack.c.bf16 %v3266_v14, %v3265_v0 }
 0x487   : > { %v8387_v32 = vld [vmem:[#allocation25 + $0x14] sm:$0xf0]  ;;  %v7512_v41 = vld [vmem:[#allocation25 + $0x18] sm:$0xf0]  ;;  %3785 = vmatpush.bf16.msra.mxu2 %v8403_v63 }
 0x488   : > { %3269 = vst [vmem:[#allocation25] sm:$0xff] %v3267_v48  ;;  %v7511_v46 = vor.u32 %v8387_v32, %v7510_v33  ;;  %v7515_v37 = vor.u32 %v8386_v47, %v7512_v41  ;;  %3798 = vmatpush.bf16.msra.mxu3 %v8412_v13 }
 0x489   : > { %3270 = vst [vmem:[#allocation25 + $0x8] sm:$0xff] %v3268_v50 }
 0x48a   : > { %3617 = vmatpush.bf16.msra.mxu0 %v7511_v46  ;;  %3631 = vmatpush.bf16.msra.mxu1 %v7515_v37 }
 0x48b   : > { %3786 = vmatpush.bf16.msra.mxu2 %v8402_v30 }
 0x48c   : > { %3799 = vmatpush.bf16.msra.mxu3 %v8411_v52 }
 0x48f   : > { %v7502_v15 = vld [vmem:[#allocation25] sm:$0xf]  ;;  %v8384_v26 = vld [vmem:[#allocation25 + $0x4] sm:$0xf]  ;;  %3787 = vmatpush.bf16.msra.mxu2 %v8401_v55 }
 0x490   : > { %v8385_v29 = vld [vmem:[#allocation25 + $0x4] sm:$0xf0]  ;;  %v7504_v10 = vld [vmem:[#allocation25 + $0x8] sm:$0xf0]  ;;  %3800 = vmatpush.bf16.msra.mxu3 %v8410_v38 }
 0x491   : > { %v7503_v56 = vor.u32 %v8385_v29, %v7502_v15  ;;  %v7507_v42 = vor.u32 %v8384_v26, %v7504_v10 }
 0x493   : > { %3618 = vmatpush.bf16.msra.mxu0 %v7503_v56  ;;  %3632 = vmatpush.bf16.msra.mxu1 %v7507_v42 }
 0x494   : > { %3801 = vmatpush.bf16.msra.mxu3 %v8409_v45  ;;  %3788 = vmatpush.bf16.msra.mxu2 %v8400_v59 }
 0x496   : > { %3619 = vmatmul.bf16.vlgmr.msra.gmra.mxu0 %v8383_v6  ;;  %3633 = vmatmul.bf16.vlgmr.msra.gmra.mxu1 %v8383_v6 }
 0x498   : > { %3802 = vmatpush.bf16.msra.mxu3 %v8408_v60 }
 0x4ed   : > { %v3678_v18 = vpop.permute.xlu0 %3677 }
 0x4f7   : > { %v3683_v51 = vpop.permute.xlu0 %3682 }
 0x513   : > { %v3620_v3 = vpop.f32.mrf.mxu0  ;;  %v3634_v44 = vpop.f32.mrf.mxu1 }
 0x51b   : > { %v3622_v4 = vpop.f32.mrf.mxu0  ;;  %v3636_v12 = vpop.f32.mrf.mxu1 }
 0x51c   : > { %v3639_v9 = vpack.c.bf16 %v3622_v4, %v3620_v3  ;;  %v3640_v34 = vpack.c.bf16 %v3636_v12, %v3634_v44 }
 0x51e   : > { %3789 = vmatmul.bf16.vlgmr.msra.gmra.mxu2 %v3639_v9  ;;  %3803 = vmatmul.bf16.vlgmr.msra.gmra.mxu3 %v3640_v34 }
 0x5a1   : > { %v3790_v17 = vpop.f32.mrf.mxu2  ;;  %v3804_v54 = vpop.f32.mrf.mxu3 }
 0x5a2   : > { %v3791_v11 = vadd.f32 %v3790_v17, %v3678_v18 }
 0x5a4   : > { %v3805_v61 = vadd.f32 %v3804_v54, %v3791_v11 }
 0x5a6   : > { %vm3809_vm9 = vcmp.gt.f32.partialorder %v3805_v61, 0.0  ;;  %v3811_v36 = vmul.f32 0.2, %v3805_v61 }
 0x5a8   : > { %v3813_v39 = vsel %vm3809_vm9, %v3805_v61, %v3811_v36 }
 0x5a9   : > { %v3792_v20 = vpop.f32.mrf.mxu2  ;;  %v3806_v8 = vpop.f32.mrf.mxu3 }
 0x5aa   : > { %v3793_v35 = vadd.f32 %v3792_v20, %v3683_v51 }
 0x5ac   : > { %v3807_v25 = vadd.f32 %v3806_v8, %v3793_v35 }
 0x5ae   : > { %vm3810_vm10 = vcmp.gt.f32.partialorder %v3807_v25, 0.0  ;;  %v3812_v27 = vmul.f32 0.2, %v3807_v25 }
 0x5b0   : > { %v3814_v23 = vsel %vm3810_vm10, %v3807_v25, %v3812_v27 }
 0x5b1   : > { %s10017_s3 = smov 110   ;;  %s10018_s11 = smov 126   ;;  %v9466_v16 = vld [vmem:[#allocation15 + $0x6] ss:$0 sm:$0xff]  ;;  %v8584_v43 = vpack.c.bf16 %v3814_v23, %v3813_v39  ;;  %v9467_v48 = vld [vmem:[#allocation15 + $0xf] ss:$0 sm:$0xff]  ;;  %9481 = vset.pattern.permute.xlu0 %v10001_v5  ;;  %9482 = vset.pattern.permute.xlu1 %v10001_v5 }
 0x5b2   : > { %3987 = vrot.lane.b32.xlu1 %v3813_v39, %s10017_s3  ;;  %3891 = vrot.lane.b32.xlu0 %v3813_v39, %s10018_s11  ;;  %s10019_s2 = smov 127   ;;  %s10020_s19 = smov 111   ;;  %v9468_v50 = vld [vmem:[#allocation15 + $0x7] ss:$0 sm:$0xff]  ;;  %v9469_v10 = vld [vmem:[#allocation15 + $0xe] ss:$0 sm:$0xff] }
 0x5b3   : > { %3879 = vrot.lane.b32.xlu2 %v3813_v39, %s10019_s2  ;;  %s10021_s9 = smov 112   ;;  %s10022_s28 = smov 1   ;;  %9120 = vst [vmem:[#allocation26 + $0x68] sm:$0xff] %v8584_v43   ;;  %v9471_v12 = vld [vmem:[#allocation15 + $0x4] ss:$0 sm:$0xff] }
 0x5b4   : > { %s10023_s30 = smov 113   ;;  %s10024_s13 = smov 6   ;;  %v9470_v2 = vld [vmem:[#allocation15 + $0xd] ss:$0 sm:$0xff]  ;;  %v9472_v45 = vld [vmem:[#allocation15 + $0xc] ss:$0 sm:$0xff] }
 0x5b5   : > { %s10025_s4 = smov 118   ;;  %s10026_s7 = smov 7   ;;  %v9474_v17 = vld [vmem:[#allocation15 + $0xb] ss:$0 sm:$0xff]  ;;  %v9473_v11 = vld [vmem:[#allocation15 + $0x3] ss:$0 sm:$0xff] }
 0x5b6   : > { %s10027_s17 = smov 119   ;;  %s10028_s8 = smov 8  }
 0x5b7   : > { %s10029_s27 = smov 120  }
 0x5ba   : > { %3989 = vrot.lane.b32.xlu1 %v3814_v23, %s10017_s3  ;;  %3893 = vrot.lane.b32.xlu0 %v3814_v23, %s10018_s11  ;;  %s10030_s3 = smov 9   ;;  %s10031_s11 = smov 121   ;;  %v8425_v30 = vld [vmem:[#allocation26 + $0x68] sm:$0xff] }
 0x5bb   : > { %3881 = vrot.lane.b32.xlu2 %v3814_v23, %s10019_s2 }
 0x5c2   : > { %3977 = vrot.lane.b32.xlu1 %v3814_v23, %s10020_s19  ;;  %3975 = vrot.lane.b32.xlu0 %v3813_v39, %s10020_s19 }
 0x5c3   : > { %3963 = vrot.lane.b32.xlu2 %v3813_v39, %s10021_s9 }
 0x5ca   : > { %3965 = vrot.lane.b32.xlu0 %v3814_v23, %s10021_s9  ;;  %3863 = vrot.lane.b32.xlu1 %v3813_v39, %s10022_s28 }
 0x5cb   : > { %3865 = vrot.lane.b32.xlu2 %v3814_v23, %s10022_s28 }
 0x5d2   : > { %3951 = vrot.lane.b32.xlu0 %v3813_v39, %s10023_s30  ;;  %3953 = vrot.lane.b32.xlu1 %v3814_v23, %s10023_s30 }
 0x5d3   : > { %3851 = vrot.lane.b32.xlu2 %v3813_v39, %s10024_s13 }
 0x5da   : > { %3939 = vrot.lane.b32.xlu1 %v3813_v39, %s10025_s4  ;;  %3853 = vrot.lane.b32.xlu0 %v3814_v23, %s10024_s13 }
 0x5db   : > { %3941 = vrot.lane.b32.xlu2 %v3814_v23, %s10025_s4 }
 0x5e2   : > { %3841 = vrot.lane.b32.xlu1 %v3814_v23, %s10026_s7  ;;  %3839 = vrot.lane.b32.xlu0 %v3813_v39, %s10026_s7 }
 0x5e3   : > { %3927 = vrot.lane.b32.xlu2 %v3813_v39, %s10027_s17 }
 0x5ea   : > { %3929 = vrot.lane.b32.xlu0 %v3814_v23, %s10027_s17  ;;  %3827 = vrot.lane.b32.xlu1 %v3813_v39, %s10028_s8 }
 0x5eb   : > { %3829 = vrot.lane.b32.xlu2 %v3814_v23, %s10028_s8 }
 0x5f2   : > { %3915 = vrot.lane.b32.xlu0 %v3813_v39, %s10029_s27  ;;  %3917 = vrot.lane.b32.xlu1 %v3814_v23, %s10029_s27 }
 0x5f3   : > { %3815 = vrot.lane.b32.xlu2 %v3813_v39, %s10030_s3 }
 0x5fa   : > { %3903 = vrot.lane.b32.xlu1 %v3813_v39, %s10031_s11  ;;  %3817 = vrot.lane.b32.xlu0 %v3814_v23, %s10030_s3 }
 0x5fb   : > { %3905 = vrot.lane.b32.xlu2 %v3814_v23, %s10031_s11 }
 0x60d   : > { %v3880_v40 = vpop.permute.xlu2 %3879 }
 0x60e   : > { %v3885_v28 = vmul.f32 %v9466_v16, %v3880_v40 }
 0x615   : > { %v3882_v57 = vpop.permute.xlu2 %3881 }
 0x616   : > { %v3886_v22 = vmul.f32 %v9466_v16, %v3882_v57  ;;  %v9476_v16 = vld [vmem:[#allocation15 + $0x2] ss:$0 sm:$0xff] }
 0x618   : > { %v8589_v7 = vpack.c.bf16 %v3886_v22, %v3885_v28 }
 0x61a   : > { %9121 = vst [vmem:[#allocation26 + $0x8] sm:$0xff] %v8589_v7  }
 0x61d   : > { %v3964_v24 = vpop.permute.xlu2 %3963 }
 0x61e   : > { %v3969_v1 = vmul.f32 %v9470_v2, %v3964_v24 }
 0x621   : > { %v8426_v62 = vld [vmem:[#allocation26 + $0x8] sm:$0xff] }
 0x624   : > { %v3988_v0 = vpop.permute.xlu1 %3987  ;;  %v3892_v14 = vpop.permute.xlu0 %3891 }
 0x625   : > { %v3866_v33 = vpop.permute.xlu2 %3865  ;;  %v3993_v41 = vmul.f32 %v9467_v48, %v3988_v0  ;;  %v3897_v46 = vmul.f32 %v9468_v50, %v3892_v14  ;;  %v9477_v0 = vld [vmem:[#allocation15 + $0x1] ss:$0 sm:$0xff] }
 0x626   : > { %v3870_v58 = vmul.f32 %v9471_v12, %v3866_v33 }
 0x62c   : > { %v3990_v32 = vpop.permute.xlu1 %3989  ;;  %v3894_v47 = vpop.permute.xlu0 %3893 }
 0x62d   : > { %v3994_v37 = vmul.f32 %v9467_v48, %v3990_v32  ;;  %v3898_v15 = vmul.f32 %v9468_v50, %v3894_v47  ;;  %v3852_v44 = vpop.permute.xlu2 %3851  ;;  %v9475_v48 = vld [vmem:[#allocation15 + $0xa] ss:$0 sm:$0xff] }
 0x62e   : > { %v3857_v35 = vmul.f32 %v9473_v11, %v3852_v44 }
 0x62f   : > { %v8634_v26 = vpack.c.bf16 %v3994_v37, %v3993_v41  ;;  %v8594_v29 = vpack.c.bf16 %v3898_v15, %v3897_v46 }
 0x631   : > { %9130 = vst [vmem:[#allocation26 + $0x28] sm:$0xff] %v8634_v26  }
 0x632   : > { %9122 = vst [vmem:[#allocation26 + $0x48] sm:$0xff] %v8594_v29  }
 0x634   : > { %v3978_v56 = vpop.permute.xlu1 %3977  ;;  %v3976_v42 = vpop.permute.xlu0 %3975 }
 0x635   : > { %v3982_v6 = vmul.f32 %v9469_v10, %v3978_v56  ;;  %v3981_v3 = vmul.f32 %v9469_v10, %v3976_v42  ;;  %v3942_v38 = vpop.permute.xlu2 %3941  ;;  %v9478_v56 = vld [vmem:[#allocation15 + $0x9] ss:$0 sm:$0xff] }
 0x636   : > { %v3946_v39 = vmul.f32 %v9474_v17, %v3942_v38  ;;  %v7630_v38 = vld [vmem:[#allocation14] sm:$0xf] }
 0x637   : > { %v8629_v4 = vpack.c.bf16 %v3982_v6, %v3981_v3 }
 0x638   : > { %v8435_v19 = vld [vmem:[#allocation26 + $0x28] sm:$0xff] }
 0x639   : > { %9129 = vst [vmem:[#allocation26 + $0x78] sm:$0xff] %v8629_v4   ;;  %v8427_v21 = vld [vmem:[#allocation26 + $0x48] sm:$0xff]  ;;  %4170 = vmatpush.bf16.msrb.mxu1 %v8435_v19 }
 0x63a   : > { %4151 = vmatpush.bf16.msrb.mxu0 %v8427_v21  ;;  %v9479_v21 = vld [vmem:[#allocation15] ss:$0 sm:$0xff] }
 0x63c   : > { %v3966_v31 = vpop.permute.xlu0 %3965  ;;  %v3864_v53 = vpop.permute.xlu1 %3863 }
 0x63d   : > { %v3970_v49 = vmul.f32 %v9470_v2, %v3966_v31  ;;  %v3869_v13 = vmul.f32 %v9471_v12, %v3864_v53  ;;  %v3928_v36 = vpop.permute.xlu2 %3927  ;;  %v9480_v12 = vld [vmem:[#allocation15 + $0x8] ss:$0 sm:$0xff] }
 0x63e   : > { %4152 = vmatpush.bf16.msrb.mxu0 %v8426_v62  ;;  %v3933_v41 = vmul.f32 %v9475_v48, %v3928_v36 }
 0x63f   : > { %v8624_v63 = vpack.c.bf16 %v3970_v49, %v3969_v1  ;;  %v8579_v52 = vpack.c.bf16 %v3870_v58, %v3869_v13 }
 0x640   : > { %v8434_v55 = vld [vmem:[#allocation26 + $0x78] sm:$0xff] }
 0x641   : > { %9128 = vst [vmem:[#allocation26 + $0x70] sm:$0xff] %v8624_v63   ;;  %4171 = vmatpush.bf16.msrb.mxu1 %v8434_v55  ;;  %v8417_v55 = vld [vmem:[#allocation14 + $0x4] sm:$0xf0] }
 0x642   : > { %9119 = vst [vmem:[#allocation26 + $0x50] sm:$0xff] %v8579_v52   ;;  %4153 = vmatpush.bf16.msrb.mxu0 %v8425_v30 }
 0x644   : > { %v3952_v59 = vpop.permute.xlu0 %3951  ;;  %v3954_v60 = vpop.permute.xlu1 %3953 }
 0x645   : > { %v3957_v9 = vmul.f32 %v9472_v45, %v3952_v59  ;;  %v3958_v34 = vmul.f32 %v9472_v45, %v3954_v60  ;;  %v3830_v28 = vpop.permute.xlu2 %3829  ;;  %v8416_v45 = vld [vmem:[#allocation14 + $0x4] sm:$0xf]  ;;  %v7632_v59 = vld [vmem:[#allocation14 + $0x8] sm:$0xf0] }
 0x646   : > { %v3834_v33 = vmul.f32 %v9477_v0, %v3830_v28 }
 0x647   : > { %v8619_v18 = vpack.c.bf16 %v3958_v34, %v3957_v9  ;;  %v7631_v34 = vor.u32 %v8417_v55, %v7630_v38 }
 0x648   : > { %v8433_v54 = vld [vmem:[#allocation26 + $0x70] sm:$0xff] }
 0x649   : > { %9127 = vst [vmem:[#allocation26 + $0x60] sm:$0xff] %v8619_v18   ;;  %v8424_v61 = vld [vmem:[#allocation26 + $0x50] sm:$0xff]  ;;  %4172 = vmatpush.bf16.msrb.mxu1 %v8433_v54  ;;  %v7635_v18 = vor.u32 %v8416_v45, %v7632_v59  ;;  %v8419_v54 = vld [vmem:[#allocation14 + $0x14] sm:$0xf0] }
 0x64a   : > { %4154 = vmatpush.bf16.msrb.mxu0 %v8424_v61  ;;  %v7640_v61 = vld [vmem:[#allocation14 + $0x18] sm:$0xf0] }
 0x64c   : > { %v3940_v51 = vpop.permute.xlu1 %3939  ;;  %v3854_v20 = vpop.permute.xlu0 %3853 }
 0x64d   : > { %v3945_v8 = vmul.f32 %v9474_v17, %v3940_v51  ;;  %v3858_v25 = vmul.f32 %v9473_v11, %v3854_v20  ;;  %v3816_v15 = vpop.permute.xlu2 %3815  ;;  %v7638_v17 = vld [vmem:[#allocation14 + $0x10] sm:$0xf]  ;;  %v8418_v11 = vld [vmem:[#allocation14 + $0x14] sm:$0xf] }
 0x64e   : > { %v3821_v49 = vmul.f32 %v9479_v21, %v3816_v15  ;;  %v7639_v36 = vor.u32 %v8419_v54, %v7638_v17 }
 0x64f   : > { %v8574_v27 = vpack.c.bf16 %v3858_v25, %v3857_v35  ;;  %v8614_v23 = vpack.c.bf16 %v3946_v39, %v3945_v8  ;;  %v7643_v39 = vor.u32 %v8418_v11, %v7640_v61 }
 0x650   : > { %v8432_v40 = vld [vmem:[#allocation26 + $0x60] sm:$0xff] }
 0x651   : > { %9118 = vst [vmem:[#allocation26 + $0x18] sm:$0xff] %v8574_v27   ;;  %4173 = vmatpush.bf16.msrb.mxu1 %v8432_v40 }
 0x652   : > { %9126 = vst [vmem:[#allocation26 + $0x38] sm:$0xff] %v8614_v23  }
 0x654   : > { %v3842_v57 = vpop.permute.xlu1 %3841  ;;  %v3840_v22 = vpop.permute.xlu0 %3839 }
 0x655   : > { %v3846_v7 = vmul.f32 %v9476_v16, %v3842_v57  ;;  %v3845_v43 = vmul.f32 %v9476_v16, %v3840_v22  ;;  %v3906_v2 = vpop.permute.xlu2 %3905 }
 0x656   : > { %v3910_v31 = vmul.f32 %v9480_v12, %v3906_v2 }
 0x657   : > { %v8569_v24 = vpack.c.bf16 %v3846_v7, %v3845_v43  ;;  %v8443_v7 = vld [vmem:[#allocation17 + $0x38] sm:$0xff]  ;;  %v8442_v43 = vld [vmem:[#allocation17 + $0x30] sm:$0xff] }
 0x658   : > { %v8423_v14 = vld [vmem:[#allocation26 + $0x18] sm:$0xff]  ;;  %4279 = vmatpush.bf16.msrb.mxu2 %v8443_v7 }
 0x659   : > { %9117 = vst [vmem:[#allocation26 + $0x58] sm:$0xff] %v8569_v24   ;;  %v8431_v50 = vld [vmem:[#allocation26 + $0x38] sm:$0xff]  ;;  %4155 = vmatpush.bf16.msrb.mxu0 %v8423_v14  ;;  %v8441_v24 = vld [vmem:[#allocation17 + $0x28] sm:$0xff] }
 0x65a   : > { %4174 = vmatpush.bf16.msrb.mxu1 %v8431_v50  ;;  %v8439_v14 = vld [vmem:[#allocation17 + $0x18] sm:$0xff]  ;;  %v4209_v50 = vld [vmem:[%s12009_s10 + $0x10] sm:$0xff] }
 0x65b   : > { %4223 = vperm.xlu1 %9482, %v4209_v50  }
 0x65c   : > { %v3930_v32 = vpop.permute.xlu0 %3929  ;;  %v3828_v47 = vpop.permute.xlu1 %3827  ;;  %4280 = vmatpush.bf16.msrb.mxu2 %v8442_v43 }
 0x65d   : > { %v3934_v46 = vmul.f32 %v9475_v48, %v3930_v32  ;;  %v3833_v37 = vmul.f32 %v9477_v0, %v3828_v47  ;;  %v8440_v0 = vld [vmem:[#allocation17 + $0x20] sm:$0xff]  ;;  %v8437_v32 = vld [vmem:[#allocation17 + $0x8] sm:$0xff] }
 0x65e   : > { %v4207_v48 = vld [vmem:[%s12009_s10] sm:$0xff]  ;;  %v4208_v47 = vld [vmem:[%s12009_s10 + $0x8] sm:$0xff] }
 0x65f   : > { %v8609_v26 = vpack.c.bf16 %v3934_v46, %v3933_v41  ;;  %v8564_v29 = vpack.c.bf16 %v3834_v33, %v3833_v37  ;;  %v8438_v33 = vld [vmem:[#allocation17 + $0x10] sm:$0xff]  ;;  %4213 = vperm.xlu0 %9481, %v4207_v48   ;;  %v8436_v46 = vld [vmem:[#allocation17] sm:$0xff] }
 0x660   : > { %v8422_v10 = vld [vmem:[#allocation26 + $0x58] sm:$0xff]  ;;  %4281 = vmatpush.bf16.msrb.mxu2 %v8441_v24 }
 0x661   : > { %9125 = vst [vmem:[#allocation26 + $0x10] sm:$0xff] %v8609_v26   ;;  %4156 = vmatpush.bf16.msrb.mxu0 %v8422_v10  ;;  %v4210_v41 = vld [vmem:[%s12009_s10 + $0x18] sm:$0xff] }
 0x662   : > { %9116 = vst [vmem:[#allocation26] sm:$0xff] %v8564_v29  }
 0x663   : > { %4228 = vperm.xlu1 %9482, %v4210_v41  }
 0x664   : > { %v3916_v42 = vpop.permute.xlu0 %3915  ;;  %v3918_v6 = vpop.permute.xlu1 %3917  ;;  %4282 = vmatpush.bf16.msrb.mxu2 %v8440_v0 }
 0x665   : > { %v3921_v3 = vmul.f32 %v9478_v56, %v3916_v42  ;;  %v3922_v44 = vmul.f32 %v9478_v56, %v3918_v6 }
 0x667   : > { %v8604_v4 = vpack.c.bf16 %v3922_v44, %v3921_v3  ;;  %4218 = vperm.xlu0 %9481, %v4208_v47  }
 0x668   : > { %v8430_v19 = vld [vmem:[#allocation26 + $0x10] sm:$0xff]  ;;  %4283 = vmatpush.bf16.msrb.mxu2 %v8439_v14 }
 0x669   : > { %9124 = vst [vmem:[#allocation26 + $0x20] sm:$0xff] %v8604_v4   ;;  %v8421_v58 = vld [vmem:[#allocation26] sm:$0xff]  ;;  %4175 = vmatpush.bf16.msrb.mxu1 %v8430_v19 }
 0x66a   : > { %4157 = vmatpush.bf16.msrb.mxu0 %v8421_v58 }
 0x66c   : > { %v3904_v53 = vpop.permute.xlu1 %3903  ;;  %v3818_v1 = vpop.permute.xlu0 %3817  ;;  %4284 = vmatpush.bf16.msrb.mxu2 %v8438_v33 }
 0x66d   : > { %v3909_v13 = vmul.f32 %v9480_v12, %v3904_v53  ;;  %v3822_v62 = vmul.f32 %v9479_v21, %v3818_v1 }
 0x66f   : > { %v8559_v63 = vpack.c.bf16 %v3822_v62, %v3821_v49  ;;  %v8599_v52 = vpack.c.bf16 %v3910_v31, %v3909_v13 }
 0x670   : > { %v8429_v30 = vld [vmem:[#allocation26 + $0x20] sm:$0xff]  ;;  %4285 = vmatpush.bf16.msrb.mxu2 %v8437_v32 }
 0x671   : > { %8560 = vst [vmem:[#allocation26 + $0x30] sm:$0xff] %v8559_v63   ;;  %4176 = vmatpush.bf16.msrb.mxu1 %v8429_v30 }
 0x672   : > { %9123 = vst [vmem:[#allocation26 + $0x40] sm:$0xff] %v8599_v52  }
 0x674   : > { %4286 = vmatpush.bf16.msrb.mxu2 %v8436_v46 }
 0x678   : > { %v8420_v60 = vld [vmem:[#allocation26 + $0x30] sm:$0xff] }
 0x679   : > { %v8428_v9 = vld [vmem:[#allocation26 + $0x40] sm:$0xff]  ;;  %4158 = vmatpush.bf16.msrb.mxu0 %v8420_v60 }
 0x67a   : > { %4177 = vmatpush.bf16.msrb.mxu1 %v8428_v9 }
 0x67c   : > { %4159 = vmatmul.bf16.vlgmr.msrb.gmra.mxu0 %v7631_v34 }
 0x67d   : > { %4178 = vmatmul.bf16.vlgmr.msrb.gmra.mxu1 %v7635_v18 }
 0x68c   : > { %4164 = vmatmul.bf16.gmra.mxu0 %v7639_v36 }
 0x68d   : > { %4183 = vmatmul.bf16.gmra.mxu1 %v7643_v39 }
 0x6cd   : > { %v4224_v19 = vpop.permute.xlu1 %4223 }
 0x6d1   : > { %v4214_v26 = vpop.permute.xlu0 %4213 }
 0x6d5   : > { %v4229_v53 = vpop.permute.xlu1 %4228 }
 0x6d9   : > { %v4219_v6 = vpop.permute.xlu0 %4218 }
 0x6f9   : > { %v4160_v51 = vpop.f32.mrf.mxu0 }
 0x6fa   : > { %v4179_v20 = vpop.f32.mrf.mxu1 }
 0x6fb   : > { %v4180_v35 = vadd.f32 %v4179_v20, %v4160_v51 }
 0x701   : > { %v4162_v8 = vpop.f32.mrf.mxu0 }
 0x702   : > { %v4181_v25 = vpop.f32.mrf.mxu1 }
 0x703   : > { %v4182_v27 = vadd.f32 %v4181_v25, %v4162_v8 }
 0x705   : > { %v4189_v37 = vpack.c.bf16 %v4182_v27, %v4180_v35 }
 0x707   : > { %4287 = vmatmul.bf16.vlgmr.msrb.gmra.mxu2 %v4189_v37 }
 0x709   : > { %v4165_v23 = vpop.f32.mrf.mxu0 }
 0x70a   : > { %v4184_v40 = vpop.f32.mrf.mxu1 }
 0x70b   : > { %v4185_v16 = vadd.f32 %v4184_v40, %v4165_v23 }
 0x711   : > { %v4167_v28 = vpop.f32.mrf.mxu0 }
 0x712   : > { %v4186_v57 = vpop.f32.mrf.mxu1 }
 0x713   : > { %v4187_v22 = vadd.f32 %v4186_v57, %v4167_v28 }
 0x715   : > { %v4190_v15 = vpack.c.bf16 %v4187_v22, %v4185_v16 }
 0x717   : > { %4292 = vmatmul.bf16.gmra.mxu2 %v4190_v15 }
 0x78a   : > { %v4288_v29 = vpop.f32.mrf.mxu2 }
 0x78b   : > { %v4289_v10 = vadd.f32 %v4288_v29, %v4214_v26 }
 0x78d   : > { %vm4298_vm11 = vcmp.gt.f32.partialorder %v4289_v10, 0.0  ;;  %v4302_v56 = vmul.f32 0.2, %v4289_v10 }
 0x78f   : > { %v11505_v42 = vsel %vm4298_vm11, %v4289_v10, %v4302_v56 }
 0x792   : > { %v4290_v3 = vpop.f32.mrf.mxu2 }
 0x793   : > { %v4291_v44 = vadd.f32 %v4290_v3, %v4219_v6 }
 0x795   : > { %vm4299_vm12 = vcmp.gt.f32.partialorder %v4291_v44, 0.0  ;;  %v4303_v4 = vmul.f32 0.2, %v4291_v44 }
 0x797   : > { %v11507_v12 = vsel %vm4299_vm12, %v4291_v44, %v4303_v4 }
 0x79a   : > { %v4293_v2 = vpop.f32.mrf.mxu2 }
 0x79b   : > { %v4294_v21 = vadd.f32 %v4293_v2, %v4224_v19 }
 0x79d   : > { %vm4300_vm13 = vcmp.gt.f32.partialorder %v4294_v21, 0.0  ;;  %v4304_v58 = vmul.f32 0.2, %v4294_v21 }
 0x79f   : > { %v11509_v31 = vsel %vm4300_vm13, %v4294_v21, %v4304_v58 }
 0x7a2   : > { %v4295_v1 = vpop.f32.mrf.mxu2 }
 0x7a3   : > { %v4296_v49 = vadd.f32 %v4295_v1, %v4229_v53 }
 0x7a5   : > { %vm4301_vm14 = vcmp.gt.f32.partialorder %v4296_v49, 0.0  ;;  %v4305_v13 = vmul.f32 0.2, %v4296_v49 }
 0x7a7   : > { %v11511_v62 = vsel %vm4301_vm14, %v4296_v49, %v4305_v13 }
 0x7a8   : > { %s10032_s17 = smov 2   ;;  %s10033_s8 = smov 118   ;;  %v11549_v52 = vld [vmem:[#allocation20 + $0xf] ss:$0 sm:$0xff]  ;;  %v9484_v17 = vld [vmem:[#allocation20 + $0x3] ss:$0 sm:$0xff]  ;;  %9499 = vset.pattern.permute.xlu1 %v10001_v5  ;;  %9498 = vset.pattern.permute.xlu0 %v10001_v5 }
 0x7a9   : > { %4376 = vrot.lane.b32.xlu1 %v11505_v42, %s10032_s17  ;;  %4380 = vrot.lane.b32.xlu0 %v11509_v31, %s10032_s17  ;;  %s10034_s27 = smov 126   ;;  %s10035_s3 = smov 3   ;;  %v9485_v25 = vld [vmem:[#allocation20 + $0x7] ss:$0 sm:$0xff]  ;;  %v9487_v22 = vld [vmem:[#allocation20 + $0xb] ss:$0 sm:$0xff] }
 0x7aa   : > { %4630 = vrot.lane.b32.xlu2 %v11509_v31, %s10033_s8  ;;  %s10036_s11 = smov 122   ;;  %s10037_s2 = smov 119   ;;  %v9486_v7 = vld [vmem:[#allocation20 + $0x2] ss:$0 sm:$0xff] }
 0x7ab   : > { %s10038_s19 = smov 127   ;;  %s10039_s9 = smov 4   ;;  %9500 = vset.pattern.permute.xlu2 %v10001_v5 }
 0x7ac   : > { %s10040_s28 = smov 123   ;;  %s10041_s30 = smov 120  }
 0x7ad   : > { %s10042_s13 = smov 5   ;;  %s10043_s4 = smov 124  }
 0x7ae   : > { %s10044_s7 = smov 121  }
 0x7b1   : > { %4378 = vrot.lane.b32.xlu1 %v11507_v12, %s10032_s17  ;;  %4382 = vrot.lane.b32.xlu0 %v11511_v62, %s10032_s17  ;;  %s10045_s17 = smov 1  }
 0x7b2   : > { %4632 = vrot.lane.b32.xlu2 %v11511_v62, %s10033_s8 }
 0x7b9   : > { %4456 = vrot.lane.b32.xlu1 %v11511_v62, %s10034_s27  ;;  %4454 = vrot.lane.b32.xlu0 %v11509_v31, %s10034_s27 }
 0x7ba   : > { %4358 = vrot.lane.b32.xlu2 %v11509_v31, %s10035_s3 }
 0x7c1   : > { %4542 = vrot.lane.b32.xlu1 %v11509_v31, %s10036_s11  ;;  %4360 = vrot.lane.b32.xlu0 %v11511_v62, %s10035_s3 }
 0x7c2   : > { %4544 = vrot.lane.b32.xlu2 %v11511_v62, %s10036_s11 }
 0x7c9   : > { %4628 = vrot.lane.b32.xlu1 %v11507_v12, %s10033_s8  ;;  %4626 = vrot.lane.b32.xlu0 %v11505_v42, %s10033_s8  ;;  %s10046_s8 = smov 125  }
 0x7ca   : > { %4450 = vrot.lane.b32.xlu2 %v11505_v42, %s10034_s27 }
 0x7d1   : > { %4354 = vrot.lane.b32.xlu1 %v11505_v42, %s10035_s3  ;;  %4452 = vrot.lane.b32.xlu0 %v11507_v12, %s10034_s27 }
 0x7d2   : > { %4356 = vrot.lane.b32.xlu2 %v11507_v12, %s10035_s3 }
 0x7d9   : > { %4540 = vrot.lane.b32.xlu1 %v11507_v12, %s10036_s11  ;;  %4538 = vrot.lane.b32.xlu0 %v11505_v42, %s10036_s11 }
 0x7da   : > { %4608 = vrot.lane.b32.xlu2 %v11509_v31, %s10037_s2 }
 0x7e1   : > { %4432 = vrot.lane.b32.xlu1 %v11509_v31, %s10038_s19  ;;  %4610 = vrot.lane.b32.xlu0 %v11511_v62, %s10037_s2 }
 0x7e2   : > { %4434 = vrot.lane.b32.xlu2 %v11511_v62, %s10038_s19 }
 0x7e9   : > { %4338 = vrot.lane.b32.xlu1 %v11511_v62, %s10039_s9  ;;  %4336 = vrot.lane.b32.xlu0 %v11509_v31, %s10039_s9 }
 0x7ea   : > { %4520 = vrot.lane.b32.xlu2 %v11509_v31, %s10040_s28 }
 0x7f1   : > { %4604 = vrot.lane.b32.xlu1 %v11505_v42, %s10037_s2  ;;  %4522 = vrot.lane.b32.xlu0 %v11511_v62, %s10040_s28 }
 0x7f2   : > { %4606 = vrot.lane.b32.xlu2 %v11507_v12, %s10037_s2 }
 0x7f9   : > { %4430 = vrot.lane.b32.xlu1 %v11507_v12, %s10038_s19  ;;  %4428 = vrot.lane.b32.xlu0 %v11505_v42, %s10038_s19 }
 0x7fa   : > { %4332 = vrot.lane.b32.xlu2 %v11505_v42, %s10039_s9 }
 0x801   : > { %4516 = vrot.lane.b32.xlu1 %v11505_v42, %s10040_s28  ;;  %4334 = vrot.lane.b32.xlu0 %v11507_v12, %s10039_s9 }
 0x802   : > { %4518 = vrot.lane.b32.xlu2 %v11507_v12, %s10040_s28 }
 0x804   : > { %v4631_v63 = vpop.permute.xlu2 %4630 }
 0x805   : > { %v4638_v30 = vmul.f32 %v11549_v52, %v4631_v63 }
 0x809   : > { %4588 = vrot.lane.b32.xlu1 %v11511_v62, %s10041_s30  ;;  %4586 = vrot.lane.b32.xlu0 %v11509_v31, %s10041_s30 }
 0x80a   : > { %4314 = vrot.lane.b32.xlu2 %v11509_v31, %s10042_s13 }
 0x80c   : > { %v4633_v38 = vpop.permute.xlu2 %4632 }
 0x80d   : > { %v4639_v55 = vmul.f32 %v11549_v52, %v4633_v38 }
 0x80f   : > { %v8794_v45 = vpack.c.bf16 %v4639_v55, %v4638_v30 }
 0x811   : > { %4498 = vrot.lane.b32.xlu1 %v11509_v31, %s10043_s4  ;;  %4316 = vrot.lane.b32.xlu0 %v11511_v62, %s10042_s13  ;;  %9161 = vst [vmem:[#allocation27 + $0x98] sm:$0xff] %v8794_v45  }
 0x812   : > { %4500 = vrot.lane.b32.xlu2 %v11511_v62, %s10043_s4 }
 0x814   : > { %v4359_v59 = vpop.permute.xlu2 %4358 }
 0x815   : > { %v4366_v48 = vmul.f32 %v9486_v7, %v4359_v59 }
 0x818   : > { %v8491_v60 = vld [vmem:[#allocation27 + $0x98] sm:$0xff] }
 0x819   : > { %4584 = vrot.lane.b32.xlu1 %v11507_v12, %s10041_s30  ;;  %4582 = vrot.lane.b32.xlu0 %v11505_v42, %s10041_s30 }
 0x81a   : > { %5087 = vmatpush.bf16.msra.mxu2 %v8491_v60  ;;  %4310 = vrot.lane.b32.xlu2 %v11505_v42, %s10042_s13  ;;  %v9489_v60 = vld [vmem:[#allocation20 + $0x6] ss:$0 sm:$0xff] }
 0x81b   : > { %v4377_v9 = vpop.permute.xlu1 %4376  ;;  %v4381_v34 = vpop.permute.xlu0 %4380 }
 0x81c   : > { %v4545_v18 = vpop.permute.xlu2 %4544  ;;  %v4386_v61 = vmul.f32 %v9484_v17, %v4377_v9  ;;  %v4388_v36 = vmul.f32 %v9484_v17, %v4381_v34  ;;  %v9488_v34 = vld [vmem:[#allocation20 + $0xe] ss:$0 sm:$0xff] }
 0x81d   : > { %v4551_v24 = vmul.f32 %v9487_v22, %v4545_v18 }
 0x821   : > { %4494 = vrot.lane.b32.xlu1 %v11505_v42, %s10043_s4  ;;  %4312 = vrot.lane.b32.xlu0 %v11507_v12, %s10042_s13 }
 0x822   : > { %4496 = vrot.lane.b32.xlu2 %v11507_v12, %s10043_s4 }
 0x823   : > { %v4379_v54 = vpop.permute.xlu1 %4378  ;;  %v4383_v11 = vpop.permute.xlu0 %4382 }
 0x824   : > { %v4387_v39 = vmul.f32 %v9484_v17, %v4379_v54  ;;  %v4389_v51 = vmul.f32 %v9484_v17, %v4383_v11  ;;  %v4451_v20 = vpop.permute.xlu2 %4450 }
 0x825   : > { %v4460_v21 = vmul.f32 %v9485_v25, %v4451_v20 }
 0x826   : > { %v8669_v35 = vpack.c.bf16 %v4387_v39, %v4386_v61  ;;  %v8674_v8 = vpack.c.bf16 %v4389_v51, %v4388_v36 }
 0x828   : > { %9136 = vst [vmem:[#allocation27 + $0x70] sm:$0xff] %v8669_v35  }
 0x829   : > { %9137 = vst [vmem:[#allocation27 + $0x38] sm:$0xff] %v8674_v8   ;;  %4566 = vrot.lane.b32.xlu1 %v11511_v62, %s10044_s7  ;;  %4564 = vrot.lane.b32.xlu0 %v11509_v31, %s10044_s7 }
 0x82a   : > { %4402 = vrot.lane.b32.xlu2 %v11509_v31, %s10045_s17 }
 0x82b   : > { %v4457_v27 = vpop.permute.xlu1 %4456  ;;  %v4455_v23 = vpop.permute.xlu0 %4454 }
 0x82c   : > { %v4463_v40 = vmul.f32 %v9485_v25, %v4457_v27  ;;  %v4462_v16 = vmul.f32 %v9485_v25, %v4455_v23  ;;  %v4357_v28 = vpop.permute.xlu2 %4356 }
 0x82d   : > { %v4365_v4 = vmul.f32 %v9486_v7, %v4357_v28 }
 0x82e   : > { %v8714_v57 = vpack.c.bf16 %v4463_v40, %v4462_v16 }
 0x82f   : > { %v8466_v32 = vld [vmem:[#allocation27 + $0x70] sm:$0xff] }
 0x830   : > { %9145 = vst [vmem:[#allocation27 + $0x50] sm:$0xff] %v8714_v57   ;;  %v8467_v43 = vld [vmem:[#allocation27 + $0x38] sm:$0xff] }
 0x831   : > { %4476 = vrot.lane.b32.xlu1 %v11509_v31, %s10046_s8  ;;  %4404 = vrot.lane.b32.xlu0 %v11511_v62, %s10045_s17 }
 0x832   : > { %5000 = vmatpush.bf16.msrb.mxu3 %v8467_v43  ;;  %4478 = vrot.lane.b32.xlu2 %v11511_v62, %s10046_s8 }
 0x833   : > { %v4543_v0 = vpop.permute.xlu1 %4542  ;;  %v4361_v14 = vpop.permute.xlu0 %4360 }
 0x834   : > { %v4550_v50 = vmul.f32 %v9487_v22, %v4543_v0  ;;  %v4367_v33 = vmul.f32 %v9486_v7, %v4361_v14  ;;  %v4609_v47 = vpop.permute.xlu2 %4608 }
 0x835   : > { %v4616_v61 = vmul.f32 %v9488_v34, %v4609_v47 }
 0x836   : > { %v8664_v41 = vpack.c.bf16 %v4367_v33, %v4366_v48  ;;  %v8754_v46 = vpack.c.bf16 %v4551_v24, %v4550_v50  ;;  %5001 = vmatpush.bf16.msrb.mxu3 %v8466_v32 }
 0x837   : > { %v8475_v37 = vld [vmem:[#allocation27 + $0x50] sm:$0xff] }
 0x838   : > { %9135 = vst [vmem:[#allocation27 + $0xb0] sm:$0xff] %v8664_v41   ;;  %5029 = vmatpush.bf16.msra.mxu0 %v8475_v37 }
 0x839   : > { %9153 = vst [vmem:[#allocation27] sm:$0xff] %v8754_v46   ;;  %4562 = vrot.lane.b32.xlu1 %v11507_v12, %s10044_s7  ;;  %4560 = vrot.lane.b32.xlu0 %v11505_v42, %s10044_s7 }
 0x83a   : > { %4398 = vrot.lane.b32.xlu2 %v11505_v42, %s10045_s17 }
 0x83b   : > { %v4629_v15 = vpop.permute.xlu1 %4628  ;;  %v4627_v26 = vpop.permute.xlu0 %4626 }
 0x83c   : > { %v4637_v29 = vmul.f32 %v11549_v52, %v4629_v15  ;;  %v4636_v10 = vmul.f32 %v11549_v52, %v4627_v26  ;;  %v4435_v56 = vpop.permute.xlu2 %4434 }
 0x83d   : > { %v4441_v17 = vmul.f32 %v9489_v60, %v4435_v56 }
 0x83e   : > { %v8789_v6 = vpack.c.bf16 %v4637_v29, %v4636_v10 }
 0x83f   : > { %v8465_v3 = vld [vmem:[#allocation27 + $0xb0] sm:$0xff] }
 0x840   : > { %9160 = vst [vmem:[#allocation27 + $0x60] sm:$0xff] %v8789_v6   ;;  %v8483_v44 = vld [vmem:[#allocation27] sm:$0xff]  ;;  %5002 = vmatpush.bf16.msrb.mxu3 %v8465_v3 }
 0x841   : > { %4472 = vrot.lane.b32.xlu1 %v11505_v42, %s10046_s8  ;;  %4400 = vrot.lane.b32.xlu0 %v11507_v12, %s10045_s17 }
 0x842   : > { %5058 = vmatpush.bf16.msra.mxu1 %v8483_v44  ;;  %4474 = vrot.lane.b32.xlu2 %v11507_v12, %s10046_s8 }
 0x843   : > { %v4355_v19 = vpop.permute.xlu1 %4354  ;;  %v4453_v2 = vpop.permute.xlu0 %4452 }
 0x844   : > { %v4364_v58 = vmul.f32 %v9486_v7, %v4355_v19  ;;  %v4461_v53 = vmul.f32 %v9485_v25, %v4453_v2  ;;  %v4521_v1 = vpop.permute.xlu2 %4520  ;;  %v9491_v25 = vld [vmem:[#allocation20 + $0x1] ss:$0 sm:$0xff]  ;;  %v9490_v7 = vld [vmem:[#allocation20 + $0xa] ss:$0 sm:$0xff] }
 0x845   : > { %v4528_v48 = vmul.f32 %v9490_v7, %v4521_v1 }
 0x846   : > { %v8709_v49 = vpack.c.bf16 %v4461_v53, %v4460_v21  ;;  %v8659_v13 = vpack.c.bf16 %v4365_v4, %v4364_v58 }
 0x847   : > { %v8490_v63 = vld [vmem:[#allocation27 + $0x60] sm:$0xff] }
 0x848   : > { %9144 = vst [vmem:[#allocation27 + $0x30] sm:$0xff] %v8709_v49   ;;  %5088 = vmatpush.bf16.msra.mxu2 %v8490_v63 }
 0x849   : > { %9134 = vst [vmem:[#allocation27 + $0xc8] sm:$0xff] %v8659_v13   ;;  %v9492_v13 = vld [vmem:[#allocation20 + $0xd] ss:$0 sm:$0xff] }
 0x84b   : > { %v4541_v52 = vpop.permute.xlu1 %4540  ;;  %v4539_v30 = vpop.permute.xlu0 %4538 }
 0x84c   : > { %v4549_v38 = vmul.f32 %v9487_v22, %v4541_v52  ;;  %v4548_v55 = vmul.f32 %v9487_v22, %v4539_v30  ;;  %v4607_v45 = vpop.permute.xlu2 %4606 }
 0x84d   : > { %v4615_v24 = vmul.f32 %v9488_v34, %v4607_v45 }
 0x84e   : > { %v8749_v59 = vpack.c.bf16 %v4549_v38, %v4548_v55 }
 0x84f   : > { %v8474_v9 = vld [vmem:[#allocation27 + $0x30] sm:$0xff] }
 0x850   : > { %9152 = vst [vmem:[#allocation27 + $0x28] sm:$0xff] %v8749_v59   ;;  %v8464_v18 = vld [vmem:[#allocation27 + $0xc8] sm:$0xff]  ;;  %5030 = vmatpush.bf16.msra.mxu0 %v8474_v9  ;;  %v9494_v59 = vld [vmem:[#allocation20 + $0x9] ss:$0 sm:$0xff]  ;;  %v8694_v9 = vpack.c.bf16 %v11511_v62, %v11509_v31 }
 0x851   : > { %5003 = vmatpush.bf16.msrb.mxu3 %v8464_v18 }
 0x852   : > { %9141 = vst [vmem:[#allocation27 + $0x88] sm:$0xff] %v8694_v9  }
 0x853   : > { %v4433_v54 = vpop.permute.xlu1 %4432  ;;  %v4611_v11 = vpop.permute.xlu0 %4610 }
 0x854   : > { %v4440_v36 = vmul.f32 %v9489_v60, %v4433_v54  ;;  %v4617_v39 = vmul.f32 %v9488_v34, %v4611_v11  ;;  %v4333_v51 = vpop.permute.xlu2 %4332 }
 0x855   : > { %v4342_v2 = vmul.f32 %v9491_v25, %v4333_v51 }
 0x856   : > { %v8784_v20 = vpack.c.bf16 %v4617_v39, %v4616_v61  ;;  %v8704_v35 = vpack.c.bf16 %v4441_v17, %v4440_v36  ;;  %v8689_v61 = vpack.c.bf16 %v11507_v12, %v11505_v42 }
 0x857   : > { %v8482_v8 = vld [vmem:[#allocation27 + $0x28] sm:$0xff] }
 0x858   : > { %9159 = vst [vmem:[#allocation27 + $0xe0] sm:$0xff] %v8784_v20   ;;  %5059 = vmatpush.bf16.msra.mxu1 %v8482_v8 }
 0x859   : > { %9143 = vst [vmem:[#allocation27 + $0x18] sm:$0xff] %v8704_v35   ;;  %v8471_v62 = vld [vmem:[#allocation27 + $0x88] sm:$0xff] }
 0x85a   : > { %9140 = vst [vmem:[#allocation27 + $0x78] sm:$0xff] %v8689_v61  }
 0x85b   : > { %v4339_v27 = vpop.permute.xlu1 %4338  ;;  %v4337_v23 = vpop.permute.xlu0 %4336 }
 0x85c   : > { %v4345_v40 = vmul.f32 %v9491_v25, %v4339_v27  ;;  %v4344_v16 = vmul.f32 %v9491_v25, %v4337_v23  ;;  %v4519_v57 = vpop.permute.xlu2 %4518 }
 0x85d   : > { %v4527_v3 = vmul.f32 %v9490_v7, %v4519_v57 }
 0x85e   : > { %v8654_v28 = vpack.c.bf16 %v4345_v40, %v4344_v16 }
 0x85f   : > { %v8489_v22 = vld [vmem:[#allocation27 + $0xe0] sm:$0xff] }
 0x860   : > { %9133 = vst [vmem:[#allocation27 + $0xc0] sm:$0xff] %v8654_v28   ;;  %v8473_v43 = vld [vmem:[#allocation27 + $0x18] sm:$0xff]  ;;  %5089 = vmatpush.bf16.msra.mxu2 %v8489_v22 }
 0x861   : > { %5031 = vmatpush.bf16.msra.mxu0 %v8473_v43  ;;  %v8470_v16 = vld [vmem:[#allocation27 + $0x78] sm:$0xff] }
 0x863   : > { %v4605_v0 = vpop.permute.xlu1 %4604  ;;  %v4523_v14 = vpop.permute.xlu0 %4522 }
 0x864   : > { %v4614_v50 = vmul.f32 %v9488_v34, %v4605_v0  ;;  %v4529_v33 = vmul.f32 %v9490_v7, %v4523_v14  ;;  %v4315_v46 = vpop.permute.xlu2 %4314  ;;  %v9493_v34 = vld [vmem:[#allocation20] ss:$0 sm:$0xff] }
 0x865   : > { %v4322_v36 = vmul.f32 %v9493_v34, %v4315_v46 }
 0x866   : > { %v8779_v32 = vpack.c.bf16 %v4615_v24, %v4614_v50  ;;  %v8744_v47 = vpack.c.bf16 %v4529_v33, %v4528_v48 }
 0x867   : > { %v8463_v41 = vld [vmem:[#allocation27 + $0xc0] sm:$0xff] }
 0x868   : > { %9158 = vst [vmem:[#allocation27 + $0x8] sm:$0xff] %v8779_v32   ;;  %5004 = vmatpush.bf16.msrb.mxu3 %v8463_v41  ;;  %v9495_v32 = vld [vmem:[#allocation20 + $0xc] ss:$0 sm:$0xff] }
 0x869   : > { %9151 = vst [vmem:[#allocation27 + $0x40] sm:$0xff] %v8744_v47  }
 0x86b   : > { %v4431_v37 = vpop.permute.xlu1 %4430  ;;  %v4429_v15 = vpop.permute.xlu0 %4428 }
 0x86c   : > { %v4439_v26 = vmul.f32 %v9489_v60, %v4431_v37  ;;  %v4438_v29 = vmul.f32 %v9489_v60, %v4429_v15  ;;  %v4501_v44 = vpop.permute.xlu2 %4500 }
 0x86d   : > { %v4507_v17 = vmul.f32 %v9494_v59, %v4501_v44 }
 0x86e   : > { %v8699_v10 = vpack.c.bf16 %v4439_v26, %v4438_v29  ;;  %v7742_v26 = vld [vmem:[#allocation18] sm:$0xf]  ;;  %v8446_v29 = vld [vmem:[#allocation18 + $0xc] sm:$0xf0] }
 0x86f   : > { %v8488_v56 = vld [vmem:[#allocation27 + $0x8] sm:$0xff] }
 0x870   : > { %9142 = vst [vmem:[#allocation27 + $0xf0] sm:$0xff] %v8699_v10   ;;  %v8481_v6 = vld [vmem:[#allocation27 + $0x40] sm:$0xff]  ;;  %5090 = vmatpush.bf16.msra.mxu2 %v8488_v56 }
 0x871   : > { %5060 = vmatpush.bf16.msra.mxu1 %v8481_v6  ;;  %v9497_v56 = vld [vmem:[#allocation20 + $0x8] ss:$0 sm:$0xff] }
 0x873   : > { %v4517_v4 = vpop.permute.xlu1 %4516  ;;  %v4335_v19 = vpop.permute.xlu0 %4334 }
 0x874   : > { %v4526_v21 = vmul.f32 %v9490_v7, %v4517_v4  ;;  %v4343_v58 = vmul.f32 %v9491_v25, %v4335_v19  ;;  %v4311_v55 = vpop.permute.xlu2 %4310  ;;  %v7743_v4 = vor.u32 %v8446_v29, %v7742_v26  ;;  %v8453_v29 = vld [vmem:[#allocation18 + $0x4c] sm:$0xf] }
 0x875   : > { %v4320_v24 = vmul.f32 %v9493_v34, %v4311_v55 }
 0x876   : > { %v8739_v53 = vpack.c.bf16 %v4527_v3, %v4526_v21  ;;  %v8649_v1 = vpack.c.bf16 %v4343_v58, %v4342_v2  ;;  %v9496_v3 = vld [vmem:[#allocation20 + $0x4] ss:$0 sm:$0xff] }
 0x877   : > { %v8472_v49 = vld [vmem:[#allocation27 + $0xf0] sm:$0xff] }
 0x878   : > { %9150 = vst [vmem:[#allocation27 + $0x80] sm:$0xff] %v8739_v53   ;;  %5032 = vmatpush.bf16.msra.mxu0 %v8472_v49 }
 0x879   : > { %9132 = vst [vmem:[#allocation27 + $0x10] sm:$0xff] %v8649_v1  }
 0x87b   : > { %v4589_v63 = vpop.permute.xlu1 %4588  ;;  %v4587_v52 = vpop.permute.xlu0 %4586 }
 0x87c   : > { %v4595_v30 = vmul.f32 %v9492_v13, %v4589_v63  ;;  %v4594_v38 = vmul.f32 %v9492_v13, %v4587_v52  ;;  %v4497_v8 = vpop.permute.xlu2 %4496  ;;  %5033 = vmatpush.bf16.msra.mxu0 %v8471_v62 }
 0x87d   : > { %v4505_v22 = vmul.f32 %v9494_v59, %v4497_v8  ;;  %v7752_v8 = vld [vmem:[#allocation18 + $0x18] sm:$0xf0] }
 0x87e   : > { %v8774_v45 = vpack.c.bf16 %v4595_v30, %v4594_v38 }
 0x87f   : > { %v8480_v60 = vld [vmem:[#allocation27 + $0x80] sm:$0xff] }
 0x880   : > { %9157 = vst [vmem:[#allocation27 + $0x20] sm:$0xff] %v8774_v45   ;;  %v8462_v18 = vld [vmem:[#allocation27 + $0x10] sm:$0xff]  ;;  %5061 = vmatpush.bf16.msra.mxu1 %v8480_v60  ;;  %5034 = vmatpush.bf16.msra.mxu0 %v8470_v16  ;;  %v7774_v16 = vld [vmem:[#allocation18 + $0x40] sm:$0xf] }
 0x881   : > { %5005 = vmatpush.bf16.msrb.mxu3 %v8462_v18  ;;  %v8450_v60 = vld [vmem:[#allocation18 + $0x2c] sm:$0xf0] }
 0x883   : > { %v4499_v54 = vpop.permute.xlu1 %4498  ;;  %v4317_v11 = vpop.permute.xlu0 %4316 }
 0x884   : > { %v4506_v39 = vmul.f32 %v9494_v59, %v4499_v54  ;;  %v4323_v51 = vmul.f32 %v9493_v34, %v4317_v11  ;;  %v4403_v57 = vpop.permute.xlu2 %4402 }
 0x885   : > { %v4410_v58 = vmul.f32 %v9496_v3, %v4403_v57 }
 0x886   : > { %v8644_v20 = vpack.c.bf16 %v4323_v51, %v4322_v36  ;;  %v8734_v35 = vpack.c.bf16 %v4507_v17, %v4506_v39 }
 0x887   : > { %v8487_v31 = vld [vmem:[#allocation27 + $0x20] sm:$0xff] }
 0x888   : > { %9131 = vst [vmem:[#allocation27 + $0x68] sm:$0xff] %v8644_v20   ;;  %5091 = vmatpush.bf16.msra.mxu2 %v8487_v31 }
 0x889   : > { %9149 = vst [vmem:[#allocation27 + $0x58] sm:$0xff] %v8734_v35   ;;  %v8445_v35 = vld [vmem:[#allocation18 + $0xc] sm:$0xf] }
 0x88b   : > { %v4585_v25 = vpop.permute.xlu1 %4584  ;;  %v4583_v27 = vpop.permute.xlu0 %4582 }
 0x88c   : > { %v4593_v23 = vmul.f32 %v9492_v13, %v4585_v25  ;;  %v4592_v40 = vmul.f32 %v9492_v13, %v4583_v27  ;;  %v4479_v47 = vpop.permute.xlu2 %4478  ;;  %v7755_v27 = vor.u32 %v8445_v35, %v7752_v8 }
 0x88d   : > { %v4485_v19 = vmul.f32 %v9497_v56, %v4479_v47  ;;  %v8458_v47 = vld [vmem:[#allocation18 + $0x6c] sm:$0xf0] }
 0x88e   : > { %v8769_v28 = vpack.c.bf16 %v4593_v23, %v4592_v40  ;;  %v8444_v23 = vld [vmem:[#allocation18 + $0x4] sm:$0xf]  ;;  %v7744_v40 = vld [vmem:[#allocation18 + $0x10] sm:$0xf0] }
 0x88f   : > { %v8461_v42 = vld [vmem:[#allocation27 + $0x68] sm:$0xff] }
 0x890   : > { %9156 = vst [vmem:[#allocation27 + $0xa0] sm:$0xff] %v8769_v28   ;;  %v8479_v12 = vld [vmem:[#allocation27 + $0x58] sm:$0xff]  ;;  %5006 = vmatpush.bf16.msrb.mxu3 %v8461_v42  ;;  %v8454_v28 = vld [vmem:[#allocation18 + $0x4c] sm:$0xf0]  ;;  %v7750_v42 = vld [vmem:[#allocation18 + $0x8] sm:$0xf] }
 0x891   : > { %5062 = vmatpush.bf16.msra.mxu1 %v8479_v12  ;;  %v8447_v12 = vld [vmem:[#allocation18 + $0x14] sm:$0xf0] }
 0x893   : > { %v4495_v7 = vpop.permute.xlu1 %4494  ;;  %v4313_v43 = vpop.permute.xlu0 %4312 }
 0x894   : > { %v4504_v0 = vmul.f32 %v9494_v59, %v4495_v7  ;;  %v4321_v14 = vmul.f32 %v9493_v34, %v4313_v43  ;;  %v4399_v49 = vpop.permute.xlu2 %4398  ;;  %v7758_v59 = vld [vmem:[#allocation18 + $0x20] sm:$0xf]  ;;  %v7747_v7 = vor.u32 %v8444_v23, %v7744_v40  ;;  %v7775_v43 = vor.u32 %v8454_v28, %v7774_v16 }
 0x895   : > { %v7759_v54 = vor.u32 %v8450_v60, %v7758_v59  ;;  %v4408_v39 = vmul.f32 %v9496_v3, %v4399_v49  ;;  %v7792_v49 = vld [vmem:[#allocation18 + $0x70] sm:$0xf0] }
 0x896   : > { %v8639_v48 = vpack.c.bf16 %v4321_v14, %v4320_v24  ;;  %v8729_v50 = vpack.c.bf16 %v4505_v22, %v4504_v0  ;;  %v7751_v24 = vor.u32 %v8447_v12, %v7750_v42  ;;  %v8449_v0 = vld [vmem:[#allocation18 + $0x2c] sm:$0xf]  ;;  %v7768_v14 = vld [vmem:[#allocation18 + $0x38] sm:$0xf0] }
 0x897   : > { %v8486_v33 = vld [vmem:[#allocation27 + $0xa0] sm:$0xff] }
 0x898   : > { %8640 = vst [vmem:[#allocation27 + $0xa8] sm:$0xff] %v8639_v48   ;;  %5092 = vmatpush.bf16.msra.mxu2 %v8486_v33  ;;  %v7771_v48 = vor.u32 %v8449_v0, %v7768_v14  ;;  %v7760_v33 = vld [vmem:[#allocation18 + $0x30] sm:$0xf0] }
 0x899   : > { %9148 = vst [vmem:[#allocation27 + $0xd8] sm:$0xff] %v8729_v50   ;;  %v8448_v50 = vld [vmem:[#allocation18 + $0x24] sm:$0xf] }
 0x89b   : > { %v4567_v41 = vpop.permute.xlu1 %4566  ;;  %v4565_v46 = vpop.permute.xlu0 %4564 }
 0x89c   : > { %v4573_v37 = vmul.f32 %v9495_v32, %v4567_v41  ;;  %v4572_v15 = vmul.f32 %v9495_v32, %v4565_v46  ;;  %v4475_v18 = vpop.permute.xlu2 %4474  ;;  %v7766_v41 = vld [vmem:[#allocation18 + $0x28] sm:$0xf]  ;;  %v8451_v46 = vld [vmem:[#allocation18 + $0x34] sm:$0xf0] }
 0x89d   : > { %v4483_v11 = vmul.f32 %v9497_v56, %v4475_v18  ;;  %v7767_v26 = vor.u32 %v8451_v46, %v7766_v41 }
 0x89e   : > { %v8764_v10 = vpack.c.bf16 %v4573_v37, %v4572_v15  ;;  %v7763_v37 = vor.u32 %v8448_v50, %v7760_v33 }
 0x89f   : > { %v8460_v6 = vld [vmem:[#allocation27 + $0xa8] sm:$0xff] }
 0x8a0   : > { %9155 = vst [vmem:[#allocation27 + $0xe8] sm:$0xff] %v8764_v10   ;;  %v8478_v44 = vld [vmem:[#allocation27 + $0xd8] sm:$0xff]  ;;  %5007 = vmatpush.bf16.msrb.mxu3 %v8460_v6  ;;  %v8452_v6 = vld [vmem:[#allocation18 + $0x44] sm:$0xf] }
 0x8a1   : > { %5063 = vmatpush.bf16.msra.mxu1 %v8478_v44  ;;  %v7784_v10 = vld [vmem:[#allocation18 + $0x58] sm:$0xf0]  ;;  %v7782_v44 = vld [vmem:[#allocation18 + $0x48] sm:$0xf] }
 0x8a3   : > { %v4477_v2 = vpop.permute.xlu1 %4476  ;;  %v4405_v21 = vpop.permute.xlu0 %4404  ;;  %5008 = vmatmul.bf16.vlgmr.msrb.gmra.mxu3 %v7743_v4  ;;  %v8455_v4 = vld [vmem:[#allocation18 + $0x54] sm:$0xf0] }
 0x8a4   : > { %v4484_v53 = vmul.f32 %v9497_v56, %v4477_v2  ;;  %v4411_v1 = vmul.f32 %v9496_v3, %v4405_v21  ;;  %v7783_v2 = vor.u32 %v8455_v4, %v7782_v44  ;;  %v8457_v21 = vld [vmem:[#allocation18 + $0x6c] sm:$0xf] }
 0x8a6   : > { %v8684_v13 = vpack.c.bf16 %v4411_v1, %v4410_v58  ;;  %v8724_v63 = vpack.c.bf16 %v4485_v19, %v4484_v53  ;;  %v7800_v58 = vld [vmem:[#allocation18 + $0x78] sm:$0xf0]  ;;  %v8456_v1 = vld [vmem:[#allocation18 + $0x64] sm:$0xf] }
 0x8a7   : > { %v8485_v52 = vld [vmem:[#allocation27 + $0xe8] sm:$0xff]  ;;  %v7803_v53 = vor.u32 %v8457_v21, %v7800_v58 }
 0x8a8   : > { %9139 = vst [vmem:[#allocation27 + $0xf8] sm:$0xff] %v8684_v13   ;;  %5093 = vmatpush.bf16.msra.mxu2 %v8485_v52  ;;  %v7798_v13 = vld [vmem:[#allocation18 + $0x68] sm:$0xf]  ;;  %v7795_v52 = vor.u32 %v8456_v1, %v7792_v49  ;;  %v5116_v1 = vld [vmem:[%s12013_s14] sm:$0xff] }
 0x8a9   : > { %9147 = vst [vmem:[#allocation27 + $0xd0] sm:$0xff] %v8724_v63   ;;  %v8459_v63 = vld [vmem:[#allocation18 + $0x74] sm:$0xf0]  ;;  %5126 = vperm.xlu0 %9498, %v5116_v1  }
 0x8aa   : > { %v5120_v49 = vld [vmem:[%s12013_s14 + $0x20] sm:$0xff] }
 0x8ab   : > { %v4563_v30 = vpop.permute.xlu1 %4562  ;;  %v4561_v38 = vpop.permute.xlu0 %4560  ;;  %5146 = vperm.xlu2 %9500, %v5120_v49  }
 0x8ac   : > { %v4571_v55 = vmul.f32 %v9495_v32, %v4563_v30  ;;  %v4570_v45 = vmul.f32 %v9495_v32, %v4561_v38  ;;  %v7790_v32 = vld [vmem:[#allocation18 + $0x60] sm:$0xf]  ;;  %v7799_v30 = vor.u32 %v8459_v63, %v7798_v13  ;;  %v5119_v13 = vld [vmem:[%s12013_s14 + $0x18] sm:$0xff] }
 0x8ad   : > { %v7791_v15 = vor.u32 %v8458_v47, %v7790_v32  ;;  %v5117_v63 = vld [vmem:[%s12013_s14 + $0x8] sm:$0xff] }
 0x8ae   : > { %v8759_v9 = vpack.c.bf16 %v4571_v55, %v4570_v45 }
 0x8af   : > { %v8469_v34 = vld [vmem:[#allocation27 + $0xf8] sm:$0xff] }
 0x8b0   : > { %9154 = vst [vmem:[#allocation27 + $0x90] sm:$0xff] %v8759_v9   ;;  %v8477_v17 = vld [vmem:[#allocation27 + $0xd0] sm:$0xff]  ;;  %5035 = vmatpush.bf16.msra.mxu0 %v8469_v34 }
 0x8b1   : > { %5064 = vmatpush.bf16.msra.mxu1 %v8477_v17  ;;  %5131 = vperm.xlu0 %9498, %v5117_v63  }
 0x8b3   : > { %v4473_v61 = vpop.permute.xlu1 %4472  ;;  %v4401_v36 = vpop.permute.xlu0 %4400  ;;  %5013 = vmatmul.bf16.gmra.mxu3 %v7759_v54 }
 0x8b4   : > { %v4482_v51 = vmul.f32 %v9497_v56, %v4473_v61  ;;  %v4409_v20 = vmul.f32 %v9496_v3, %v4401_v36  ;;  %v7787_v56 = vor.u32 %v8453_v29, %v7784_v10  ;;  %v7776_v3 = vld [vmem:[#allocation18 + $0x50] sm:$0xf0] }
 0x8b5   : > { %v7779_v19 = vor.u32 %v8452_v6, %v7776_v3 }
 0x8b6   : > { %v8679_v31 = vpack.c.bf16 %v4409_v20, %v4408_v39  ;;  %v8719_v62 = vpack.c.bf16 %v4483_v11, %v4482_v51 }
 0x8b7   : > { %v8484_v25 = vld [vmem:[#allocation27 + $0x90] sm:$0xff] }
 0x8b8   : > { %9138 = vst [vmem:[#allocation27 + $0x48] sm:$0xff] %v8679_v31   ;;  %5094 = vmatpush.bf16.msra.mxu2 %v8484_v25 }
 0x8b9   : > { %9146 = vst [vmem:[#allocation27 + $0xb8] sm:$0xff] %v8719_v62  }
 0x8bb   : > { %5095 = vmatmul.bf16.vlgmr.msra.gmra.mxu2 %v7755_v27 }
 0x8bf   : > { %v8468_v57 = vld [vmem:[#allocation27 + $0x48] sm:$0xff] }
 0x8c0   : > { %v8476_v22 = vld [vmem:[#allocation27 + $0xb8] sm:$0xff]  ;;  %5036 = vmatpush.bf16.msra.mxu0 %v8468_v57 }
 0x8c1   : > { %5065 = vmatpush.bf16.msra.mxu1 %v8476_v22 }
 0x8c3   : > { %5037 = vmatmul.bf16.vlgmr.msra.gmra.mxu0 %v7747_v7  ;;  %5018 = vmatmul.bf16.gmra.mxu3 %v7775_v43 }
 0x8c4   : > { %5066 = vmatmul.bf16.vlgmr.msra.gmra.mxu1 %v7751_v24 }
 0x8cb   : > { %5100 = vmatmul.bf16.gmra.mxu2 %v7771_v48 }
 0x8d3   : > { %5042 = vmatmul.bf16.gmra.mxu0 %v7763_v37  ;;  %5023 = vmatmul.bf16.gmra.mxu3 %v7791_v15 }
 0x8d4   : > { %5071 = vmatmul.bf16.gmra.mxu1 %v7767_v26 }
 0x8db   : > { %5105 = vmatmul.bf16.gmra.mxu2 %v7787_v56 }
 0x8e3   : > { %5047 = vmatmul.bf16.gmra.mxu0 %v7779_v19 }
 0x8e4   : > { %5076 = vmatmul.bf16.gmra.mxu1 %v7783_v2 }
 0x8eb   : > { %5110 = vmatmul.bf16.gmra.mxu2 %v7803_v53  ;;  %v5118_v53 = vld [vmem:[%s12013_s14 + $0x10] sm:$0xff] }
 0x8ec   : > { %5136 = vperm.xlu1 %9499, %v5118_v53  }
 0x8f3   : > { %5052 = vmatmul.bf16.gmra.mxu0 %v7795_v52  ;;  %v5121_v52 = vld [vmem:[%s12013_s14 + $0x28] sm:$0xff] }
 0x8f4   : > { %5081 = vmatmul.bf16.gmra.mxu1 %v7799_v30  ;;  %5141 = vperm.xlu1 %9499, %v5119_v13   ;;  %v5123_v30 = vld [vmem:[%s12013_s14 + $0x38] sm:$0xff] }
 0x8f5   : > { %5151 = vperm.xlu2 %9500, %v5121_v52  }
 0x8fc   : > { %5161 = vperm.xlu1 %9499, %v5123_v30  }
 0x926   : > { %v5009_v38 = vpop.f32.mrf.mxu3 }
 0x92e   : > { %v5011_v55 = vpop.f32.mrf.mxu3 }
 0x936   : > { %v5014_v54 = vpop.f32.mrf.mxu3 }
 0x93e   : > { %v5096_v45 = vpop.f32.mrf.mxu2  ;;  %v5016_v35 = vpop.f32.mrf.mxu3 }
 0x940   : > { %v5038_v59 = vpop.f32.mrf.mxu0 }
 0x941   : > { %v5039_v60 = vadd.f32 %v5038_v59, %v5009_v38  ;;  %v5067_v9 = vpop.f32.mrf.mxu1  ;;  %v5122_v38 = vld [vmem:[%s12013_s14 + $0x30] sm:$0xff] }
 0x942   : > { %5156 = vperm.xlu0 %9498, %v5122_v38  }
 0x943   : > { %v5068_v34 = vadd.f32 %v5067_v9, %v5039_v60 }
 0x945   : > { %v11595_v18 = vadd.f32 %v5096_v45, %v5068_v34 }
 0x946   : > { %v5098_v17 = vpop.f32.mrf.mxu2  ;;  %v5019_v42 = vpop.f32.mrf.mxu3 }
 0x948   : > { %v5040_v11 = vpop.f32.mrf.mxu0 }
 0x949   : > { %v5041_v61 = vadd.f32 %v5040_v11, %v5011_v55  ;;  %v5069_v36 = vpop.f32.mrf.mxu1  ;;  %v5147_v55 = vpop.permute.xlu2 %5146 }
 0x94b   : > { %v5070_v39 = vadd.f32 %v5069_v36, %v5041_v61  ;;  %v5127_v61 = vpop.permute.xlu0 %5126 }
 0x94d   : > { %v11597_v51 = vadd.f32 %v5098_v17, %v5070_v39  ;;  %v5164_v39 = vadd.f32 %v5127_v61, %v11595_v18 }
 0x94e   : > { %v5101_v20 = vpop.f32.mrf.mxu2  ;;  %v5021_v14 = vpop.f32.mrf.mxu3 }
 0x94f   : > { %vm5172_vm2 = vcmp.gt.f32.partialorder %v5164_v39, 0.0 }
 0x950   : > { %v5043_v8 = vpop.f32.mrf.mxu0 }
 0x951   : > { %v5044_v31 = vadd.f32 %v5043_v8, %v5014_v54  ;;  %v5072_v62 = vpop.f32.mrf.mxu1  ;;  %v5152_v9 = vpop.permute.xlu2 %5151 }
 0x953   : > { %v5073_v25 = vadd.f32 %v5072_v62, %v5044_v31 }
 0x955   : > { %v11599_v27 = vadd.f32 %v5101_v20, %v5073_v25  ;;  %v5132_v25 = vpop.permute.xlu0 %5131 }
 0x956   : > { %v5103_v23 = vpop.f32.mrf.mxu2  ;;  %v5024_v37 = vpop.f32.mrf.mxu3 }
 0x958   : > { %v5045_v40 = vpop.f32.mrf.mxu0 }
 0x959   : > { %v5046_v16 = vadd.f32 %v5045_v40, %v5016_v35  ;;  %v5074_v28 = vpop.f32.mrf.mxu1  ;;  %v5180_v35 = vmul.f32 0.2, %v5164_v39  ;;  %v5165_v40 = vadd.f32 %v5132_v25, %v11597_v51 }
 0x95b   : > { %v5075_v12 = vadd.f32 %v5074_v28, %v5046_v16  ;;  %v11638_v31 = vsel %vm5172_vm2, %v5164_v39, %v5180_v35  ;;  %vm5173_vm5 = vcmp.gt.f32.partialorder %v5165_v40, 0.0 }
 0x95d   : > { %v11601_v57 = vadd.f32 %v5103_v23, %v5075_v12 }
 0x95e   : > { %v5106_v22 = vpop.f32.mrf.mxu2  ;;  %v5026_v3 = vpop.f32.mrf.mxu3 }
 0x95f   : > { %v5137_v11 = vpop.permute.xlu1 %5136 }
 0x960   : > { %v5048_v7 = vpop.f32.mrf.mxu0  ;;  %v5166_v36 = vadd.f32 %v5137_v11, %v11599_v27  ;;  %v5181_v27 = vmul.f32 0.2, %v5165_v40 }
 0x961   : > { %v5049_v43 = vadd.f32 %v5048_v7, %v5019_v42  ;;  %v5077_v24 = vpop.f32.mrf.mxu1 }
 0x962   : > { %vm5174_vm1 = vcmp.gt.f32.partialorder %v5166_v36, 0.0  ;;  %v5182_v20 = vmul.f32 0.2, %v5166_v36  ;;  %v11644_v18 = vsel %vm5173_vm5, %v5165_v40, %v5181_v27 }
 0x963   : > { %v5078_v0 = vadd.f32 %v5077_v24, %v5049_v43 }
 0x964   : > { %v11636_v8 = vsel %vm5174_vm1, %v5166_v36, %v5182_v20 }
 0x965   : > { %v5107_v48 = vadd.f32 %v5106_v22, %v5078_v0 }
 0x966   : > { %v5108_v50 = vpop.f32.mrf.mxu2 }
 0x967   : > { %v5168_v45 = vadd.f32 %v5147_v55, %v5107_v48  ;;  %v5142_v62 = vpop.permute.xlu1 %5141 }
 0x968   : > { %v5050_v33 = vpop.f32.mrf.mxu0  ;;  %v5167_v23 = vadd.f32 %v5142_v62, %v11601_v57 }
 0x969   : > { %v5051_v32 = vadd.f32 %v5050_v33, %v5021_v14  ;;  %v5079_v47 = vpop.f32.mrf.mxu1  ;;  %vm5176_vm15 = vcmp.gt.f32.partialorder %v5168_v45, 0.0  ;;  %v5184_v59 = vmul.f32 0.2, %v5168_v45 }
 0x96a   : > { %vm5175_vm3 = vcmp.gt.f32.partialorder %v5167_v23, 0.0  ;;  %v5183_v16 = vmul.f32 0.2, %v5167_v23 }
 0x96b   : > { %v5080_v41 = vadd.f32 %v5079_v47, %v5051_v32  ;;  %v11630_v60 = vsel %vm5176_vm15, %v5168_v45, %v5184_v59 }
 0x96c   : > { %v11642_v28 = vsel %vm5175_vm3, %v5167_v23, %v5183_v16 }
 0x96d   : > { %v5109_v46 = vadd.f32 %v5108_v50, %v5080_v41 }
 0x96e   : > { %v5111_v10 = vpop.f32.mrf.mxu2 }
 0x96f   : > { %v5169_v34 = vadd.f32 %v5152_v9, %v5109_v46  ;;  %v5162_v42 = vpop.permute.xlu1 %5161 }
 0x970   : > { %v5053_v15 = vpop.f32.mrf.mxu0 }
 0x971   : > { %v5054_v26 = vadd.f32 %v5053_v15, %v5024_v37  ;;  %v5082_v29 = vpop.f32.mrf.mxu1  ;;  %vm5177_vm0 = vcmp.gt.f32.partialorder %v5169_v34, 0.0  ;;  %v5185_v17 = vmul.f32 0.2, %v5169_v34 }
 0x973   : > { %v5083_v56 = vadd.f32 %v5082_v29, %v5054_v26  ;;  %v11632_v54 = vsel %vm5177_vm0, %v5169_v34, %v5185_v17 }
 0x975   : > { %v5112_v6 = vadd.f32 %v5111_v10, %v5083_v56 }
 0x976   : > { %v5113_v21 = vpop.f32.mrf.mxu2 }
 0x978   : > { %v5055_v44 = vpop.f32.mrf.mxu0 }
 0x979   : > { %v5056_v4 = vadd.f32 %v5055_v44, %v5026_v3  ;;  %v5084_v19 = vpop.f32.mrf.mxu1 }
 0x97b   : > { %v5085_v2 = vadd.f32 %v5084_v19, %v5056_v4 }
 0x97d   : > { %v5114_v58 = vadd.f32 %v5113_v21, %v5085_v2 }
 0x97f   : > { %v5171_v22 = vadd.f32 %v5162_v42, %v5114_v58 }
 0x981   : > { %vm5179_vm6 = vcmp.gt.f32.partialorder %v5171_v22, 0.0  ;;  %v5187_v43 = vmul.f32 0.2, %v5171_v22 }
 0x983   : > { %v11646_v0 = vsel %vm5179_vm6, %v5171_v22, %v5187_v43 }
 0x9b4   : > { %v5157_v12 = vpop.permute.xlu0 %5156 }
 0x9b5   : > { %v5170_v7 = vadd.f32 %v5157_v12, %v5112_v6 }
 0x9b7   : > { %vm5178_vm7 = vcmp.gt.f32.partialorder %v5170_v7, 0.0  ;;  %v5186_v24 = vmul.f32 0.2, %v5170_v7 }
 0x9b9   : > { %v11648_v57 = vsel %vm5178_vm7, %v5170_v7, %v5186_v24 }
 0x9ba   : > { %s10047_s2 = smov 5   ;;  %s10048_s19 = smov 4   ;;  %v9501_v14 = vld [vmem:[#allocation21] ss:$0 sm:$0xff]  ;;  %v9502_v49 = vld [vmem:[#allocation21 + $0x1] ss:$0 sm:$0xff]  ;;  %9516 = vset.pattern.permute.xlu0 %v10001_v5 }
 0x9bb   : > { %5200 = vrot.lane.b32.xlu1 %v11636_v8, %s10047_s2  ;;  %5196 = vrot.lane.b32.xlu0 %v11638_v31, %s10047_s2  ;;  %s10049_s9 = smov 3   ;;  %s10050_s28 = smov 2   ;;  %v9503_v20 = vld [vmem:[#allocation21 + $0x2] ss:$0 sm:$0xff] }
 0x9bc   : > { %5204 = vrot.lane.b32.xlu2 %v11630_v60, %s10047_s2  ;;  %s10051_s30 = smov 1   ;;  %s10052_s13 = smov 127  }
 0x9bd   : > { %s10053_s4 = smov 126   ;;  %s10054_s7 = smov 124  }
 0x9be   : > { %s10055_s17 = smov 118   ;;  %s10056_s8 = smov 122  }
 0x9bf   : > { %s10057_s27 = smov 120   ;;  %s10058_s3 = smov 125  }
 0x9c0   : > { %s10059_s11 = smov 119  }
 0x9c3   : > { %5202 = vrot.lane.b32.xlu1 %v11642_v28, %s10047_s2  ;;  %5198 = vrot.lane.b32.xlu0 %v11644_v18, %s10047_s2 }
 0x9c4   : > { %5206 = vrot.lane.b32.xlu2 %v11632_v54, %s10047_s2 }
 0x9cb   : > { %5210 = vrot.lane.b32.xlu1 %v11646_v0, %s10047_s2  ;;  %5208 = vrot.lane.b32.xlu0 %v11648_v57, %s10047_s2  ;;  %s10060_s2 = smov 123  }
 0x9cc   : > { %5238 = vrot.lane.b32.xlu2 %v11638_v31, %s10048_s19 }
 0x9d3   : > { %5242 = vrot.lane.b32.xlu1 %v11636_v8, %s10048_s19  ;;  %5240 = vrot.lane.b32.xlu0 %v11644_v18, %s10048_s19 }
 0x9d4   : > { %5244 = vrot.lane.b32.xlu2 %v11642_v28, %s10048_s19 }
 0x9db   : > { %5248 = vrot.lane.b32.xlu1 %v11632_v54, %s10048_s19  ;;  %5246 = vrot.lane.b32.xlu0 %v11630_v60, %s10048_s19 }
 0x9dc   : > { %5250 = vrot.lane.b32.xlu2 %v11648_v57, %s10048_s19 }
 0x9e3   : > { %5280 = vrot.lane.b32.xlu1 %v11638_v31, %s10049_s9  ;;  %5252 = vrot.lane.b32.xlu0 %v11646_v0, %s10048_s19  ;;  %s10061_s19 = smov 121  }
 0x9e4   : > { %5282 = vrot.lane.b32.xlu2 %v11644_v18, %s10049_s9 }
 0x9eb   : > { %5286 = vrot.lane.b32.xlu1 %v11642_v28, %s10049_s9  ;;  %5284 = vrot.lane.b32.xlu0 %v11636_v8, %s10049_s9 }
 0x9ec   : > { %5288 = vrot.lane.b32.xlu2 %v11630_v60, %s10049_s9 }
 0x9f3   : > { %5292 = vrot.lane.b32.xlu1 %v11648_v57, %s10049_s9  ;;  %5290 = vrot.lane.b32.xlu0 %v11632_v54, %s10049_s9 }
 0x9f4   : > { %5294 = vrot.lane.b32.xlu2 %v11646_v0, %s10049_s9 }
 0x9fb   : > { %5324 = vrot.lane.b32.xlu1 %v11644_v18, %s10050_s28  ;;  %5322 = vrot.lane.b32.xlu0 %v11638_v31, %s10050_s28 }
 0x9fc   : > { %5326 = vrot.lane.b32.xlu2 %v11636_v8, %s10050_s28 }
 0xa03   : > { %5330 = vrot.lane.b32.xlu1 %v11630_v60, %s10050_s28  ;;  %5328 = vrot.lane.b32.xlu0 %v11642_v28, %s10050_s28 }
 0xa04   : > { %5332 = vrot.lane.b32.xlu2 %v11632_v54, %s10050_s28 }
 0xa0b   : > { %5336 = vrot.lane.b32.xlu1 %v11646_v0, %s10050_s28  ;;  %5334 = vrot.lane.b32.xlu0 %v11648_v57, %s10050_s28 }
 0xa0c   : > { %5364 = vrot.lane.b32.xlu2 %v11638_v31, %s10051_s30 }
 0xa13   : > { %5368 = vrot.lane.b32.xlu1 %v11636_v8, %s10051_s30  ;;  %5366 = vrot.lane.b32.xlu0 %v11644_v18, %s10051_s30 }
 0xa14   : > { %5370 = vrot.lane.b32.xlu2 %v11642_v28, %s10051_s30 }
 0xa16   : > { %v5205_v51 = vpop.permute.xlu2 %5204 }
 0xa17   : > { %v5218_v48 = vmul.f32 %v9501_v14, %v5205_v51 }
 0xa1b   : > { %5374 = vrot.lane.b32.xlu1 %v11632_v54, %s10051_s30  ;;  %5372 = vrot.lane.b32.xlu0 %v11630_v60, %s10051_s30 }
 0xa1c   : > { %5376 = vrot.lane.b32.xlu2 %v11648_v57, %s10051_s30 }
 0xa1e   : > { %v5207_v50 = vpop.permute.xlu2 %5206 }
 0xa1f   : > { %v5219_v33 = vmul.f32 %v9501_v14, %v5207_v50 }
 0xa21   : > { %v8809_v32 = vpack.c.bf16 %v5219_v33, %v5218_v48 }
 0xa23   : > { %5422 = vrot.lane.b32.xlu1 %v11638_v31, %s10052_s13  ;;  %5378 = vrot.lane.b32.xlu0 %v11646_v0, %s10051_s30  ;;  %9163 = vst [vmem:[#allocation28 + $0xc8] sm:$0xff] %v8809_v32   ;;  %s12062_s30 = sld [smem:[#allocation48_spill]] }
 0xa24   : > { %5476 = vrot.lane.b32.xlu2 %v11648_v57, %s10053_s4 }
 0xa26   : > { %v5239_v47 = vpop.permute.xlu2 %5238 }
 0xa27   : > { %v5256_v30 = vmul.f32 %v9502_v49, %v5239_v47 }
 0xa2b   : > { %5472 = vrot.lane.b32.xlu1 %v11630_v60, %s10053_s4  ;;  %5478 = vrot.lane.b32.xlu0 %v11646_v0, %s10053_s4 }
 0xa2c   : > { %5474 = vrot.lane.b32.xlu2 %v11632_v54, %s10053_s4 }
 0xa2d   : > { %v5201_v41 = vpop.permute.xlu1 %5200  ;;  %v5197_v46 = vpop.permute.xlu0 %5196 }
 0xa2e   : > { %v5245_v37 = vpop.permute.xlu2 %5244  ;;  %v5216_v29 = vmul.f32 %v9501_v14, %v5201_v41  ;;  %v5214_v10 = vmul.f32 %v9501_v14, %v5197_v46 }
 0xa2f   : > { %v5259_v13 = vmul.f32 %v9502_v49, %v5245_v37 }
 0xa33   : > { %5470 = vrot.lane.b32.xlu1 %v11642_v28, %s10053_s4  ;;  %5468 = vrot.lane.b32.xlu0 %v11636_v8, %s10053_s4 }
 0xa34   : > { %5464 = vrot.lane.b32.xlu2 %v11638_v31, %s10053_s4 }
 0xa35   : > { %v5203_v15 = vpop.permute.xlu1 %5202  ;;  %v5199_v26 = vpop.permute.xlu0 %5198 }
 0xa36   : > { %v5217_v56 = vmul.f32 %v9501_v14, %v5203_v15  ;;  %v5215_v6 = vmul.f32 %v9501_v14, %v5199_v26  ;;  %v5251_v3 = vpop.permute.xlu2 %5250 }
 0xa37   : > { %v5262_v23 = vmul.f32 %v9502_v49, %v5251_v3 }
 0xa38   : > { %v8804_v44 = vpack.c.bf16 %v5217_v56, %v5216_v29  ;;  %v8799_v4 = vpack.c.bf16 %v5215_v6, %v5214_v10  ;;  %v8914_v10 = vpack.c.bf16 %v11646_v0, %v11648_v57  ;;  %v9504_v6 = vld [vmem:[#allocation21 + $0x3] ss:$0 sm:$0xff] }
 0xa3a   : > { %9162 = vst [vmem:[#allocation28 + $0xb8] sm:$0xff] %v8804_v44  }
 0xa3b   : > { %8800 = vst [vmem:[#allocation28 + $0x198] sm:$0xff] %v8799_v4   ;;  %5434 = vrot.lane.b32.xlu1 %v11648_v57, %s10052_s13  ;;  %5466 = vrot.lane.b32.xlu0 %v11644_v18, %s10053_s4  ;;  %v8909_v4 = vpack.c.bf16 %v11632_v54, %v11630_v60 }
 0xa3c   : > { %5436 = vrot.lane.b32.xlu2 %v11646_v0, %s10052_s13  ;;  %9184 = vst [vmem:[#allocation28 + $0x18] sm:$0xff] %v8914_v10  }
 0xa3d   : > { %v5211_v19 = vpop.permute.xlu1 %5210  ;;  %v5209_v2 = vpop.permute.xlu0 %5208  ;;  %9183 = vst [vmem:[#allocation28 + $0x48] sm:$0xff] %v8909_v4  }
 0xa3e   : > { %v5221_v21 = vmul.f32 %v9501_v14, %v5211_v19  ;;  %v5220_v58 = vmul.f32 %v9501_v14, %v5209_v2  ;;  %v5283_v53 = vpop.permute.xlu2 %5282 }
 0xa3f   : > { %v5299_v35 = vmul.f32 %v9503_v20, %v5283_v53 }
 0xa40   : > { %v8814_v1 = vpack.c.bf16 %v5221_v21, %v5220_v58 }
 0xa42   : > { %9164 = vst [vmem:[#allocation28 + $0x1c0] sm:$0xff] %v8814_v1   ;;  %v8904_v1 = vpack.c.bf16 %v11642_v28, %v11636_v8 }
 0xa43   : > { %5562 = vrot.lane.b32.xlu1 %v11646_v0, %s10054_s7  ;;  %5560 = vrot.lane.b32.xlu0 %v11648_v57, %s10054_s7 }
 0xa44   : > { %5812 = vrot.lane.b32.xlu2 %v11648_v57, %s10055_s17  ;;  %9182 = vst [vmem:[#allocation28 + $0x158] sm:$0xff] %v8904_v1  }
 0xa45   : > { %v5243_v63 = vpop.permute.xlu1 %5242  ;;  %v5241_v52 = vpop.permute.xlu0 %5240 }
 0xa46   : > { %v5258_v38 = vmul.f32 %v9502_v49, %v5243_v63  ;;  %v5257_v55 = vmul.f32 %v9502_v49, %v5241_v52  ;;  %v5289_v45 = vpop.permute.xlu2 %5288 }
 0xa47   : > { %v5302_v47 = vmul.f32 %v9503_v20, %v5289_v45 }
 0xa48   : > { %v8824_v59 = vpack.c.bf16 %v5259_v13, %v5258_v38  ;;  %v8819_v9 = vpack.c.bf16 %v5257_v55, %v5256_v30  ;;  %v8515_v13 = vld [vmem:[#allocation28 + $0x18] sm:$0xff]  ;;  %v8899_v38 = vpack.c.bf16 %v11644_v18, %v11638_v31 }
 0xa49   : > { %6399 = vmatpush.bf16.msrb.mxu1 %v8515_v13 }
 0xa4a   : > { %9166 = vst [vmem:[#allocation28 + $0x118] sm:$0xff] %v8824_v59  }
 0xa4b   : > { %9165 = vst [vmem:[#allocation28 + $0x98] sm:$0xff] %v8819_v9   ;;  %5430 = vrot.lane.b32.xlu1 %v11630_v60, %s10052_s13  ;;  %5814 = vrot.lane.b32.xlu0 %v11646_v0, %s10055_s17  ;;  %v8494_v9 = vld [vmem:[#allocation28 + $0xc8] sm:$0xff] }
 0xa4c   : > { %5432 = vrot.lane.b32.xlu2 %v11632_v54, %s10052_s13  ;;  %9181 = vst [vmem:[#allocation28 + $0x1e8] sm:$0xff] %v8899_v38  }
 0xa4d   : > { %v5249_v34 = vpop.permute.xlu1 %5248  ;;  %v5247_v17 = vpop.permute.xlu0 %5246 }
 0xa4e   : > { %v5261_v11 = vmul.f32 %v9502_v49, %v5249_v34  ;;  %v5260_v61 = vmul.f32 %v9502_v49, %v5247_v17  ;;  %v5295_v36 = vpop.permute.xlu2 %5294  ;;  %v8514_v17 = vld [vmem:[#allocation28 + $0x48] sm:$0xff] }
 0xa4f   : > { %v5305_v50 = vmul.f32 %v9503_v20, %v5295_v36  ;;  %6400 = vmatpush.bf16.msrb.mxu1 %v8514_v17  ;;  %v8493_v36 = vld [vmem:[#allocation28 + $0xb8] sm:$0xff] }
 0xa50   : > { %v8829_v39 = vpack.c.bf16 %v5261_v11, %v5260_v61 }
 0xa51   : > { %v8497_v56 = vld [vmem:[#allocation28 + $0x118] sm:$0xff] }
 0xa52   : > { %9167 = vst [vmem:[#allocation28 + $0x38] sm:$0xff] %v8829_v39   ;;  %v8496_v21 = vld [vmem:[#allocation28 + $0x98] sm:$0xff] }
 0xa53   : > { %5558 = vrot.lane.b32.xlu1 %v11632_v54, %s10054_s7  ;;  %5556 = vrot.lane.b32.xlu0 %v11630_v60, %s10054_s7  ;;  %v8513_v39 = vld [vmem:[#allocation28 + $0x158] sm:$0xff] }
 0xa54   : > { %5808 = vrot.lane.b32.xlu2 %v11630_v60, %s10055_s17  ;;  %6401 = vmatpush.bf16.msrb.mxu1 %v8513_v39 }
 0xa55   : > { %v5281_v62 = vpop.permute.xlu1 %5280  ;;  %v5253_v25 = vpop.permute.xlu0 %5252 }
 0xa56   : > { %v5298_v40 = vmul.f32 %v9503_v20, %v5281_v62  ;;  %v5263_v16 = vmul.f32 %v9502_v49, %v5253_v25  ;;  %v11722_v27 = vpop.permute.xlu2 %5326  ;;  %v8495_v49 = vld [vmem:[#allocation28 + $0x1c0] sm:$0xff] }
 0xa57   : > { %v5342_v55 = vmul.f32 %v9504_v6, %v11722_v27 }
 0xa58   : > { %v8839_v42 = vpack.c.bf16 %v5299_v35, %v5298_v40  ;;  %v8834_v12 = vpack.c.bf16 %v5263_v16, %v5262_v23  ;;  %v8492_v23 = vld [vmem:[#allocation28 + $0x198] sm:$0xff]  ;;  %v8512_v16 = vld [vmem:[#allocation28 + $0x1e8] sm:$0xff] }
 0xa59   : > { %v8498_v37 = vld [vmem:[#allocation28 + $0x38] sm:$0xff]  ;;  %6402 = vmatpush.bf16.msrb.mxu1 %v8512_v16 }
 0xa5a   : > { %9169 = vst [vmem:[#allocation28 + $0x128] sm:$0xff] %v8839_v42   ;;  %v9505_v42 = vld [vmem:[#allocation21 + $0x4] ss:$0 sm:$0xff] }
 0xa5b   : > { %9168 = vst [vmem:[#allocation28 + $0xa0] sm:$0xff] %v8834_v12   ;;  %5644 = vrot.lane.b32.xlu1 %v11648_v57, %s10056_s8  ;;  %5810 = vrot.lane.b32.xlu0 %v11632_v54, %s10055_s17 }
 0xa5c   : > { %5646 = vrot.lane.b32.xlu2 %v11646_v0, %s10056_s8 }
 0xa5d   : > { %v5287_v22 = vpop.permute.xlu1 %5286  ;;  %v5285_v7 = vpop.permute.xlu0 %5284 }
 0xa5e   : > { %v5301_v43 = vmul.f32 %v9503_v20, %v5287_v22  ;;  %v5300_v24 = vmul.f32 %v9503_v20, %v5285_v7  ;;  %v5333_v51 = vpop.permute.xlu2 %5332 }
 0xa5f   : > { %v5345_v63 = vmul.f32 %v9504_v6, %v5333_v51 }
 0xa60   : > { %v8844_v14 = vpack.c.bf16 %v5301_v43, %v5300_v24 }
 0xa62   : > { %9170 = vst [vmem:[#allocation28 + $0x160] sm:$0xff] %v8844_v14   ;;  %v8499_v48 = vld [vmem:[#allocation28 + $0xa0] sm:$0xff] }
 0xa63   : > { %5730 = vrot.lane.b32.xlu1 %v11646_v0, %s10057_s27  ;;  %5728 = vrot.lane.b32.xlu0 %v11648_v57, %s10057_s27 }
 0xa64   : > { %6373 = vmatpush.bf16.msra.mxu3 %v8499_v48  ;;  %5426 = vrot.lane.b32.xlu2 %v11636_v8, %s10052_s13 }
 0xa65   : > { %v5293_v33 = vpop.permute.xlu1 %5292  ;;  %v5291_v32 = vpop.permute.xlu0 %5290 }
 0xa66   : > { %v5304_v41 = vmul.f32 %v9503_v20, %v5293_v33  ;;  %v5303_v46 = vmul.f32 %v9503_v20, %v5291_v32  ;;  %v11736_v15 = vpop.permute.xlu2 %5364 }
 0xa67   : > { %v5382_v43 = vmul.f32 %v9505_v42, %v11736_v15 }
 0xa68   : > { %v8854_v26 = vpack.c.bf16 %v5305_v50, %v5304_v41  ;;  %v8849_v29 = vpack.c.bf16 %v5303_v46, %v5302_v47  ;;  %6374 = vmatpush.bf16.msra.mxu3 %v8498_v37 }
 0xa6a   : > { %9172 = vst [vmem:[#allocation28 + $0x190] sm:$0xff] %v8854_v26  }
 0xa6b   : > { %9171 = vst [vmem:[#allocation28 + $0xd8] sm:$0xff] %v8849_v29   ;;  %5552 = vrot.lane.b32.xlu1 %v11636_v8, %s10054_s7  ;;  %5428 = vrot.lane.b32.xlu0 %v11642_v28, %s10052_s13 }
 0xa6c   : > { %6375 = vmatpush.bf16.msra.mxu3 %v8497_v56  ;;  %5554 = vrot.lane.b32.xlu2 %v11642_v28, %s10054_s7 }
 0xa6d   : > { %v5325_v3 = vpop.permute.xlu1 %5324  ;;  %v5323_v44 = vpop.permute.xlu0 %5322 }
 0xa6e   : > { %v5341_v19 = vmul.f32 %v9504_v6, %v5325_v3  ;;  %v5340_v2 = vmul.f32 %v9504_v6, %v5323_v44  ;;  %v5371_v58 = vpop.permute.xlu2 %5370 }
 0xa6f   : > { %v5385_v12 = vmul.f32 %v9505_v42, %v5371_v58 }
 0xa70   : > { %v8859_v53 = vpack.c.bf16 %v5341_v19, %v5340_v2  ;;  %6376 = vmatpush.bf16.msra.mxu3 %v8496_v21  ;;  %v9506_v2 = vld [vmem:[#allocation21 + $0x7] ss:$0 sm:$0xff] }
 0xa71   : > { %v8503_v21 = vld [vmem:[#allocation28 + $0x190] sm:$0xff] }
 0xa72   : > { %9173 = vst [vmem:[#allocation28 + $0x10] sm:$0xff] %v8859_v53  }
 0xa73   : > { %5806 = vrot.lane.b32.xlu1 %v11642_v28, %s10055_s17  ;;  %5804 = vrot.lane.b32.xlu0 %v11636_v8, %s10055_s17 }
 0xa74   : > { %6377 = vmatpush.bf16.msra.mxu3 %v8495_v49  ;;  %5640 = vrot.lane.b32.xlu2 %v11630_v60, %s10056_s8 }
 0xa75   : > { %v5331_v52 = vpop.permute.xlu1 %5330  ;;  %v5329_v30 = vpop.permute.xlu0 %5328 }
 0xa76   : > { %v5344_v45 = vmul.f32 %v9504_v6, %v5331_v52  ;;  %v5343_v59 = vmul.f32 %v9504_v6, %v5329_v30  ;;  %v11759_v34 = vpop.permute.xlu2 %5376  ;;  %v8502_v52 = vld [vmem:[#allocation28 + $0xd8] sm:$0xff] }
 0xa78   : > { %v8869_v11 = vpack.c.bf16 %v5345_v63, %v5344_v45  ;;  %v8864_v61 = vpack.c.bf16 %v5343_v59, %v5342_v55  ;;  %6378 = vmatpush.bf16.msra.mxu3 %v8494_v9  ;;  %v8501_v59 = vld [vmem:[#allocation28 + $0x160] sm:$0xff] }
 0xa79   : > { %v8504_v44 = vld [vmem:[#allocation28 + $0x10] sm:$0xff] }
 0xa7a   : > { %9175 = vst [vmem:[#allocation28] sm:$0xff] %v8869_v11  }
 0xa7b   : > { %9174 = vst [vmem:[#allocation28 + $0xc0] sm:$0xff] %v8864_v61   ;;  %5724 = vrot.lane.b32.xlu1 %v11630_v60, %s10057_s27  ;;  %5642 = vrot.lane.b32.xlu0 %v11632_v54, %s10056_s8  ;;  %v8500_v61 = vld [vmem:[#allocation28 + $0x128] sm:$0xff] }
 0xa7c   : > { %6379 = vmatpush.bf16.msra.mxu3 %v8493_v36  ;;  %5726 = vrot.lane.b32.xlu2 %v11632_v54, %s10057_s27 }
 0xa7d   : > { %v5337_v20 = vpop.permute.xlu1 %5336  ;;  %v5335_v35 = vpop.permute.xlu0 %5334 }
 0xa7e   : > { %v5347_v62 = vmul.f32 %v9504_v6, %v5337_v20  ;;  %v5346_v25 = vmul.f32 %v9504_v6, %v5335_v35  ;;  %v5477_v40 = vpop.permute.xlu2 %5476  ;;  %v5388_v6 = vmul.f32 %v9505_v42, %v11759_v34  ;;  %v11805_v35 = vld [vmem:[#allocation21 + $0x6] ss:$0 sm:$0xff] }
 0xa7f   : > { %v5488_v49 = vmul.f32 %v9506_v2, %v5477_v40 }
 0xa80   : > { %v8874_v27 = vpack.c.bf16 %v5347_v62, %v5346_v25  ;;  %6380 = vmatpush.bf16.msra.mxu3 %v8492_v23 }
 0xa81   : > { %v8506_v37 = vld [vmem:[#allocation28] sm:$0xff] }
 0xa82   : > { %9176 = vst [vmem:[#allocation28 + $0x1b0] sm:$0xff] %v8874_v27   ;;  %v8505_v29 = vld [vmem:[#allocation28 + $0xc0] sm:$0xff] }
 0xa83   : > { %5548 = vrot.lane.b32.xlu1 %v11638_v31, %s10054_s7  ;;  %5424 = vrot.lane.b32.xlu0 %v11644_v18, %s10052_s13 }
 0xa84   : > { %5550 = vrot.lane.b32.xlu2 %v11644_v18, %s10054_s7  ;;  %s12063_s7 = sld [smem:[#allocation49_spill]] }
 0xa85   : > { %v5369_v22 = vpop.permute.xlu1 %5368  ;;  %v5367_v7 = vpop.permute.xlu0 %5366 }
 0xa86   : > { %v5384_v24 = vmul.f32 %v9505_v42, %v5369_v22  ;;  %v5383_v51 = vmul.f32 %v9505_v42, %v5367_v7  ;;  %v5475_v14 = vpop.permute.xlu2 %5474 }
 0xa87   : > { %v5487_v58 = vmul.f32 %v9506_v2, %v5475_v14 }
 0xa88   : > { %v8884_v48 = vpack.c.bf16 %v5385_v12, %v5384_v24  ;;  %v8879_v50 = vpack.c.bf16 %v5383_v51, %v5382_v43 }
 0xa89   : > { %v8507_v33 = vld [vmem:[#allocation28 + $0x1b0] sm:$0xff] }
 0xa8a   : > { %9178 = vst [vmem:[#allocation28 + $0xf0] sm:$0xff] %v8884_v48   ;;  %6386 = vmatpush.bf16.msrb.mxu0 %v8507_v33  ;;  %v11816_v48 = vld [vmem:[#allocation21 + $0x9] ss:$0 sm:$0xff] }
 0xa8b   : > { %9177 = vst [vmem:[#allocation28 + $0x120] sm:$0xff] %v8879_v50   ;;  %5802 = vrot.lane.b32.xlu1 %v11644_v18, %s10055_s17  ;;  %5800 = vrot.lane.b32.xlu0 %v11638_v31, %s10055_s17  ;;  %s6495_s17 = scalar_lea.hbm %s12063_s7, %s10189_s25 }
 0xa8c   : > { %5636 = vrot.lane.b32.xlu2 %v11636_v8, %s10056_s8 }
 0xa8d   : > { %v5375_v32 = vpop.permute.xlu1 %5374  ;;  %v5373_v47 = vpop.permute.xlu0 %5372 }
 0xa8e   : > { %v5387_v41 = vmul.f32 %v9505_v42, %v5375_v32  ;;  %v5386_v46 = vmul.f32 %v9505_v42, %v5373_v47  ;;  %v11780_v15 = vpop.permute.xlu2 %5464  ;;  %6387 = vmatpush.bf16.msrb.mxu0 %v8506_v37  ;;  %v11826_v37 = vld [vmem:[#allocation21 + $0xf] ss:$0 sm:$0xff] }
 0xa8f   : > { %v5482_v27 = vmul.f32 %v9506_v2, %v11780_v15 }
 0xa90   : > { %v8889_v26 = vpack.c.bf16 %v5387_v41, %v5386_v46 }
 0xa91   : > { %v8509_v62 = vld [vmem:[#allocation28 + $0xf0] sm:$0xff] }
 0xa92   : > { %9179 = vst [vmem:[#allocation28 + $0x1d8] sm:$0xff] %v8889_v26   ;;  %6388 = vmatpush.bf16.msrb.mxu0 %v8505_v29  ;;  %v8508_v22 = vld [vmem:[#allocation28 + $0x120] sm:$0xff] }
 0xa93   : > { %5720 = vrot.lane.b32.xlu1 %v11636_v8, %s10057_s27  ;;  %5638 = vrot.lane.b32.xlu0 %v11642_v28, %s10056_s8 }
 0xa94   : > { %5722 = vrot.lane.b32.xlu2 %v11642_v28, %s10057_s27 }
 0xa95   : > { %v11788_v10 = vpop.permute.xlu1 %5422  ;;  %v5379_v56 = vpop.permute.xlu0 %5378 }
 0xa96   : > { %v5389_v3 = vmul.f32 %v9505_v42, %v5379_v56  ;;  %v5437_v4 = vpop.permute.xlu2 %5436  ;;  %6389 = vmatpush.bf16.msrb.mxu0 %v8504_v44 }
 0xa97   : > { %v5447_v23 = vmul.f32 %v11805_v35, %v5437_v4 }
 0xa98   : > { %v8894_v19 = vpack.c.bf16 %v5389_v3, %v5388_v6 }
 0xa99   : > { %v8510_v36 = vld [vmem:[#allocation28 + $0x1d8] sm:$0xff] }
 0xa9a   : > { %9180 = vst [vmem:[#allocation28 + $0xf8] sm:$0xff] %v8894_v19   ;;  %6390 = vmatpush.bf16.msrb.mxu0 %v8503_v21 }
 0xa9b   : > { %5520 = vrot.lane.b32.xlu1 %v11646_v0, %s10058_s3  ;;  %5518 = vrot.lane.b32.xlu0 %v11648_v57, %s10058_s3 }
 0xa9c   : > { %5770 = vrot.lane.b32.xlu2 %v11648_v57, %s10059_s11 }
 0xa9d   : > { %v5473_v53 = vpop.permute.xlu1 %5472  ;;  %v5479_v1 = vpop.permute.xlu0 %5478 }
 0xa9e   : > { %v5486_v13 = vmul.f32 %v9506_v2, %v5473_v53  ;;  %v5489_v63 = vmul.f32 %v9506_v2, %v5479_v1  ;;  %v11797_v30 = vpop.permute.xlu2 %5812  ;;  %6391 = vmatpush.bf16.msrb.mxu0 %v8502_v52  ;;  %v11847_v52 = vld [vmem:[#allocation21 + $0xb] ss:$0 sm:$0xff] }
 0xa9f   : > { %v5824_v6 = vmul.f32 %v11826_v37, %v11797_v30 }
 0xaa0   : > { %v8949_v38 = vpack.c.bf16 %v5487_v58, %v5486_v13  ;;  %v8954_v55 = vpack.c.bf16 %v5489_v63, %v5488_v49 }
 0xaa1   : > { %v8511_v45 = vld [vmem:[#allocation28 + $0xf8] sm:$0xff] }
 0xaa2   : > { %9191 = vst [vmem:[#allocation28 + $0x20] sm:$0xff] %v8949_v38   ;;  %6392 = vmatpush.bf16.msrb.mxu0 %v8501_v59  ;;  %6403 = vmatpush.bf16.msrb.mxu1 %v8511_v45 }
 0xaa3   : > { %9192 = vst [vmem:[#allocation28 + $0x150] sm:$0xff] %v8954_v55   ;;  %5632 = vrot.lane.b32.xlu1 %v11638_v31, %s10056_s8  ;;  %5772 = vrot.lane.b32.xlu0 %v11646_v0, %s10059_s11 }
 0xaa4   : > { %5634 = vrot.lane.b32.xlu2 %v11644_v18, %s10056_s8  ;;  %s12064_s8 = scalar_lea.vmem [#allocation23], %s10336_s16 }
 0xaa5   : > { %v5471_v9 = vpop.permute.xlu1 %5470  ;;  %v5469_v34 = vpop.permute.xlu0 %5468 }
 0xaa6   : > { %v5485_v17 = vmul.f32 %v9506_v2, %v5471_v9  ;;  %v5484_v11 = vmul.f32 %v9506_v2, %v5469_v34  ;;  %v5433_v39 = vpop.permute.xlu2 %5432  ;;  %6393 = vmatpush.bf16.msrb.mxu0 %v8500_v61  ;;  %6404 = vmatpush.bf16.msrb.mxu1 %v8510_v36  ;;  %v11859_v36 = vld [vmem:[#allocation21 + $0xd] ss:$0 sm:$0xff] }
 0xaa7   : > { %v5445_v26 = vmul.f32 %v11805_v35, %v5433_v39 }
 0xaa8   : > { %v8944_v20 = vpack.c.bf16 %v5485_v17, %v5484_v11 }
 0xaa9   : > { %v8522_v7 = vld [vmem:[#allocation28 + $0x20] sm:$0xff] }
 0xaaa   : > { %9190 = vst [vmem:[#allocation28 + $0xe8] sm:$0xff] %v8944_v20   ;;  %v8523_v25 = vld [vmem:[#allocation28 + $0x150] sm:$0xff]  ;;  %6405 = vmatpush.bf16.msrb.mxu1 %v8509_v62 }
 0xaab   : > { %5718 = vrot.lane.b32.xlu1 %v11644_v18, %s10057_s27  ;;  %5716 = vrot.lane.b32.xlu0 %v11638_v31, %s10057_s27  ;;  %s6497_s27 = sshll.u32 %s12064_s8, 4  ;;  %s6498_s27 = int_to_ptr.vmem [resolvable:$true] %s6497_s27 }
 0xaac   : > { %6412 = vmatpush.bf16.msrb.mxu2 %v8523_v25  ;;  %5514 = vrot.lane.b32.xlu2 %v11630_v60, %s10058_s3 }
 0xaad   : > { %v5435_v40 = vpop.permute.xlu1 %5434  ;;  %v5467_v16 = vpop.permute.xlu0 %5466 }
 0xaae   : > { %v5446_v42 = vmul.f32 %v11805_v35, %v5435_v40  ;;  %v5483_v12 = vmul.f32 %v9506_v2, %v5467_v16  ;;  %v5809_v43 = vpop.permute.xlu2 %5808  ;;  %6406 = vmatpush.bf16.msrb.mxu1 %v8508_v22 }
 0xaaf   : > { %v5822_v45 = vmul.f32 %v11826_v37, %v5809_v43 }
 0xab0   : > { %v8934_v24 = vpack.c.bf16 %v5447_v23, %v5446_v42  ;;  %v8939_v51 = vpack.c.bf16 %v5483_v12, %v5482_v27  ;;  %6413 = vmatpush.bf16.msrb.mxu2 %v8522_v7 }
 0xab1   : > { %v8521_v14 = vld [vmem:[#allocation28 + $0xe8] sm:$0xff] }
 0xab2   : > { %9188 = vst [vmem:[#allocation28 + $0x88] sm:$0xff] %v8934_v24  }
 0xab3   : > { %9189 = vst [vmem:[#allocation28 + $0x140] sm:$0xff] %v8939_v51   ;;  %5766 = vrot.lane.b32.xlu1 %v11630_v60, %s10059_s11  ;;  %5516 = vrot.lane.b32.xlu0 %v11632_v54, %s10058_s3 }
 0xab4   : > { %6414 = vmatpush.bf16.msrb.mxu2 %v8521_v14  ;;  %5768 = vrot.lane.b32.xlu2 %v11632_v54, %s10059_s11 }
 0xab5   : > { %v5563_v50 = vpop.permute.xlu1 %5562  ;;  %v5561_v33 = vpop.permute.xlu0 %5560 }
 0xab6   : > { %v5573_v32 = vmul.f32 %v11816_v48, %v5563_v50  ;;  %v5572_v47 = vmul.f32 %v11816_v48, %v5561_v33  ;;  %v5647_v41 = vpop.permute.xlu2 %5646 }
 0xab8   : > { %v8994_v46 = vpack.c.bf16 %v5573_v32, %v5572_v47 }
 0xab9   : > { %v8519_v4 = vld [vmem:[#allocation28 + $0x88] sm:$0xff] }
 0xaba   : > { %9200 = vst [vmem:[#allocation28 + $0x1f0] sm:$0xff] %v8994_v46   ;;  %v8520_v15 = vld [vmem:[#allocation28 + $0x140] sm:$0xff] }
 0xabb   : > { %5604 = vrot.lane.b32.xlu1 %v11646_v0, %s10060_s2  ;;  %5602 = vrot.lane.b32.xlu0 %v11648_v57, %s10060_s2 }
 0xabc   : > { %6415 = vmatpush.bf16.msrb.mxu2 %v8520_v15  ;;  %5686 = vrot.lane.b32.xlu2 %v11648_v57, %s10061_s19 }
 0xabd   : > { %v5431_v29 = vpop.permute.xlu1 %5430  ;;  %v5815_v56 = vpop.permute.xlu0 %5814 }
 0xabe   : > { %v5444_v3 = vmul.f32 %v11805_v35, %v5431_v29  ;;  %v5825_v44 = vmul.f32 %v11826_v37, %v5815_v56  ;;  %v5427_v19 = vpop.permute.xlu2 %5426 }
 0xac0   : > { %v8929_v2 = vpack.c.bf16 %v5445_v26, %v5444_v3  ;;  %v9114_v21 = vpack.c.bf16 %v5825_v44, %v5824_v6  ;;  %6416 = vmatpush.bf16.msrb.mxu2 %v8519_v4 }
 0xac1   : > { %v8531_v58 = vld [vmem:[#allocation28 + $0x1f0] sm:$0xff] }
 0xac2   : > { %9187 = vst [vmem:[#allocation28 + $0x1b8] sm:$0xff] %v8929_v2   ;;  %6425 = vmatpush.bf16.msrb.mxu3 %v8531_v58  ;;  %v5440_v58 = vmul.f32 %v11805_v35, %v11788_v10 }
 0xac3   : > { %9224 = vst [vmem:[#allocation28 + $0x108] sm:$0xff] %v9114_v21   ;;  %5510 = vrot.lane.b32.xlu1 %v11636_v8, %s10058_s3  ;;  %5688 = vrot.lane.b32.xlu0 %v11646_v0, %s10061_s19  ;;  %v5657_v0 = vmul.f32 %v11847_v52, %v5647_v41 }
 0xac4   : > { %5512 = vrot.lane.b32.xlu2 %v11642_v28, %s10058_s3 }
 0xac5   : > { %v5559_v57 = vpop.permute.xlu1 %5558  ;;  %v5557_v53 = vpop.permute.xlu0 %5556 }
 0xac6   : > { %v5571_v1 = vmul.f32 %v11816_v48, %v5559_v57  ;;  %v5570_v49 = vmul.f32 %v11816_v48, %v5557_v53  ;;  %v5555_v13 = vpop.permute.xlu2 %5554 }
 0xac8   : > { %v8989_v63 = vpack.c.bf16 %v5571_v1, %v5570_v49 }
 0xac9   : > { %v8518_v30 = vld [vmem:[#allocation28 + $0x1b8] sm:$0xff] }
 0xaca   : > { %9199 = vst [vmem:[#allocation28 + $0x1a8] sm:$0xff] %v8989_v63   ;;  %6417 = vmatpush.bf16.msrb.mxu2 %v8518_v30 }
 0xacb   : > { %5764 = vrot.lane.b32.xlu1 %v11642_v28, %s10059_s11  ;;  %5762 = vrot.lane.b32.xlu0 %v11636_v8, %s10059_s11 }
 0xacc   : > { %5598 = vrot.lane.b32.xlu2 %v11630_v60, %s10060_s2 }
 0xacd   : > { %v5645_v38 = vpop.permute.xlu1 %5644  ;;  %v5811_v55 = vpop.permute.xlu0 %5810 }
 0xace   : > { %v5656_v59 = vmul.f32 %v11847_v52, %v5645_v38  ;;  %v5823_v9 = vmul.f32 %v11826_v37, %v5811_v55  ;;  %v5641_v34 = vpop.permute.xlu2 %5640 }
 0xacf   : > { %v5654_v6 = vmul.f32 %v11847_v52, %v5641_v34 }
 0xad0   : > { %v9034_v17 = vpack.c.bf16 %v5657_v0, %v5656_v59  ;;  %v9109_v11 = vpack.c.bf16 %v5823_v9, %v5822_v45  ;;  %v8555_v45 = vld [vmem:[#allocation28 + $0x108] sm:$0xff] }
 0xad1   : > { %v8530_v61 = vld [vmem:[#allocation28 + $0x1a8] sm:$0xff] }
 0xad2   : > { %9208 = vst [vmem:[#allocation28 + $0x90] sm:$0xff] %v9034_v17   ;;  %6426 = vmatpush.bf16.msrb.mxu3 %v8530_v61 }
 0xad3   : > { %9223 = vst [vmem:[#allocation28 + $0x180] sm:$0xff] %v9109_v11   ;;  %5682 = vrot.lane.b32.xlu1 %v11630_v60, %s10061_s19  ;;  %5600 = vrot.lane.b32.xlu0 %v11632_v54, %s10060_s2  ;;  %v5569_v60 = vmul.f32 %v11816_v48, %v5555_v13 }
 0xad4   : > { %5684 = vrot.lane.b32.xlu2 %v11632_v54, %s10061_s19  ;;  %v5442_v54 = vmul.f32 %v11805_v35, %v5427_v19 }
 0xad5   : > { %v5731_v39 = vpop.permute.xlu1 %5730  ;;  %v5729_v20 = vpop.permute.xlu0 %5728 }
 0xad6   : > { %v5741_v62 = vmul.f32 %v11859_v36, %v5731_v39  ;;  %v5740_v25 = vmul.f32 %v11859_v36, %v5729_v20  ;;  %v5727_v23 = vpop.permute.xlu2 %5726 }
 0xad7   : > { %v5739_v26 = vmul.f32 %v11859_v36, %v5727_v23 }
 0xad8   : > { %v9074_v40 = vpack.c.bf16 %v5741_v62, %v5740_v25  ;;  %v11914_v25 = vld [vmem:[#allocation21 + $0x8] ss:$0 sm:$0xff] }
 0xad9   : > { %v8539_v16 = vld [vmem:[#allocation28 + $0x90] sm:$0xff] }
 0xada   : > { %9216 = vst [vmem:[#allocation28 + $0x30] sm:$0xff] %v9074_v40   ;;  %6438 = vmatpush.bf16.msra.mxu0 %v8539_v16 }
 0xadb   : > { %5508 = vrot.lane.b32.xlu1 %v11644_v18, %s10058_s3  ;;  %5506 = vrot.lane.b32.xlu0 %v11638_v31, %s10058_s3  ;;  %s6499_s3 = sshll.u32 %s6495_s17, 4  ;;  %s6500_s3 = int_to_ptr.hbm [resolvable:$true] %s6499_s3 }
 0xadc   : > { %5758 = vrot.lane.b32.xlu2 %v11638_v31, %s10059_s11 }
 0xadd   : > { %v5553_v27 = vpop.permute.xlu1 %5552  ;;  %v5429_v42 = vpop.permute.xlu0 %5428 }
 0xade   : > { %v5568_v12 = vmul.f32 %v11816_v48, %v5553_v27  ;;  %v5443_v22 = vmul.f32 %v11805_v35, %v5429_v42  ;;  %v5551_v7 = vpop.permute.xlu2 %5550 }
 0xae0   : > { %v8984_v43 = vpack.c.bf16 %v5569_v60, %v5568_v12  ;;  %v8924_v24 = vpack.c.bf16 %v5443_v22, %v5442_v54 }
 0xae1   : > { %v8547_v51 = vld [vmem:[#allocation28 + $0x30] sm:$0xff] }
 0xae2   : > { %9198 = vst [vmem:[#allocation28 + $0x58] sm:$0xff] %v8984_v43   ;;  %6451 = vmatpush.bf16.msra.mxu1 %v8547_v51 }
 0xae3   : > { %9186 = vst [vmem:[#allocation28 + $0x1a0] sm:$0xff] %v8924_v24   ;;  %5594 = vrot.lane.b32.xlu1 %v11636_v8, %s10060_s2  ;;  %5760 = vrot.lane.b32.xlu0 %v11644_v18, %s10059_s11  ;;  %s12065_s11 = smov %s12064_s8 }
 0xae4   : > { %5596 = vrot.lane.b32.xlu2 %v11642_v28, %s10060_s2 }
 0xae5   : > { %v5807_v14 = vpop.permute.xlu1 %5806  ;;  %v5805_v50 = vpop.permute.xlu0 %5804 }
 0xae6   : > { %v5821_v33 = vmul.f32 %v11826_v37, %v5807_v14  ;;  %v5820_v32 = vmul.f32 %v11826_v37, %v5805_v50  ;;  %v5637_v47 = vpop.permute.xlu2 %5636 }
 0xae7   : > { %v5652_v17 = vmul.f32 %v11847_v52, %v5637_v47 }
 0xae8   : > { %v9104_v41 = vpack.c.bf16 %v5821_v33, %v5820_v32 }
 0xae9   : > { %v8529_v46 = vld [vmem:[#allocation28 + $0x58] sm:$0xff] }
 0xaea   : > { %9222 = vst [vmem:[#allocation28 + $0x1e0] sm:$0xff] %v9104_v41   ;;  %v8517_v15 = vld [vmem:[#allocation28 + $0x1a0] sm:$0xff]  ;;  %6427 = vmatpush.bf16.msrb.mxu3 %v8529_v46 }
 0xaeb   : > { %5680 = vrot.lane.b32.xlu1 %v11642_v28, %s10061_s19  ;;  %5678 = vrot.lane.b32.xlu0 %v11636_v8, %s10061_s19  ;;  %v5567_v8 = vmul.f32 %v11816_v48, %v5551_v7  ;;  %v11918_v7 = vld [vmem:[#allocation21 + $0xe] ss:$0 sm:$0xff] }
 0xaec   : > { %6418 = vmatpush.bf16.msrb.mxu2 %v8517_v15  ;;  %5590 = vrot.lane.b32.xlu2 %v11638_v31, %s10060_s2 }
 0xaed   : > { %v5725_v29 = vpop.permute.xlu1 %5724  ;;  %v5643_v56 = vpop.permute.xlu0 %5642 }
 0xaee   : > { %v5738_v3 = vmul.f32 %v11859_v36, %v5725_v29  ;;  %v5655_v44 = vmul.f32 %v11847_v52, %v5643_v56  ;;  %v5723_v4 = vpop.permute.xlu2 %5722 }
 0xaef   : > { %v5737_v59 = vmul.f32 %v11859_v36, %v5723_v4 }
 0xaf0   : > { %v9069_v28 = vpack.c.bf16 %v5739_v26, %v5738_v3  ;;  %v9029_v19 = vpack.c.bf16 %v5655_v44, %v5654_v6 }
 0xaf1   : > { %v8553_v23 = vld [vmem:[#allocation28 + $0x1e0] sm:$0xff] }
 0xaf2   : > { %9215 = vst [vmem:[#allocation28 + $0x50] sm:$0xff] %v9069_v28  }
 0xaf3   : > { %9207 = vst [vmem:[#allocation28 + $0x188] sm:$0xff] %v9029_v19   ;;  %5674 = vrot.lane.b32.xlu1 %v11638_v31, %s10061_s19  ;;  %5592 = vrot.lane.b32.xlu0 %v11644_v18, %s10060_s2  ;;  %s6487_s2 = scalar_lea.sflag [#allocation5], %s10336_s16 }
 0xaf4   : > { %5676 = vrot.lane.b32.xlu2 %v11644_v18, %s10061_s19  ;;  %s9891_s19 = sshra.s32 %s6500_s3, 4  ;;  %s9892_s19 = int_to_ptr.hbm [resolvable:$true] %s9891_s19 }
 0xaf5   : > { %v5549_v2 = vpop.permute.xlu1 %5548  ;;  %v5425_v21 = vpop.permute.xlu0 %5424  ;;  %s9893_s9 = scalar_lea.hbm %s9892_s19, 1  ;;  %p9898_p12 = scmp.lt.s32.totalorder %s9892_s19, %s12063_s7 }
 0xaf6   : > { %v5566_v57 = vmul.f32 %v11816_v48, %v5549_v2  ;;  %v5441_v53 = vmul.f32 %v11805_v35, %v5425_v21  ;;  %v5771_v1 = vpop.permute.xlu2 %5770  ;;  %p9894_p1 = scmp.ne.s32.totalorder %s9892_s19, %s9893_s9 }
 0xaf7   : > { %v5782_v50 = vmul.f32 %v11918_v7, %v5771_v1  ;;  %v11930_v1 = vld [vmem:[#allocation21 + $0xa] ss:$0 sm:$0xff] }
 0xaf8   : > { %v8979_v49 = vpack.c.bf16 %v5567_v8, %v5566_v57  ;;  %v8919_v31 = vpack.c.bf16 %v5441_v53, %v5440_v58  ;;  %p9895_p3 = pnand %p9894_p1, %p10305_p13 }
 0xaf9   : > { %v8546_v13 = vld [vmem:[#allocation28 + $0x50] sm:$0xff] }
 0xafa   : > { %9197 = vst [vmem:[#allocation28 + $0x170] sm:$0xff] %v8979_v49   ;;  %v8538_v63 = vld [vmem:[#allocation28 + $0x188] sm:$0xff]  ;;  %6452 = vmatpush.bf16.msra.mxu1 %v8546_v13  ;;  %v5842_v49 = vld [vmem:[%s12062_s30] sm:$0xff]  ;;  %p9896_p4 = pneg %p9895_p3  ;;  %s9897_s30 = scalar_lea.hbm %s12063_s7, 2 }
 0xafb   : > { %9185 = vst [vmem:[#allocation28 + $0x60] sm:$0xff] %v8919_v31   ;;  %6439 = vmatpush.bf16.msra.mxu0 %v8538_v63  ;;  %p9899_p8 = scmp.lt.s32.totalorder %s9897_s30, %s9893_s9 }
 0xafc   : > { %5972 = vst [vmem:[#allocation1] ss:$9 sm:$0xff] %v5842_v49 }
 0xafd   : > { %v5803_v30 = vpop.permute.xlu1 %5802  ;;  %v5801_v0 = vpop.permute.xlu0 %5800  ;;  %p9900_p7 = por %p9899_p8, %p9898_p12 }
 0xafe   : > { %v5819_v18 = vmul.f32 %v11826_v37, %v5803_v30  ;;  %v5818_v38 = vmul.f32 %v11826_v37, %v5801_v0  ;;  %v5635_v10 = vpop.permute.xlu2 %5634  ;;  %v8554_v37 = vld [vmem:[#allocation28 + $0x180] sm:$0xff] }
 0xaff   : > { %v5651_v24 = vmul.f32 %v11847_v52, %v5635_v10  ;;  %v11937_v10 = vld [vmem:[#allocation21 + $0xc] ss:$0 sm:$0xff]  ;;  %p9901_p9 = pnand %p9900_p7, %p9896_p4 }
 0xb00   : > { %v9099_v55 = vpack.c.bf16 %v5819_v18, %v5818_v38 }
 0xb01   : > { %v8528_v48 = vld [vmem:[#allocation28 + $0x170] sm:$0xff] }
 0xb02   : > { %9221 = vst [vmem:[#allocation28 + $0x78] sm:$0xff] %v9099_v55   ;;  %v8516_v35 = vld [vmem:[#allocation28 + $0x60] sm:$0xff]  ;;  %6428 = vmatpush.bf16.msrb.mxu3 %v8528_v48 }
 0xb03   : > { %6419 = vmatpush.bf16.msrb.mxu2 %v8516_v35  ;;  %v5973_v48 = vld [vmem:[#allocation1] sm:$0xff] }
 0xb04   : > { %6381 = vmatmul.bf16.vlgmr.msra.gmra.mxu3 %v5973_v48 }
 0xb05   : > { %v5721_v9 = vpop.permute.xlu1 %5720  ;;  %v5639_v34 = vpop.permute.xlu0 %5638 }
 0xb06   : > { %v5736_v11 = vmul.f32 %v11859_v36, %v5721_v9  ;;  %v5653_v61 = vmul.f32 %v11847_v52, %v5639_v34  ;;  %v5515_v39 = vpop.permute.xlu2 %5514 }
 0xb07   : > { %6464 = vmatpush.bf16.msra.mxu2 %v8555_v45  ;;  %v5528_v2 = vmul.f32 %v11914_v25, %v5515_v39  ;;  %v5976_v39 = vld [vmem:[#allocation1 + $0x1b] sm:$0xff] }
 0xb08   : > { %v9064_v20 = vpack.c.bf16 %v5737_v59, %v5736_v11  ;;  %v9024_v62 = vpack.c.bf16 %v5653_v61, %v5652_v17  ;;  %6420 = vmatmul.bf16.vlgmr.msrb.gmra.mxu2 %v5976_v39  ;;  %v5978_v39 = vld [vmem:[#allocation1 + $0x2d] sm:$0xff] }
 0xb09   : > { %v8552_v42 = vld [vmem:[#allocation28 + $0x78] sm:$0xff] }
 0xb0a   : > { %9214 = vst [vmem:[#allocation28 + $0x28] sm:$0xff] %v9064_v20  }
 0xb0b   : > { %6465 = vmatpush.bf16.msra.mxu2 %v8554_v37  ;;  %9206 = vst [vmem:[#allocation28 + $0x130] sm:$0xff] %v9024_v62  }
 0xb0d   : > { %v5521_v40 = vpop.permute.xlu1 %5520  ;;  %v5519_v16 = vpop.permute.xlu0 %5518 }
 0xb0e   : > { %v5531_v60 = vmul.f32 %v11914_v25, %v5521_v40  ;;  %v5530_v27 = vmul.f32 %v11914_v25, %v5519_v16  ;;  %v5769_v12 = vpop.permute.xlu2 %5768 }
 0xb0f   : > { %6466 = vmatpush.bf16.msra.mxu2 %v8553_v23 }
 0xb10   : > { %v8974_v54 = vpack.c.bf16 %v5531_v60, %v5530_v27  ;;  %v5974_v60 = vld [vmem:[#allocation1 + $0x9] sm:$0xff]  ;;  %v5975_v27 = vld [vmem:[#allocation1 + $0x12] sm:$0xff] }
 0xb11   : > { %v8545_v22 = vld [vmem:[#allocation28 + $0x28] sm:$0xff]  ;;  %6394 = vmatmul.bf16.vlgmr.msrb.gmra.mxu0 %v5974_v60  ;;  %6407 = vmatmul.bf16.vlgmr.msrb.gmra.mxu1 %v5975_v27 }
 0xb12   : > { %9196 = vst [vmem:[#allocation28 + $0x8] sm:$0xff] %v8974_v54   ;;  %v8537_v43 = vld [vmem:[#allocation28 + $0x130] sm:$0xff]  ;;  %6453 = vmatpush.bf16.msra.mxu1 %v8545_v22 }
 0xb13   : > { %6467 = vmatpush.bf16.msra.mxu2 %v8552_v42  ;;  %6440 = vmatpush.bf16.msra.mxu0 %v8537_v43 }
 0xb15   : > { %v5633_v51 = vpop.permute.xlu1 %5632  ;;  %v5773_v14 = vpop.permute.xlu0 %5772 }
 0xb16   : > { %v5650_v33 = vmul.f32 %v11847_v52, %v5633_v51  ;;  %v5783_v32 = vmul.f32 %v11918_v7, %v5773_v14  ;;  %v5687_v15 = vpop.permute.xlu2 %5686  ;;  %v5781_v52 = vmul.f32 %v11918_v7, %v5769_v12 }
 0xb17   : > { %v5698_v9 = vmul.f32 %v11937_v10, %v5687_v15 }
 0xb18   : > { %v9019_v47 = vpack.c.bf16 %v5651_v24, %v5650_v33  ;;  %v9094_v41 = vpack.c.bf16 %v5783_v32, %v5782_v50 }
 0xb19   : > { %v8527_v46 = vld [vmem:[#allocation28 + $0x8] sm:$0xff] }
 0xb1a   : > { %9205 = vst [vmem:[#allocation28 + $0x1f8] sm:$0xff] %v9019_v47   ;;  %6429 = vmatpush.bf16.msrb.mxu3 %v8527_v46 }
 0xb1b   : > { %9220 = vst [vmem:[#allocation28 + $0x1d0] sm:$0xff] %v9094_v41  }
 0xb1d   : > { %v5719_v26 = vpop.permute.xlu1 %5718  ;;  %v5717_v29 = vpop.permute.xlu0 %5716 }
 0xb1e   : > { %v5735_v56 = vmul.f32 %v11859_v36, %v5719_v26  ;;  %v5734_v6 = vmul.f32 %v11859_v36, %v5717_v29  ;;  %v5513_v28 = vpop.permute.xlu2 %5512 }
 0xb1f   : > { %v5527_v35 = vmul.f32 %v11914_v25, %v5513_v28 }
 0xb20   : > { %v9059_v3 = vpack.c.bf16 %v5735_v56, %v5734_v6 }
 0xb21   : > { %v8536_v44 = vld [vmem:[#allocation28 + $0x1f8] sm:$0xff] }
 0xb22   : > { %9213 = vst [vmem:[#allocation28 + $0x100] sm:$0xff] %v9059_v3   ;;  %v8551_v4 = vld [vmem:[#allocation28 + $0x1d0] sm:$0xff]  ;;  %6441 = vmatpush.bf16.msra.mxu0 %v8536_v44 }
 0xb23   : > { %6468 = vmatpush.bf16.msra.mxu2 %v8551_v4 }
 0xb25   : > { %v5767_v19 = vpop.permute.xlu1 %5766  ;;  %v5517_v8 = vpop.permute.xlu0 %5516 }
 0xb26   : > { %v5780_v21 = vmul.f32 %v11918_v7, %v5767_v19  ;;  %v5529_v58 = vmul.f32 %v11914_v25, %v5517_v8  ;;  %v5599_v0 = vpop.permute.xlu2 %5598 }
 0xb27   : > { %v5612_v14 = vmul.f32 %v11930_v1, %v5599_v0 }
 0xb28   : > { %v9089_v57 = vpack.c.bf16 %v5781_v52, %v5780_v21  ;;  %v8969_v53 = vpack.c.bf16 %v5529_v58, %v5528_v2 }
 0xb29   : > { %v8544_v36 = vld [vmem:[#allocation28 + $0x100] sm:$0xff] }
 0xb2a   : > { %9219 = vst [vmem:[#allocation28 + $0x148] sm:$0xff] %v9089_v57   ;;  %6454 = vmatpush.bf16.msra.mxu1 %v8544_v36 }
 0xb2b   : > { %9195 = vst [vmem:[#allocation28 + $0x138] sm:$0xff] %v8969_v53   ;;  %v5977_v53 = vld [vmem:[#allocation1 + $0x24] sm:$0xff] }
 0xb2d   : > { %v5605_v31 = vpop.permute.xlu1 %5604  ;;  %v5603_v13 = vpop.permute.xlu0 %5602 }
 0xb2e   : > { %v5615_v63 = vmul.f32 %v11930_v1, %v5605_v31  ;;  %v5614_v30 = vmul.f32 %v11930_v1, %v5603_v13  ;;  %v5685_v37 = vpop.permute.xlu2 %5684 }
 0xb2f   : > { %v5697_v43 = vmul.f32 %v11937_v10, %v5685_v37  ;;  %v5979_v37 = vld [vmem:[#allocation1 + $0x36] sm:$0xff] }
 0xb30   : > { %v9014_v18 = vpack.c.bf16 %v5615_v63, %v5614_v30 }
 0xb31   : > { %v8550_v38 = vld [vmem:[#allocation28 + $0x148] sm:$0xff] }
 0xb32   : > { %9204 = vst [vmem:[#allocation28 + $0xd0] sm:$0xff] %v9014_v18   ;;  %v8526_v55 = vld [vmem:[#allocation28 + $0x138] sm:$0xff]  ;;  %6469 = vmatpush.bf16.msra.mxu2 %v8550_v38 }
 0xb33   : > { %6430 = vmatpush.bf16.msrb.mxu3 %v8526_v55  ;;  %v5980_v38 = vld [vmem:[#allocation1 + $0x3f] sm:$0xff] }
 0xb35   : > { %v5511_v45 = vpop.permute.xlu1 %5510  ;;  %v5689_v59 = vpop.permute.xlu0 %5688 }
 0xb36   : > { %v5526_v34 = vmul.f32 %v11914_v25, %v5511_v45  ;;  %v5699_v17 = vmul.f32 %v11937_v10, %v5689_v59  ;;  %v5759_v22 = vpop.permute.xlu2 %5758 }
 0xb37   : > { %v5776_v19 = vmul.f32 %v11918_v7, %v5759_v22 }
 0xb38   : > { %v8964_v11 = vpack.c.bf16 %v5527_v35, %v5526_v34  ;;  %v9054_v61 = vpack.c.bf16 %v5699_v17, %v5698_v9 }
 0xb39   : > { %v8535_v20 = vld [vmem:[#allocation28 + $0xd0] sm:$0xff] }
 0xb3a   : > { %9194 = vst [vmem:[#allocation28 + $0x178] sm:$0xff] %v8964_v11   ;;  %6442 = vmatpush.bf16.msra.mxu0 %v8535_v20 }
 0xb3b   : > { %9212 = vst [vmem:[#allocation28 + $0xa8] sm:$0xff] %v9054_v61  }
 0xb3d   : > { %v5765_v62 = vpop.permute.xlu1 %5764  ;;  %v5763_v23 = vpop.permute.xlu0 %5762 }
 0xb3e   : > { %v5779_v40 = vmul.f32 %v11918_v7, %v5765_v62  ;;  %v5778_v16 = vmul.f32 %v11918_v7, %v5763_v23  ;;  %v5597_v46 = vpop.permute.xlu2 %5596 }
 0xb3f   : > { %v5611_v4 = vmul.f32 %v11930_v1, %v5597_v46 }
 0xb40   : > { %v9084_v42 = vpack.c.bf16 %v5779_v40, %v5778_v16 }
 0xb41   : > { %v8525_v54 = vld [vmem:[#allocation28 + $0x178] sm:$0xff] }
 0xb42   : > { %9218 = vst [vmem:[#allocation28 + $0x168] sm:$0xff] %v9084_v42   ;;  %v8543_v12 = vld [vmem:[#allocation28 + $0xa8] sm:$0xff]  ;;  %6431 = vmatpush.bf16.msrb.mxu3 %v8525_v54 }
 0xb43   : > { %6455 = vmatpush.bf16.msra.mxu1 %v8543_v12 }
 0xb45   : > { %v5683_v24 = vpop.permute.xlu1 %5682  ;;  %v5601_v51 = vpop.permute.xlu0 %5600 }
 0xb46   : > { %v5696_v50 = vmul.f32 %v11937_v10, %v5683_v24  ;;  %v5613_v33 = vmul.f32 %v11930_v1, %v5601_v51  ;;  %v5591_v21 = vpop.permute.xlu2 %5590 }
 0xb47   : > { %v5608_v35 = vmul.f32 %v11930_v1, %v5591_v21 }
 0xb48   : > { %v9049_v32 = vpack.c.bf16 %v5697_v43, %v5696_v50  ;;  %v9009_v47 = vpack.c.bf16 %v5613_v33, %v5612_v14 }
 0xb49   : > { %v8549_v41 = vld [vmem:[#allocation28 + $0x168] sm:$0xff] }
 0xb4a   : > { %9211 = vst [vmem:[#allocation28 + $0x68] sm:$0xff] %v9049_v32   ;;  %6470 = vmatpush.bf16.msra.mxu2 %v8549_v41 }
 0xb4b   : > { %9203 = vst [vmem:[#allocation28 + $0x1c8] sm:$0xff] %v9009_v47  }
 0xb4d   : > { %v5509_v15 = vpop.permute.xlu1 %5508  ;;  %v5507_v26 = vpop.permute.xlu0 %5506 }
 0xb4e   : > { %v5525_v29 = vmul.f32 %v11914_v25, %v5509_v15  ;;  %v5524_v56 = vmul.f32 %v11914_v25, %v5507_v26  ;;  %v5677_v0 = vpop.permute.xlu2 %5676  ;;  %v6477_v15 = vld [vmem:[#allocation2] sm:$0x1] }
 0xb4f   : > { %v5693_v18 = vmul.f32 %v11937_v10, %v5677_v0  ;;  %6480 = vperm.xlu0 %9516, %v6477_v15  }
 0xb50   : > { %v8959_v6 = vpack.c.bf16 %v5525_v29, %v5524_v56 }
 0xb51   : > { %v8542_v3 = vld [vmem:[#allocation28 + $0x68] sm:$0xff] }
 0xb52   : > { %9193 = vst [vmem:[#allocation28 + $0x40] sm:$0xff] %v8959_v6   ;;  %v8534_v44 = vld [vmem:[#allocation28 + $0x1c8] sm:$0xff]  ;;  %6456 = vmatpush.bf16.msra.mxu1 %v8542_v3 }
 0xb53   : > { %6443 = vmatpush.bf16.msra.mxu0 %v8534_v44 }
 0xb55   : > { %v5595_v52 = vpop.permute.xlu1 %5594  ;;  %v5761_v28 = vpop.permute.xlu0 %5760 }
 0xb56   : > { %v5610_v8 = vmul.f32 %v11930_v1, %v5595_v52  ;;  %v5777_v2 = vmul.f32 %v11918_v7, %v5761_v28 }
 0xb58   : > { %v9004_v58 = vpack.c.bf16 %v5611_v4, %v5610_v8  ;;  %v9079_v57 = vpack.c.bf16 %v5777_v2, %v5776_v19 }
 0xb59   : > { %v8524_v25 = vld [vmem:[#allocation28 + $0x40] sm:$0xff] }
 0xb5a   : > { %9202 = vst [vmem:[#allocation28 + $0x70] sm:$0xff] %v9004_v58   ;;  %6432 = vmatpush.bf16.msrb.mxu3 %v8524_v25 }
 0xb5b   : > { %9217 = vst [vmem:[#allocation28 + $0xb0] sm:$0xff] %v9079_v57  }
 0xb5d   : > { %v5681_v36 = vpop.permute.xlu1 %5680  ;;  %v5679_v49 = vpop.permute.xlu0 %5678  ;;  %6433 = vmatmul.bf16.vlgmr.msrb.gmra.mxu3 %v5977_v53 }
 0xb5e   : > { %v5695_v31 = vmul.f32 %v11937_v10, %v5681_v36  ;;  %v5694_v13 = vmul.f32 %v11937_v10, %v5679_v49 }
 0xb60   : > { %v9044_v63 = vpack.c.bf16 %v5695_v31, %v5694_v13 }
 0xb61   : > { %v8533_v30 = vld [vmem:[#allocation28 + $0x70] sm:$0xff] }
 0xb62   : > { %9210 = vst [vmem:[#allocation28 + $0x110] sm:$0xff] %v9044_v63   ;;  %v8548_v7 = vld [vmem:[#allocation28 + $0xb0] sm:$0xff]  ;;  %6444 = vmatpush.bf16.msra.mxu0 %v8533_v30 }
 0xb63   : > { %6471 = vmatpush.bf16.msra.mxu2 %v8548_v7 }
 0xb65   : > { %v5675_v55 = vpop.permute.xlu1 %5674  ;;  %v5593_v48 = vpop.permute.xlu0 %5592 }
 0xb66   : > { %v5692_v45 = vmul.f32 %v11937_v10, %v5675_v55  ;;  %v5609_v59 = vmul.f32 %v11930_v1, %v5593_v48  ;;  %6472 = vmatmul.bf16.vlgmr.msra.gmra.mxu2 %v5980_v38 }
 0xb68   : > { %v9039_v9 = vpack.c.bf16 %v5693_v18, %v5692_v45  ;;  %v8999_v34 = vpack.c.bf16 %v5609_v59, %v5608_v35 }
 0xb69   : > { %v8541_v17 = vld [vmem:[#allocation28 + $0x110] sm:$0xff] }
 0xb6a   : > { %9209 = vst [vmem:[#allocation28 + $0x80] sm:$0xff] %v9039_v9   ;;  %6457 = vmatpush.bf16.msra.mxu1 %v8541_v17 }
 0xb6b   : > { %9201 = vst [vmem:[#allocation28 + $0xe0] sm:$0xff] %v8999_v34  }
 0xb71   : > { %v8540_v11 = vld [vmem:[#allocation28 + $0x80] sm:$0xff] }
 0xb72   : > { %v8532_v61 = vld [vmem:[#allocation28 + $0xe0] sm:$0xff]  ;;  %6458 = vmatpush.bf16.msra.mxu1 %v8540_v11 }
 0xb73   : > { %6445 = vmatpush.bf16.msra.mxu0 %v8532_v61 }
 0xb75   : > { %6459 = vmatmul.bf16.vlgmr.msra.gmra.mxu1 %v5979_v37 }
 0xb76   : > { %6446 = vmatmul.bf16.vlgmr.msra.gmra.mxu0 %v5978_v39 }
 0xb87   : > { %v6382_v20 = vpop.f32.mrf.mxu3 }
 0xb8b   : > { %v6421_v23 = vpop.f32.mrf.mxu2 }
 0xb8e   : > { %v6395_v62 = vpop.f32.mrf.mxu0  ;;  %v6408_v10 = vpop.f32.mrf.mxu1 }
 0xb8f   : > { %v6384_v1 = vpop.f32.mrf.mxu3  ;;  %v6396_v42 = vadd.f32 %v6395_v62, %v6382_v20 }
 0xb91   : > { %v6409_v22 = vadd.f32 %v6408_v10, %v6396_v42 }
 0xb93   : > { %v6423_v60 = vpop.f32.mrf.mxu2  ;;  %v6422_v43 = vadd.f32 %v6421_v23, %v6409_v22 }
 0xb96   : > { %v6397_v40 = vpop.f32.mrf.mxu0  ;;  %v6410_v16 = vpop.f32.mrf.mxu1 }
 0xbc1   : > { %v6481_v26 = vpop.permute.xlu0 %6480 }
 0xbc2   : > { %v6483_v29 = vperm.slane %v6481_v26, 0 }
 0xbe0   : > { %v6434_v27 = vpop.f32.mrf.mxu3 }
 0xbe1   : > { %v6435_v51 = vadd.f32 %v6434_v27, %v6422_v43 }
 0xbe8   : > { %v6436_v54 = vpop.f32.mrf.mxu3 }
 0xbe9   : > { %v6473_v12 = vpop.f32.mrf.mxu2 }
 0xbf1   : > { %v6475_v24 = vpop.f32.mrf.mxu2 }
 0xbf2   : > { %v6460_v14 = vpop.f32.mrf.mxu1 }
 0xbf3   : > { %v6447_v50 = vpop.f32.mrf.mxu0 }
 0xbf4   : > { %v6448_v33 = vadd.f32 %v6447_v50, %v6435_v51 }
 0xbf6   : > { %v6461_v32 = vadd.f32 %v6460_v14, %v6448_v33 }
 0xbf8   : > { %v6474_v47 = vadd.f32 %v6473_v12, %v6461_v32 }
 0xbfa   : > { %v6462_v41 = vpop.f32.mrf.mxu1  ;;  %v6484_v56 = vadd.f32 %v6483_v29, %v6474_v47 }
 0xbfb   : > { %v6449_v46 = vpop.f32.mrf.mxu0 }
 0xbfc   : > { %6485 = vst [vmem:[%s12065_s11] sm:$0x1] %v6484_v56 }
 0xbfd   : > { %9904 = shalt.err (!%p9901_p9)
}
 0xbfe   : > { %9271 = dma.vmem_to_hbm [thread:$0]  (%p10305_p13), %s6498_s27, 16, %s6500_s3, %s6487_s2  }
 0xbff PF: > { %s6511_s16 = sand.u32 1, %s9955_s20   ;;  %p12066_p10 = scmp.ge.s32.totalorder %s9967_s22, 2 }
 0xc00   : > { %s6512_s17 = scalar_lea.sflag [#allocation5], %s6511_s16 }
 0xc01   : > { %p9312_p11 = pnand %p12066_p10, %p10310_p5 }
 0xc03   : > { %p9313_p0 = pneg %p9312_p11 }
 0xc05   : > { %9950 = dma.done.wait (%p9313_p0), %s6512_s17, 16  }
 0xc06   : > { %9952 = vsyncadd (%p9313_p0), %s6512_s17, 4294967280  ;;  %p40_p2 = scmp.ge.s32.totalorder %s10285_s0, 4   ;;  %s12067_s20 = smov %s9959_s21 }
 0xc07   : > { %s12068_s21 = smov %s9963_s1  ;;  %s12069_s1 = smov %s10297_s23 }
 0xc08   : > { %s12070_s22 = smov %s10285_s0  ;;  %42 = sbr.rel (!%p40_p2) target bundleno = 25 (0x19), region = 218 }
 0xc0d   :  { %6517 = vsyncpa [#allocation4], 1 }
 0xc0e   :  { %6519 = vsyncpa [#allocation4 + $0x1], 1 }
 0xc0f   :  { %6520 = vsyncpa [#allocation7], 1 }
 0xc10   :  { %6521 = vsyncpa [#allocation10], 1 }
 0xc11   :  { %6522 = vsyncpa [#allocation13], 1 }
 0xc12   :  { %6523 = vsyncpa [#allocation16], 1 }
 0xc13   :  { %6524 = vsyncpa [#allocation19], 1 }
 0xc14   :  { %6525 = vsyncpa [#allocation22], 1 }
 0xc15   :  { %6526 = vsyncpa [#allocation5], 1 }
 0xc16   :  { %6528 = vsyncpa [#allocation5 + $0x1], 1 }

</bundles_post_ra>
